<compile_context>
chip_gen: v7x
topology: tpu7x:2x2x1
jax: 0.10.0
libtpu: 0.0.40
codegen_flags: <defaults>
</compile_context>

<pallas_src>
import jax
import jax.numpy as jnp
from jax.experimental import pallas as pl
from jax.experimental.pallas import tpu as pltpu

NUM_CLASSES = 10
PADDED_CLASSES = 128          # fc2 output rows, padded for 128-alignment
PADDED_HIDDEN = 128           # fc1 output rows, padded for 128-alignment
NEG_INF = -1e30               # bias of padded logit rows (exp() underflows to 0)


# --------------------------------- kernel --------------------------------------

def _convnet_kernel(x_ref, w1_ref, b1_ref, w2_ref, b2_ref,
                    wf1_ref, bf1_ref, wf2_ref, bf2_ref, o_ref,
                    a1_ref, a2_ref, feat_ref):
    """Full ConvNet forward for one batch tile (batch on the lane axis).

    x_ref    : (28, 28, BT)   input images, batch-in-lanes
    w1/b1    : SMEM (72,)/(8,)      conv1 taps [co*9+kh*3+kw] / biases
    w2/b2    : SMEM (576,)/(8,)     conv2 taps [(co*8+cin)*9+kw*3+kh] / biases
    wf1/bf1  : (128, 200)/(128, 1)  fc1 padded to 128 hidden rows
    wf2/bf2  : (128, 128)/(128, 1)  fc2 padded to 128 class rows (-1e30 bias pad)
    o_ref    : (128, BT)            log-probs, classes on sublanes
    a1_ref   : (104, 13, BT)  pooled conv1 acts, row = co*13 + w_out, (h_out, b)
    a2_ref   : (8, 11, 11, BT) conv2 pre-pool accumulators, (w, h, b) per channel
    feat_ref : (200, BT)       flattened features in PyTorch (c, h, w) order
    """
    bt = x_ref.shape[2]

    # ---- conv1 (1->8, 3x3, VALID) + bias + ReLU + 2x2 max-pool (batch-in-lanes).
    def conv1_channel(co, carry):
        def tap_row(kh, acc):
            for kw in range(3):                       # static sublane offsets
                w = w1_ref[co * 9 + kh * 3 + kw]      # SMEM scalar tap
                acc = acc + x_ref[pl.ds(kh, 26), kw:kw + 26, :] * w
            return acc
        acc1 = jax.lax.fori_loop(0, 3, tap_row,
                                 jnp.zeros((26, 26, bt), jnp.float32))
        # pool rows (free leading-dim reshape); bias/ReLU commute with max, so
        # they are applied to the pooled (small) tensor.
        accr = acc1.reshape(13, 2, 26, bt)
        rows = jnp.maximum(accr[:, 0], accr[:, 1])    # (13, 26, bt): (h_out, w, b)
        b1c = b1_ref[co]
        for j in range(13):                           # j = w_out (column pairs)
            piece = jnp.maximum(rows[:, 2 * j, :], rows[:, 2 * j + 1, :])  # (13, bt)
            a1_ref[co * 13 + j] = jnp.maximum(piece + b1c, 0.0)
        return carry

    jax.lax.fori_loop(0, 8, conv1_channel, 0)

    # ---- conv2 (8->8, 3x3, VALID): accumulate each output channel into a2_ref.
    # a1 is stored spatially transposed (w, h, b); weights were pre-swapped to
    # [.., kw, kh] order so the taps line up, and the pooling below flips the
    # result back to standard (h, w) order.
    def conv2_channel(co, carry):
        def cin_body(cin, acc):
            a1c = a1_ref[pl.ds(cin * 13, 13)]         # (13, 13, bt): (w, h, b)
            for i in range(3):                        # i = kw (leading axis)
                for j in range(3):                    # j = kh (sublane axis)
                    w = w2_ref[(co * 8 + cin) * 9 + i * 3 + j]
                    acc = acc + a1c[i:i + 11, j:j + 11, :] * w
            return acc
        acc2 = jax.lax.fori_loop(0, 8, cin_body,
                                 jnp.zeros((11, 11, bt), jnp.float32))
        a2_ref[co] = acc2                             # (11, 11, bt): (w, h, b)
        return carry

    jax.lax.fori_loop(0, 8, conv2_channel, 0)

    # ---- conv2 epilogue: bias + ReLU + 2x2 max-pool (floor) + flatten to (200, BT).
    for co in range(8):                               # static -> static feat offsets
        acc2 = a2_ref[co]                             # (11, 11, bt): (w, h, b)
        accr = acc2[:10].reshape(5, 2, 11, bt)        # floor-drop w = 10
        rows = jnp.maximum(accr[:, 0], accr[:, 1])    # (5, 11, bt): (w_out, h, b)
        b2c = b2_ref[co]
        for j in range(5):                            # j = h_out; floor-drops h = 10
            piece = jnp.maximum(rows[:, 2 * j, :], rows[:, 2 * j + 1, :])  # (5, bt)
            piece = jnp.maximum(piece + b2c, 0.0)
            r0 = co * 25 + j * 5                      # PyTorch flatten: c*25 + h*5 + w
            feat_ref[r0:r0 + 5, :] = piece

    # ---- head: fc1 + ReLU + fc2 + log_softmax (classes on sublanes, batch on lanes).
    feat = feat_ref[...]                              # (200, bt)
    h = jnp.dot(wf1_ref[...], feat, preferred_element_type=jnp.float32)    # (128, bt)
    h = jnp.maximum(h + bf1_ref[...], 0.0)
    logits = jnp.dot(wf2_ref[...], h, preferred_element_type=jnp.float32) + bf2_ref[...]
    m = jnp.max(logits, axis=0, keepdims=True)        # padded rows are -1e30
    z = logits - m
    s = jnp.sum(jnp.exp(z), axis=0, keepdims=True)    # padded rows add exp() = 0
    o_ref[...] = z - jnp.log(s)                       # (128, bt) log-probs


# ----------------------------- parameter preparation ---------------------------

def _prepare_params(p):
    """PyTorch-layout parameters -> kernel-ready constants (tiny, one-off)."""
    f32 = jnp.float32
    # conv taps as flat scalar tables for SMEM.
    w1 = p["conv1_w"].astype(f32).reshape(72)                                  # [co*9 + kh*3 + kw]
    w2 = p["conv2_w"].astype(f32).transpose(0, 1, 3, 2).reshape(576)           # [(co*8+cin)*9 + kw*3 + kh]
    # fc1/fc2 padded to 128 output rows; padded class rows get a -1e30 bias so
    # they contribute exp()=0 to the softmax and are sliced away outside.
    wf1 = jnp.zeros((PADDED_HIDDEN, 200), f32).at[:64].set(p["fc1_w"].astype(f32))
    bf1 = jnp.zeros((PADDED_HIDDEN, 1), f32).at[:64, 0].set(p["fc1_b"].astype(f32))
    wf2 = jnp.zeros((PADDED_CLASSES, PADDED_HIDDEN), f32)
    wf2 = wf2.at[:NUM_CLASSES, :64].set(p["fc2_w"].astype(f32))
    bf2 = jnp.full((PADDED_CLASSES, 1), NEG_INF, f32).at[:NUM_CLASSES, 0].set(p["fc2_b"].astype(f32))
    return {"w1": w1, "b1": p["conv1_b"].astype(f32),
            "w2": w2, "b2": p["conv2_b"].astype(f32),
            "wf1": wf1, "bf1": bf1, "wf2": wf2, "bf2": bf2}


# --------------------------------- forward -------------------------------------

def convnet_forward(params, x_nchw):
    assert x_nchw.shape[1:] == (1, 28, 28), "fc1 expects 200 = 8*5*5 features"
    kp = _prepare_params(params)
    n = x_nchw.shape[0]

    # Batch tile: 128 images in the lane axis for large batches; for small
    # batches use the (padded) full batch as a single full-extent block.
    if n >= 128:
        bt = 128
        n_pad = ((n + 127) // 128) * 128
    else:
        n_pad = max(8, ((n + 7) // 8) * 8)
        bt = n_pad

    # NCHW -> (H, W, N) batch-in-lanes layout (pure layout plumbing outside).
    x = jnp.transpose(x_nchw.astype(jnp.float32).reshape(n, 28, 28), (1, 2, 0))
    if n_pad != n:
        x = jnp.pad(x, ((0, 0), (0, 0), (0, n_pad - n)))

    out = pl.pallas_call(
        _convnet_kernel,
        out_shape=jax.ShapeDtypeStruct((PADDED_CLASSES, n_pad), jnp.float32),
        grid=(n_pad // bt,),
        in_specs=[
            pl.BlockSpec((28, 28, bt), lambda i: (0, 0, i)),                   # images
            pl.BlockSpec(memory_space=pltpu.MemorySpace.SMEM),                 # conv1 taps
            pl.BlockSpec(memory_space=pltpu.MemorySpace.SMEM),                 # conv1 bias
            pl.BlockSpec(memory_space=pltpu.MemorySpace.SMEM),                 # conv2 taps
            pl.BlockSpec(memory_space=pltpu.MemorySpace.SMEM),                 # conv2 bias
            pl.BlockSpec((PADDED_HIDDEN, 200), lambda i: (0, 0)),              # fc1 w
            pl.BlockSpec((PADDED_HIDDEN, 1), lambda i: (0, 0)),                # fc1 b
            pl.BlockSpec((PADDED_CLASSES, PADDED_HIDDEN), lambda i: (0, 0)),   # fc2 w
            pl.BlockSpec((PADDED_CLASSES, 1), lambda i: (0, 0)),               # fc2 b
        ],
        out_specs=pl.BlockSpec((PADDED_CLASSES, bt), lambda i: (0, i)),
        scratch_shapes=[
            pltpu.VMEM((8 * 13, 13, bt), jnp.float32),   # pooled conv1 activations
            pltpu.VMEM((8, 11, 11, bt), jnp.float32),    # conv2 pre-pool accumulators
            pltpu.VMEM((200, bt), jnp.float32),          # flattened features
        ],
        compiler_params=pltpu.CompilerParams(dimension_semantics=("parallel",)),
    )(x, kp["w1"], kp["b1"], kp["w2"], kp["b2"],
      kp["wf1"], kp["bf1"], kp["wf2"], kp["bf2"])

    return out[:NUM_CLASSES, :n].T                     # (N, 10) log-probs


# ------------------------------ pure-JAX reference ------------------------------

def _reference_forward(params, x_nchw):
    hi = jax.lax.Precision.HIGHEST
    neg_inf = jnp.float32(-jnp.inf)
    x = x_nchw.astype(jnp.float32)
    y = jax.lax.conv_general_dilated(x, params["conv1_w"], (1, 1), "VALID",
                                     dimension_numbers=("NCHW", "OIHW", "NCHW"),
                                     precision=hi)
    y = jnp.maximum(y + params["conv1_b"][None, :, None, None], 0.0)
    y = jax.lax.reduce_window(y, neg_inf, jax.lax.max, (1, 1, 2, 2), (1, 1, 2, 2), "VALID")
    y = jax.lax.conv_general_dilated(y, params["conv2_w"], (1, 1), "VALID",
                                     dimension_numbers=("NCHW", "OIHW", "NCHW"),
                                     precision=hi)
    y = jnp.maximum(y + params["conv2_b"][None, :, None, None], 0.0)
    y = jax.lax.reduce_window(y, neg_inf, jax.lax.max, (1, 1, 2, 2), (1, 1, 2, 2), "VALID")
    y = y.reshape(y.shape[0], -1)
    y = jnp.maximum(jnp.dot(y, params["fc1_w"].T, precision=hi) + params["fc1_b"], 0.0)
    y = jnp.dot(y, params["fc2_w"].T, precision=hi) + params["fc2_b"]
    return jax.nn.log_softmax(y, axis=-1)


# ---------------------------- params / smoke test -------------------------------

def init_params(key):
    """Parameters in PyTorch layout (Conv2d: (O,I,KH,KW); Linear: (out,in))."""
    ks = jax.random.split(key, 8)
    s = 0.1
    return {
        "conv1_w": s * jax.random.normal(ks[0], (8, 1, 3, 3), jnp.float32),
        "conv1_b": s * jax.random.normal(ks[1], (8,), jnp.float32),
        "conv2_w": s * jax.random.normal(ks[2], (8, 8, 3, 3), jnp.float32),
        "conv2_b": s * jax.random.normal(ks[3], (8,), jnp.float32),
        "fc1_w": s * jax.random.normal(ks[4], (64, 200), jnp.float32),
        "fc1_b": s * jax.random.normal(ks[5], (64,), jnp.float32),
        "fc2_w": s * jax.random.normal(ks[6], (10, 64), jnp.float32),
        "fc2_b": s * jax.random.normal(ks[7], (10,), jnp.float32),
    }


if __name__ == "__main__":
    key = jax.random.PRNGKey(0)
    kparam, kx = jax.random.split(key)
    params = init_params(kparam)
    # fc1 expects 200 = 8*5*5 features -> input spatial size must be 28x28.
    x = jax.random.normal(kx, (2, 1, 28, 28), jnp.float32)

    out = jax.jit(convnet_forward)(params, x)
    out = jax.block_until_ready(out)

    assert out.shape == (2, NUM_CLASSES)
    assert bool(jnp.all(jnp.isfinite(out)))
    # log_softmax rows must (approximately) exp-sum to 1.
    row_sums = jnp.exp(out).sum(axis=1)
    assert bool(jnp.all(jnp.abs(row_sums - 1.0) < 1e-4))

    # Numerical check against a pure-JAX/XLA reference of the PyTorch forward.
    ref = jax.block_until_ready(jax.jit(_reference_forward)(params, x))
    max_err = float(jnp.max(jnp.abs(out - ref)))
    assert max_err < 5e-3, f"kernel/reference mismatch: {max_err}"

    print("KERNEL_OK")
</pallas_src>

<mosaic_0001>
module attributes {stable_mosaic.version = 11 : i64} {
  func.func @_convnet_kernel(%arg0: i32, %arg1: memref<28x28x8xf32, #tpu.memory_space<vmem>>, %arg2: memref<72xf32, #tpu.memory_space<smem>>, %arg3: memref<8xf32, #tpu.memory_space<smem>>, %arg4: memref<576xf32, #tpu.memory_space<smem>>, %arg5: memref<8xf32, #tpu.memory_space<smem>>, %arg6: memref<128x200xf32, #tpu.memory_space<vmem>>, %arg7: memref<128x1xf32, #tpu.memory_space<vmem>>, %arg8: memref<128x128xf32, #tpu.memory_space<vmem>>, %arg9: memref<128x1xf32, #tpu.memory_space<vmem>>, %arg10: memref<128x8xf32, #tpu.memory_space<vmem>>, %arg11: memref<104x13x8xf32, #tpu.memory_space<vmem>>, %arg12: memref<8x11x11x8xf32, #tpu.memory_space<vmem>>, %arg13: memref<200x8xf32, #tpu.memory_space<vmem>>) attributes {dimension_semantics = [#tpu.dimension_semantics<parallel>], iteration_bounds = array<i64: 1>, scalar_prefetch = 0 : i64, scratch_operands = 3 : i64, tpu.core_type = #tpu.core_type<tc>, window_params = [{transform_indices = @transform_0, window_bounds = array<i64: 28, 28, 8>}, {transform_indices = @transform_1, window_bounds = array<i64: 72>}, {transform_indices = @transform_2, window_bounds = array<i64: 8>}, {transform_indices = @transform_3, window_bounds = array<i64: 576>}, {transform_indices = @transform_4, window_bounds = array<i64: 8>}, {pipeline_mode = #tpu.pipeline_mode<synchronous>, transform_indices = @transform_5, window_bounds = array<i64: 128, 200>}, {pipeline_mode = #tpu.pipeline_mode<synchronous>, transform_indices = @transform_6, window_bounds = array<i64: 128, 1>}, {pipeline_mode = #tpu.pipeline_mode<synchronous>, transform_indices = @transform_7, window_bounds = array<i64: 128, 128>}, {pipeline_mode = #tpu.pipeline_mode<synchronous>, transform_indices = @transform_8, window_bounds = array<i64: 128, 1>}, {transform_indices = @transform_9, window_bounds = array<i64: 128, 8>}]} {
    %c0_i32 = arith.constant 0 : i32
    %c8_i32 = arith.constant 8 : i32
    %0 = arith.addi %c0_i32, %c8_i32 : i32
    %c1_i32 = arith.constant 1 : i32
    scf.for %arg14 = %c0_i32 to %0 step %c1_i32  : i32 {
      %cst_135 = arith.constant 0.000000e+00 : f32
      %506 = vector.broadcast %cst_135 : f32 to vector<26x26x8xf32>
      %c0_i32_136 = arith.constant 0 : i32
      %c3_i32 = arith.constant 3 : i32
      %507 = arith.addi %c0_i32_136, %c3_i32 : i32
      %c1_i32_137 = arith.constant 1 : i32
      %508 = scf.for %arg15 = %c0_i32_136 to %507 step %c1_i32_137 iter_args(%arg16 = %506) -> (vector<26x26x8xf32>)  : i32 {
        %c9_i32_194 = arith.constant 9 : i32
        %712 = arith.muli %arg14, %c9_i32_194 : i32
        %c3_i32_195 = arith.constant 3 : i32
        %713 = arith.muli %arg15, %c3_i32_195 : i32
        %714 = arith.addi %712, %713 : i32
        %c0_i32_196 = arith.constant 0 : i32
        %715 = arith.addi %714, %c0_i32_196 : i32
        %716 = arith.index_cast %715 : i32 to index
        %717 = memref.load %arg2[%716] : memref<72xf32, #tpu.memory_space<smem>>
        %718 = arith.index_cast %arg15 : i32 to index
        %c0_197 = arith.constant 0 : index
        %c0_198 = arith.constant 0 : index
        %719 = vector.load %arg1[%718, %c0_197, %c0_198] : memref<28x28x8xf32, #tpu.memory_space<vmem>>, vector<26x26x8xf32>
        %720 = vector.broadcast %717 : f32 to vector<26x26x8xf32>
        %721 = arith.mulf %719, %720 : vector<26x26x8xf32>
        %722 = arith.addf %arg16, %721 : vector<26x26x8xf32>
        %c9_i32_199 = arith.constant 9 : i32
        %723 = arith.muli %arg14, %c9_i32_199 : i32
        %c3_i32_200 = arith.constant 3 : i32
        %724 = arith.muli %arg15, %c3_i32_200 : i32
        %725 = arith.addi %723, %724 : i32
        %c1_i32_201 = arith.constant 1 : i32
        %726 = arith.addi %725, %c1_i32_201 : i32
        %727 = arith.index_cast %726 : i32 to index
        %728 = memref.load %arg2[%727] : memref<72xf32, #tpu.memory_space<smem>>
        %729 = arith.index_cast %arg15 : i32 to index
        %c1_202 = arith.constant 1 : index
        %c0_203 = arith.constant 0 : index
        %730 = vector.load %arg1[%729, %c1_202, %c0_203] : memref<28x28x8xf32, #tpu.memory_space<vmem>>, vector<26x26x8xf32>
        %731 = vector.broadcast %728 : f32 to vector<26x26x8xf32>
        %732 = arith.mulf %730, %731 : vector<26x26x8xf32>
        %733 = arith.addf %722, %732 : vector<26x26x8xf32>
        %c9_i32_204 = arith.constant 9 : i32
        %734 = arith.muli %arg14, %c9_i32_204 : i32
        %c3_i32_205 = arith.constant 3 : i32
        %735 = arith.muli %arg15, %c3_i32_205 : i32
        %736 = arith.addi %734, %735 : i32
        %c2_i32_206 = arith.constant 2 : i32
        %737 = arith.addi %736, %c2_i32_206 : i32
        %738 = arith.index_cast %737 : i32 to index
        %739 = memref.load %arg2[%738] : memref<72xf32, #tpu.memory_space<smem>>
        %740 = arith.index_cast %arg15 : i32 to index
        %c2_207 = arith.constant 2 : index
        %c0_208 = arith.constant 0 : index
        %741 = vector.load %arg1[%740, %c2_207, %c0_208] : memref<28x28x8xf32, #tpu.memory_space<vmem>>, vector<26x26x8xf32>
        %742 = vector.broadcast %739 : f32 to vector<26x26x8xf32>
        %743 = arith.mulf %741, %742 : vector<26x26x8xf32>
        %744 = arith.addf %733, %743 : vector<26x26x8xf32>
        scf.yield %744 : vector<26x26x8xf32>
      }
      %c3_i32_138 = arith.constant 3 : i32
      %509 = vector.shape_cast %508 : vector<26x26x8xf32> to vector<13x2x26x8xf32>
      %510 = vector.extract_strided_slice %509 {offsets = [0, 0, 0, 0], sizes = [13, 1, 26, 8], strides = [1, 1, 1, 1]} : vector<13x2x26x8xf32> to vector<13x1x26x8xf32>
      %511 = vector.shape_cast %510 : vector<13x1x26x8xf32> to vector<13x26x8xf32>
      %512 = vector.extract_strided_slice %509 {offsets = [0, 1, 0, 0], sizes = [13, 1, 26, 8], strides = [1, 1, 1, 1]} : vector<13x2x26x8xf32> to vector<13x1x26x8xf32>
      %513 = vector.shape_cast %512 : vector<13x1x26x8xf32> to vector<13x26x8xf32>
      %514 = arith.maximumf %511, %513 : vector<13x26x8xf32>
      %515 = arith.index_cast %arg14 : i32 to index
      %516 = memref.load %arg3[%515] : memref<8xf32, #tpu.memory_space<smem>>
      %517 = vector.extract_strided_slice %514 {offsets = [0, 0, 0], sizes = [13, 1, 8], strides = [1, 1, 1]} : vector<13x26x8xf32> to vector<13x1x8xf32>
      %518 = vector.shape_cast %517 : vector<13x1x8xf32> to vector<13x8xf32>
      %519 = vector.extract_strided_slice %514 {offsets = [0, 1, 0], sizes = [13, 1, 8], strides = [1, 1, 1]} : vector<13x26x8xf32> to vector<13x1x8xf32>
      %520 = vector.shape_cast %519 : vector<13x1x8xf32> to vector<13x8xf32>
      %521 = arith.maximumf %518, %520 : vector<13x8xf32>
      %522 = vector.broadcast %516 : f32 to vector<13x8xf32>
      %523 = arith.addf %521, %522 : vector<13x8xf32>
      %cst_139 = arith.constant 0.000000e+00 : f32
      %524 = vector.broadcast %cst_139 : f32 to vector<13x8xf32>
      %525 = arith.maximumf %523, %524 : vector<13x8xf32>
      %c13_i32 = arith.constant 13 : i32
      %526 = arith.muli %arg14, %c13_i32 : i32
      %c0_i32_140 = arith.constant 0 : i32
      %527 = arith.addi %526, %c0_i32_140 : i32
      %528 = arith.index_cast %527 : i32 to index
      %c0_141 = arith.constant 0 : index
      %c0_142 = arith.constant 0 : index
      %529 = vector.load %arg11[%528, %c0_141, %c0_142] : memref<104x13x8xf32, #tpu.memory_space<vmem>>, vector<1x13x8xf32>
      %530 = vector.shape_cast %529 : vector<1x13x8xf32> to vector<13x8xf32>
      %531 = vector.shape_cast %525 : vector<13x8xf32> to vector<1x13x8xf32>
      tpu.vector_store %arg11[%528, %c0_141, %c0_142], %531 {strides = array<i32>} : memref<104x13x8xf32, #tpu.memory_space<vmem>>, vector<1x13x8xf32>,
      %532 = vector.extract_strided_slice %514 {offsets = [0, 2, 0], sizes = [13, 1, 8], strides = [1, 1, 1]} : vector<13x26x8xf32> to vector<13x1x8xf32>
      %533 = vector.shape_cast %532 : vector<13x1x8xf32> to vector<13x8xf32>
      %534 = vector.extract_strided_slice %514 {offsets = [0, 3, 0], sizes = [13, 1, 8], strides = [1, 1, 1]} : vector<13x26x8xf32> to vector<13x1x8xf32>
      %535 = vector.shape_cast %534 : vector<13x1x8xf32> to vector<13x8xf32>
      %536 = arith.maximumf %533, %535 : vector<13x8xf32>
      %537 = vector.broadcast %516 : f32 to vector<13x8xf32>
      %538 = arith.addf %536, %537 : vector<13x8xf32>
      %cst_143 = arith.constant 0.000000e+00 : f32
      %539 = vector.broadcast %cst_143 : f32 to vector<13x8xf32>
      %540 = arith.maximumf %538, %539 : vector<13x8xf32>
      %c13_i32_144 = arith.constant 13 : i32
      %541 = arith.muli %arg14, %c13_i32_144 : i32
      %c1_i32_145 = arith.constant 1 : i32
      %542 = arith.addi %541, %c1_i32_145 : i32
      %543 = arith.index_cast %542 : i32 to index
      %c0_146 = arith.constant 0 : index
      %c0_147 = arith.constant 0 : index
      %544 = vector.load %arg11[%543, %c0_146, %c0_147] : memref<104x13x8xf32, #tpu.memory_space<vmem>>, vector<1x13x8xf32>
      %545 = vector.shape_cast %544 : vector<1x13x8xf32> to vector<13x8xf32>
      %546 = vector.shape_cast %540 : vector<13x8xf32> to vector<1x13x8xf32>
      tpu.vector_store %arg11[%543, %c0_146, %c0_147], %546 {strides = array<i32>} : memref<104x13x8xf32, #tpu.memory_space<vmem>>, vector<1x13x8xf32>,
      %547 = vector.extract_strided_slice %514 {offsets = [0, 4, 0], sizes = [13, 1, 8], strides = [1, 1, 1]} : vector<13x26x8xf32> to vector<13x1x8xf32>
      %548 = vector.shape_cast %547 : vector<13x1x8xf32> to vector<13x8xf32>
      %549 = vector.extract_strided_slice %514 {offsets = [0, 5, 0], sizes = [13, 1, 8], strides = [1, 1, 1]} : vector<13x26x8xf32> to vector<13x1x8xf32>
      %550 = vector.shape_cast %549 : vector<13x1x8xf32> to vector<13x8xf32>
      %551 = arith.maximumf %548, %550 : vector<13x8xf32>
      %552 = vector.broadcast %516 : f32 to vector<13x8xf32>
      %553 = arith.addf %551, %552 : vector<13x8xf32>
      %cst_148 = arith.constant 0.000000e+00 : f32
      %554 = vector.broadcast %cst_148 : f32 to vector<13x8xf32>
      %555 = arith.maximumf %553, %554 : vector<13x8xf32>
      %c13_i32_149 = arith.constant 13 : i32
      %556 = arith.muli %arg14, %c13_i32_149 : i32
      %c2_i32 = arith.constant 2 : i32
      %557 = arith.addi %556, %c2_i32 : i32
      %558 = arith.index_cast %557 : i32 to index
      %c0_150 = arith.constant 0 : index
      %c0_151 = arith.constant 0 : index
      %559 = vector.load %arg11[%558, %c0_150, %c0_151] : memref<104x13x8xf32, #tpu.memory_space<vmem>>, vector<1x13x8xf32>
      %560 = vector.shape_cast %559 : vector<1x13x8xf32> to vector<13x8xf32>
      %561 = vector.shape_cast %555 : vector<13x8xf32> to vector<1x13x8xf32>
      tpu.vector_store %arg11[%558, %c0_150, %c0_151], %561 {strides = array<i32>} : memref<104x13x8xf32, #tpu.memory_space<vmem>>, vector<1x13x8xf32>,
      %562 = vector.extract_strided_slice %514 {offsets = [0, 6, 0], sizes = [13, 1, 8], strides = [1, 1, 1]} : vector<13x26x8xf32> to vector<13x1x8xf32>
      %563 = vector.shape_cast %562 : vector<13x1x8xf32> to vector<13x8xf32>
      %564 = vector.extract_strided_slice %514 {offsets = [0, 7, 0], sizes = [13, 1, 8], strides = [1, 1, 1]} : vector<13x26x8xf32> to vector<13x1x8xf32>
      %565 = vector.shape_cast %564 : vector<13x1x8xf32> to vector<13x8xf32>
      %566 = arith.maximumf %563, %565 : vector<13x8xf32>
      %567 = vector.broadcast %516 : f32 to vector<13x8xf32>
      %568 = arith.addf %566, %567 : vector<13x8xf32>
      %cst_152 = arith.constant 0.000000e+00 : f32
      %569 = vector.broadcast %cst_152 : f32 to vector<13x8xf32>
      %570 = arith.maximumf %568, %569 : vector<13x8xf32>
      %c13_i32_153 = arith.constant 13 : i32
      %571 = arith.muli %arg14, %c13_i32_153 : i32
      %c3_i32_154 = arith.constant 3 : i32
      %572 = arith.addi %571, %c3_i32_154 : i32
      %573 = arith.index_cast %572 : i32 to index
      %c0_155 = arith.constant 0 : index
      %c0_156 = arith.constant 0 : index
      %574 = vector.load %arg11[%573, %c0_155, %c0_156] : memref<104x13x8xf32, #tpu.memory_space<vmem>>, vector<1x13x8xf32>
      %575 = vector.shape_cast %574 : vector<1x13x8xf32> to vector<13x8xf32>
      %576 = vector.shape_cast %570 : vector<13x8xf32> to vector<1x13x8xf32>
      tpu.vector_store %arg11[%573, %c0_155, %c0_156], %576 {strides = array<i32>} : memref<104x13x8xf32, #tpu.memory_space<vmem>>, vector<1x13x8xf32>,
      %577 = vector.extract_strided_slice %514 {offsets = [0, 8, 0], sizes = [13, 1, 8], strides = [1, 1, 1]} : vector<13x26x8xf32> to vector<13x1x8xf32>
      %578 = vector.shape_cast %577 : vector<13x1x8xf32> to vector<13x8xf32>
      %579 = vector.extract_strided_slice %514 {offsets = [0, 9, 0], sizes = [13, 1, 8], strides = [1, 1, 1]} : vector<13x26x8xf32> to vector<13x1x8xf32>
      %580 = vector.shape_cast %579 : vector<13x1x8xf32> to vector<13x8xf32>
      %581 = arith.maximumf %578, %580 : vector<13x8xf32>
      %582 = vector.broadcast %516 : f32 to vector<13x8xf32>
      %583 = arith.addf %581, %582 : vector<13x8xf32>
      %cst_157 = arith.constant 0.000000e+00 : f32
      %584 = vector.broadcast %cst_157 : f32 to vector<13x8xf32>
      %585 = arith.maximumf %583, %584 : vector<13x8xf32>
      %c13_i32_158 = arith.constant 13 : i32
      %586 = arith.muli %arg14, %c13_i32_158 : i32
      %c4_i32 = arith.constant 4 : i32
      %587 = arith.addi %586, %c4_i32 : i32
      %588 = arith.index_cast %587 : i32 to index
      %c0_159 = arith.constant 0 : index
      %c0_160 = arith.constant 0 : index
      %589 = vector.load %arg11[%588, %c0_159, %c0_160] : memref<104x13x8xf32, #tpu.memory_space<vmem>>, vector<1x13x8xf32>
      %590 = vector.shape_cast %589 : vector<1x13x8xf32> to vector<13x8xf32>
      %591 = vector.shape_cast %585 : vector<13x8xf32> to vector<1x13x8xf32>
      tpu.vector_store %arg11[%588, %c0_159, %c0_160], %591 {strides = array<i32>} : memref<104x13x8xf32, #tpu.memory_space<vmem>>, vector<1x13x8xf32>,
      %592 = vector.extract_strided_slice %514 {offsets = [0, 10, 0], sizes = [13, 1, 8], strides = [1, 1, 1]} : vector<13x26x8xf32> to vector<13x1x8xf32>
      %593 = vector.shape_cast %592 : vector<13x1x8xf32> to vector<13x8xf32>
      %594 = vector.extract_strided_slice %514 {offsets = [0, 11, 0], sizes = [13, 1, 8], strides = [1, 1, 1]} : vector<13x26x8xf32> to vector<13x1x8xf32>
      %595 = vector.shape_cast %594 : vector<13x1x8xf32> to vector<13x8xf32>
      %596 = arith.maximumf %593, %595 : vector<13x8xf32>
      %597 = vector.broadcast %516 : f32 to vector<13x8xf32>
      %598 = arith.addf %596, %597 : vector<13x8xf32>
      %cst_161 = arith.constant 0.000000e+00 : f32
      %599 = vector.broadcast %cst_161 : f32 to vector<13x8xf32>
      %600 = arith.maximumf %598, %599 : vector<13x8xf32>
      %c13_i32_162 = arith.constant 13 : i32
      %601 = arith.muli %arg14, %c13_i32_162 : i32
      %c5_i32 = arith.constant 5 : i32
      %602 = arith.addi %601, %c5_i32 : i32
      %603 = arith.index_cast %602 : i32 to index
      %c0_163 = arith.constant 0 : index
      %c0_164 = arith.constant 0 : index
      %604 = vector.load %arg11[%603, %c0_163, %c0_164] : memref<104x13x8xf32, #tpu.memory_space<vmem>>, vector<1x13x8xf32>
      %605 = vector.shape_cast %604 : vector<1x13x8xf32> to vector<13x8xf32>
      %606 = vector.shape_cast %600 : vector<13x8xf32> to vector<1x13x8xf32>
      tpu.vector_store %arg11[%603, %c0_163, %c0_164], %606 {strides = array<i32>} : memref<104x13x8xf32, #tpu.memory_space<vmem>>, vector<1x13x8xf32>,
      %607 = vector.extract_strided_slice %514 {offsets = [0, 12, 0], sizes = [13, 1, 8], strides = [1, 1, 1]} : vector<13x26x8xf32> to vector<13x1x8xf32>
      %608 = vector.shape_cast %607 : vector<13x1x8xf32> to vector<13x8xf32>
      %609 = vector.extract_strided_slice %514 {offsets = [0, 13, 0], sizes = [13, 1, 8], strides = [1, 1, 1]} : vector<13x26x8xf32> to vector<13x1x8xf32>
      %610 = vector.shape_cast %609 : vector<13x1x8xf32> to vector<13x8xf32>
      %611 = arith.maximumf %608, %610 : vector<13x8xf32>
      %612 = vector.broadcast %516 : f32 to vector<13x8xf32>
      %613 = arith.addf %611, %612 : vector<13x8xf32>
      %cst_165 = arith.constant 0.000000e+00 : f32
      %614 = vector.broadcast %cst_165 : f32 to vector<13x8xf32>
      %615 = arith.maximumf %613, %614 : vector<13x8xf32>
      %c13_i32_166 = arith.constant 13 : i32
      %616 = arith.muli %arg14, %c13_i32_166 : i32
      %c6_i32 = arith.constant 6 : i32
      %617 = arith.addi %616, %c6_i32 : i32
      %618 = arith.index_cast %617 : i32 to index
      %c0_167 = arith.constant 0 : index
      %c0_168 = arith.constant 0 : index
      %619 = vector.load %arg11[%618, %c0_167, %c0_168] : memref<104x13x8xf32, #tpu.memory_space<vmem>>, vector<1x13x8xf32>
      %620 = vector.shape_cast %619 : vector<1x13x8xf32> to vector<13x8xf32>
      %621 = vector.shape_cast %615 : vector<13x8xf32> to vector<1x13x8xf32>
      tpu.vector_store %arg11[%618, %c0_167, %c0_168], %621 {strides = array<i32>} : memref<104x13x8xf32, #tpu.memory_space<vmem>>, vector<1x13x8xf32>,
      %622 = vector.extract_strided_slice %514 {offsets = [0, 14, 0], sizes = [13, 1, 8], strides = [1, 1, 1]} : vector<13x26x8xf32> to vector<13x1x8xf32>
      %623 = vector.shape_cast %622 : vector<13x1x8xf32> to vector<13x8xf32>
      %624 = vector.extract_strided_slice %514 {offsets = [0, 15, 0], sizes = [13, 1, 8], strides = [1, 1, 1]} : vector<13x26x8xf32> to vector<13x1x8xf32>
      %625 = vector.shape_cast %624 : vector<13x1x8xf32> to vector<13x8xf32>
      %626 = arith.maximumf %623, %625 : vector<13x8xf32>
      %627 = vector.broadcast %516 : f32 to vector<13x8xf32>
      %628 = arith.addf %626, %627 : vector<13x8xf32>
      %cst_169 = arith.constant 0.000000e+00 : f32
      %629 = vector.broadcast %cst_169 : f32 to vector<13x8xf32>
      %630 = arith.maximumf %628, %629 : vector<13x8xf32>
      %c13_i32_170 = arith.constant 13 : i32
      %631 = arith.muli %arg14, %c13_i32_170 : i32
      %c7_i32 = arith.constant 7 : i32
      %632 = arith.addi %631, %c7_i32 : i32
      %633 = arith.index_cast %632 : i32 to index
      %c0_171 = arith.constant 0 : index
      %c0_172 = arith.constant 0 : index
      %634 = vector.load %arg11[%633, %c0_171, %c0_172] : memref<104x13x8xf32, #tpu.memory_space<vmem>>, vector<1x13x8xf32>
      %635 = vector.shape_cast %634 : vector<1x13x8xf32> to vector<13x8xf32>
      %636 = vector.shape_cast %630 : vector<13x8xf32> to vector<1x13x8xf32>
      tpu.vector_store %arg11[%633, %c0_171, %c0_172], %636 {strides = array<i32>} : memref<104x13x8xf32, #tpu.memory_space<vmem>>, vector<1x13x8xf32>,
      %637 = vector.extract_strided_slice %514 {offsets = [0, 16, 0], sizes = [13, 1, 8], strides = [1, 1, 1]} : vector<13x26x8xf32> to vector<13x1x8xf32>
      %638 = vector.shape_cast %637 : vector<13x1x8xf32> to vector<13x8xf32>
      %639 = vector.extract_strided_slice %514 {offsets = [0, 17, 0], sizes = [13, 1, 8], strides = [1, 1, 1]} : vector<13x26x8xf32> to vector<13x1x8xf32>
      %640 = vector.shape_cast %639 : vector<13x1x8xf32> to vector<13x8xf32>
      %641 = arith.maximumf %638, %640 : vector<13x8xf32>
      %642 = vector.broadcast %516 : f32 to vector<13x8xf32>
      %643 = arith.addf %641, %642 : vector<13x8xf32>
      %cst_173 = arith.constant 0.000000e+00 : f32
      %644 = vector.broadcast %cst_173 : f32 to vector<13x8xf32>
      %645 = arith.maximumf %643, %644 : vector<13x8xf32>
      %c13_i32_174 = arith.constant 13 : i32
      %646 = arith.muli %arg14, %c13_i32_174 : i32
      %c8_i32_175 = arith.constant 8 : i32
      %647 = arith.addi %646, %c8_i32_175 : i32
      %648 = arith.index_cast %647 : i32 to index
      %c0_176 = arith.constant 0 : index
      %c0_177 = arith.constant 0 : index
      %649 = vector.load %arg11[%648, %c0_176, %c0_177] : memref<104x13x8xf32, #tpu.memory_space<vmem>>, vector<1x13x8xf32>
      %650 = vector.shape_cast %649 : vector<1x13x8xf32> to vector<13x8xf32>
      %651 = vector.shape_cast %645 : vector<13x8xf32> to vector<1x13x8xf32>
      tpu.vector_store %arg11[%648, %c0_176, %c0_177], %651 {strides = array<i32>} : memref<104x13x8xf32, #tpu.memory_space<vmem>>, vector<1x13x8xf32>,
      %652 = vector.extract_strided_slice %514 {offsets = [0, 18, 0], sizes = [13, 1, 8], strides = [1, 1, 1]} : vector<13x26x8xf32> to vector<13x1x8xf32>
      %653 = vector.shape_cast %652 : vector<13x1x8xf32> to vector<13x8xf32>
      %654 = vector.extract_strided_slice %514 {offsets = [0, 19, 0], sizes = [13, 1, 8], strides = [1, 1, 1]} : vector<13x26x8xf32> to vector<13x1x8xf32>
      %655 = vector.shape_cast %654 : vector<13x1x8xf32> to vector<13x8xf32>
      %656 = arith.maximumf %653, %655 : vector<13x8xf32>
      %657 = vector.broadcast %516 : f32 to vector<13x8xf32>
      %658 = arith.addf %656, %657 : vector<13x8xf32>
      %cst_178 = arith.constant 0.000000e+00 : f32
      %659 = vector.broadcast %cst_178 : f32 to vector<13x8xf32>
      %660 = arith.maximumf %658, %659 : vector<13x8xf32>
      %c13_i32_179 = arith.constant 13 : i32
      %661 = arith.muli %arg14, %c13_i32_179 : i32
      %c9_i32 = arith.constant 9 : i32
      %662 = arith.addi %661, %c9_i32 : i32
      %663 = arith.index_cast %662 : i32 to index
      %c0_180 = arith.constant 0 : index
      %c0_181 = arith.constant 0 : index
      %664 = vector.load %arg11[%663, %c0_180, %c0_181] : memref<104x13x8xf32, #tpu.memory_space<vmem>>, vector<1x13x8xf32>
      %665 = vector.shape_cast %664 : vector<1x13x8xf32> to vector<13x8xf32>
      %666 = vector.shape_cast %660 : vector<13x8xf32> to vector<1x13x8xf32>
      tpu.vector_store %arg11[%663, %c0_180, %c0_181], %666 {strides = array<i32>} : memref<104x13x8xf32, #tpu.memory_space<vmem>>, vector<1x13x8xf32>,
      %667 = vector.extract_strided_slice %514 {offsets = [0, 20, 0], sizes = [13, 1, 8], strides = [1, 1, 1]} : vector<13x26x8xf32> to vector<13x1x8xf32>
      %668 = vector.shape_cast %667 : vector<13x1x8xf32> to vector<13x8xf32>
      %669 = vector.extract_strided_slice %514 {offsets = [0, 21, 0], sizes = [13, 1, 8], strides = [1, 1, 1]} : vector<13x26x8xf32> to vector<13x1x8xf32>
      %670 = vector.shape_cast %669 : vector<13x1x8xf32> to vector<13x8xf32>
      %671 = arith.maximumf %668, %670 : vector<13x8xf32>
      %672 = vector.broadcast %516 : f32 to vector<13x8xf32>
      %673 = arith.addf %671, %672 : vector<13x8xf32>
      %cst_182 = arith.constant 0.000000e+00 : f32
      %674 = vector.broadcast %cst_182 : f32 to vector<13x8xf32>
      %675 = arith.maximumf %673, %674 : vector<13x8xf32>
      %c13_i32_183 = arith.constant 13 : i32
      %676 = arith.muli %arg14, %c13_i32_183 : i32
      %c10_i32 = arith.constant 10 : i32
      %677 = arith.addi %676, %c10_i32 : i32
      %678 = arith.index_cast %677 : i32 to index
      %c0_184 = arith.constant 0 : index
      %c0_185 = arith.constant 0 : index
      %679 = vector.load %arg11[%678, %c0_184, %c0_185] : memref<104x13x8xf32, #tpu.memory_space<vmem>>, vector<1x13x8xf32>
      %680 = vector.shape_cast %679 : vector<1x13x8xf32> to vector<13x8xf32>
      %681 = vector.shape_cast %675 : vector<13x8xf32> to vector<1x13x8xf32>
      tpu.vector_store %arg11[%678, %c0_184, %c0_185], %681 {strides = array<i32>} : memref<104x13x8xf32, #tpu.memory_space<vmem>>, vector<1x13x8xf32>,
      %682 = vector.extract_strided_slice %514 {offsets = [0, 22, 0], sizes = [13, 1, 8], strides = [1, 1, 1]} : vector<13x26x8xf32> to vector<13x1x8xf32>
      %683 = vector.shape_cast %682 : vector<13x1x8xf32> to vector<13x8xf32>
      %684 = vector.extract_strided_slice %514 {offsets = [0, 23, 0], sizes = [13, 1, 8], strides = [1, 1, 1]} : vector<13x26x8xf32> to vector<13x1x8xf32>
      %685 = vector.shape_cast %684 : vector<13x1x8xf32> to vector<13x8xf32>
      %686 = arith.maximumf %683, %685 : vector<13x8xf32>
      %687 = vector.broadcast %516 : f32 to vector<13x8xf32>
      %688 = arith.addf %686, %687 : vector<13x8xf32>
      %cst_186 = arith.constant 0.000000e+00 : f32
      %689 = vector.broadcast %cst_186 : f32 to vector<13x8xf32>
      %690 = arith.maximumf %688, %689 : vector<13x8xf32>
      %c13_i32_187 = arith.constant 13 : i32
      %691 = arith.muli %arg14, %c13_i32_187 : i32
      %c11_i32 = arith.constant 11 : i32
      %692 = arith.addi %691, %c11_i32 : i32
      %693 = arith.index_cast %692 : i32 to index
      %c0_188 = arith.constant 0 : index
      %c0_189 = arith.constant 0 : index
      %694 = vector.load %arg11[%693, %c0_188, %c0_189] : memref<104x13x8xf32, #tpu.memory_space<vmem>>, vector<1x13x8xf32>
      %695 = vector.shape_cast %694 : vector<1x13x8xf32> to vector<13x8xf32>
      %696 = vector.shape_cast %690 : vector<13x8xf32> to vector<1x13x8xf32>
      tpu.vector_store %arg11[%693, %c0_188, %c0_189], %696 {strides = array<i32>} : memref<104x13x8xf32, #tpu.memory_space<vmem>>, vector<1x13x8xf32>,
      %697 = vector.extract_strided_slice %514 {offsets = [0, 24, 0], sizes = [13, 1, 8], strides = [1, 1, 1]} : vector<13x26x8xf32> to vector<13x1x8xf32>
      %698 = vector.shape_cast %697 : vector<13x1x8xf32> to vector<13x8xf32>
      %699 = vector.extract_strided_slice %514 {offsets = [0, 25, 0], sizes = [13, 1, 8], strides = [1, 1, 1]} : vector<13x26x8xf32> to vector<13x1x8xf32>
      %700 = vector.shape_cast %699 : vector<13x1x8xf32> to vector<13x8xf32>
      %701 = arith.maximumf %698, %700 : vector<13x8xf32>
      %702 = vector.broadcast %516 : f32 to vector<13x8xf32>
      %703 = arith.addf %701, %702 : vector<13x8xf32>
      %cst_190 = arith.constant 0.000000e+00 : f32
      %704 = vector.broadcast %cst_190 : f32 to vector<13x8xf32>
      %705 = arith.maximumf %703, %704 : vector<13x8xf32>
      %c13_i32_191 = arith.constant 13 : i32
      %706 = arith.muli %arg14, %c13_i32_191 : i32
      %c12_i32 = arith.constant 12 : i32
      %707 = arith.addi %706, %c12_i32 : i32
      %708 = arith.index_cast %707 : i32 to index
      %c0_192 = arith.constant 0 : index
      %c0_193 = arith.constant 0 : index
      %709 = vector.load %arg11[%708, %c0_192, %c0_193] : memref<104x13x8xf32, #tpu.memory_space<vmem>>, vector<1x13x8xf32>
      %710 = vector.shape_cast %709 : vector<1x13x8xf32> to vector<13x8xf32>
      %711 = vector.shape_cast %705 : vector<13x8xf32> to vector<1x13x8xf32>
      tpu.vector_store %arg11[%708, %c0_192, %c0_193], %711 {strides = array<i32>} : memref<104x13x8xf32, #tpu.memory_space<vmem>>, vector<1x13x8xf32>,
    }
    %c8_i32_0 = arith.constant 8 : i32
    %c0_i32_1 = arith.constant 0 : i32
    %c8_i32_2 = arith.constant 8 : i32
    %1 = arith.addi %c0_i32_1, %c8_i32_2 : i32
    %c1_i32_3 = arith.constant 1 : i32
    scf.for %arg14 = %c0_i32_1 to %1 step %c1_i32_3  : i32 {
      %cst_135 = arith.constant 0.000000e+00 : f32
      %506 = vector.broadcast %cst_135 : f32 to vector<11x11x8xf32>
      %c0_i32_136 = arith.constant 0 : i32
      %c8_i32_137 = arith.constant 8 : i32
      %507 = arith.addi %c0_i32_136, %c8_i32_137 : i32
      %c1_i32_138 = arith.constant 1 : i32
      %508 = scf.for %arg15 = %c0_i32_136 to %507 step %c1_i32_138 iter_args(%arg16 = %506) -> (vector<11x11x8xf32>)  : i32 {
        %c13_i32 = arith.constant 13 : i32
        %513 = arith.muli %arg15, %c13_i32 : i32
        %514 = arith.index_cast %513 : i32 to index
        %c0_143 = arith.constant 0 : index
        %c0_144 = arith.constant 0 : index
        %515 = vector.load %arg11[%514, %c0_143, %c0_144] : memref<104x13x8xf32, #tpu.memory_space<vmem>>, vector<13x13x8xf32>
        %c8_i32_145 = arith.constant 8 : i32
        %516 = arith.muli %arg14, %c8_i32_145 : i32
        %517 = arith.addi %516, %arg15 : i32
        %c9_i32 = arith.constant 9 : i32
        %518 = arith.muli %517, %c9_i32 : i32
        %c0_i32_146 = arith.constant 0 : i32
        %519 = arith.addi %518, %c0_i32_146 : i32
        %c0_i32_147 = arith.constant 0 : i32
        %520 = arith.addi %519, %c0_i32_147 : i32
        %521 = arith.index_cast %520 : i32 to index
        %522 = memref.load %arg4[%521] : memref<576xf32, #tpu.memory_space<smem>>
        %523 = vector.extract_strided_slice %515 {offsets = [0, 0, 0], sizes = [11, 11, 8], strides = [1, 1, 1]} : vector<13x13x8xf32> to vector<11x11x8xf32>
        %524 = vector.broadcast %522 : f32 to vector<11x11x8xf32>
        %525 = arith.mulf %523, %524 : vector<11x11x8xf32>
        %526 = arith.addf %arg16, %525 : vector<11x11x8xf32>
        %c8_i32_148 = arith.constant 8 : i32
        %527 = arith.muli %arg14, %c8_i32_148 : i32
        %528 = arith.addi %527, %arg15 : i32
        %c9_i32_149 = arith.constant 9 : i32
        %529 = arith.muli %528, %c9_i32_149 : i32
        %c0_i32_150 = arith.constant 0 : i32
        %530 = arith.addi %529, %c0_i32_150 : i32
        %c1_i32_151 = arith.constant 1 : i32
        %531 = arith.addi %530, %c1_i32_151 : i32
        %532 = arith.index_cast %531 : i32 to index
        %533 = memref.load %arg4[%532] : memref<576xf32, #tpu.memory_space<smem>>
        %534 = vector.extract_strided_slice %515 {offsets = [0, 1, 0], sizes = [11, 11, 8], strides = [1, 1, 1]} : vector<13x13x8xf32> to vector<11x11x8xf32>
        %535 = vector.broadcast %533 : f32 to vector<11x11x8xf32>
        %536 = arith.mulf %534, %535 : vector<11x11x8xf32>
        %537 = arith.addf %526, %536 : vector<11x11x8xf32>
        %c8_i32_152 = arith.constant 8 : i32
        %538 = arith.muli %arg14, %c8_i32_152 : i32
        %539 = arith.addi %538, %arg15 : i32
        %c9_i32_153 = arith.constant 9 : i32
        %540 = arith.muli %539, %c9_i32_153 : i32
        %c0_i32_154 = arith.constant 0 : i32
        %541 = arith.addi %540, %c0_i32_154 : i32
        %c2_i32 = arith.constant 2 : i32
        %542 = arith.addi %541, %c2_i32 : i32
        %543 = arith.index_cast %542 : i32 to index
        %544 = memref.load %arg4[%543] : memref<576xf32, #tpu.memory_space<smem>>
        %545 = vector.extract_strided_slice %515 {offsets = [0, 2, 0], sizes = [11, 11, 8], strides = [1, 1, 1]} : vector<13x13x8xf32> to vector<11x11x8xf32>
        %546 = vector.broadcast %544 : f32 to vector<11x11x8xf32>
        %547 = arith.mulf %545, %546 : vector<11x11x8xf32>
        %548 = arith.addf %537, %547 : vector<11x11x8xf32>
        %c8_i32_155 = arith.constant 8 : i32
        %549 = arith.muli %arg14, %c8_i32_155 : i32
        %550 = arith.addi %549, %arg15 : i32
        %c9_i32_156 = arith.constant 9 : i32
        %551 = arith.muli %550, %c9_i32_156 : i32
        %c3_i32 = arith.constant 3 : i32
        %552 = arith.addi %551, %c3_i32 : i32
        %c0_i32_157 = arith.constant 0 : i32
        %553 = arith.addi %552, %c0_i32_157 : i32
        %554 = arith.index_cast %553 : i32 to index
        %555 = memref.load %arg4[%554] : memref<576xf32, #tpu.memory_space<smem>>
        %556 = vector.extract_strided_slice %515 {offsets = [1, 0, 0], sizes = [11, 11, 8], strides = [1, 1, 1]} : vector<13x13x8xf32> to vector<11x11x8xf32>
        %557 = vector.broadcast %555 : f32 to vector<11x11x8xf32>
        %558 = arith.mulf %556, %557 : vector<11x11x8xf32>
        %559 = arith.addf %548, %558 : vector<11x11x8xf32>
        %c8_i32_158 = arith.constant 8 : i32
        %560 = arith.muli %arg14, %c8_i32_158 : i32
        %561 = arith.addi %560, %arg15 : i32
        %c9_i32_159 = arith.constant 9 : i32
        %562 = arith.muli %561, %c9_i32_159 : i32
        %c3_i32_160 = arith.constant 3 : i32
        %563 = arith.addi %562, %c3_i32_160 : i32
        %c1_i32_161 = arith.constant 1 : i32
        %564 = arith.addi %563, %c1_i32_161 : i32
        %565 = arith.index_cast %564 : i32 to index
        %566 = memref.load %arg4[%565] : memref<576xf32, #tpu.memory_space<smem>>
        %567 = vector.extract_strided_slice %515 {offsets = [1, 1, 0], sizes = [11, 11, 8], strides = [1, 1, 1]} : vector<13x13x8xf32> to vector<11x11x8xf32>
        %568 = vector.broadcast %566 : f32 to vector<11x11x8xf32>
        %569 = arith.mulf %567, %568 : vector<11x11x8xf32>
        %570 = arith.addf %559, %569 : vector<11x11x8xf32>
        %c8_i32_162 = arith.constant 8 : i32
        %571 = arith.muli %arg14, %c8_i32_162 : i32
        %572 = arith.addi %571, %arg15 : i32
        %c9_i32_163 = arith.constant 9 : i32
        %573 = arith.muli %572, %c9_i32_163 : i32
        %c3_i32_164 = arith.constant 3 : i32
        %574 = arith.addi %573, %c3_i32_164 : i32
        %c2_i32_165 = arith.constant 2 : i32
        %575 = arith.addi %574, %c2_i32_165 : i32
        %576 = arith.index_cast %575 : i32 to index
        %577 = memref.load %arg4[%576] : memref<576xf32, #tpu.memory_space<smem>>
        %578 = vector.extract_strided_slice %515 {offsets = [1, 2, 0], sizes = [11, 11, 8], strides = [1, 1, 1]} : vector<13x13x8xf32> to vector<11x11x8xf32>
        %579 = vector.broadcast %577 : f32 to vector<11x11x8xf32>
        %580 = arith.mulf %578, %579 : vector<11x11x8xf32>
        %581 = arith.addf %570, %580 : vector<11x11x8xf32>
        %c8_i32_166 = arith.constant 8 : i32
        %582 = arith.muli %arg14, %c8_i32_166 : i32
        %583 = arith.addi %582, %arg15 : i32
        %c9_i32_167 = arith.constant 9 : i32
        %584 = arith.muli %583, %c9_i32_167 : i32
        %c6_i32 = arith.constant 6 : i32
        %585 = arith.addi %584, %c6_i32 : i32
        %c0_i32_168 = arith.constant 0 : i32
        %586 = arith.addi %585, %c0_i32_168 : i32
        %587 = arith.index_cast %586 : i32 to index
        %588 = memref.load %arg4[%587] : memref<576xf32, #tpu.memory_space<smem>>
        %589 = vector.extract_strided_slice %515 {offsets = [2, 0, 0], sizes = [11, 11, 8], strides = [1, 1, 1]} : vector<13x13x8xf32> to vector<11x11x8xf32>
        %590 = vector.broadcast %588 : f32 to vector<11x11x8xf32>
        %591 = arith.mulf %589, %590 : vector<11x11x8xf32>
        %592 = arith.addf %581, %591 : vector<11x11x8xf32>
        %c8_i32_169 = arith.constant 8 : i32
        %593 = arith.muli %arg14, %c8_i32_169 : i32
        %594 = arith.addi %593, %arg15 : i32
        %c9_i32_170 = arith.constant 9 : i32
        %595 = arith.muli %594, %c9_i32_170 : i32
        %c6_i32_171 = arith.constant 6 : i32
        %596 = arith.addi %595, %c6_i32_171 : i32
        %c1_i32_172 = arith.constant 1 : i32
        %597 = arith.addi %596, %c1_i32_172 : i32
        %598 = arith.index_cast %597 : i32 to index
        %599 = memref.load %arg4[%598] : memref<576xf32, #tpu.memory_space<smem>>
        %600 = vector.extract_strided_slice %515 {offsets = [2, 1, 0], sizes = [11, 11, 8], strides = [1, 1, 1]} : vector<13x13x8xf32> to vector<11x11x8xf32>
        %601 = vector.broadcast %599 : f32 to vector<11x11x8xf32>
        %602 = arith.mulf %600, %601 : vector<11x11x8xf32>
        %603 = arith.addf %592, %602 : vector<11x11x8xf32>
        %c8_i32_173 = arith.constant 8 : i32
        %604 = arith.muli %arg14, %c8_i32_173 : i32
        %605 = arith.addi %604, %arg15 : i32
        %c9_i32_174 = arith.constant 9 : i32
        %606 = arith.muli %605, %c9_i32_174 : i32
        %c6_i32_175 = arith.constant 6 : i32
        %607 = arith.addi %606, %c6_i32_175 : i32
        %c2_i32_176 = arith.constant 2 : i32
        %608 = arith.addi %607, %c2_i32_176 : i32
        %609 = arith.index_cast %608 : i32 to index
        %610 = memref.load %arg4[%609] : memref<576xf32, #tpu.memory_space<smem>>
        %611 = vector.extract_strided_slice %515 {offsets = [2, 2, 0], sizes = [11, 11, 8], strides = [1, 1, 1]} : vector<13x13x8xf32> to vector<11x11x8xf32>
        %612 = vector.broadcast %610 : f32 to vector<11x11x8xf32>
        %613 = arith.mulf %611, %612 : vector<11x11x8xf32>
        %614 = arith.addf %603, %613 : vector<11x11x8xf32>
        scf.yield %614 : vector<11x11x8xf32>
      }
      %c8_i32_139 = arith.constant 8 : i32
      %509 = arith.index_cast %arg14 : i32 to index
      %c0_140 = arith.constant 0 : index
      %c0_141 = arith.constant 0 : index
      %c0_142 = arith.constant 0 : index
      %510 = vector.load %arg12[%509, %c0_140, %c0_141, %c0_142] : memref<8x11x11x8xf32, #tpu.memory_space<vmem>>, vector<1x11x11x8xf32>
      %511 = vector.shape_cast %510 : vector<1x11x11x8xf32> to vector<11x11x8xf32>
      %512 = vector.shape_cast %508 : vector<11x11x8xf32> to vector<1x11x11x8xf32>
      tpu.vector_store %arg12[%509, %c0_140, %c0_141, %c0_142], %512 {strides = array<i32>} : memref<8x11x11x8xf32, #tpu.memory_space<vmem>>, vector<1x11x11x8xf32>,
    }
    %c8_i32_4 = arith.constant 8 : i32
    %c0 = arith.constant 0 : index
    %c0_5 = arith.constant 0 : index
    %c0_6 = arith.constant 0 : index
    %c0_7 = arith.constant 0 : index
    %2 = vector.load %arg12[%c0, %c0_5, %c0_6, %c0_7] : memref<8x11x11x8xf32, #tpu.memory_space<vmem>>, vector<1x11x11x8xf32>
    %3 = vector.shape_cast %2 : vector<1x11x11x8xf32> to vector<11x11x8xf32>
    %4 = vector.extract_strided_slice %3 {offsets = [0, 0, 0], sizes = [10, 11, 8], strides = [1, 1, 1]} : vector<11x11x8xf32> to vector<10x11x8xf32>
    %5 = vector.shape_cast %4 : vector<10x11x8xf32> to vector<5x2x11x8xf32>
    %6 = vector.extract_strided_slice %5 {offsets = [0, 0, 0, 0], sizes = [5, 1, 11, 8], strides = [1, 1, 1, 1]} : vector<5x2x11x8xf32> to vector<5x1x11x8xf32>
    %7 = vector.shape_cast %6 : vector<5x1x11x8xf32> to vector<5x11x8xf32>
    %8 = vector.extract_strided_slice %5 {offsets = [0, 1, 0, 0], sizes = [5, 1, 11, 8], strides = [1, 1, 1, 1]} : vector<5x2x11x8xf32> to vector<5x1x11x8xf32>
    %9 = vector.shape_cast %8 : vector<5x1x11x8xf32> to vector<5x11x8xf32>
    %10 = arith.maximumf %7, %9 : vector<5x11x8xf32>
    %c0_8 = arith.constant 0 : index
    %11 = memref.load %arg5[%c0_8] : memref<8xf32, #tpu.memory_space<smem>>
    %12 = vector.extract_strided_slice %10 {offsets = [0, 0, 0], sizes = [5, 1, 8], strides = [1, 1, 1]} : vector<5x11x8xf32> to vector<5x1x8xf32>
    %13 = vector.shape_cast %12 : vector<5x1x8xf32> to vector<5x8xf32>
    %14 = vector.extract_strided_slice %10 {offsets = [0, 1, 0], sizes = [5, 1, 8], strides = [1, 1, 1]} : vector<5x11x8xf32> to vector<5x1x8xf32>
    %15 = vector.shape_cast %14 : vector<5x1x8xf32> to vector<5x8xf32>
    %16 = arith.maximumf %13, %15 : vector<5x8xf32>
    %17 = vector.broadcast %11 : f32 to vector<5x8xf32>
    %18 = arith.addf %16, %17 : vector<5x8xf32>
    %cst = arith.constant 0.000000e+00 : f32
    %19 = vector.broadcast %cst : f32 to vector<5x8xf32>
    %20 = arith.maximumf %18, %19 : vector<5x8xf32>
    %c0_9 = arith.constant 0 : index
    %c0_10 = arith.constant 0 : index
    %21 = vector.load %arg13[%c0_9, %c0_10] : memref<200x8xf32, #tpu.memory_space<vmem>>, vector<5x8xf32>
    tpu.vector_store %arg13[%c0_9, %c0_10], %20 {strides = array<i32>} : memref<200x8xf32, #tpu.memory_space<vmem>>, vector<5x8xf32>,
    %22 = vector.extract_strided_slice %10 {offsets = [0, 2, 0], sizes = [5, 1, 8], strides = [1, 1, 1]} : vector<5x11x8xf32> to vector<5x1x8xf32>
    %23 = vector.shape_cast %22 : vector<5x1x8xf32> to vector<5x8xf32>
    %24 = vector.extract_strided_slice %10 {offsets = [0, 3, 0], sizes = [5, 1, 8], strides = [1, 1, 1]} : vector<5x11x8xf32> to vector<5x1x8xf32>
    %25 = vector.shape_cast %24 : vector<5x1x8xf32> to vector<5x8xf32>
    %26 = arith.maximumf %23, %25 : vector<5x8xf32>
    %27 = vector.broadcast %11 : f32 to vector<5x8xf32>
    %28 = arith.addf %26, %27 : vector<5x8xf32>
    %cst_11 = arith.constant 0.000000e+00 : f32
    %29 = vector.broadcast %cst_11 : f32 to vector<5x8xf32>
    %30 = arith.maximumf %28, %29 : vector<5x8xf32>
    %c5 = arith.constant 5 : index
    %c0_12 = arith.constant 0 : index
    %31 = vector.load %arg13[%c5, %c0_12] : memref<200x8xf32, #tpu.memory_space<vmem>>, vector<5x8xf32>
    tpu.vector_store %arg13[%c5, %c0_12], %30 {strides = array<i32>} : memref<200x8xf32, #tpu.memory_space<vmem>>, vector<5x8xf32>,
    %32 = vector.extract_strided_slice %10 {offsets = [0, 4, 0], sizes = [5, 1, 8], strides = [1, 1, 1]} : vector<5x11x8xf32> to vector<5x1x8xf32>
    %33 = vector.shape_cast %32 : vector<5x1x8xf32> to vector<5x8xf32>
    %34 = vector.extract_strided_slice %10 {offsets = [0, 5, 0], sizes = [5, 1, 8], strides = [1, 1, 1]} : vector<5x11x8xf32> to vector<5x1x8xf32>
    %35 = vector.shape_cast %34 : vector<5x1x8xf32> to vector<5x8xf32>
    %36 = arith.maximumf %33, %35 : vector<5x8xf32>
    %37 = vector.broadcast %11 : f32 to vector<5x8xf32>
    %38 = arith.addf %36, %37 : vector<5x8xf32>
    %cst_13 = arith.constant 0.000000e+00 : f32
    %39 = vector.broadcast %cst_13 : f32 to vector<5x8xf32>
    %40 = arith.maximumf %38, %39 : vector<5x8xf32>
    %c10 = arith.constant 10 : index
    %c0_14 = arith.constant 0 : index
    %41 = vector.load %arg13[%c10, %c0_14] : memref<200x8xf32, #tpu.memory_space<vmem>>, vector<5x8xf32>
    tpu.vector_store %arg13[%c10, %c0_14], %40 {strides = array<i32>} : memref<200x8xf32, #tpu.memory_space<vmem>>, vector<5x8xf32>,
    %42 = vector.extract_strided_slice %10 {offsets = [0, 6, 0], sizes = [5, 1, 8], strides = [1, 1, 1]} : vector<5x11x8xf32> to vector<5x1x8xf32>
    %43 = vector.shape_cast %42 : vector<5x1x8xf32> to vector<5x8xf32>
    %44 = vector.extract_strided_slice %10 {offsets = [0, 7, 0], sizes = [5, 1, 8], strides = [1, 1, 1]} : vector<5x11x8xf32> to vector<5x1x8xf32>
    %45 = vector.shape_cast %44 : vector<5x1x8xf32> to vector<5x8xf32>
    %46 = arith.maximumf %43, %45 : vector<5x8xf32>
    %47 = vector.broadcast %11 : f32 to vector<5x8xf32>
    %48 = arith.addf %46, %47 : vector<5x8xf32>
    %cst_15 = arith.constant 0.000000e+00 : f32
    %49 = vector.broadcast %cst_15 : f32 to vector<5x8xf32>
    %50 = arith.maximumf %48, %49 : vector<5x8xf32>
    %c15 = arith.constant 15 : index
    %c0_16 = arith.constant 0 : index
    %51 = vector.load %arg13[%c15, %c0_16] : memref<200x8xf32, #tpu.memory_space<vmem>>, vector<5x8xf32>
    tpu.vector_store %arg13[%c15, %c0_16], %50 {strides = array<i32>} : memref<200x8xf32, #tpu.memory_space<vmem>>, vector<5x8xf32>,
    %52 = vector.extract_strided_slice %10 {offsets = [0, 8, 0], sizes = [5, 1, 8], strides = [1, 1, 1]} : vector<5x11x8xf32> to vector<5x1x8xf32>
    %53 = vector.shape_cast %52 : vector<5x1x8xf32> to vector<5x8xf32>
    %54 = vector.extract_strided_slice %10 {offsets = [0, 9, 0], sizes = [5, 1, 8], strides = [1, 1, 1]} : vector<5x11x8xf32> to vector<5x1x8xf32>
    %55 = vector.shape_cast %54 : vector<5x1x8xf32> to vector<5x8xf32>
    %56 = arith.maximumf %53, %55 : vector<5x8xf32>
    %57 = vector.broadcast %11 : f32 to vector<5x8xf32>
    %58 = arith.addf %56, %57 : vector<5x8xf32>
    %cst_17 = arith.constant 0.000000e+00 : f32
    %59 = vector.broadcast %cst_17 : f32 to vector<5x8xf32>
    %60 = arith.maximumf %58, %59 : vector<5x8xf32>
    %c20 = arith.constant 20 : index
    %c0_18 = arith.constant 0 : index
    %61 = vector.load %arg13[%c20, %c0_18] : memref<200x8xf32, #tpu.memory_space<vmem>>, vector<5x8xf32>
    tpu.vector_store %arg13[%c20, %c0_18], %60 {strides = array<i32>} : memref<200x8xf32, #tpu.memory_space<vmem>>, vector<5x8xf32>,
    %c1 = arith.constant 1 : index
    %c0_19 = arith.constant 0 : index
    %c0_20 = arith.constant 0 : index
    %c0_21 = arith.constant 0 : index
    %62 = vector.load %arg12[%c1, %c0_19, %c0_20, %c0_21] : memref<8x11x11x8xf32, #tpu.memory_space<vmem>>, vector<1x11x11x8xf32>
    %63 = vector.shape_cast %62 : vector<1x11x11x8xf32> to vector<11x11x8xf32>
    %64 = vector.extract_strided_slice %63 {offsets = [0, 0, 0], sizes = [10, 11, 8], strides = [1, 1, 1]} : vector<11x11x8xf32> to vector<10x11x8xf32>
    %65 = vector.shape_cast %64 : vector<10x11x8xf32> to vector<5x2x11x8xf32>
    %66 = vector.extract_strided_slice %65 {offsets = [0, 0, 0, 0], sizes = [5, 1, 11, 8], strides = [1, 1, 1, 1]} : vector<5x2x11x8xf32> to vector<5x1x11x8xf32>
    %67 = vector.shape_cast %66 : vector<5x1x11x8xf32> to vector<5x11x8xf32>
    %68 = vector.extract_strided_slice %65 {offsets = [0, 1, 0, 0], sizes = [5, 1, 11, 8], strides = [1, 1, 1, 1]} : vector<5x2x11x8xf32> to vector<5x1x11x8xf32>
    %69 = vector.shape_cast %68 : vector<5x1x11x8xf32> to vector<5x11x8xf32>
    %70 = arith.maximumf %67, %69 : vector<5x11x8xf32>
    %c1_22 = arith.constant 1 : index
    %71 = memref.load %arg5[%c1_22] : memref<8xf32, #tpu.memory_space<smem>>
    %72 = vector.extract_strided_slice %70 {offsets = [0, 0, 0], sizes = [5, 1, 8], strides = [1, 1, 1]} : vector<5x11x8xf32> to vector<5x1x8xf32>
    %73 = vector.shape_cast %72 : vector<5x1x8xf32> to vector<5x8xf32>
    %74 = vector.extract_strided_slice %70 {offsets = [0, 1, 0], sizes = [5, 1, 8], strides = [1, 1, 1]} : vector<5x11x8xf32> to vector<5x1x8xf32>
    %75 = vector.shape_cast %74 : vector<5x1x8xf32> to vector<5x8xf32>
    %76 = arith.maximumf %73, %75 : vector<5x8xf32>
    %77 = vector.broadcast %71 : f32 to vector<5x8xf32>
    %78 = arith.addf %76, %77 : vector<5x8xf32>
    %cst_23 = arith.constant 0.000000e+00 : f32
    %79 = vector.broadcast %cst_23 : f32 to vector<5x8xf32>
    %80 = arith.maximumf %78, %79 : vector<5x8xf32>
    %c25 = arith.constant 25 : index
    %c0_24 = arith.constant 0 : index
    %81 = vector.load %arg13[%c25, %c0_24] : memref<200x8xf32, #tpu.memory_space<vmem>>, vector<5x8xf32>
    tpu.vector_store %arg13[%c25, %c0_24], %80 {strides = array<i32>} : memref<200x8xf32, #tpu.memory_space<vmem>>, vector<5x8xf32>,
    %82 = vector.extract_strided_slice %70 {offsets = [0, 2, 0], sizes = [5, 1, 8], strides = [1, 1, 1]} : vector<5x11x8xf32> to vector<5x1x8xf32>
    %83 = vector.shape_cast %82 : vector<5x1x8xf32> to vector<5x8xf32>
    %84 = vector.extract_strided_slice %70 {offsets = [0, 3, 0], sizes = [5, 1, 8], strides = [1, 1, 1]} : vector<5x11x8xf32> to vector<5x1x8xf32>
    %85 = vector.shape_cast %84 : vector<5x1x8xf32> to vector<5x8xf32>
    %86 = arith.maximumf %83, %85 : vector<5x8xf32>
    %87 = vector.broadcast %71 : f32 to vector<5x8xf32>
    %88 = arith.addf %86, %87 : vector<5x8xf32>
    %cst_25 = arith.constant 0.000000e+00 : f32
    %89 = vector.broadcast %cst_25 : f32 to vector<5x8xf32>
    %90 = arith.maximumf %88, %89 : vector<5x8xf32>
    %c30 = arith.constant 30 : index
    %c0_26 = arith.constant 0 : index
    %91 = vector.load %arg13[%c30, %c0_26] : memref<200x8xf32, #tpu.memory_space<vmem>>, vector<5x8xf32>
    tpu.vector_store %arg13[%c30, %c0_26], %90 {strides = array<i32>} : memref<200x8xf32, #tpu.memory_space<vmem>>, vector<5x8xf32>,
    %92 = vector.extract_strided_slice %70 {offsets = [0, 4, 0], sizes = [5, 1, 8], strides = [1, 1, 1]} : vector<5x11x8xf32> to vector<5x1x8xf32>
    %93 = vector.shape_cast %92 : vector<5x1x8xf32> to vector<5x8xf32>
    %94 = vector.extract_strided_slice %70 {offsets = [0, 5, 0], sizes = [5, 1, 8], strides = [1, 1, 1]} : vector<5x11x8xf32> to vector<5x1x8xf32>
    %95 = vector.shape_cast %94 : vector<5x1x8xf32> to vector<5x8xf32>
    %96 = arith.maximumf %93, %95 : vector<5x8xf32>
    %97 = vector.broadcast %71 : f32 to vector<5x8xf32>
    %98 = arith.addf %96, %97 : vector<5x8xf32>
    %cst_27 = arith.constant 0.000000e+00 : f32
    %99 = vector.broadcast %cst_27 : f32 to vector<5x8xf32>
    %100 = arith.maximumf %98, %99 : vector<5x8xf32>
    %c35 = arith.constant 35 : index
    %c0_28 = arith.constant 0 : index
    %101 = vector.load %arg13[%c35, %c0_28] : memref<200x8xf32, #tpu.memory_space<vmem>>, vector<5x8xf32>
    tpu.vector_store %arg13[%c35, %c0_28], %100 {strides = array<i32>} : memref<200x8xf32, #tpu.memory_space<vmem>>, vector<5x8xf32>,
    %102 = vector.extract_strided_slice %70 {offsets = [0, 6, 0], sizes = [5, 1, 8], strides = [1, 1, 1]} : vector<5x11x8xf32> to vector<5x1x8xf32>
    %103 = vector.shape_cast %102 : vector<5x1x8xf32> to vector<5x8xf32>
    %104 = vector.extract_strided_slice %70 {offsets = [0, 7, 0], sizes = [5, 1, 8], strides = [1, 1, 1]} : vector<5x11x8xf32> to vector<5x1x8xf32>
    %105 = vector.shape_cast %104 : vector<5x1x8xf32> to vector<5x8xf32>
    %106 = arith.maximumf %103, %105 : vector<5x8xf32>
    %107 = vector.broadcast %71 : f32 to vector<5x8xf32>
    %108 = arith.addf %106, %107 : vector<5x8xf32>
    %cst_29 = arith.constant 0.000000e+00 : f32
    %109 = vector.broadcast %cst_29 : f32 to vector<5x8xf32>
    %110 = arith.maximumf %108, %109 : vector<5x8xf32>
    %c40 = arith.constant 40 : index
    %c0_30 = arith.constant 0 : index
    %111 = vector.load %arg13[%c40, %c0_30] : memref<200x8xf32, #tpu.memory_space<vmem>>, vector<5x8xf32>
    tpu.vector_store %arg13[%c40, %c0_30], %110 {strides = array<i32>} : memref<200x8xf32, #tpu.memory_space<vmem>>, vector<5x8xf32>,
    %112 = vector.extract_strided_slice %70 {offsets = [0, 8, 0], sizes = [5, 1, 8], strides = [1, 1, 1]} : vector<5x11x8xf32> to vector<5x1x8xf32>
    %113 = vector.shape_cast %112 : vector<5x1x8xf32> to vector<5x8xf32>
    %114 = vector.extract_strided_slice %70 {offsets = [0, 9, 0], sizes = [5, 1, 8], strides = [1, 1, 1]} : vector<5x11x8xf32> to vector<5x1x8xf32>
    %115 = vector.shape_cast %114 : vector<5x1x8xf32> to vector<5x8xf32>
    %116 = arith.maximumf %113, %115 : vector<5x8xf32>
    %117 = vector.broadcast %71 : f32 to vector<5x8xf32>
    %118 = arith.addf %116, %117 : vector<5x8xf32>
    %cst_31 = arith.constant 0.000000e+00 : f32
    %119 = vector.broadcast %cst_31 : f32 to vector<5x8xf32>
    %120 = arith.maximumf %118, %119 : vector<5x8xf32>
    %c45 = arith.constant 45 : index
    %c0_32 = arith.constant 0 : index
    %121 = vector.load %arg13[%c45, %c0_32] : memref<200x8xf32, #tpu.memory_space<vmem>>, vector<5x8xf32>
    tpu.vector_store %arg13[%c45, %c0_32], %120 {strides = array<i32>} : memref<200x8xf32, #tpu.memory_space<vmem>>, vector<5x8xf32>,
    %c2 = arith.constant 2 : index
    %c0_33 = arith.constant 0 : index
    %c0_34 = arith.constant 0 : index
    %c0_35 = arith.constant 0 : index
    %122 = vector.load %arg12[%c2, %c0_33, %c0_34, %c0_35] : memref<8x11x11x8xf32, #tpu.memory_space<vmem>>, vector<1x11x11x8xf32>
    %123 = vector.shape_cast %122 : vector<1x11x11x8xf32> to vector<11x11x8xf32>
    %124 = vector.extract_strided_slice %123 {offsets = [0, 0, 0], sizes = [10, 11, 8], strides = [1, 1, 1]} : vector<11x11x8xf32> to vector<10x11x8xf32>
    %125 = vector.shape_cast %124 : vector<10x11x8xf32> to vector<5x2x11x8xf32>
    %126 = vector.extract_strided_slice %125 {offsets = [0, 0, 0, 0], sizes = [5, 1, 11, 8], strides = [1, 1, 1, 1]} : vector<5x2x11x8xf32> to vector<5x1x11x8xf32>
    %127 = vector.shape_cast %126 : vector<5x1x11x8xf32> to vector<5x11x8xf32>
    %128 = vector.extract_strided_slice %125 {offsets = [0, 1, 0, 0], sizes = [5, 1, 11, 8], strides = [1, 1, 1, 1]} : vector<5x2x11x8xf32> to vector<5x1x11x8xf32>
    %129 = vector.shape_cast %128 : vector<5x1x11x8xf32> to vector<5x11x8xf32>
    %130 = arith.maximumf %127, %129 : vector<5x11x8xf32>
    %c2_36 = arith.constant 2 : index
    %131 = memref.load %arg5[%c2_36] : memref<8xf32, #tpu.memory_space<smem>>
    %132 = vector.extract_strided_slice %130 {offsets = [0, 0, 0], sizes = [5, 1, 8], strides = [1, 1, 1]} : vector<5x11x8xf32> to vector<5x1x8xf32>
    %133 = vector.shape_cast %132 : vector<5x1x8xf32> to vector<5x8xf32>
    %134 = vector.extract_strided_slice %130 {offsets = [0, 1, 0], sizes = [5, 1, 8], strides = [1, 1, 1]} : vector<5x11x8xf32> to vector<5x1x8xf32>
    %135 = vector.shape_cast %134 : vector<5x1x8xf32> to vector<5x8xf32>
    %136 = arith.maximumf %133, %135 : vector<5x8xf32>
    %137 = vector.broadcast %131 : f32 to vector<5x8xf32>
    %138 = arith.addf %136, %137 : vector<5x8xf32>
    %cst_37 = arith.constant 0.000000e+00 : f32
    %139 = vector.broadcast %cst_37 : f32 to vector<5x8xf32>
    %140 = arith.maximumf %138, %139 : vector<5x8xf32>
    %c50 = arith.constant 50 : index
    %c0_38 = arith.constant 0 : index
    %141 = vector.load %arg13[%c50, %c0_38] : memref<200x8xf32, #tpu.memory_space<vmem>>, vector<5x8xf32>
    tpu.vector_store %arg13[%c50, %c0_38], %140 {strides = array<i32>} : memref<200x8xf32, #tpu.memory_space<vmem>>, vector<5x8xf32>,
    %142 = vector.extract_strided_slice %130 {offsets = [0, 2, 0], sizes = [5, 1, 8], strides = [1, 1, 1]} : vector<5x11x8xf32> to vector<5x1x8xf32>
    %143 = vector.shape_cast %142 : vector<5x1x8xf32> to vector<5x8xf32>
    %144 = vector.extract_strided_slice %130 {offsets = [0, 3, 0], sizes = [5, 1, 8], strides = [1, 1, 1]} : vector<5x11x8xf32> to vector<5x1x8xf32>
    %145 = vector.shape_cast %144 : vector<5x1x8xf32> to vector<5x8xf32>
    %146 = arith.maximumf %143, %145 : vector<5x8xf32>
    %147 = vector.broadcast %131 : f32 to vector<5x8xf32>
    %148 = arith.addf %146, %147 : vector<5x8xf32>
    %cst_39 = arith.constant 0.000000e+00 : f32
    %149 = vector.broadcast %cst_39 : f32 to vector<5x8xf32>
    %150 = arith.maximumf %148, %149 : vector<5x8xf32>
    %c55 = arith.constant 55 : index
    %c0_40 = arith.constant 0 : index
    %151 = vector.load %arg13[%c55, %c0_40] : memref<200x8xf32, #tpu.memory_space<vmem>>, vector<5x8xf32>
    tpu.vector_store %arg13[%c55, %c0_40], %150 {strides = array<i32>} : memref<200x8xf32, #tpu.memory_space<vmem>>, vector<5x8xf32>,
    %152 = vector.extract_strided_slice %130 {offsets = [0, 4, 0], sizes = [5, 1, 8], strides = [1, 1, 1]} : vector<5x11x8xf32> to vector<5x1x8xf32>
    %153 = vector.shape_cast %152 : vector<5x1x8xf32> to vector<5x8xf32>
    %154 = vector.extract_strided_slice %130 {offsets = [0, 5, 0], sizes = [5, 1, 8], strides = [1, 1, 1]} : vector<5x11x8xf32> to vector<5x1x8xf32>
    %155 = vector.shape_cast %154 : vector<5x1x8xf32> to vector<5x8xf32>
    %156 = arith.maximumf %153, %155 : vector<5x8xf32>
    %157 = vector.broadcast %131 : f32 to vector<5x8xf32>
    %158 = arith.addf %156, %157 : vector<5x8xf32>
    %cst_41 = arith.constant 0.000000e+00 : f32
    %159 = vector.broadcast %cst_41 : f32 to vector<5x8xf32>
    %160 = arith.maximumf %158, %159 : vector<5x8xf32>
    %c60 = arith.constant 60 : index
    %c0_42 = arith.constant 0 : index
    %161 = vector.load %arg13[%c60, %c0_42] : memref<200x8xf32, #tpu.memory_space<vmem>>, vector<5x8xf32>
    tpu.vector_store %arg13[%c60, %c0_42], %160 {strides = array<i32>} : memref<200x8xf32, #tpu.memory_space<vmem>>, vector<5x8xf32>,
    %162 = vector.extract_strided_slice %130 {offsets = [0, 6, 0], sizes = [5, 1, 8], strides = [1, 1, 1]} : vector<5x11x8xf32> to vector<5x1x8xf32>
    %163 = vector.shape_cast %162 : vector<5x1x8xf32> to vector<5x8xf32>
    %164 = vector.extract_strided_slice %130 {offsets = [0, 7, 0], sizes = [5, 1, 8], strides = [1, 1, 1]} : vector<5x11x8xf32> to vector<5x1x8xf32>
    %165 = vector.shape_cast %164 : vector<5x1x8xf32> to vector<5x8xf32>
    %166 = arith.maximumf %163, %165 : vector<5x8xf32>
    %167 = vector.broadcast %131 : f32 to vector<5x8xf32>
    %168 = arith.addf %166, %167 : vector<5x8xf32>
    %cst_43 = arith.constant 0.000000e+00 : f32
    %169 = vector.broadcast %cst_43 : f32 to vector<5x8xf32>
    %170 = arith.maximumf %168, %169 : vector<5x8xf32>
    %c65 = arith.constant 65 : index
    %c0_44 = arith.constant 0 : index
    %171 = vector.load %arg13[%c65, %c0_44] : memref<200x8xf32, #tpu.memory_space<vmem>>, vector<5x8xf32>
    tpu.vector_store %arg13[%c65, %c0_44], %170 {strides = array<i32>} : memref<200x8xf32, #tpu.memory_space<vmem>>, vector<5x8xf32>,
    %172 = vector.extract_strided_slice %130 {offsets = [0, 8, 0], sizes = [5, 1, 8], strides = [1, 1, 1]} : vector<5x11x8xf32> to vector<5x1x8xf32>
    %173 = vector.shape_cast %172 : vector<5x1x8xf32> to vector<5x8xf32>
    %174 = vector.extract_strided_slice %130 {offsets = [0, 9, 0], sizes = [5, 1, 8], strides = [1, 1, 1]} : vector<5x11x8xf32> to vector<5x1x8xf32>
    %175 = vector.shape_cast %174 : vector<5x1x8xf32> to vector<5x8xf32>
    %176 = arith.maximumf %173, %175 : vector<5x8xf32>
    %177 = vector.broadcast %131 : f32 to vector<5x8xf32>
    %178 = arith.addf %176, %177 : vector<5x8xf32>
    %cst_45 = arith.constant 0.000000e+00 : f32
    %179 = vector.broadcast %cst_45 : f32 to vector<5x8xf32>
    %180 = arith.maximumf %178, %179 : vector<5x8xf32>
    %c70 = arith.constant 70 : index
    %c0_46 = arith.constant 0 : index
    %181 = vector.load %arg13[%c70, %c0_46] : memref<200x8xf32, #tpu.memory_space<vmem>>, vector<5x8xf32>
    tpu.vector_store %arg13[%c70, %c0_46], %180 {strides = array<i32>} : memref<200x8xf32, #tpu.memory_space<vmem>>, vector<5x8xf32>,
    %c3 = arith.constant 3 : index
    %c0_47 = arith.constant 0 : index
    %c0_48 = arith.constant 0 : index
    %c0_49 = arith.constant 0 : index
    %182 = vector.load %arg12[%c3, %c0_47, %c0_48, %c0_49] : memref<8x11x11x8xf32, #tpu.memory_space<vmem>>, vector<1x11x11x8xf32>
    %183 = vector.shape_cast %182 : vector<1x11x11x8xf32> to vector<11x11x8xf32>
    %184 = vector.extract_strided_slice %183 {offsets = [0, 0, 0], sizes = [10, 11, 8], strides = [1, 1, 1]} : vector<11x11x8xf32> to vector<10x11x8xf32>
    %185 = vector.shape_cast %184 : vector<10x11x8xf32> to vector<5x2x11x8xf32>
    %186 = vector.extract_strided_slice %185 {offsets = [0, 0, 0, 0], sizes = [5, 1, 11, 8], strides = [1, 1, 1, 1]} : vector<5x2x11x8xf32> to vector<5x1x11x8xf32>
    %187 = vector.shape_cast %186 : vector<5x1x11x8xf32> to vector<5x11x8xf32>
    %188 = vector.extract_strided_slice %185 {offsets = [0, 1, 0, 0], sizes = [5, 1, 11, 8], strides = [1, 1, 1, 1]} : vector<5x2x11x8xf32> to vector<5x1x11x8xf32>
    %189 = vector.shape_cast %188 : vector<5x1x11x8xf32> to vector<5x11x8xf32>
    %190 = arith.maximumf %187, %189 : vector<5x11x8xf32>
    %c3_50 = arith.constant 3 : index
    %191 = memref.load %arg5[%c3_50] : memref<8xf32, #tpu.memory_space<smem>>
    %192 = vector.extract_strided_slice %190 {offsets = [0, 0, 0], sizes = [5, 1, 8], strides = [1, 1, 1]} : vector<5x11x8xf32> to vector<5x1x8xf32>
    %193 = vector.shape_cast %192 : vector<5x1x8xf32> to vector<5x8xf32>
    %194 = vector.extract_strided_slice %190 {offsets = [0, 1, 0], sizes = [5, 1, 8], strides = [1, 1, 1]} : vector<5x11x8xf32> to vector<5x1x8xf32>
    %195 = vector.shape_cast %194 : vector<5x1x8xf32> to vector<5x8xf32>
    %196 = arith.maximumf %193, %195 : vector<5x8xf32>
    %197 = vector.broadcast %191 : f32 to vector<5x8xf32>
    %198 = arith.addf %196, %197 : vector<5x8xf32>
    %cst_51 = arith.constant 0.000000e+00 : f32
    %199 = vector.broadcast %cst_51 : f32 to vector<5x8xf32>
    %200 = arith.maximumf %198, %199 : vector<5x8xf32>
    %c75 = arith.constant 75 : index
    %c0_52 = arith.constant 0 : index
    %201 = vector.load %arg13[%c75, %c0_52] : memref<200x8xf32, #tpu.memory_space<vmem>>, vector<5x8xf32>
    tpu.vector_store %arg13[%c75, %c0_52], %200 {strides = array<i32>} : memref<200x8xf32, #tpu.memory_space<vmem>>, vector<5x8xf32>,
    %202 = vector.extract_strided_slice %190 {offsets = [0, 2, 0], sizes = [5, 1, 8], strides = [1, 1, 1]} : vector<5x11x8xf32> to vector<5x1x8xf32>
    %203 = vector.shape_cast %202 : vector<5x1x8xf32> to vector<5x8xf32>
    %204 = vector.extract_strided_slice %190 {offsets = [0, 3, 0], sizes = [5, 1, 8], strides = [1, 1, 1]} : vector<5x11x8xf32> to vector<5x1x8xf32>
    %205 = vector.shape_cast %204 : vector<5x1x8xf32> to vector<5x8xf32>
    %206 = arith.maximumf %203, %205 : vector<5x8xf32>
    %207 = vector.broadcast %191 : f32 to vector<5x8xf32>
    %208 = arith.addf %206, %207 : vector<5x8xf32>
    %cst_53 = arith.constant 0.000000e+00 : f32
    %209 = vector.broadcast %cst_53 : f32 to vector<5x8xf32>
    %210 = arith.maximumf %208, %209 : vector<5x8xf32>
    %c80 = arith.constant 80 : index
    %c0_54 = arith.constant 0 : index
    %211 = vector.load %arg13[%c80, %c0_54] : memref<200x8xf32, #tpu.memory_space<vmem>>, vector<5x8xf32>
    tpu.vector_store %arg13[%c80, %c0_54], %210 {strides = array<i32>} : memref<200x8xf32, #tpu.memory_space<vmem>>, vector<5x8xf32>,
    %212 = vector.extract_strided_slice %190 {offsets = [0, 4, 0], sizes = [5, 1, 8], strides = [1, 1, 1]} : vector<5x11x8xf32> to vector<5x1x8xf32>
    %213 = vector.shape_cast %212 : vector<5x1x8xf32> to vector<5x8xf32>
    %214 = vector.extract_strided_slice %190 {offsets = [0, 5, 0], sizes = [5, 1, 8], strides = [1, 1, 1]} : vector<5x11x8xf32> to vector<5x1x8xf32>
    %215 = vector.shape_cast %214 : vector<5x1x8xf32> to vector<5x8xf32>
    %216 = arith.maximumf %213, %215 : vector<5x8xf32>
    %217 = vector.broadcast %191 : f32 to vector<5x8xf32>
    %218 = arith.addf %216, %217 : vector<5x8xf32>
    %cst_55 = arith.constant 0.000000e+00 : f32
    %219 = vector.broadcast %cst_55 : f32 to vector<5x8xf32>
    %220 = arith.maximumf %218, %219 : vector<5x8xf32>
    %c85 = arith.constant 85 : index
    %c0_56 = arith.constant 0 : index
    %221 = vector.load %arg13[%c85, %c0_56] : memref<200x8xf32, #tpu.memory_space<vmem>>, vector<5x8xf32>
    tpu.vector_store %arg13[%c85, %c0_56], %220 {strides = array<i32>} : memref<200x8xf32, #tpu.memory_space<vmem>>, vector<5x8xf32>,
    %222 = vector.extract_strided_slice %190 {offsets = [0, 6, 0], sizes = [5, 1, 8], strides = [1, 1, 1]} : vector<5x11x8xf32> to vector<5x1x8xf32>
    %223 = vector.shape_cast %222 : vector<5x1x8xf32> to vector<5x8xf32>
    %224 = vector.extract_strided_slice %190 {offsets = [0, 7, 0], sizes = [5, 1, 8], strides = [1, 1, 1]} : vector<5x11x8xf32> to vector<5x1x8xf32>
    %225 = vector.shape_cast %224 : vector<5x1x8xf32> to vector<5x8xf32>
    %226 = arith.maximumf %223, %225 : vector<5x8xf32>
    %227 = vector.broadcast %191 : f32 to vector<5x8xf32>
    %228 = arith.addf %226, %227 : vector<5x8xf32>
    %cst_57 = arith.constant 0.000000e+00 : f32
    %229 = vector.broadcast %cst_57 : f32 to vector<5x8xf32>
    %230 = arith.maximumf %228, %229 : vector<5x8xf32>
    %c90 = arith.constant 90 : index
    %c0_58 = arith.constant 0 : index
    %231 = vector.load %arg13[%c90, %c0_58] : memref<200x8xf32, #tpu.memory_space<vmem>>, vector<5x8xf32>
    tpu.vector_store %arg13[%c90, %c0_58], %230 {strides = array<i32>} : memref<200x8xf32, #tpu.memory_space<vmem>>, vector<5x8xf32>,
    %232 = vector.extract_strided_slice %190 {offsets = [0, 8, 0], sizes = [5, 1, 8], strides = [1, 1, 1]} : vector<5x11x8xf32> to vector<5x1x8xf32>
    %233 = vector.shape_cast %232 : vector<5x1x8xf32> to vector<5x8xf32>
    %234 = vector.extract_strided_slice %190 {offsets = [0, 9, 0], sizes = [5, 1, 8], strides = [1, 1, 1]} : vector<5x11x8xf32> to vector<5x1x8xf32>
    %235 = vector.shape_cast %234 : vector<5x1x8xf32> to vector<5x8xf32>
    %236 = arith.maximumf %233, %235 : vector<5x8xf32>
    %237 = vector.broadcast %191 : f32 to vector<5x8xf32>
    %238 = arith.addf %236, %237 : vector<5x8xf32>
    %cst_59 = arith.constant 0.000000e+00 : f32
    %239 = vector.broadcast %cst_59 : f32 to vector<5x8xf32>
    %240 = arith.maximumf %238, %239 : vector<5x8xf32>
    %c95 = arith.constant 95 : index
    %c0_60 = arith.constant 0 : index
    %241 = vector.load %arg13[%c95, %c0_60] : memref<200x8xf32, #tpu.memory_space<vmem>>, vector<5x8xf32>
    tpu.vector_store %arg13[%c95, %c0_60], %240 {strides = array<i32>} : memref<200x8xf32, #tpu.memory_space<vmem>>, vector<5x8xf32>,
    %c4 = arith.constant 4 : index
    %c0_61 = arith.constant 0 : index
    %c0_62 = arith.constant 0 : index
    %c0_63 = arith.constant 0 : index
    %242 = vector.load %arg12[%c4, %c0_61, %c0_62, %c0_63] : memref<8x11x11x8xf32, #tpu.memory_space<vmem>>, vector<1x11x11x8xf32>
    %243 = vector.shape_cast %242 : vector<1x11x11x8xf32> to vector<11x11x8xf32>
    %244 = vector.extract_strided_slice %243 {offsets = [0, 0, 0], sizes = [10, 11, 8], strides = [1, 1, 1]} : vector<11x11x8xf32> to vector<10x11x8xf32>
    %245 = vector.shape_cast %244 : vector<10x11x8xf32> to vector<5x2x11x8xf32>
    %246 = vector.extract_strided_slice %245 {offsets = [0, 0, 0, 0], sizes = [5, 1, 11, 8], strides = [1, 1, 1, 1]} : vector<5x2x11x8xf32> to vector<5x1x11x8xf32>
    %247 = vector.shape_cast %246 : vector<5x1x11x8xf32> to vector<5x11x8xf32>
    %248 = vector.extract_strided_slice %245 {offsets = [0, 1, 0, 0], sizes = [5, 1, 11, 8], strides = [1, 1, 1, 1]} : vector<5x2x11x8xf32> to vector<5x1x11x8xf32>
    %249 = vector.shape_cast %248 : vector<5x1x11x8xf32> to vector<5x11x8xf32>
    %250 = arith.maximumf %247, %249 : vector<5x11x8xf32>
    %c4_64 = arith.constant 4 : index
    %251 = memref.load %arg5[%c4_64] : memref<8xf32, #tpu.memory_space<smem>>
    %252 = vector.extract_strided_slice %250 {offsets = [0, 0, 0], sizes = [5, 1, 8], strides = [1, 1, 1]} : vector<5x11x8xf32> to vector<5x1x8xf32>
    %253 = vector.shape_cast %252 : vector<5x1x8xf32> to vector<5x8xf32>
    %254 = vector.extract_strided_slice %250 {offsets = [0, 1, 0], sizes = [5, 1, 8], strides = [1, 1, 1]} : vector<5x11x8xf32> to vector<5x1x8xf32>
    %255 = vector.shape_cast %254 : vector<5x1x8xf32> to vector<5x8xf32>
    %256 = arith.maximumf %253, %255 : vector<5x8xf32>
    %257 = vector.broadcast %251 : f32 to vector<5x8xf32>
    %258 = arith.addf %256, %257 : vector<5x8xf32>
    %cst_65 = arith.constant 0.000000e+00 : f32
    %259 = vector.broadcast %cst_65 : f32 to vector<5x8xf32>
    %260 = arith.maximumf %258, %259 : vector<5x8xf32>
    %c100 = arith.constant 100 : index
    %c0_66 = arith.constant 0 : index
    %261 = vector.load %arg13[%c100, %c0_66] : memref<200x8xf32, #tpu.memory_space<vmem>>, vector<5x8xf32>
    tpu.vector_store %arg13[%c100, %c0_66], %260 {strides = array<i32>} : memref<200x8xf32, #tpu.memory_space<vmem>>, vector<5x8xf32>,
    %262 = vector.extract_strided_slice %250 {offsets = [0, 2, 0], sizes = [5, 1, 8], strides = [1, 1, 1]} : vector<5x11x8xf32> to vector<5x1x8xf32>
    %263 = vector.shape_cast %262 : vector<5x1x8xf32> to vector<5x8xf32>
    %264 = vector.extract_strided_slice %250 {offsets = [0, 3, 0], sizes = [5, 1, 8], strides = [1, 1, 1]} : vector<5x11x8xf32> to vector<5x1x8xf32>
    %265 = vector.shape_cast %264 : vector<5x1x8xf32> to vector<5x8xf32>
    %266 = arith.maximumf %263, %265 : vector<5x8xf32>
    %267 = vector.broadcast %251 : f32 to vector<5x8xf32>
    %268 = arith.addf %266, %267 : vector<5x8xf32>
    %cst_67 = arith.constant 0.000000e+00 : f32
    %269 = vector.broadcast %cst_67 : f32 to vector<5x8xf32>
    %270 = arith.maximumf %268, %269 : vector<5x8xf32>
    %c105 = arith.constant 105 : index
    %c0_68 = arith.constant 0 : index
    %271 = vector.load %arg13[%c105, %c0_68] : memref<200x8xf32, #tpu.memory_space<vmem>>, vector<5x8xf32>
    tpu.vector_store %arg13[%c105, %c0_68], %270 {strides = array<i32>} : memref<200x8xf32, #tpu.memory_space<vmem>>, vector<5x8xf32>,
    %272 = vector.extract_strided_slice %250 {offsets = [0, 4, 0], sizes = [5, 1, 8], strides = [1, 1, 1]} : vector<5x11x8xf32> to vector<5x1x8xf32>
    %273 = vector.shape_cast %272 : vector<5x1x8xf32> to vector<5x8xf32>
    %274 = vector.extract_strided_slice %250 {offsets = [0, 5, 0], sizes = [5, 1, 8], strides = [1, 1, 1]} : vector<5x11x8xf32> to vector<5x1x8xf32>
    %275 = vector.shape_cast %274 : vector<5x1x8xf32> to vector<5x8xf32>
    %276 = arith.maximumf %273, %275 : vector<5x8xf32>
    %277 = vector.broadcast %251 : f32 to vector<5x8xf32>
    %278 = arith.addf %276, %277 : vector<5x8xf32>
    %cst_69 = arith.constant 0.000000e+00 : f32
    %279 = vector.broadcast %cst_69 : f32 to vector<5x8xf32>
    %280 = arith.maximumf %278, %279 : vector<5x8xf32>
    %c110 = arith.constant 110 : index
    %c0_70 = arith.constant 0 : index
    %281 = vector.load %arg13[%c110, %c0_70] : memref<200x8xf32, #tpu.memory_space<vmem>>, vector<5x8xf32>
    tpu.vector_store %arg13[%c110, %c0_70], %280 {strides = array<i32>} : memref<200x8xf32, #tpu.memory_space<vmem>>, vector<5x8xf32>,
    %282 = vector.extract_strided_slice %250 {offsets = [0, 6, 0], sizes = [5, 1, 8], strides = [1, 1, 1]} : vector<5x11x8xf32> to vector<5x1x8xf32>
    %283 = vector.shape_cast %282 : vector<5x1x8xf32> to vector<5x8xf32>
    %284 = vector.extract_strided_slice %250 {offsets = [0, 7, 0], sizes = [5, 1, 8], strides = [1, 1, 1]} : vector<5x11x8xf32> to vector<5x1x8xf32>
    %285 = vector.shape_cast %284 : vector<5x1x8xf32> to vector<5x8xf32>
    %286 = arith.maximumf %283, %285 : vector<5x8xf32>
    %287 = vector.broadcast %251 : f32 to vector<5x8xf32>
    %288 = arith.addf %286, %287 : vector<5x8xf32>
    %cst_71 = arith.constant 0.000000e+00 : f32
    %289 = vector.broadcast %cst_71 : f32 to vector<5x8xf32>
    %290 = arith.maximumf %288, %289 : vector<5x8xf32>
    %c115 = arith.constant 115 : index
    %c0_72 = arith.constant 0 : index
    %291 = vector.load %arg13[%c115, %c0_72] : memref<200x8xf32, #tpu.memory_space<vmem>>, vector<5x8xf32>
    tpu.vector_store %arg13[%c115, %c0_72], %290 {strides = array<i32>} : memref<200x8xf32, #tpu.memory_space<vmem>>, vector<5x8xf32>,
    %292 = vector.extract_strided_slice %250 {offsets = [0, 8, 0], sizes = [5, 1, 8], strides = [1, 1, 1]} : vector<5x11x8xf32> to vector<5x1x8xf32>
    %293 = vector.shape_cast %292 : vector<5x1x8xf32> to vector<5x8xf32>
    %294 = vector.extract_strided_slice %250 {offsets = [0, 9, 0], sizes = [5, 1, 8], strides = [1, 1, 1]} : vector<5x11x8xf32> to vector<5x1x8xf32>
    %295 = vector.shape_cast %294 : vector<5x1x8xf32> to vector<5x8xf32>
    %296 = arith.maximumf %293, %295 : vector<5x8xf32>
    %297 = vector.broadcast %251 : f32 to vector<5x8xf32>
    %298 = arith.addf %296, %297 : vector<5x8xf32>
    %cst_73 = arith.constant 0.000000e+00 : f32
    %299 = vector.broadcast %cst_73 : f32 to vector<5x8xf32>
    %300 = arith.maximumf %298, %299 : vector<5x8xf32>
    %c120 = arith.constant 120 : index
    %c0_74 = arith.constant 0 : index
    %301 = vector.load %arg13[%c120, %c0_74] : memref<200x8xf32, #tpu.memory_space<vmem>>, vector<5x8xf32>
    tpu.vector_store %arg13[%c120, %c0_74], %300 {strides = array<i32>} : memref<200x8xf32, #tpu.memory_space<vmem>>, vector<5x8xf32>,
    %c5_75 = arith.constant 5 : index
    %c0_76 = arith.constant 0 : index
    %c0_77 = arith.constant 0 : index
    %c0_78 = arith.constant 0 : index
    %302 = vector.load %arg12[%c5_75, %c0_76, %c0_77, %c0_78] : memref<8x11x11x8xf32, #tpu.memory_space<vmem>>, vector<1x11x11x8xf32>
    %303 = vector.shape_cast %302 : vector<1x11x11x8xf32> to vector<11x11x8xf32>
    %304 = vector.extract_strided_slice %303 {offsets = [0, 0, 0], sizes = [10, 11, 8], strides = [1, 1, 1]} : vector<11x11x8xf32> to vector<10x11x8xf32>
    %305 = vector.shape_cast %304 : vector<10x11x8xf32> to vector<5x2x11x8xf32>
    %306 = vector.extract_strided_slice %305 {offsets = [0, 0, 0, 0], sizes = [5, 1, 11, 8], strides = [1, 1, 1, 1]} : vector<5x2x11x8xf32> to vector<5x1x11x8xf32>
    %307 = vector.shape_cast %306 : vector<5x1x11x8xf32> to vector<5x11x8xf32>
    %308 = vector.extract_strided_slice %305 {offsets = [0, 1, 0, 0], sizes = [5, 1, 11, 8], strides = [1, 1, 1, 1]} : vector<5x2x11x8xf32> to vector<5x1x11x8xf32>
    %309 = vector.shape_cast %308 : vector<5x1x11x8xf32> to vector<5x11x8xf32>
    %310 = arith.maximumf %307, %309 : vector<5x11x8xf32>
    %c5_79 = arith.constant 5 : index
    %311 = memref.load %arg5[%c5_79] : memref<8xf32, #tpu.memory_space<smem>>
    %312 = vector.extract_strided_slice %310 {offsets = [0, 0, 0], sizes = [5, 1, 8], strides = [1, 1, 1]} : vector<5x11x8xf32> to vector<5x1x8xf32>
    %313 = vector.shape_cast %312 : vector<5x1x8xf32> to vector<5x8xf32>
    %314 = vector.extract_strided_slice %310 {offsets = [0, 1, 0], sizes = [5, 1, 8], strides = [1, 1, 1]} : vector<5x11x8xf32> to vector<5x1x8xf32>
    %315 = vector.shape_cast %314 : vector<5x1x8xf32> to vector<5x8xf32>
    %316 = arith.maximumf %313, %315 : vector<5x8xf32>
    %317 = vector.broadcast %311 : f32 to vector<5x8xf32>
    %318 = arith.addf %316, %317 : vector<5x8xf32>
    %cst_80 = arith.constant 0.000000e+00 : f32
    %319 = vector.broadcast %cst_80 : f32 to vector<5x8xf32>
    %320 = arith.maximumf %318, %319 : vector<5x8xf32>
    %c125 = arith.constant 125 : index
    %c0_81 = arith.constant 0 : index
    %321 = vector.load %arg13[%c125, %c0_81] : memref<200x8xf32, #tpu.memory_space<vmem>>, vector<5x8xf32>
    tpu.vector_store %arg13[%c125, %c0_81], %320 {strides = array<i32>} : memref<200x8xf32, #tpu.memory_space<vmem>>, vector<5x8xf32>,
    %322 = vector.extract_strided_slice %310 {offsets = [0, 2, 0], sizes = [5, 1, 8], strides = [1, 1, 1]} : vector<5x11x8xf32> to vector<5x1x8xf32>
    %323 = vector.shape_cast %322 : vector<5x1x8xf32> to vector<5x8xf32>
    %324 = vector.extract_strided_slice %310 {offsets = [0, 3, 0], sizes = [5, 1, 8], strides = [1, 1, 1]} : vector<5x11x8xf32> to vector<5x1x8xf32>
    %325 = vector.shape_cast %324 : vector<5x1x8xf32> to vector<5x8xf32>
    %326 = arith.maximumf %323, %325 : vector<5x8xf32>
    %327 = vector.broadcast %311 : f32 to vector<5x8xf32>
    %328 = arith.addf %326, %327 : vector<5x8xf32>
    %cst_82 = arith.constant 0.000000e+00 : f32
    %329 = vector.broadcast %cst_82 : f32 to vector<5x8xf32>
    %330 = arith.maximumf %328, %329 : vector<5x8xf32>
    %c130 = arith.constant 130 : index
    %c0_83 = arith.constant 0 : index
    %331 = vector.load %arg13[%c130, %c0_83] : memref<200x8xf32, #tpu.memory_space<vmem>>, vector<5x8xf32>
    tpu.vector_store %arg13[%c130, %c0_83], %330 {strides = array<i32>} : memref<200x8xf32, #tpu.memory_space<vmem>>, vector<5x8xf32>,
    %332 = vector.extract_strided_slice %310 {offsets = [0, 4, 0], sizes = [5, 1, 8], strides = [1, 1, 1]} : vector<5x11x8xf32> to vector<5x1x8xf32>
    %333 = vector.shape_cast %332 : vector<5x1x8xf32> to vector<5x8xf32>
    %334 = vector.extract_strided_slice %310 {offsets = [0, 5, 0], sizes = [5, 1, 8], strides = [1, 1, 1]} : vector<5x11x8xf32> to vector<5x1x8xf32>
    %335 = vector.shape_cast %334 : vector<5x1x8xf32> to vector<5x8xf32>
    %336 = arith.maximumf %333, %335 : vector<5x8xf32>
    %337 = vector.broadcast %311 : f32 to vector<5x8xf32>
    %338 = arith.addf %336, %337 : vector<5x8xf32>
    %cst_84 = arith.constant 0.000000e+00 : f32
    %339 = vector.broadcast %cst_84 : f32 to vector<5x8xf32>
    %340 = arith.maximumf %338, %339 : vector<5x8xf32>
    %c135 = arith.constant 135 : index
    %c0_85 = arith.constant 0 : index
    %341 = vector.load %arg13[%c135, %c0_85] : memref<200x8xf32, #tpu.memory_space<vmem>>, vector<5x8xf32>
    tpu.vector_store %arg13[%c135, %c0_85], %340 {strides = array<i32>} : memref<200x8xf32, #tpu.memory_space<vmem>>, vector<5x8xf32>,
    %342 = vector.extract_strided_slice %310 {offsets = [0, 6, 0], sizes = [5, 1, 8], strides = [1, 1, 1]} : vector<5x11x8xf32> to vector<5x1x8xf32>
    %343 = vector.shape_cast %342 : vector<5x1x8xf32> to vector<5x8xf32>
    %344 = vector.extract_strided_slice %310 {offsets = [0, 7, 0], sizes = [5, 1, 8], strides = [1, 1, 1]} : vector<5x11x8xf32> to vector<5x1x8xf32>
    %345 = vector.shape_cast %344 : vector<5x1x8xf32> to vector<5x8xf32>
    %346 = arith.maximumf %343, %345 : vector<5x8xf32>
    %347 = vector.broadcast %311 : f32 to vector<5x8xf32>
    %348 = arith.addf %346, %347 : vector<5x8xf32>
    %cst_86 = arith.constant 0.000000e+00 : f32
    %349 = vector.broadcast %cst_86 : f32 to vector<5x8xf32>
    %350 = arith.maximumf %348, %349 : vector<5x8xf32>
    %c140 = arith.constant 140 : index
    %c0_87 = arith.constant 0 : index
    %351 = vector.load %arg13[%c140, %c0_87] : memref<200x8xf32, #tpu.memory_space<vmem>>, vector<5x8xf32>
    tpu.vector_store %arg13[%c140, %c0_87], %350 {strides = array<i32>} : memref<200x8xf32, #tpu.memory_space<vmem>>, vector<5x8xf32>,
    %352 = vector.extract_strided_slice %310 {offsets = [0, 8, 0], sizes = [5, 1, 8], strides = [1, 1, 1]} : vector<5x11x8xf32> to vector<5x1x8xf32>
    %353 = vector.shape_cast %352 : vector<5x1x8xf32> to vector<5x8xf32>
    %354 = vector.extract_strided_slice %310 {offsets = [0, 9, 0], sizes = [5, 1, 8], strides = [1, 1, 1]} : vector<5x11x8xf32> to vector<5x1x8xf32>
    %355 = vector.shape_cast %354 : vector<5x1x8xf32> to vector<5x8xf32>
    %356 = arith.maximumf %353, %355 : vector<5x8xf32>
    %357 = vector.broadcast %311 : f32 to vector<5x8xf32>
    %358 = arith.addf %356, %357 : vector<5x8xf32>
    %cst_88 = arith.constant 0.000000e+00 : f32
    %359 = vector.broadcast %cst_88 : f32 to vector<5x8xf32>
    %360 = arith.maximumf %358, %359 : vector<5x8xf32>
    %c145 = arith.constant 145 : index
    %c0_89 = arith.constant 0 : index
    %361 = vector.load %arg13[%c145, %c0_89] : memref<200x8xf32, #tpu.memory_space<vmem>>, vector<5x8xf32>
    tpu.vector_store %arg13[%c145, %c0_89], %360 {strides = array<i32>} : memref<200x8xf32, #tpu.memory_space<vmem>>, vector<5x8xf32>,
    %c6 = arith.constant 6 : index
    %c0_90 = arith.constant 0 : index
    %c0_91 = arith.constant 0 : index
    %c0_92 = arith.constant 0 : index
    %362 = vector.load %arg12[%c6, %c0_90, %c0_91, %c0_92] : memref<8x11x11x8xf32, #tpu.memory_space<vmem>>, vector<1x11x11x8xf32>
    %363 = vector.shape_cast %362 : vector<1x11x11x8xf32> to vector<11x11x8xf32>
    %364 = vector.extract_strided_slice %363 {offsets = [0, 0, 0], sizes = [10, 11, 8], strides = [1, 1, 1]} : vector<11x11x8xf32> to vector<10x11x8xf32>
    %365 = vector.shape_cast %364 : vector<10x11x8xf32> to vector<5x2x11x8xf32>
    %366 = vector.extract_strided_slice %365 {offsets = [0, 0, 0, 0], sizes = [5, 1, 11, 8], strides = [1, 1, 1, 1]} : vector<5x2x11x8xf32> to vector<5x1x11x8xf32>
    %367 = vector.shape_cast %366 : vector<5x1x11x8xf32> to vector<5x11x8xf32>
    %368 = vector.extract_strided_slice %365 {offsets = [0, 1, 0, 0], sizes = [5, 1, 11, 8], strides = [1, 1, 1, 1]} : vector<5x2x11x8xf32> to vector<5x1x11x8xf32>
    %369 = vector.shape_cast %368 : vector<5x1x11x8xf32> to vector<5x11x8xf32>
    %370 = arith.maximumf %367, %369 : vector<5x11x8xf32>
    %c6_93 = arith.constant 6 : index
    %371 = memref.load %arg5[%c6_93] : memref<8xf32, #tpu.memory_space<smem>>
    %372 = vector.extract_strided_slice %370 {offsets = [0, 0, 0], sizes = [5, 1, 8], strides = [1, 1, 1]} : vector<5x11x8xf32> to vector<5x1x8xf32>
    %373 = vector.shape_cast %372 : vector<5x1x8xf32> to vector<5x8xf32>
    %374 = vector.extract_strided_slice %370 {offsets = [0, 1, 0], sizes = [5, 1, 8], strides = [1, 1, 1]} : vector<5x11x8xf32> to vector<5x1x8xf32>
    %375 = vector.shape_cast %374 : vector<5x1x8xf32> to vector<5x8xf32>
    %376 = arith.maximumf %373, %375 : vector<5x8xf32>
    %377 = vector.broadcast %371 : f32 to vector<5x8xf32>
    %378 = arith.addf %376, %377 : vector<5x8xf32>
    %cst_94 = arith.constant 0.000000e+00 : f32
    %379 = vector.broadcast %cst_94 : f32 to vector<5x8xf32>
    %380 = arith.maximumf %378, %379 : vector<5x8xf32>
    %c150 = arith.constant 150 : index
    %c0_95 = arith.constant 0 : index
    %381 = vector.load %arg13[%c150, %c0_95] : memref<200x8xf32, #tpu.memory_space<vmem>>, vector<5x8xf32>
    tpu.vector_store %arg13[%c150, %c0_95], %380 {strides = array<i32>} : memref<200x8xf32, #tpu.memory_space<vmem>>, vector<5x8xf32>,
    %382 = vector.extract_strided_slice %370 {offsets = [0, 2, 0], sizes = [5, 1, 8], strides = [1, 1, 1]} : vector<5x11x8xf32> to vector<5x1x8xf32>
    %383 = vector.shape_cast %382 : vector<5x1x8xf32> to vector<5x8xf32>
    %384 = vector.extract_strided_slice %370 {offsets = [0, 3, 0], sizes = [5, 1, 8], strides = [1, 1, 1]} : vector<5x11x8xf32> to vector<5x1x8xf32>
    %385 = vector.shape_cast %384 : vector<5x1x8xf32> to vector<5x8xf32>
    %386 = arith.maximumf %383, %385 : vector<5x8xf32>
    %387 = vector.broadcast %371 : f32 to vector<5x8xf32>
    %388 = arith.addf %386, %387 : vector<5x8xf32>
    %cst_96 = arith.constant 0.000000e+00 : f32
    %389 = vector.broadcast %cst_96 : f32 to vector<5x8xf32>
    %390 = arith.maximumf %388, %389 : vector<5x8xf32>
    %c155 = arith.constant 155 : index
    %c0_97 = arith.constant 0 : index
    %391 = vector.load %arg13[%c155, %c0_97] : memref<200x8xf32, #tpu.memory_space<vmem>>, vector<5x8xf32>
    tpu.vector_store %arg13[%c155, %c0_97], %390 {strides = array<i32>} : memref<200x8xf32, #tpu.memory_space<vmem>>, vector<5x8xf32>,
    %392 = vector.extract_strided_slice %370 {offsets = [0, 4, 0], sizes = [5, 1, 8], strides = [1, 1, 1]} : vector<5x11x8xf32> to vector<5x1x8xf32>
    %393 = vector.shape_cast %392 : vector<5x1x8xf32> to vector<5x8xf32>
    %394 = vector.extract_strided_slice %370 {offsets = [0, 5, 0], sizes = [5, 1, 8], strides = [1, 1, 1]} : vector<5x11x8xf32> to vector<5x1x8xf32>
    %395 = vector.shape_cast %394 : vector<5x1x8xf32> to vector<5x8xf32>
    %396 = arith.maximumf %393, %395 : vector<5x8xf32>
    %397 = vector.broadcast %371 : f32 to vector<5x8xf32>
    %398 = arith.addf %396, %397 : vector<5x8xf32>
    %cst_98 = arith.constant 0.000000e+00 : f32
    %399 = vector.broadcast %cst_98 : f32 to vector<5x8xf32>
    %400 = arith.maximumf %398, %399 : vector<5x8xf32>
    %c160 = arith.constant 160 : index
    %c0_99 = arith.constant 0 : index
    %401 = vector.load %arg13[%c160, %c0_99] : memref<200x8xf32, #tpu.memory_space<vmem>>, vector<5x8xf32>
    tpu.vector_store %arg13[%c160, %c0_99], %400 {strides = array<i32>} : memref<200x8xf32, #tpu.memory_space<vmem>>, vector<5x8xf32>,
    %402 = vector.extract_strided_slice %370 {offsets = [0, 6, 0], sizes = [5, 1, 8], strides = [1, 1, 1]} : vector<5x11x8xf32> to vector<5x1x8xf32>
    %403 = vector.shape_cast %402 : vector<5x1x8xf32> to vector<5x8xf32>
    %404 = vector.extract_strided_slice %370 {offsets = [0, 7, 0], sizes = [5, 1, 8], strides = [1, 1, 1]} : vector<5x11x8xf32> to vector<5x1x8xf32>
    %405 = vector.shape_cast %404 : vector<5x1x8xf32> to vector<5x8xf32>
    %406 = arith.maximumf %403, %405 : vector<5x8xf32>
    %407 = vector.broadcast %371 : f32 to vector<5x8xf32>
    %408 = arith.addf %406, %407 : vector<5x8xf32>
    %cst_100 = arith.constant 0.000000e+00 : f32
    %409 = vector.broadcast %cst_100 : f32 to vector<5x8xf32>
    %410 = arith.maximumf %408, %409 : vector<5x8xf32>
    %c165 = arith.constant 165 : index
    %c0_101 = arith.constant 0 : index
    %411 = vector.load %arg13[%c165, %c0_101] : memref<200x8xf32, #tpu.memory_space<vmem>>, vector<5x8xf32>
    tpu.vector_store %arg13[%c165, %c0_101], %410 {strides = array<i32>} : memref<200x8xf32, #tpu.memory_space<vmem>>, vector<5x8xf32>,
    %412 = vector.extract_strided_slice %370 {offsets = [0, 8, 0], sizes = [5, 1, 8], strides = [1, 1, 1]} : vector<5x11x8xf32> to vector<5x1x8xf32>
    %413 = vector.shape_cast %412 : vector<5x1x8xf32> to vector<5x8xf32>
    %414 = vector.extract_strided_slice %370 {offsets = [0, 9, 0], sizes = [5, 1, 8], strides = [1, 1, 1]} : vector<5x11x8xf32> to vector<5x1x8xf32>
    %415 = vector.shape_cast %414 : vector<5x1x8xf32> to vector<5x8xf32>
    %416 = arith.maximumf %413, %415 : vector<5x8xf32>
    %417 = vector.broadcast %371 : f32 to vector<5x8xf32>
    %418 = arith.addf %416, %417 : vector<5x8xf32>
    %cst_102 = arith.constant 0.000000e+00 : f32
    %419 = vector.broadcast %cst_102 : f32 to vector<5x8xf32>
    %420 = arith.maximumf %418, %419 : vector<5x8xf32>
    %c170 = arith.constant 170 : index
    %c0_103 = arith.constant 0 : index
    %421 = vector.load %arg13[%c170, %c0_103] : memref<200x8xf32, #tpu.memory_space<vmem>>, vector<5x8xf32>
    tpu.vector_store %arg13[%c170, %c0_103], %420 {strides = array<i32>} : memref<200x8xf32, #tpu.memory_space<vmem>>, vector<5x8xf32>,
    %c7 = arith.constant 7 : index
    %c0_104 = arith.constant 0 : index
    %c0_105 = arith.constant 0 : index
    %c0_106 = arith.constant 0 : index
    %422 = vector.load %arg12[%c7, %c0_104, %c0_105, %c0_106] : memref<8x11x11x8xf32, #tpu.memory_space<vmem>>, vector<1x11x11x8xf32>
    %423 = vector.shape_cast %422 : vector<1x11x11x8xf32> to vector<11x11x8xf32>
    %424 = vector.extract_strided_slice %423 {offsets = [0, 0, 0], sizes = [10, 11, 8], strides = [1, 1, 1]} : vector<11x11x8xf32> to vector<10x11x8xf32>
    %425 = vector.shape_cast %424 : vector<10x11x8xf32> to vector<5x2x11x8xf32>
    %426 = vector.extract_strided_slice %425 {offsets = [0, 0, 0, 0], sizes = [5, 1, 11, 8], strides = [1, 1, 1, 1]} : vector<5x2x11x8xf32> to vector<5x1x11x8xf32>
    %427 = vector.shape_cast %426 : vector<5x1x11x8xf32> to vector<5x11x8xf32>
    %428 = vector.extract_strided_slice %425 {offsets = [0, 1, 0, 0], sizes = [5, 1, 11, 8], strides = [1, 1, 1, 1]} : vector<5x2x11x8xf32> to vector<5x1x11x8xf32>
    %429 = vector.shape_cast %428 : vector<5x1x11x8xf32> to vector<5x11x8xf32>
    %430 = arith.maximumf %427, %429 : vector<5x11x8xf32>
    %c7_107 = arith.constant 7 : index
    %431 = memref.load %arg5[%c7_107] : memref<8xf32, #tpu.memory_space<smem>>
    %432 = vector.extract_strided_slice %430 {offsets = [0, 0, 0], sizes = [5, 1, 8], strides = [1, 1, 1]} : vector<5x11x8xf32> to vector<5x1x8xf32>
    %433 = vector.shape_cast %432 : vector<5x1x8xf32> to vector<5x8xf32>
    %434 = vector.extract_strided_slice %430 {offsets = [0, 1, 0], sizes = [5, 1, 8], strides = [1, 1, 1]} : vector<5x11x8xf32> to vector<5x1x8xf32>
    %435 = vector.shape_cast %434 : vector<5x1x8xf32> to vector<5x8xf32>
    %436 = arith.maximumf %433, %435 : vector<5x8xf32>
    %437 = vector.broadcast %431 : f32 to vector<5x8xf32>
    %438 = arith.addf %436, %437 : vector<5x8xf32>
    %cst_108 = arith.constant 0.000000e+00 : f32
    %439 = vector.broadcast %cst_108 : f32 to vector<5x8xf32>
    %440 = arith.maximumf %438, %439 : vector<5x8xf32>
    %c175 = arith.constant 175 : index
    %c0_109 = arith.constant 0 : index
    %441 = vector.load %arg13[%c175, %c0_109] : memref<200x8xf32, #tpu.memory_space<vmem>>, vector<5x8xf32>
    tpu.vector_store %arg13[%c175, %c0_109], %440 {strides = array<i32>} : memref<200x8xf32, #tpu.memory_space<vmem>>, vector<5x8xf32>,
    %442 = vector.extract_strided_slice %430 {offsets = [0, 2, 0], sizes = [5, 1, 8], strides = [1, 1, 1]} : vector<5x11x8xf32> to vector<5x1x8xf32>
    %443 = vector.shape_cast %442 : vector<5x1x8xf32> to vector<5x8xf32>
    %444 = vector.extract_strided_slice %430 {offsets = [0, 3, 0], sizes = [5, 1, 8], strides = [1, 1, 1]} : vector<5x11x8xf32> to vector<5x1x8xf32>
    %445 = vector.shape_cast %444 : vector<5x1x8xf32> to vector<5x8xf32>
    %446 = arith.maximumf %443, %445 : vector<5x8xf32>
    %447 = vector.broadcast %431 : f32 to vector<5x8xf32>
    %448 = arith.addf %446, %447 : vector<5x8xf32>
    %cst_110 = arith.constant 0.000000e+00 : f32
    %449 = vector.broadcast %cst_110 : f32 to vector<5x8xf32>
    %450 = arith.maximumf %448, %449 : vector<5x8xf32>
    %c180 = arith.constant 180 : index
    %c0_111 = arith.constant 0 : index
    %451 = vector.load %arg13[%c180, %c0_111] : memref<200x8xf32, #tpu.memory_space<vmem>>, vector<5x8xf32>
    tpu.vector_store %arg13[%c180, %c0_111], %450 {strides = array<i32>} : memref<200x8xf32, #tpu.memory_space<vmem>>, vector<5x8xf32>,
    %452 = vector.extract_strided_slice %430 {offsets = [0, 4, 0], sizes = [5, 1, 8], strides = [1, 1, 1]} : vector<5x11x8xf32> to vector<5x1x8xf32>
    %453 = vector.shape_cast %452 : vector<5x1x8xf32> to vector<5x8xf32>
    %454 = vector.extract_strided_slice %430 {offsets = [0, 5, 0], sizes = [5, 1, 8], strides = [1, 1, 1]} : vector<5x11x8xf32> to vector<5x1x8xf32>
    %455 = vector.shape_cast %454 : vector<5x1x8xf32> to vector<5x8xf32>
    %456 = arith.maximumf %453, %455 : vector<5x8xf32>
    %457 = vector.broadcast %431 : f32 to vector<5x8xf32>
    %458 = arith.addf %456, %457 : vector<5x8xf32>
    %cst_112 = arith.constant 0.000000e+00 : f32
    %459 = vector.broadcast %cst_112 : f32 to vector<5x8xf32>
    %460 = arith.maximumf %458, %459 : vector<5x8xf32>
    %c185 = arith.constant 185 : index
    %c0_113 = arith.constant 0 : index
    %461 = vector.load %arg13[%c185, %c0_113] : memref<200x8xf32, #tpu.memory_space<vmem>>, vector<5x8xf32>
    tpu.vector_store %arg13[%c185, %c0_113], %460 {strides = array<i32>} : memref<200x8xf32, #tpu.memory_space<vmem>>, vector<5x8xf32>,
    %462 = vector.extract_strided_slice %430 {offsets = [0, 6, 0], sizes = [5, 1, 8], strides = [1, 1, 1]} : vector<5x11x8xf32> to vector<5x1x8xf32>
    %463 = vector.shape_cast %462 : vector<5x1x8xf32> to vector<5x8xf32>
    %464 = vector.extract_strided_slice %430 {offsets = [0, 7, 0], sizes = [5, 1, 8], strides = [1, 1, 1]} : vector<5x11x8xf32> to vector<5x1x8xf32>
    %465 = vector.shape_cast %464 : vector<5x1x8xf32> to vector<5x8xf32>
    %466 = arith.maximumf %463, %465 : vector<5x8xf32>
    %467 = vector.broadcast %431 : f32 to vector<5x8xf32>
    %468 = arith.addf %466, %467 : vector<5x8xf32>
    %cst_114 = arith.constant 0.000000e+00 : f32
    %469 = vector.broadcast %cst_114 : f32 to vector<5x8xf32>
    %470 = arith.maximumf %468, %469 : vector<5x8xf32>
    %c190 = arith.constant 190 : index
    %c0_115 = arith.constant 0 : index
    %471 = vector.load %arg13[%c190, %c0_115] : memref<200x8xf32, #tpu.memory_space<vmem>>, vector<5x8xf32>
    tpu.vector_store %arg13[%c190, %c0_115], %470 {strides = array<i32>} : memref<200x8xf32, #tpu.memory_space<vmem>>, vector<5x8xf32>,
    %472 = vector.extract_strided_slice %430 {offsets = [0, 8, 0], sizes = [5, 1, 8], strides = [1, 1, 1]} : vector<5x11x8xf32> to vector<5x1x8xf32>
    %473 = vector.shape_cast %472 : vector<5x1x8xf32> to vector<5x8xf32>
    %474 = vector.extract_strided_slice %430 {offsets = [0, 9, 0], sizes = [5, 1, 8], strides = [1, 1, 1]} : vector<5x11x8xf32> to vector<5x1x8xf32>
    %475 = vector.shape_cast %474 : vector<5x1x8xf32> to vector<5x8xf32>
    %476 = arith.maximumf %473, %475 : vector<5x8xf32>
    %477 = vector.broadcast %431 : f32 to vector<5x8xf32>
    %478 = arith.addf %476, %477 : vector<5x8xf32>
    %cst_116 = arith.constant 0.000000e+00 : f32
    %479 = vector.broadcast %cst_116 : f32 to vector<5x8xf32>
    %480 = arith.maximumf %478, %479 : vector<5x8xf32>
    %c195 = arith.constant 195 : index
    %c0_117 = arith.constant 0 : index
    %481 = vector.load %arg13[%c195, %c0_117] : memref<200x8xf32, #tpu.memory_space<vmem>>, vector<5x8xf32>
    tpu.vector_store %arg13[%c195, %c0_117], %480 {strides = array<i32>} : memref<200x8xf32, #tpu.memory_space<vmem>>, vector<5x8xf32>,
    %c0_118 = arith.constant 0 : index
    %c0_119 = arith.constant 0 : index
    %482 = vector.load %arg13[%c0_118, %c0_119] : memref<200x8xf32, #tpu.memory_space<vmem>>, vector<200x8xf32>
    %c0_120 = arith.constant 0 : index
    %c0_121 = arith.constant 0 : index
    %483 = vector.load %arg6[%c0_120, %c0_121] : memref<128x200xf32, #tpu.memory_space<vmem>>, vector<128x200xf32>
    %cst_122 = arith.constant dense<0.000000e+00> : vector<128x8xf32>
    %484 = tpu.matmul %483, %482, %cst_122 {dimension_numbers = #tpu.dot_dimension_numbers<[1], [0], [0], [1], [0, 0, 1, 1], [], []>} : vector<128x200xf32>, vector<200x8xf32>, vector<128x8xf32> -> vector<128x8xf32>
    %c0_123 = arith.constant 0 : index
    %c0_124 = arith.constant 0 : index
    %485 = vector.load %arg7[%c0_123, %c0_124] : memref<128x1xf32, #tpu.memory_space<vmem>>, vector<128x1xf32>
    %486 = vector.broadcast %485 : vector<128x1xf32> to vector<128x8xf32>
    %487 = arith.addf %484, %486 : vector<128x8xf32>
    %cst_125 = arith.constant 0.000000e+00 : f32
    %488 = vector.broadcast %cst_125 : f32 to vector<128x8xf32>
    %489 = arith.maximumf %487, %488 : vector<128x8xf32>
    %c0_126 = arith.constant 0 : index
    %c0_127 = arith.constant 0 : index
    %490 = vector.load %arg8[%c0_126, %c0_127] : memref<128x128xf32, #tpu.memory_space<vmem>>, vector<128x128xf32>
    %cst_128 = arith.constant dense<0.000000e+00> : vector<128x8xf32>
    %491 = tpu.matmul %490, %489, %cst_128 {dimension_numbers = #tpu.dot_dimension_numbers<[1], [0], [0], [1], [0, 0, 1, 1], [], []>} : vector<128x128xf32>, vector<128x8xf32>, vector<128x8xf32> -> vector<128x8xf32>
    %c0_129 = arith.constant 0 : index
    %c0_130 = arith.constant 0 : index
    %492 = vector.load %arg9[%c0_129, %c0_130] : memref<128x1xf32, #tpu.memory_space<vmem>>, vector<128x1xf32>
    %493 = vector.broadcast %492 : vector<128x1xf32> to vector<128x8xf32>
    %494 = arith.addf %491, %493 : vector<128x8xf32>
    %cst_131 = arith.constant dense<0xFF800000> : vector<8xf32>
    %495 = vector.multi_reduction <maximumf>, %494, %cst_131 [0] : vector<128x8xf32> to vector<8xf32>
    %496 = vector.shape_cast %495 : vector<8xf32> to vector<1x8xf32>
    %497 = vector.broadcast %496 : vector<1x8xf32> to vector<128x8xf32>
    %498 = arith.subf %494, %497 : vector<128x8xf32>
    %499 = math.exp %498 : vector<128x8xf32>
    %cst_132 = arith.constant dense<0.000000e+00> : vector<8xf32>
    %500 = vector.multi_reduction <add>, %499, %cst_132 [0] : vector<128x8xf32> to vector<8xf32>
    %501 = vector.shape_cast %500 : vector<8xf32> to vector<1x8xf32>
    %502 = math.log %501 : vector<1x8xf32>
    %503 = vector.broadcast %502 : vector<1x8xf32> to vector<128x8xf32>
    %504 = arith.subf %498, %503 : vector<128x8xf32>
    %c0_133 = arith.constant 0 : index
    %c0_134 = arith.constant 0 : index
    %505 = vector.load %arg10[%c0_133, %c0_134] : memref<128x8xf32, #tpu.memory_space<vmem>>, vector<128x8xf32>
    tpu.vector_store %arg10[%c0_133, %c0_134], %504 {strides = array<i32>} : memref<128x8xf32, #tpu.memory_space<vmem>>, vector<128x8xf32>,
    return
  }
  func.func @transform_0(%arg0: i32) -> (i32, i32, i32) {
    %c0_i32 = arith.constant 0 : i32
    %c0_i32_0 = arith.constant 0 : i32
    %c0_i32_1 = arith.constant 0 : i32
    return %c0_i32, %c0_i32_0, %arg0 : i32, i32, i32
  }
  func.func @transform_1(%arg0: i32) -> i32 {
    %c0_i32 = arith.constant 0 : i32
    %c0_i32_0 = arith.constant 0 : i32
    return %c0_i32 : i32
  }
  func.func @transform_2(%arg0: i32) -> i32 {
    %c0_i32 = arith.constant 0 : i32
    %c0_i32_0 = arith.constant 0 : i32
    return %c0_i32 : i32
  }
  func.func @transform_3(%arg0: i32) -> i32 {
    %c0_i32 = arith.constant 0 : i32
    %c0_i32_0 = arith.constant 0 : i32
    return %c0_i32 : i32
  }
  func.func @transform_4(%arg0: i32) -> i32 {
    %c0_i32 = arith.constant 0 : i32
    %c0_i32_0 = arith.constant 0 : i32
    return %c0_i32 : i32
  }
  func.func @transform_5(%arg0: i32) -> (i32, i32) {
    %c0_i32 = arith.constant 0 : i32
    %c0_i32_0 = arith.constant 0 : i32
    %c0_i32_1 = arith.constant 0 : i32
    return %c0_i32, %c0_i32_0 : i32, i32
  }
  func.func @transform_6(%arg0: i32) -> (i32, i32) {
    %c0_i32 = arith.constant 0 : i32
    %c0_i32_0 = arith.constant 0 : i32
    %c0_i32_1 = arith.constant 0 : i32
    return %c0_i32, %c0_i32_0 : i32, i32
  }
  func.func @transform_7(%arg0: i32) -> (i32, i32) {
    %c0_i32 = arith.constant 0 : i32
    %c0_i32_0 = arith.constant 0 : i32
    %c0_i32_1 = arith.constant 0 : i32
    return %c0_i32, %c0_i32_0 : i32, i32
  }
  func.func @transform_8(%arg0: i32) -> (i32, i32) {
    %c0_i32 = arith.constant 0 : i32
    %c0_i32_0 = arith.constant 0 : i32
    %c0_i32_1 = arith.constant 0 : i32
    return %c0_i32, %c0_i32_0 : i32, i32
  }
  func.func @transform_9(%arg0: i32) -> (i32, i32) {
    %c0_i32 = arith.constant 0 : i32
    %c0_i32_0 = arith.constant 0 : i32
    return %c0_i32, %arg0 : i32, i32
  }
}

</mosaic_0001>

<bundles_post_ra>
// kernel: convnet_forward.1
= control target key start
LH: loop header
LB: loop body
LE: loop exit
PB: predicated region body
PF: predicated region fallthrough
CT: control target
= control target key end

     0   :  { %14 = vsyncpa [#allocation6], 0  ;;  %s13502_s0 = inlined_call_operand.vmem [shape: f32[28,28,8], index: 0, kind: input, shape index: {}]   ;;  %s13503_s1 = inlined_call_operand.vmem [shape: f32[72], index: 1, kind: input, shape index: {}]   ;;  %s13504_s2 = inlined_call_operand.vmem [shape: f32[8], index: 2, kind: input, shape index: {}]   ;;  %s13505_s3 = inlined_call_operand.vmem [shape: f32[576], index: 3, kind: input, shape index: {}]   ;;  %s13506_s4 = inlined_call_operand.vmem [shape: f32[8], index: 4, kind: input, shape index: {}]   ;;  %s13507_s5 = inlined_call_operand.vmem [shape: f32[128,200], index: 5, kind: input, shape index: {}]   ;;  %s13508_s6 = inlined_call_operand.vmem [shape: f32[128,1], index: 6, kind: input, shape index: {}]   ;;  %s13509_s7 = inlined_call_operand.vmem [shape: f32[128,128], index: 7, kind: input, shape index: {}]   ;;  %s13510_s8 = inlined_call_operand.vmem [shape: f32[128,1], index: 8, kind: input, shape index: {}]   ;;  %s13511_s9 = inlined_call_operand.vmem [shape: f32[128,8], index: 9, kind: output, shape index: {}]  }
   0x1   :  { %15 = vsyncpa [#allocation8], 0  ;;  %s35_s11 = sshll.u32 %s13504_s2, 4  ;;  %s36_s11 = int_to_ptr.vmem [resolvable:$true] %s35_s11 }
   0x2   :  { %16 = vsyncpa [#allocation11], 0  ;;  %s25_s14 = sshll.u32 %s13503_s1, 4  ;;  %s6560_s15 = scalar_lea.vmem %s36_s11, 16  ;;  %s26_s14 = int_to_ptr.vmem [resolvable:$true] %s25_s14 }
   0x3   :  { %p6561_p0 = scmp.ne.s32.totalorder %s36_s11, %s6560_s15  ;;  %p6565_p1 = scmp.lt.s32.totalorder %s36_s11, %s36_s11 }
   0x4   :  { %p6566_p2 = scmp.lt.s32.totalorder %s6560_s15, %s6560_s15 }
   0x6   :  { %p6567_p3 = por %p6566_p2, %p6565_p1 }
   0x8   :  { %p6568_p4 = pnand %p6567_p3, %p6561_p0 }
   0xa   :  { %6571 = shalt.err (!%p6568_p4)
}
   0xb   :  { %s7654_s16 = smov [#allocation7]   ;;  %s6572_s17 = scalar_lea.vmem %s26_s14, 16 }
   0xc   :  { %38 = dma.vmem_to_smem %s36_s11, 16, %s7654_s16, [#allocation8]  }
   0xd   :  { %p6573_p5 = scmp.ne.s32.totalorder %s26_s14, %s6572_s17  ;;  %p6577_p6 = scmp.lt.s32.totalorder %s26_s14, %s26_s14 }
   0xe   :  { %p6578_p7 = scmp.lt.s32.totalorder %s6572_s17, %s6572_s17 }
  0x10   :  { %p6579_p8 = por %p6578_p7, %p6577_p6 }
  0x12   :  { %p6580_p9 = pnand %p6579_p8, %p6573_p5 }
  0x14   :  { %6583 = shalt.err (!%p6580_p9)
}
  0x15   :  { %s7655_s2 = smov [#allocation5]   ;;  %s45_s19 = sshll.u32 %s13505_s3, 4  ;;  %s46_s19 = int_to_ptr.vmem [resolvable:$true] %s45_s19 }
  0x16   :  { %28 = dma.vmem_to_smem %s26_s14, 16, %s7655_s2, [#allocation6]  }
  0x17   :  { %s55_s22 = sshll.u32 %s13506_s4, 4  ;;  %s6584_s23 = scalar_lea.vmem %s46_s19, 80  ;;  %s56_s22 = int_to_ptr.vmem [resolvable:$true] %s55_s22 }
  0x18   :  { %p6585_p10 = scmp.ne.s32.totalorder %s46_s19, %s6584_s23  ;;  %s6588_s24 = scalar_lea.vmem %s46_s19, 128 }
  0x19   :  { %p6589_p11 = scmp.lt.s32.totalorder %s46_s19, %s46_s19  ;;  %p6590_p12 = scmp.lt.s32.totalorder %s6588_s24, %s6584_s23 }
  0x1b   :  { %p6591_p13 = por %p6590_p12, %p6589_p11 }
  0x1d   :  { %p6592_p0 = pnand %p6591_p13, %p6585_p10 }
  0x1f   :  { %6595 = shalt.err (!%p6592_p0)
}
  0x20   :  { %s7656_s25 = smov [#allocation9]   ;;  %s6596_s26 = scalar_lea.vmem %s56_s22, 16 }
  0x21   :  { %48 = dma.vmem_to_smem %s46_s19, 80, %s7656_s25, [#allocation8]  }
  0x22   :  { %p6597_p1 = scmp.ne.s32.totalorder %s56_s22, %s6596_s26  ;;  %p6601_p2 = scmp.lt.s32.totalorder %s56_s22, %s56_s22 }
  0x23   :  { %p6602_p3 = scmp.lt.s32.totalorder %s6596_s26, %s6596_s26 }
  0x25   :  { %p6603_p4 = por %p6602_p3, %p6601_p2 }
  0x27   :  { %p6604_p5 = pnand %p6603_p4, %p6597_p1 }
  0x29   :  { %6607 = shalt.err (!%p6604_p5)
}
  0x2a   :  { %s7657_s3 = smov [#allocation10]  }
  0x2b   :  { %58 = dma.vmem_to_smem %s56_s22, 16, %s7657_s3, [#allocation11]  }
  0x2c   :  { %7128 = dma.done.wait [#allocation6], 16  }
  0x2d   :  { %7129 = vsyncadd [#allocation6], 4294967280 }
  0x2e   :  { %7130 = dma.done.wait [#allocation8], 96  }
  0x2f   :  { %7131 = vsyncadd [#allocation8], 4294967200 }
  0x30   :  { %7132 = dma.done.wait [#allocation11], 16  }
  0x31   :  { %7133 = vsyncadd [#allocation11], 4294967280 }
  0x32   :  { %79 = sfence }
  0x33   :  { %s7723_s4 = smov 0  }
  0x34 LB: > { %v7728_v0 = vmov 0.0   ;;  %v7730_v1 = vmov 0.0   ;;  %v7732_v2 = vmov 0.0   ;;  %v7734_v3 = vmov 0.0   ;;  %s7936_s27 = smov 0   ;;  %s7136_s4 = sphi %s7723_s4, %s85_s4  }
  0x35   : > { %v7736_v4 = vmov 0.0   ;;  %v7738_v5 = vmov 0.0   ;;  %v7740_v6 = vmov 0.0   ;;  %v7742_v7 = vmov 0.0  }
  0x36   : > { %v7744_v8 = vmov 0.0   ;;  %v7746_v9 = vmov 0.0   ;;  %v7748_v10 = vmov 0.0   ;;  %v7750_v11 = vmov 0.0  }
  0x37   : > { %v7752_v12 = vmov 0.0   ;;  %v7754_v13 = vmov 0.0   ;;  %v7756_v14 = vmov 0.0   ;;  %v7758_v15 = vmov 0.0  }
  0x38   : > { %v7760_v16 = vmov 0.0   ;;  %v7762_v17 = vmov 0.0   ;;  %v7764_v18 = vmov 0.0   ;;  %v7766_v19 = vmov 0.0  }
  0x39   : > { %v7768_v20 = vmov 0.0   ;;  %v7770_v21 = vmov 0.0   ;;  %v7772_v22 = vmov 0.0   ;;  %v7774_v23 = vmov 0.0  }
  0x3a   : > { %v7776_v24 = vmov 0.0   ;;  %v7778_v25 = vmov 0.0   ;;  %v7780_v26 = vmov 0.0   ;;  %v7782_v27 = vmov 0.0  }
  0x3b   : > { %v7784_v28 = vmov 0.0   ;;  %v7786_v29 = vmov 0.0   ;;  %v7788_v30 = vmov 0.0   ;;  %v7790_v31 = vmov 0.0  }
  0x3c   : > { %v7792_v32 = vmov 0.0   ;;  %v7794_v33 = vmov 0.0   ;;  %v7796_v34 = vmov 0.0   ;;  %v7798_v35 = vmov 0.0  }
  0x3d   : > { %v7800_v36 = vmov 0.0   ;;  %v7802_v37 = vmov 0.0   ;;  %v7804_v38 = vmov 0.0   ;;  %v7806_v39 = vmov 0.0  }
  0x3e   : > { %v7808_v40 = vmov 0.0   ;;  %v7810_v41 = vmov 0.0   ;;  %v7812_v42 = vmov 0.0   ;;  %v7814_v43 = vmov 0.0  }
  0x3f   : > { %v7816_v44 = vmov 0.0   ;;  %v7818_v45 = vmov 0.0   ;;  %v7820_v46 = vmov 0.0   ;;  %v7822_v47 = vmov 0.0  }
  0x40   : > { %v7824_v48 = vmov 0.0   ;;  %v7826_v49 = vmov 0.0   ;;  %v7828_v50 = vmov 0.0   ;;  %v7830_v51 = vmov 0.0  }
  0x41   : > { %v7832_v52 = vmov 0.0   ;;  %v7834_v53 = vmov 0.0   ;;  %v7836_v54 = vmov 0.0   ;;  %v7838_v55 = vmov 0.0  }
  0x42   : > { %13570 = vst [vmem:[#allocation15_spill] sm:$0xff] %v7834_v53  ;;  %13571 = vst [vmem:[#allocation16_spill] sm:$0xff] %v7836_v54  ;;  %v7840_v56 = vmov 0.0   ;;  %v7842_v57 = vmov 0.0   ;;  %v7844_v58 = vmov 0.0   ;;  %v7846_v59 = vmov 0.0  }
  0x43   : > { %13572 = vst [vmem:[#allocation17_spill] sm:$0xff] %v7838_v55  ;;  %13573 = vst [vmem:[#allocation18_spill] sm:$0xff] %v7840_v56  ;;  %v7848_v60 = vmov 0.0   ;;  %v7850_v61 = vmov 0.0   ;;  %v7852_v62 = vmov 0.0   ;;  %v7854_v63 = vmov 0.0  }
  0x44   : > { %13574 = vst [vmem:[#allocation19_spill] sm:$0xff] %v7842_v57  ;;  %13575 = vst [vmem:[#allocation20_spill] sm:$0xff] %v7844_v58  ;;  %v7856_v53 = vmov 0.0   ;;  %v7858_v54 = vmov 0.0   ;;  %v7860_v55 = vmov 0.0   ;;  %v7862_v56 = vmov 0.0  }
  0x45   : > { %13576 = vst [vmem:[#allocation21_spill] sm:$0xff] %v7846_v59  ;;  %13577 = vst [vmem:[#allocation22_spill] sm:$0xff] %v7848_v60  ;;  %v7864_v57 = vmov 0.0   ;;  %v7866_v58 = vmov 0.0   ;;  %v7868_v59 = vmov 0.0   ;;  %v7870_v60 = vmov 0.0  }
  0x46   : > { %13578 = vst [vmem:[#allocation23_spill] sm:$0xff] %v7850_v61  ;;  %13579 = vst [vmem:[#allocation24_spill] sm:$0xff] %v7852_v62  ;;  %v7872_v61 = vmov 0.0   ;;  %v7874_v62 = vmov 0.0  }
  0x47   : > { %13580 = vst [vmem:[#allocation25_spill] sm:$0xff] %v7854_v63  ;;  %13581 = vst [vmem:[#allocation26_spill] sm:$0xff] %v7856_v53  ;;  %v7876_v63 = vmov 0.0   ;;  %v7878_v53 = vmov 0.0  }
  0x48   : > { %13582 = vst [vmem:[#allocation27_spill] sm:$0xff] %v7858_v54  ;;  %13583 = vst [vmem:[#allocation28_spill] sm:$0xff] %v7860_v55  ;;  %v7880_v54 = vmov 0.0   ;;  %v7882_v55 = vmov 0.0  }
  0x49   : > { %13584 = vst [vmem:[#allocation29_spill] sm:$0xff] %v7862_v56  ;;  %13585 = vst [vmem:[#allocation30_spill] sm:$0xff] %v7864_v57  ;;  %v7884_v56 = vmov 0.0   ;;  %v7886_v57 = vmov 0.0  }
  0x4a   : > { %13586 = vst [vmem:[#allocation31_spill] sm:$0xff] %v7866_v58  ;;  %13587 = vst [vmem:[#allocation32_spill] sm:$0xff] %v7868_v59  ;;  %v7888_v58 = vmov 0.0   ;;  %v7890_v59 = vmov 0.0  }
  0x4b   : > { %13588 = vst [vmem:[#allocation33_spill] sm:$0xff] %v7870_v60  ;;  %13589 = vst [vmem:[#allocation34_spill] sm:$0xff] %v7872_v61  ;;  %v7892_v60 = vmov 0.0   ;;  %v7894_v61 = vmov 0.0  }
  0x4c   : > { %13590 = vst [vmem:[#allocation35_spill] sm:$0xff] %v7874_v62  ;;  %13591 = vst [vmem:[#allocation36_spill] sm:$0xff] %v7876_v63  ;;  %v7896_v62 = vmov 0.0   ;;  %v7898_v63 = vmov 0.0  }
  0x4d   : > { %13592 = vst [vmem:[#allocation37_spill] sm:$0xff] %v7878_v53  ;;  %13593 = vst [vmem:[#allocation38_spill] sm:$0xff] %v7880_v54  ;;  %v7900_v53 = vmov 0.0   ;;  %v7902_v54 = vmov 0.0  }
  0x4e   : > { %13594 = vst [vmem:[#allocation39_spill] sm:$0xff] %v7882_v55  ;;  %13595 = vst [vmem:[#allocation40_spill] sm:$0xff] %v7884_v56  ;;  %v7904_v55 = vmov 0.0   ;;  %v7906_v56 = vmov 0.0  }
  0x4f   : > { %13596 = vst [vmem:[#allocation41_spill] sm:$0xff] %v7886_v57  ;;  %13597 = vst [vmem:[#allocation42_spill] sm:$0xff] %v7888_v58  ;;  %v7908_v57 = vmov 0.0   ;;  %v7910_v58 = vmov 0.0  }
  0x50   : > { %13598 = vst [vmem:[#allocation43_spill] sm:$0xff] %v7890_v59  ;;  %13599 = vst [vmem:[#allocation44_spill] sm:$0xff] %v7892_v60  ;;  %v7912_v59 = vmov 0.0   ;;  %v7914_v60 = vmov 0.0  }
  0x51   : > { %13600 = vst [vmem:[#allocation45_spill] sm:$0xff] %v7894_v61  ;;  %13601 = vst [vmem:[#allocation46_spill] sm:$0xff] %v7896_v62  ;;  %v7916_v61 = vmov 0.0   ;;  %v7918_v62 = vmov 0.0  }
  0x52   : > { %13602 = vst [vmem:[#allocation47_spill] sm:$0xff] %v7898_v63  ;;  %13603 = vst [vmem:[#allocation48_spill] sm:$0xff] %v7900_v53  ;;  %v7920_v63 = vmov 0.0   ;;  %v7922_v53 = vmov 0.0  }
  0x53   : > { %13604 = vst [vmem:[#allocation49_spill] sm:$0xff] %v7902_v54  ;;  %13605 = vst [vmem:[#allocation50_spill] sm:$0xff] %v7904_v55  ;;  %v7924_v54 = vmov 0.0   ;;  %v7926_v55 = vmov 0.0  }
  0x54   : > { %13606 = vst [vmem:[#allocation51_spill] sm:$0xff] %v7906_v56  ;;  %13607 = vst [vmem:[#allocation52_spill] sm:$0xff] %v7908_v57  ;;  %v7928_v56 = vmov 0.0   ;;  %v7930_v57 = vmov 0.0  }
  0x55   : > { %13608 = vst [vmem:[#allocation53_spill] sm:$0xff] %v7910_v58  ;;  %13609 = vst [vmem:[#allocation54_spill] sm:$0xff] %v7912_v59  ;;  %v7932_v58 = vmov 0.0   ;;  %v7934_v59 = vmov 0.0  }
  0x56   : > { %13610 = vst [vmem:[#allocation55_spill] sm:$0xff] %v7924_v54  ;;  %13611 = vst [vmem:[#allocation56_spill] sm:$0xff] %v7926_v55 }
  0x57   : > { %13612 = vst [vmem:[#allocation57_spill] sm:$0xff] %v7930_v57  ;;  %13613 = vst [vmem:[#allocation58_spill] sm:$0xff] %v7932_v58 }
  0x58   : > { %13614 = vst [vmem:[#allocation59_spill] sm:$0xff] %v7934_v59 }
  0x59 LB: >> { %13660 = vst [vmem:[#allocation60_spill] sm:$0xff] %v7140_v0  ;;  %13661 = vst [vmem:[#allocation61_spill] sm:$0xff] %v7144_v1  ;;  %v13713_v0 = vld [vmem:[#allocation15_spill] sm:$0xff]  ;;  %v13715_v1 = vld [vmem:[#allocation16_spill] sm:$0xff]  ;;  %s196_s28 = smul.u32 9, %s7136_s4  ;;  %s5234_s10 = sshll.u32 %s7556_s27, 5  ;;  %s7556_s27 = sphi %s7936_s27, %s14879_s27   ;;  %v7540_v56 = vphi %v7928_v56, %v14872_v56   ;;  %v7528_v53 = vphi %v7922_v53, %v14867_v53   ;;  %v7524_v63 = vphi %v7920_v63, %v14866_v63   ;;  %v7520_v62 = vphi %v7918_v62, %v14865_v62   ;;  %v7516_v61 = vphi %v7916_v61, %v14864_v61   ;;  %v7512_v60 = vphi %v7914_v60, %v14863_v60   ;;  %v7348_v52 = vphi %v7832_v52, %v14782_v52   ;;  %v7344_v51 = vphi %v7830_v51, %v14781_v51   ;;  %v7340_v50 = vphi %v7828_v50, %v14780_v50   ;;  %v7336_v49 = vphi %v7826_v49, %v14779_v49   ;;  %v7332_v48 = vphi %v7824_v48, %v14778_v48   ;;  %v7328_v47 = vphi %v7822_v47, %v14777_v47   ;;  %v7324_v46 = vphi %v7820_v46, %v14776_v46   ;;  %v7320_v45 = vphi %v7818_v45, %v14775_v45   ;;  %v7316_v44 = vphi %v7816_v44, %v14774_v44   ;;  %v7312_v43 = vphi %v7814_v43, %v14773_v43   ;;  %v7308_v42 = vphi %v7812_v42, %v14772_v42   ;;  %v7304_v41 = vphi %v7810_v41, %v14771_v41   ;;  %v7300_v40 = vphi %v7808_v40, %v14770_v40   ;;  %v7296_v39 = vphi %v7806_v39, %v14769_v39   ;;  %v7292_v38 = vphi %v7804_v38, %v14768_v38   ;;  %v7288_v37 = vphi %v7802_v37, %v14767_v37   ;;  %v7284_v36 = vphi %v7800_v36, %v14766_v36   ;;  %v7280_v35 = vphi %v7798_v35, %v14765_v35   ;;  %v7276_v34 = vphi %v7796_v34, %v14764_v34   ;;  %v7272_v33 = vphi %v7794_v33, %v14763_v33   ;;  %v7268_v32 = vphi %v7792_v32, %v14762_v32   ;;  %v7264_v31 = vphi %v7790_v31, %v14761_v31   ;;  %v7260_v30 = vphi %v7788_v30, %v14760_v30   ;;  %v7256_v29 = vphi %v7786_v29, %v14759_v29   ;;  %v7252_v28 = vphi %v7784_v28, %v14758_v28   ;;  %v7248_v27 = vphi %v7782_v27, %v14757_v27   ;;  %v7244_v26 = vphi %v7780_v26, %v14756_v26   ;;  %v7240_v25 = vphi %v7778_v25, %v14755_v25   ;;  %v7236_v24 = vphi %v7776_v24, %v14754_v24   ;;  %v7232_v23 = vphi %v7774_v23, %v14753_v23   ;;  %v7228_v22 = vphi %v7772_v22, %v10684_v22   ;;  %v7224_v21 = vphi %v7770_v21, %v14752_v21   ;;  %v7220_v20 = vphi %v7768_v20, %v10692_v20   ;;  %v7216_v19 = vphi %v7766_v19, %v14751_v19   ;;  %v7212_v18 = vphi %v7764_v18, %v10700_v18   ;;  %v7208_v17 = vphi %v7762_v17, %v10704_v17   ;;  %v7204_v16 = vphi %v7760_v16, %v10708_v16   ;;  %v7200_v15 = vphi %v7758_v15, %v14750_v15   ;;  %v7196_v14 = vphi %v7756_v14, %v14749_v14   ;;  %v7192_v13 = vphi %v7754_v13, %v10720_v13   ;;  %v7188_v12 = vphi %v7752_v12, %v10724_v12   ;;  %v7184_v11 = vphi %v7750_v11, %v10728_v11   ;;  %v7180_v10 = vphi %v7748_v10, %v10732_v10   ;;  %v7176_v9 = vphi %v7746_v9, %v10736_v9   ;;  %v7172_v8 = vphi %v7744_v8, %v14748_v8   ;;  %v7168_v7 = vphi %v7742_v7, %v10744_v7   ;;  %v7164_v6 = vphi %v7740_v6, %v10748_v6   ;;  %v7160_v5 = vphi %v7738_v5, %v14747_v5   ;;  %v7156_v4 = vphi %v7736_v4, %v14746_v4   ;;  %v7152_v3 = vphi %v7734_v3, %v14744_v3   ;;  %v7148_v2 = vphi %v7732_v2, %v14742_v2   ;;  %v7144_v1 = vphi %v7730_v1, %v14740_v1   ;;  %v7140_v0 = vphi %v7728_v0, %v14738_v0  }
  0x5a   : >> { %13662 = vst [vmem:[#allocation62_spill] sm:$0xff] %v7148_v2  ;;  %13663 = vst [vmem:[#allocation63_spill] sm:$0xff] %v7152_v3  ;;  %v13717_v2 = vld [vmem:[#allocation17_spill] sm:$0xff]  ;;  %v13719_v3 = vld [vmem:[#allocation18_spill] sm:$0xff]  ;;  %s197_s29 = smul.u32 3, %s7556_s27  ;;  %s8262_s14 = scalar_lea.vmem %s13502_s0, %s5234_s10 }
  0x5b   : >> { %13664 = vst [vmem:[#allocation64_spill] sm:$0xff] %v7156_v4  ;;  %13665 = vst [vmem:[#allocation65_spill] sm:$0xff] %v7160_v5  ;;  %v13721_v4 = vld [vmem:[#allocation19_spill] sm:$0xff]  ;;  %v13723_v5 = vld [vmem:[#allocation20_spill] sm:$0xff]  ;;  %s91_s1 = sadd.s32 1, %s7556_s27  }
  0x5c   : >> { %13666 = vst [vmem:[#allocation66_spill] sm:$0xff] %v7164_v6  ;;  %13667 = vst [vmem:[#allocation67_spill] sm:$0xff] %v7168_v7  ;;  %v13725_v6 = vld [vmem:[#allocation21_spill] sm:$0xff]  ;;  %v13727_v7 = vld [vmem:[#allocation22_spill] sm:$0xff]  ;;  %s8255_s30 = sadd.s32 %s197_s29, %s196_s28  ;;  %p10777_p6 = scmp.ge.s32.totalorder %s91_s1, 3  }
  0x5d   : >> { %13668 = vst [vmem:[#allocation68_spill] sm:$0xff] %v7172_v8  ;;  %13669 = vst [vmem:[#allocation69_spill] sm:$0xff] %v7176_v9  ;;  %v13729_v8 = vld [vmem:[#allocation23_spill] sm:$0xff]  ;;  %v13731_v9 = vld [vmem:[#allocation24_spill] sm:$0xff]  ;;  %s199_s11 = sld [smem:[#allocation5 + %s8255_s30]]  ;;  %s515_s15 = sadd.s32 1, %s8255_s30 }
  0x5e   : >> { %13670 = vst [vmem:[#allocation70_spill] sm:$0xff] %v7180_v10  ;;  %13671 = vst [vmem:[#allocation71_spill] sm:$0xff] %v7184_v11  ;;  %v13733_v10 = vld [vmem:[#allocation25_spill] sm:$0xff]  ;;  %v13735_v11 = vld [vmem:[#allocation26_spill] sm:$0xff]  ;;  %s8963_s16 = sld [smem:[#allocation5 + %s515_s15]]  ;;  %s830_s17 = sadd.s32 2, %s8255_s30 }
  0x5f   : >> { %13672 = vst [vmem:[#allocation72_spill] sm:$0xff] %v7188_v12  ;;  %13673 = vst [vmem:[#allocation73_spill] sm:$0xff] %v7192_v13  ;;  %v13737_v12 = vld [vmem:[#allocation27_spill] sm:$0xff]  ;;  %v13739_v13 = vld [vmem:[#allocation28_spill] sm:$0xff]  ;;  %s9813_s2 = sld [smem:[#allocation5 + %s830_s17]]  ;;  %s14879_s27 = smov %s91_s1  ;;  %vm1292_vm0 = vcmask (%p10777_p6), 1041409  }
  0x60   : >> { %13674 = vst [vmem:[#allocation74_spill] sm:$0xff] %v7196_v14  ;;  %13675 = vst [vmem:[#allocation75_spill] sm:$0xff] %v7200_v15  ;;  %v13741_v14 = vld [vmem:[#allocation29_spill] sm:$0xff]  ;;  %v13743_v15 = vld [vmem:[#allocation30_spill] sm:$0xff]  ;;  %s1197_s19 = sld [smem:[#allocation7 + %s7136_s4]] (%p10777_p6)  ;;  %vm1295_vm1 = vcmask (%p10777_p6), 1042434  }
  0x61   : >> { %13676 = vst [vmem:[#allocation76_spill] sm:$0xff] %v7204_v16  ;;  %13677 = vst [vmem:[#allocation77_spill] sm:$0xff] %v7208_v17  ;;  %v13745_v16 = vld [vmem:[#allocation31_spill] sm:$0xff]  ;;  %v13747_v17 = vld [vmem:[#allocation32_spill] sm:$0xff]  ;;  %vm1298_vm2 = vcmask (%p10777_p6), 1043459   ;;  %vm1301_vm3 = vcmask (%p10777_p6), 1044484  }
  0x62   : >> { %13678 = vst [vmem:[#allocation78_spill] sm:$0xff] %v7212_v18  ;;  %13679 = vst [vmem:[#allocation79_spill] sm:$0xff] %v7216_v19  ;;  %v13749_v18 = vld [vmem:[#allocation33_spill] sm:$0xff]  ;;  %v13751_v19 = vld [vmem:[#allocation34_spill] sm:$0xff]  ;;  %vm1304_vm4 = vcmask (%p10777_p6), 1045509   ;;  %vm1307_vm5 = vcmask (%p10777_p6), 1046534  }
  0x63   : >> { %13680 = vst [vmem:[#allocation80_spill] sm:$0xff] %v7220_v20  ;;  %13681 = vst [vmem:[#allocation81_spill] sm:$0xff] %v7224_v21  ;;  %v13753_v20 = vld [vmem:[#allocation35_spill] sm:$0xff]  ;;  %v13755_v21 = vld [vmem:[#allocation36_spill] sm:$0xff]  ;;  %s5235_s20 = smul.u32 (%p10777_p6), 208, %s7136_s4  ;;  %vm1310_vm6 = vcmask (%p10777_p6), 1047559  }
  0x64   : >> { %13682 = vst [vmem:[#allocation82_spill] sm:$0xff] %v7228_v22  ;;  %13683 = vst [vmem:[#allocation83_spill] sm:$0xff] %v7232_v23  ;;  %v13757_v22 = vld [vmem:[#allocation37_spill] sm:$0xff]  ;;  %v13759_v23 = vld [vmem:[#allocation38_spill] sm:$0xff]  ;;  %vm1324_vm7 = vcmask (%p10777_p6), 64512   ;;  %vm1326_vm8 = vcmask (%p10777_p6), 61440  }
  0x65   : >> { %13684 = vst [vmem:[#allocation84_spill] sm:$0xff] %v7236_v24  ;;  %13685 = vst [vmem:[#allocation85_spill] sm:$0xff] %v7240_v25  ;;  %v13761_v24 = vld [vmem:[#allocation39_spill] sm:$0xff]  ;;  %v13763_v25 = vld [vmem:[#allocation40_spill] sm:$0xff]  ;;  %s11171_s21 = scalar_lea.vmem (%p10777_p6), [#allocation2], %s5235_s20  ;;  %vm1344_vm9 = vcmask (%p10777_p6), 64514  }
  0x66   : >> { %13686 = vst [vmem:[#allocation86_spill] sm:$0xff] %v7244_v26  ;;  %13687 = vst [vmem:[#allocation87_spill] sm:$0xff] %v7248_v27  ;;  %v13765_v26 = vld [vmem:[#allocation41_spill] sm:$0xff]  ;;  %v13767_v27 = vld [vmem:[#allocation42_spill] sm:$0xff]  ;;  %vm1346_vm10 = vcmask (%p10777_p6), 63488   ;;  %vm1364_vm11 = vcmask (%p10777_p6), 64516  }
  0x67   : >> { %13688 = vst [vmem:[#allocation88_spill] sm:$0xff] %v7252_v28  ;;  %13689 = vst [vmem:[#allocation89_spill] sm:$0xff] %v7256_v29  ;;  %v13769_v28 = vld [vmem:[#allocation43_spill] sm:$0xff]  ;;  %v13771_v29 = vld [vmem:[#allocation44_spill] sm:$0xff]  ;;  %vm1367_vm12 = vcmask (%p10777_p6), 57344   ;;  %vm1385_vm13 = vcmask (%p10777_p6), 64518  }
  0x68   : >> { %13690 = vst [vmem:[#allocation90_spill] sm:$0xff] %v7260_v30  ;;  %13691 = vst [vmem:[#allocation91_spill] sm:$0xff] %v7264_v31  ;;  %v13773_v30 = vld [vmem:[#allocation45_spill] sm:$0xff]  ;;  %v13775_v31 = vld [vmem:[#allocation46_spill] sm:$0xff]  ;;  %vm1388_vm14 = vcmask (%p10777_p6), 59392   ;;  %s85_s4 = sadd.s32 (%p10777_p6), 1, %s7136_s4  }
  0x69   : >> { %13692 = vst [vmem:[#allocation92_spill] sm:$0xff] %v7268_v32  ;;  %13693 = vst [vmem:[#allocation93_spill] sm:$0xff] %v7272_v33  ;;  %v13777_v32 = vld [vmem:[#allocation47_spill] sm:$0xff]  ;;  %v13779_v33 = vld [vmem:[#allocation48_spill] sm:$0xff]  ;;  %p82_p7 = scmp.ge.s32.totalorder (%p10777_p6), %s85_s4, 8  }
  0x6a   : >> { %13694 = vst [vmem:[#allocation94_spill] sm:$0xff] %v7276_v34  ;;  %13695 = vst [vmem:[#allocation95_spill] sm:$0xff] %v7280_v35  ;;  %v13781_v34 = vld [vmem:[#allocation49_spill] sm:$0xff]  ;;  %v13783_v35 = vld [vmem:[#allocation50_spill] sm:$0xff] }
  0x6b   : >> { %13696 = vst [vmem:[#allocation96_spill] sm:$0xff] %v7284_v36  ;;  %13697 = vst [vmem:[#allocation97_spill] sm:$0xff] %v7288_v37  ;;  %v13785_v36 = vld [vmem:[#allocation51_spill] sm:$0xff]  ;;  %v13786_v37 = vld [vmem:[#allocation52_spill] sm:$0xff] }
  0x6c   : >> { %13698 = vst [vmem:[#allocation98_spill] sm:$0xff] %v7292_v38  ;;  %13699 = vst [vmem:[#allocation99_spill] sm:$0xff] %v7296_v39  ;;  %v13787_v38 = vld [vmem:[#allocation53_spill] sm:$0xff]  ;;  %v13788_v39 = vld [vmem:[#allocation54_spill] sm:$0xff] }
  0x6d   : >> { %13700 = vst [vmem:[#allocation100_spill] sm:$0xff] %v7300_v40  ;;  %13701 = vst [vmem:[#allocation101_spill] sm:$0xff] %v7304_v41  ;;  %v13789_v54 = vld [vmem:[#allocation55_spill] sm:$0xff]  ;;  %v13790_v55 = vld [vmem:[#allocation56_spill] sm:$0xff] }
  0x6e   : >> { %13702 = vst [vmem:[#allocation102_spill] sm:$0xff] %v7308_v42  ;;  %13703 = vst [vmem:[#allocation103_spill] sm:$0xff] %v7312_v43  ;;  %v13791_v57 = vld [vmem:[#allocation57_spill] sm:$0xff]  ;;  %v13792_v58 = vld [vmem:[#allocation58_spill] sm:$0xff] }
  0x6f   : >> { %13704 = vst [vmem:[#allocation104_spill] sm:$0xff] %v7316_v44  ;;  %13705 = vst [vmem:[#allocation105_spill] sm:$0xff] %v7320_v45  ;;  %v13793_v59 = vld [vmem:[#allocation59_spill] sm:$0xff]  ;;  %v202_v40 = vld [vmem:[%s8262_s14] sm:$0xff] }
  0x70   : >> { %13706 = vst [vmem:[#allocation106_spill] sm:$0xff] %v7324_v46  ;;  %13707 = vst [vmem:[#allocation107_spill] sm:$0xff] %v7328_v47  ;;  %v203_v41 = vld [vmem:[%s8262_s14 + $0x8] sm:$0xff]  ;;  %v204_v42 = vld [vmem:[%s8262_s14 + $0x10] sm:$0xff] }
  0x71   : >> { %13708 = vst [vmem:[#allocation108_spill] sm:$0xff] %v7332_v48  ;;  %13709 = vst [vmem:[#allocation109_spill] sm:$0xff] %v7336_v49  ;;  %v205_v43 = vld [vmem:[%s8262_s14 + $0x18] sm:$0x3]  ;;  %v206_v44 = vld [vmem:[%s8262_s14 + $0x20] sm:$0xff] }
  0x72   : >> { %13710 = vst [vmem:[#allocation110_spill] sm:$0xff] %v7340_v50  ;;  %13711 = vst [vmem:[#allocation111_spill] sm:$0xff] %v7344_v51  ;;  %v207_v45 = vld [vmem:[%s8262_s14 + $0x28] sm:$0xff]  ;;  %v208_v46 = vld [vmem:[%s8262_s14 + $0x30] sm:$0xff] }
  0x73   : >> { %13712 = vst [vmem:[#allocation112_spill] sm:$0xff] %v7348_v52  ;;  %13714 = vst [vmem:[#allocation15_spill] sm:$0xff] %v13713_v0  ;;  %v209_v47 = vld [vmem:[%s8262_s14 + $0x38] sm:$0x3]  ;;  %v210_v48 = vld [vmem:[%s8262_s14 + $0x40] sm:$0xff] }
  0x74   : >> { %13716 = vst [vmem:[#allocation16_spill] sm:$0xff] %v13715_v1  ;;  %13718 = vst [vmem:[#allocation17_spill] sm:$0xff] %v13717_v2  ;;  %v211_v49 = vld [vmem:[%s8262_s14 + $0x48] sm:$0xff]  ;;  %v212_v50 = vld [vmem:[%s8262_s14 + $0x50] sm:$0xff]  ;;  %v8278_v1 = vstv %s199_s11 }
  0x75   : >> { %13720 = vst [vmem:[#allocation18_spill] sm:$0xff] %v13719_v3  ;;  %13722 = vst [vmem:[#allocation19_spill] sm:$0xff] %v13721_v4  ;;  %v213_v51 = vld [vmem:[%s8262_s14 + $0x58] sm:$0x3]  ;;  %v214_v52 = vld [vmem:[%s8262_s14 + $0x60] sm:$0xff] }
  0x76   : >> { %13724 = vst [vmem:[#allocation20_spill] sm:$0xff] %v13723_v5  ;;  %13726 = vst [vmem:[#allocation21_spill] sm:$0xff] %v13725_v6  ;;  %v215_v0 = vld [vmem:[%s8262_s14 + $0x68] sm:$0xff]  ;;  %v216_v2 = vld [vmem:[%s8262_s14 + $0x70] sm:$0xff] }
  0x77   : >> { %13728 = vst [vmem:[#allocation22_spill] sm:$0xff] %v13727_v7  ;;  %13730 = vst [vmem:[#allocation23_spill] sm:$0xff] %v13729_v8  ;;  %v217_v3 = vld [vmem:[%s8262_s14 + $0x78] sm:$0x3]  ;;  %v218_v4 = vld [vmem:[%s8262_s14 + $0x80] sm:$0xff] }
  0x78   : >> { %13732 = vst [vmem:[#allocation24_spill] sm:$0xff] %v13731_v9  ;;  %13734 = vst [vmem:[#allocation25_spill] sm:$0xff] %v13733_v10  ;;  %v219_v5 = vld [vmem:[%s8262_s14 + $0x88] sm:$0xff]  ;;  %v220_v6 = vld [vmem:[%s8262_s14 + $0x90] sm:$0xff]  ;;  %v8289_v10 = vmul.f32 %v8278_v1, %v202_v40  ;;  %v8305_v40 = vmul.f32 %v8278_v1, %v206_v44  ;;  %v8321_v44 = vmul.f32 %v8278_v1, %v210_v48 }
  0x79   : >> { %13736 = vst [vmem:[#allocation26_spill] sm:$0xff] %v13735_v11  ;;  %13738 = vst [vmem:[#allocation27_spill] sm:$0xff] %v13737_v12  ;;  %v221_v7 = vld [vmem:[%s8262_s14 + $0x98] sm:$0x3]  ;;  %v222_v8 = vld [vmem:[%s8262_s14 + $0xa0] sm:$0xff]  ;;  %v8292_v11 = vmul.f32 %v8278_v1, %v203_v41  ;;  %v8308_v41 = vmul.f32 %v8278_v1, %v207_v45  ;;  %v8324_v45 = vmul.f32 %v8278_v1, %v211_v49 }
  0x7a   : >> { %13740 = vst [vmem:[#allocation28_spill] sm:$0xff] %v13739_v13  ;;  %13742 = vst [vmem:[#allocation29_spill] sm:$0xff] %v13741_v14  ;;  %v223_v9 = vld [vmem:[%s8262_s14 + $0xa8] sm:$0xff]  ;;  %v224_v12 = vld [vmem:[%s8262_s14 + $0xb0] sm:$0xff]  ;;  %v8337_v48 = vmul.f32 %v8278_v1, %v214_v52  ;;  %v8340_v49 = vmul.f32 %v8278_v1, %v215_v0  ;;  %v8353_v52 = vmul.f32 %v8278_v1, %v218_v4 }
  0x7b   : >> { %13744 = vst [vmem:[#allocation30_spill] sm:$0xff] %v13743_v15  ;;  %13746 = vst [vmem:[#allocation31_spill] sm:$0xff] %v13745_v16  ;;  %v225_v13 = vld [vmem:[%s8262_s14 + $0xb8] sm:$0x3]  ;;  %v226_v14 = vld [vmem:[%s8262_s14 + $0xc0] sm:$0xff]  ;;  %v8299_v16 = vmul.f32 %v8278_v1, %v204_v42  ;;  %v8315_v42 = vmul.f32 %v8278_v1, %v208_v46  ;;  %v8331_v46 = vmul.f32 %v8278_v1, %v212_v50 }
  0x7c   : >> { %13748 = vst [vmem:[#allocation32_spill] sm:$0xff] %v13747_v17  ;;  %13750 = vst [vmem:[#allocation33_spill] sm:$0xff] %v13749_v18  ;;  %v227_v15 = vld [vmem:[%s8262_s14 + $0xc8] sm:$0xff]  ;;  %v8302_v17 = vmul.f32 %v8278_v1, %v205_v43  ;;  %v228_v18 = vld [vmem:[%s8262_s14 + $0xd0] sm:$0xff]  ;;  %v8318_v43 = vmul.f32 %v8278_v1, %v209_v47  ;;  %v8334_v47 = vmul.f32 %v8278_v1, %v213_v51 }
  0x7d   : >> { %13752 = vst [vmem:[#allocation34_spill] sm:$0xff] %v13751_v19  ;;  %13754 = vst [vmem:[#allocation35_spill] sm:$0xff] %v13753_v20  ;;  %v229_v19 = vld [vmem:[%s8262_s14 + $0xd8] sm:$0x3]  ;;  %v230_v20 = vld [vmem:[%s8262_s14 + $0xe0] sm:$0xff]  ;;  %v8347_v50 = vmul.f32 %v8278_v1, %v216_v2  ;;  %v8350_v51 = vmul.f32 %v8278_v1, %v217_v3  ;;  %v8356_v0 = vmul.f32 %v8278_v1, %v219_v5 }
  0x7e   : >> { %13756 = vst [vmem:[#allocation36_spill] sm:$0xff] %v13755_v21  ;;  %13758 = vst [vmem:[#allocation37_spill] sm:$0xff] %v13757_v22  ;;  %v231_v21 = vld [vmem:[%s8262_s14 + $0xe8] sm:$0xff]  ;;  %v232_v22 = vld [vmem:[%s8262_s14 + $0xf0] sm:$0xff]  ;;  %v8363_v2 = vmul.f32 %v8278_v1, %v220_v6  ;;  %v8366_v3 = vmul.f32 %v8278_v1, %v221_v7  ;;  %v8369_v4 = vmul.f32 %v8278_v1, %v222_v8 }
  0x7f   : >> { %13760 = vst [vmem:[#allocation38_spill] sm:$0xff] %v13759_v23  ;;  %13762 = vst [vmem:[#allocation39_spill] sm:$0xff] %v13761_v24  ;;  %v233_v23 = vld [vmem:[%s8262_s14 + $0xf8] sm:$0x3]  ;;  %v234_v24 = vld [vmem:[%s8262_s14 + $0x100] sm:$0xff]  ;;  %v8372_v5 = vmul.f32 %v8278_v1, %v223_v9  ;;  %v8379_v6 = vmul.f32 %v8278_v1, %v224_v12  ;;  %v8382_v7 = vmul.f32 %v8278_v1, %v225_v13 }
  0x80   : >> { %13764 = vst [vmem:[#allocation40_spill] sm:$0xff] %v13763_v25  ;;  %13766 = vst [vmem:[#allocation41_spill] sm:$0xff] %v13765_v26  ;;  %v235_v25 = vld [vmem:[%s8262_s14 + $0x108] sm:$0xff]  ;;  %v236_v26 = vld [vmem:[%s8262_s14 + $0x110] sm:$0xff]  ;;  %v8385_v8 = vmul.f32 %v8278_v1, %v226_v14  ;;  %v8388_v9 = vmul.f32 %v8278_v1, %v227_v15  ;;  %v8395_v12 = vmul.f32 %v8278_v1, %v228_v18 }
  0x81   : >> { %13768 = vst [vmem:[#allocation42_spill] sm:$0xff] %v13767_v27  ;;  %13770 = vst [vmem:[#allocation43_spill] sm:$0xff] %v13769_v28  ;;  %v237_v27 = vld [vmem:[%s8262_s14 + $0x118] sm:$0x3]  ;;  %v238_v28 = vld [vmem:[%s8262_s14 + $0x120] sm:$0xff]  ;;  %v8398_v13 = vmul.f32 %v8278_v1, %v229_v19  ;;  %v8401_v14 = vmul.f32 %v8278_v1, %v230_v20  ;;  %v8404_v15 = vmul.f32 %v8278_v1, %v231_v21 }
  0x82   : >> { %13772 = vst [vmem:[#allocation44_spill] sm:$0xff] %v13771_v29  ;;  %13774 = vst [vmem:[#allocation45_spill] sm:$0xff] %v13773_v30  ;;  %v239_v29 = vld [vmem:[%s8262_s14 + $0x128] sm:$0xff]  ;;  %v240_v30 = vld [vmem:[%s8262_s14 + $0x130] sm:$0xff]  ;;  %v8411_v18 = vmul.f32 %v8278_v1, %v232_v22  ;;  %v8414_v19 = vmul.f32 %v8278_v1, %v233_v23  ;;  %v8417_v20 = vmul.f32 %v8278_v1, %v234_v24 }
  0x83   : >> { %13776 = vst [vmem:[#allocation46_spill] sm:$0xff] %v13775_v31  ;;  %13778 = vst [vmem:[#allocation47_spill] sm:$0xff] %v13777_v32  ;;  %v241_v31 = vld [vmem:[%s8262_s14 + $0x138] sm:$0x3]  ;;  %v242_v32 = vld [vmem:[%s8262_s14 + $0x140] sm:$0xff]  ;;  %v8420_v21 = vmul.f32 %v8278_v1, %v235_v25  ;;  %v8427_v22 = vmul.f32 %v8278_v1, %v236_v26  ;;  %v8430_v23 = vmul.f32 %v8278_v1, %v237_v27 }
  0x84   : >> { %13780 = vst [vmem:[#allocation48_spill] sm:$0xff] %v13779_v33  ;;  %13782 = vst [vmem:[#allocation49_spill] sm:$0xff] %v13781_v34  ;;  %v243_v33 = vld [vmem:[%s8262_s14 + $0x148] sm:$0xff]  ;;  %v245_v34 = vld [vmem:[%s8262_s14 + $0x158] sm:$0x3]  ;;  %v8433_v24 = vmul.f32 %v8278_v1, %v238_v28  ;;  %v8436_v25 = vmul.f32 %v8278_v1, %v239_v29  ;;  %v8443_v26 = vmul.f32 %v8278_v1, %v240_v30 }
  0x85   : >> { %13784 = vst [vmem:[#allocation50_spill] sm:$0xff] %v13783_v35  ;;  %13794 = vst [vmem:[#allocation53_spill] sm:$0xff] %v8350_v51  ;;  %v247_v35 = vld [vmem:[%s8262_s14 + $0x168] sm:$0xff]  ;;  %v8446_v27 = vmul.f32 %v8278_v1, %v241_v31  ;;  %v8449_v28 = vmul.f32 %v8278_v1, %v242_v32  ;;  %v8452_v29 = vmul.f32 %v8278_v1, %v243_v33 }
  0x86   : >> { %13795 = vst [vmem:[#allocation54_spill] sm:$0xff] %v8353_v52  ;;  %13796 = vst [vmem:[#allocation55_spill] sm:$0xff] %v8356_v0  ;;  %v244_v0 = vld [vmem:[%s8262_s14 + $0x150] sm:$0xff]  ;;  %v246_v52 = vld [vmem:[%s8262_s14 + $0x160] sm:$0xff]  ;;  %v8462_v31 = vmul.f32 %v8278_v1, %v245_v34  ;;  %v8468_v33 = vmul.f32 %v8278_v1, %v247_v35 }
  0x87   : >> { %13797 = vst [vmem:[#allocation56_spill] sm:$0xff] %v8363_v2  ;;  %13798 = vst [vmem:[#allocation57_spill] sm:$0xff] %v8366_v3  ;;  %v250_v3 = vld [vmem:[%s8262_s14 + $0x180] sm:$0xff]  ;;  %v251_v2 = vld [vmem:[%s8262_s14 + $0x188] sm:$0xff]  ;;  %v8459_v30 = vmul.f32 %v8278_v1, %v244_v0  ;;  %v8465_v32 = vmul.f32 %v8278_v1, %v246_v52 }
  0x88   : >> { %13799 = vst [vmem:[#allocation58_spill] sm:$0xff] %v8369_v4  ;;  %13800 = vst [vmem:[#allocation59_spill] sm:$0xff] %v8372_v5  ;;  %v248_v5 = vld [vmem:[%s8262_s14 + $0x170] sm:$0xff]  ;;  %v249_v4 = vld [vmem:[%s8262_s14 + $0x178] sm:$0x3]  ;;  %v8481_v52 = vmul.f32 %v8278_v1, %v250_v3  ;;  %v8484_v35 = vmul.f32 %v8278_v1, %v251_v2 }
  0x89   : >> { %13801 = vst [vmem:[#allocation51_spill] sm:$0xff] %v8379_v6  ;;  %13802 = vst [vmem:[#allocation52_spill] sm:$0xff] %v8382_v7  ;;  %v254_v7 = vld [vmem:[%s8262_s14 + $0x1a0] sm:$0xff]  ;;  %v255_v6 = vld [vmem:[%s8262_s14 + $0x1a8] sm:$0xff]  ;;  %v8475_v0 = vmul.f32 %v8278_v1, %v248_v5  ;;  %v8478_v34 = vmul.f32 %v8278_v1, %v249_v4 }
  0x8a   : >> { %13803 = vst [vmem:[#allocation113_spill] sm:$0xff] %v8385_v8  ;;  %13804 = vst [vmem:[#allocation114_spill] sm:$0xff] %v8388_v9  ;;  %v252_v9 = vld [vmem:[%s8262_s14 + $0x190] sm:$0xff]  ;;  %v253_v8 = vld [vmem:[%s8262_s14 + $0x198] sm:$0x3]  ;;  %v8497_v4 = vmul.f32 %v8278_v1, %v254_v7  ;;  %v8500_v3 = vmul.f32 %v8278_v1, %v255_v6 }
  0x8b   : >> { %13805 = vst [vmem:[#allocation115_spill] sm:$0xff] %v8395_v12  ;;  %13806 = vst [vmem:[#allocation116_spill] sm:$0xff] %v8398_v13  ;;  %v258_v13 = vld [vmem:[%s8262_s14 + $0x1c0] sm:$0xff]  ;;  %v259_v12 = vld [vmem:[%s8262_s14 + $0x1c8] sm:$0xff]  ;;  %v8491_v51 = vmul.f32 %v8278_v1, %v252_v9  ;;  %v8494_v5 = vmul.f32 %v8278_v1, %v253_v8 }
  0x8c   : >> { %13807 = vst [vmem:[#allocation117_spill] sm:$0xff] %v8401_v14  ;;  %13808 = vst [vmem:[#allocation118_spill] sm:$0xff] %v8404_v15  ;;  %v256_v15 = vld [vmem:[%s8262_s14 + $0x1b0] sm:$0xff]  ;;  %v257_v14 = vld [vmem:[%s8262_s14 + $0x1b8] sm:$0x3]  ;;  %v8513_v8 = vmul.f32 %v8278_v1, %v258_v13  ;;  %v8516_v6 = vmul.f32 %v8278_v1, %v259_v12 }
  0x8d   : >> { %13809 = vst [vmem:[#allocation119_spill] sm:$0xff] %v8411_v18  ;;  %13810 = vst [vmem:[#allocation120_spill] sm:$0xff] %v8414_v19  ;;  %v262_v19 = vld [vmem:[%s8262_s14 + $0x1e0] sm:$0xff]  ;;  %v263_v18 = vld [vmem:[%s8262_s14 + $0x1e8] sm:$0xff]  ;;  %v8510_v9 = vmul.f32 %v8278_v1, %v257_v14 }
  0x8e   : >> { %13811 = vst [vmem:[#allocation121_spill] sm:$0xff] %v8417_v20  ;;  %13812 = vst [vmem:[#allocation122_spill] sm:$0xff] %v8420_v21  ;;  %v260_v21 = vld [vmem:[%s8262_s14 + $0x1d0] sm:$0xff]  ;;  %v261_v20 = vld [vmem:[%s8262_s14 + $0x1d8] sm:$0x3]  ;;  %v8528_v14 = vmul.f32 %v8278_v1, %v262_v19  ;;  %v8531_v13 = vmul.f32 %v8278_v1, %v263_v18 }
  0x8f   : >> { %13813 = vst [vmem:[#allocation123_spill] sm:$0xff] %v8427_v22  ;;  %13814 = vst [vmem:[#allocation124_spill] sm:$0xff] %v8430_v23  ;;  %v266_v23 = vld [vmem:[%s8262_s14 + $0x200] sm:$0xff]  ;;  %v267_v22 = vld [vmem:[%s8262_s14 + $0x208] sm:$0xff] }
  0x90   : >> { %13815 = vst [vmem:[#allocation125_spill] sm:$0xff] %v8433_v24  ;;  %13816 = vst [vmem:[#allocation126_spill] sm:$0xff] %v8436_v25  ;;  %v264_v25 = vld [vmem:[%s8262_s14 + $0x1f0] sm:$0xff]  ;;  %v265_v24 = vld [vmem:[%s8262_s14 + $0x1f8] sm:$0x3]  ;;  %v8546_v19 = vmul.f32 %v8278_v1, %v267_v22 }
  0x91   : >> { %13817 = vst [vmem:[#allocation127_spill] sm:$0xff] %v8443_v26  ;;  %13818 = vst [vmem:[#allocation128_spill] sm:$0xff] %v8446_v27  ;;  %v270_v27 = vld [vmem:[%s8262_s14 + $0x220] sm:$0xff]  ;;  %v271_v26 = vld [vmem:[%s8262_s14 + $0x228] sm:$0xff] }
  0x92   : >> { %13819 = vst [vmem:[#allocation129_spill] sm:$0xff] %v8449_v28  ;;  %13820 = vst [vmem:[#allocation130_spill] sm:$0xff] %v8452_v29  ;;  %v268_v29 = vld [vmem:[%s8262_s14 + $0x210] sm:$0xff]  ;;  %v269_v28 = vld [vmem:[%s8262_s14 + $0x218] sm:$0x3] }
  0x93   : >> { %13821 = vst [vmem:[#allocation131_spill] sm:$0xff] %v8459_v30  ;;  %13822 = vst [vmem:[#allocation132_spill] sm:$0xff] %v8462_v31  ;;  %v274_v31 = vld [vmem:[%s8262_s14 + $0x240] sm:$0xff]  ;;  %v275_v30 = vld [vmem:[%s8262_s14 + $0x248] sm:$0xff] }
  0x94   : >> { %13823 = vst [vmem:[#allocation133_spill] sm:$0xff] %v8465_v32  ;;  %13824 = vst [vmem:[#allocation134_spill] sm:$0xff] %v8468_v33  ;;  %v272_v33 = vld [vmem:[%s8262_s14 + $0x230] sm:$0xff]  ;;  %v273_v32 = vld [vmem:[%s8262_s14 + $0x238] sm:$0x3] }
  0x95   : >> { %13825 = vst [vmem:[#allocation135_spill] sm:$0xff] %v8475_v0  ;;  %13826 = vst [vmem:[#allocation136_spill] sm:$0xff] %v8478_v34  ;;  %v276_v2 = vld [vmem:[%s8262_s14 + $0x250] sm:$0xff]  ;;  %v279_v34 = vld [vmem:[%s8262_s14 + $0x268] sm:$0xff]  ;;  %v8507_v0 = vmul.f32 %v8278_v1, %v256_v15  ;;  %v8525_v15 = vmul.f32 %v8278_v1, %v261_v20  ;;  %v8543_v20 = vmul.f32 %v8278_v1, %v266_v23 }
  0x96   : >> { %13827 = vst [vmem:[#allocation137_spill] sm:$0xff] %v8481_v52  ;;  %13828 = vst [vmem:[#allocation138_spill] sm:$0xff] %v8484_v35  ;;  %v277_v35 = vld [vmem:[%s8262_s14 + $0x258] sm:$0x3]  ;;  %v278_v52 = vld [vmem:[%s8262_s14 + $0x260] sm:$0xff]  ;;  %v8561_v23 = vmul.f32 %v8278_v1, %v271_v26 }
  0x97   : >> { %13829 = vst [vmem:[#allocation139_spill] sm:$0xff] %v8494_v5  ;;  %13830 = vst [vmem:[#allocation140_spill] sm:$0xff] %v8497_v4  ;;  %v280_v7 = vld [vmem:[%s8262_s14 + $0x270] sm:$0xff]  ;;  %v282_v4 = vld [vmem:[%s8262_s14 + $0x280] sm:$0xff]  ;;  %v8522_v5 = vmul.f32 %v8278_v1, %v260_v21  ;;  %v8540_v21 = vmul.f32 %v8278_v1, %v265_v24  ;;  %v8558_v24 = vmul.f32 %v8278_v1, %v270_v27 }
  0x98   : >> { %13831 = vst [vmem:[#allocation141_spill] sm:$0xff] %v8500_v3  ;;  %13832 = vst [vmem:[#allocation142_spill] sm:$0xff] %v8510_v9  ;;  %v281_v3 = vld [vmem:[%s8262_s14 + $0x278] sm:$0x3]  ;;  %v283_v12 = vld [vmem:[%s8262_s14 + $0x288] sm:$0xff]  ;;  %v8537_v9 = vmul.f32 %v8278_v1, %v264_v25  ;;  %v8555_v25 = vmul.f32 %v8278_v1, %v269_v28  ;;  %v8573_v28 = vmul.f32 %v8278_v1, %v274_v31 }
  0x99   : >> { %13833 = vst [vmem:[#allocation143_spill] sm:$0xff] %v8513_v8  ;;  %13834 = vst [vmem:[#allocation144_spill] sm:$0xff] %v8516_v6  ;;  %v284_v6 = vld [vmem:[%s8262_s14 + $0x290] sm:$0xff]  ;;  %v285_v8 = vld [vmem:[%s8262_s14 + $0x298] sm:$0x3]  ;;  %v8576_v27 = vmul.f32 %v8278_v1, %v275_v30  ;;  %v8591_v31 = vmul.f32 %v8278_v1, %v279_v34 }
  0x9a   : >> { %13835 = vst [vmem:[#allocation145_spill] sm:$0xff] %v8525_v15  ;;  %13836 = vst [vmem:[#allocation146_spill] sm:$0xff] %v8528_v14  ;;  %v286_v18 = vld [vmem:[%s8262_s14 + $0x2a0] sm:$0xff]  ;;  %v288_v14 = vld [vmem:[%s8262_s14 + $0x2b0] sm:$0xff]  ;;  %v8552_v15 = vmul.f32 %v8278_v1, %v268_v29  ;;  %v8570_v29 = vmul.f32 %v8278_v1, %v273_v32  ;;  %v8588_v32 = vmul.f32 %v8278_v1, %v278_v52 }
  0x9b   : >> { %13837 = vst [vmem:[#allocation147_spill] sm:$0xff] %v8531_v13  ;;  %13838 = vst [vmem:[#allocation148_spill] sm:$0xff] %v8540_v21  ;;  %v287_v13 = vld [vmem:[%s8262_s14 + $0x2a8] sm:$0xff]  ;;  %v289_v22 = vld [vmem:[%s8262_s14 + $0x2b8] sm:$0x3]  ;;  %v8567_v21 = vmul.f32 %v8278_v1, %v272_v33  ;;  %v8585_v33 = vmul.f32 %v8278_v1, %v277_v35  ;;  %v8603_v35 = vmul.f32 %v8278_v1, %v282_v4 }
  0x9c   : >> { %13839 = vst [vmem:[#allocation149_spill] sm:$0xff] %v8543_v20  ;;  %13840 = vst [vmem:[#allocation150_spill] sm:$0xff] %v8546_v19  ;;  %v290_v19 = vld [vmem:[%s8262_s14 + $0x2c0] sm:$0xff]  ;;  %v291_v20 = vld [vmem:[%s8262_s14 + $0x2c8] sm:$0xff]  ;;  %v8606_v52 = vmul.f32 %v8278_v1, %v283_v12  ;;  %v8621_v4 = vmul.f32 %v8278_v1, %v287_v13 }
  0x9d   : >> { %13841 = vst [vmem:[#allocation151_spill] sm:$0xff] %v8555_v25  ;;  %13842 = vst [vmem:[#allocation152_spill] sm:$0xff] %v8558_v24  ;;  %v292_v26 = vld [vmem:[%s8262_s14 + $0x2d0] sm:$0xff]  ;;  %v294_v24 = vld [vmem:[%s8262_s14 + $0x2e0] sm:$0xff]  ;;  %v8582_v25 = vmul.f32 %v8278_v1, %v276_v2  ;;  %v8600_v2 = vmul.f32 %v8278_v1, %v281_v3  ;;  %v8618_v3 = vmul.f32 %v8278_v1, %v286_v18 }
  0x9e   : >> { %13843 = vst [vmem:[#allocation153_spill] sm:$0xff] %v8561_v23  ;;  %13844 = vst [vmem:[#allocation154_spill] sm:$0xff] %v8570_v29  ;;  %v293_v23 = vld [vmem:[%s8262_s14 + $0x2d8] sm:$0x3]  ;;  %v295_v30 = vld [vmem:[%s8262_s14 + $0x2e8] sm:$0xff]  ;;  %v8597_v29 = vmul.f32 %v8278_v1, %v280_v7  ;;  %v8615_v7 = vmul.f32 %v8278_v1, %v285_v8  ;;  %v8636_v8 = vmul.f32 %v8278_v1, %v291_v20 }
  0x9f   : >> { %13845 = vst [vmem:[#allocation155_spill] sm:$0xff] %v8573_v28  ;;  %13846 = vst [vmem:[#allocation156_spill] sm:$0xff] %v8576_v27  ;;  %v296_v27 = vld [vmem:[%s8262_s14 + $0x2f0] sm:$0xff]  ;;  %v297_v28 = vld [vmem:[%s8262_s14 + $0x2f8] sm:$0x3]  ;;  %v8641_v13 = vmul.f32 %v8278_v1, %v292_v26 }
  0xa0   : >> { %13847 = vst [vmem:[#allocation157_spill] sm:$0xff] %v8585_v33  ;;  %13848 = vst [vmem:[#allocation158_spill] sm:$0xff] %v8588_v32  ;;  %v298_v34 = vld [vmem:[%s8262_s14 + $0x300] sm:$0xff]  ;;  %v300_v32 = vld [vmem:[%s8262_s14 + $0x310] sm:$0xff]  ;;  %v8612_v33 = vmul.f32 %v8278_v1, %v284_v6  ;;  %v8633_v6 = vmul.f32 %v8278_v1, %v290_v19  ;;  %v8653_v19 = vmul.f32 %v8278_v1, %v296_v27 }
  0xa1   : >> { %13849 = vst [vmem:[#allocation159_spill] sm:$0xff] %v8591_v31  ;;  %13850 = vst [vmem:[#allocation160_spill] sm:$0xff] %v8597_v29  ;;  %v299_v31 = vld [vmem:[%s8262_s14 + $0x308] sm:$0xff]  ;;  %v8630_v29 = vmul.f32 %v8278_v1, %v289_v22  ;;  %v304_v18 = vld [vmem:[%s8262_s14 + $0x330] sm:$0xff]  ;;  %v8650_v22 = vmul.f32 %v8278_v1, %v295_v30  ;;  %v8656_v20 = vmul.f32 %v8278_v1, %v297_v28 }
  0xa2   : >> { %13851 = vst [vmem:[#allocation161_spill] sm:$0xff] %v8600_v2  ;;  %13852 = vst [vmem:[#allocation162_spill] sm:$0xff] %v8603_v35  ;;  %v301_v35 = vld [vmem:[%s8262_s14 + $0x318] sm:$0x3]  ;;  %v302_v2 = vld [vmem:[%s8262_s14 + $0x320] sm:$0xff]  ;;  %v8662_v26 = vmul.f32 %v8278_v1, %v299_v31  ;;  %v8677_v28 = vmul.f32 %v8278_v1, %v304_v18  ;;  %v8684_v31 = vadd.f32 %v13793_v59, %v8289_v10 }
  0xa3   : >> { %13853 = vst [vmem:[#allocation163_spill] sm:$0xff] %v8606_v52  ;;  %13854 = vst [vmem:[#allocation164_spill] sm:$0xff] %v8618_v3  ;;  %v303_v12 = vld [vmem:[%s8262_s14 + $0x328] sm:$0xff]  ;;  %v8627_v52 = vmul.f32 %v8278_v1, %v288_v14  ;;  %v305_v3 = vld [vmem:[%s8262_s14 + $0x338] sm:$0x3]  ;;  %v8647_v14 = vmul.f32 %v8278_v1, %v294_v24  ;;  %v8668_v24 = vmul.f32 %v8278_v1, %v301_v35 }
  0xa4   : >> { %13855 = vst [vmem:[#allocation165_spill] sm:$0xff] %v8621_v4  ;;  %13856 = vst [vmem:[#allocation166_spill] sm:$0xff] %v8636_v8  ;;  %v8644_v4 = vmul.f32 %v8278_v1, %v293_v23  ;;  %v8659_v8 = vmul.f32 %v8278_v1, %v298_v34  ;;  %v8665_v23 = vmul.f32 %v8278_v1, %v300_v32  ;;  %v13857_v59 = vld [vmem:[#allocation53_spill] sm:$0xff]  ;;  %v13879_v18 = vld [vmem:[#allocation43_spill] sm:$0xff] }
  0xa5   : >> { %v8671_v30 = vmul.f32 %v8278_v1, %v302_v2  ;;  %v8674_v27 = vmul.f32 %v8278_v1, %v303_v12  ;;  %v8680_v34 = vmul.f32 %v8278_v1, %v305_v3  ;;  %v8688_v32 = vadd.f32 %v13792_v58, %v8292_v11  ;;  %v13878_v12 = vld [vmem:[#allocation51_spill] sm:$0xff] }
  0xa6   : >> { %v8692_v2 = vadd.f32 %v13791_v57, %v8299_v16  ;;  %v8696_v35 = vadd.f32 %v7540_v56, %v8302_v17  ;;  %v8700_v1 = vadd.f32 %v13790_v55, %v8305_v40  ;;  %v8704_v10 = vadd.f32 %v13789_v54, %v8308_v41  ;;  %v13863_v40 = vld [vmem:[#allocation55_spill] sm:$0xff]  ;;  %v13864_v41 = vld [vmem:[#allocation48_spill] sm:$0xff] }
  0xa7   : >> { %v8708_v11 = vadd.f32 %v7528_v53, %v8315_v42  ;;  %v8712_v16 = vadd.f32 %v7524_v63, %v8318_v43  ;;  %v8716_v17 = vadd.f32 %v7520_v62, %v8321_v44  ;;  %v8720_v55 = vadd.f32 %v7516_v61, %v8324_v45  ;;  %v13858_v61 = vld [vmem:[#allocation50_spill] sm:$0xff]  ;;  %v13861_v63 = vld [vmem:[#allocation49_spill] sm:$0xff]  ;;  %v13866_v42 = vld [vmem:[#allocation56_spill] sm:$0xff] }
  0xa8   : >> { %v8724_v54 = vadd.f32 %v7512_v60, %v8331_v46  ;;  %v8728_v53 = vadd.f32 %v13788_v39, %v8334_v47  ;;  %v8732_v56 = vadd.f32 %v13787_v38, %v8337_v48  ;;  %v8736_v57 = vadd.f32 %v13786_v37, %v8340_v49  ;;  %v13860_v62 = vld [vmem:[#allocation54_spill] sm:$0xff]  ;;  %v13867_v43 = vld [vmem:[#allocation47_spill] sm:$0xff]  ;;  %v13869_v44 = vld [vmem:[#allocation57_spill] sm:$0xff] }
  0xa9   : >> { %v8740_v58 = vadd.f32 %v13785_v36, %v8347_v50  ;;  %v8744_v60 = vadd.f32 %v13858_v61, %v13857_v59  ;;  %v8748_v39 = vadd.f32 %v13861_v63, %v13860_v62  ;;  %v8752_v38 = vadd.f32 %v13864_v41, %v13863_v40  ;;  %v13870_v45 = vld [vmem:[#allocation46_spill] sm:$0xff]  ;;  %v13873_v47 = vld [vmem:[#allocation45_spill] sm:$0xff]  ;;  %v13875_v49 = vld [vmem:[#allocation59_spill] sm:$0xff] }
  0xaa   : >> { %v8756_v37 = vadd.f32 %v13867_v43, %v13866_v42  ;;  %v8760_v36 = vadd.f32 %v13870_v45, %v13869_v44  ;;  %v13872_v46 = vld [vmem:[#allocation58_spill] sm:$0xff]  ;;  %v13876_v50 = vld [vmem:[#allocation44_spill] sm:$0xff]  ;;  %v8772_v59 = vadd.f32 %v13879_v18, %v13878_v12  ;;  %v13884_v40 = vld [vmem:[#allocation113_spill] sm:$0xff] }
  0xab   : >> { %13859 = vst [vmem:[#allocation50_spill] sm:$0xff] %v8744_v60  ;;  %13862 = vst [vmem:[#allocation49_spill] sm:$0xff] %v8748_v39  ;;  %v8764_v48 = vadd.f32 %v13873_v47, %v13872_v46  ;;  %v8768_v3 = vadd.f32 %v13876_v50, %v13875_v49  ;;  %v13881_v61 = vld [vmem:[#allocation52_spill] sm:$0xff]  ;;  %v13882_v62 = vld [vmem:[#allocation42_spill] sm:$0xff] }
  0xac   : >> { %13865 = vst [vmem:[#allocation48_spill] sm:$0xff] %v8752_v38  ;;  %13868 = vst [vmem:[#allocation47_spill] sm:$0xff] %v8756_v37  ;;  %v8776_v63 = vadd.f32 %v13882_v62, %v13881_v61  ;;  %v13885_v41 = vld [vmem:[#allocation41_spill] sm:$0xff]  ;;  %v13887_v43 = vld [vmem:[#allocation114_spill] sm:$0xff] }
  0xad   : >> { %13871 = vst [vmem:[#allocation46_spill] sm:$0xff] %v8760_v36  ;;  %13874 = vst [vmem:[#allocation45_spill] sm:$0xff] %v8764_v48  ;;  %v8780_v42 = vadd.f32 %v13885_v41, %v13884_v40  ;;  %v13888_v44 = vld [vmem:[#allocation40_spill] sm:$0xff]  ;;  %v13890_v46 = vld [vmem:[#allocation115_spill] sm:$0xff] }
  0xae   : >> { %13877 = vst [vmem:[#allocation44_spill] sm:$0xff] %v8768_v3  ;;  %13880 = vst [vmem:[#allocation43_spill] sm:$0xff] %v8772_v59  ;;  %v8784_v45 = vadd.f32 %v13888_v44, %v13887_v43  ;;  %v13891_v47 = vld [vmem:[#allocation39_spill] sm:$0xff]  ;;  %v13893_v50 = vld [vmem:[#allocation116_spill] sm:$0xff] }
  0xaf   : >> { %13883 = vst [vmem:[#allocation42_spill] sm:$0xff] %v8776_v63  ;;  %13886 = vst [vmem:[#allocation41_spill] sm:$0xff] %v8780_v42  ;;  %v8788_v49 = vadd.f32 %v13891_v47, %v13890_v46  ;;  %v13894_v3 = vld [vmem:[#allocation38_spill] sm:$0xff]  ;;  %v13896_v18 = vld [vmem:[#allocation117_spill] sm:$0xff] }
  0xb0   : >> { %13889 = vst [vmem:[#allocation40_spill] sm:$0xff] %v8784_v45  ;;  %v8792_v12 = vadd.f32 %v13894_v3, %v13893_v50  ;;  %v13897_v59 = vld [vmem:[#allocation37_spill] sm:$0xff]  ;;  %v13899_v62 = vld [vmem:[#allocation118_spill] sm:$0xff]  ;;  %v13900_v63 = vld [vmem:[#allocation36_spill] sm:$0xff] }
  0xb1   : >> { %13892 = vst [vmem:[#allocation39_spill] sm:$0xff] %v8788_v49  ;;  %v8796_v61 = vadd.f32 %v13897_v59, %v13896_v18  ;;  %v8800_v40 = vadd.f32 %v13900_v63, %v13899_v62  ;;  %v13902_v41 = vld [vmem:[#allocation119_spill] sm:$0xff]  ;;  %v13905_v44 = vld [vmem:[#allocation120_spill] sm:$0xff]  ;;  %v13906_v45 = vld [vmem:[#allocation34_spill] sm:$0xff] }
  0xb2   : >> { %13895 = vst [vmem:[#allocation38_spill] sm:$0xff] %v8792_v12  ;;  %v13903_v42 = vld [vmem:[#allocation35_spill] sm:$0xff]  ;;  %v8808_v46 = vadd.f32 %v13906_v45, %v13905_v44  ;;  %v13908_v47 = vld [vmem:[#allocation121_spill] sm:$0xff]  ;;  %v13911_v50 = vld [vmem:[#allocation122_spill] sm:$0xff] }
  0xb3   : >> { %13898 = vst [vmem:[#allocation37_spill] sm:$0xff] %v8796_v61  ;;  %13901 = vst [vmem:[#allocation36_spill] sm:$0xff] %v8800_v40  ;;  %v8804_v43 = vadd.f32 %v13903_v42, %v13902_v41  ;;  %v13909_v49 = vld [vmem:[#allocation33_spill] sm:$0xff]  ;;  %v13912_v12 = vld [vmem:[#allocation32_spill] sm:$0xff] }
  0xb4   : >> { %13907 = vst [vmem:[#allocation34_spill] sm:$0xff] %v8808_v46  ;;  %v8812_v3 = vadd.f32 %v13909_v49, %v13908_v47  ;;  %v8816_v59 = vadd.f32 %v13912_v12, %v13911_v50  ;;  %v13914_v18 = vld [vmem:[#allocation123_spill] sm:$0xff]  ;;  %v13917_v62 = vld [vmem:[#allocation124_spill] sm:$0xff]  ;;  %v13918_v40 = vld [vmem:[#allocation30_spill] sm:$0xff] }
  0xb5   : >> { %13904 = vst [vmem:[#allocation35_spill] sm:$0xff] %v8804_v43  ;;  %v13915_v61 = vld [vmem:[#allocation31_spill] sm:$0xff]  ;;  %v8824_v42 = vadd.f32 %v13918_v40, %v13917_v62  ;;  %v13920_v41 = vld [vmem:[#allocation125_spill] sm:$0xff]  ;;  %v13923_v44 = vld [vmem:[#allocation126_spill] sm:$0xff] }
  0xb6   : >> { %13910 = vst [vmem:[#allocation33_spill] sm:$0xff] %v8812_v3  ;;  %13913 = vst [vmem:[#allocation32_spill] sm:$0xff] %v8816_v59  ;;  %v8820_v63 = vadd.f32 %v13915_v61, %v13914_v18  ;;  %v13921_v43 = vld [vmem:[#allocation29_spill] sm:$0xff]  ;;  %v13924_v46 = vld [vmem:[#allocation28_spill] sm:$0xff] }
  0xb7   : >> { %13919 = vst [vmem:[#allocation30_spill] sm:$0xff] %v8824_v42  ;;  %v8828_v45 = vadd.f32 %v13921_v43, %v13920_v41  ;;  %v8832_v49 = vadd.f32 %v13924_v46, %v13923_v44  ;;  %v13926_v47 = vld [vmem:[#allocation127_spill] sm:$0xff]  ;;  %v13929_v50 = vld [vmem:[#allocation128_spill] sm:$0xff]  ;;  %v13930_v59 = vld [vmem:[#allocation26_spill] sm:$0xff] }
  0xb8   : >> { %13916 = vst [vmem:[#allocation31_spill] sm:$0xff] %v8820_v63  ;;  %v13927_v3 = vld [vmem:[#allocation27_spill] sm:$0xff]  ;;  %v8840_v61 = vadd.f32 %v13930_v59, %v13929_v50  ;;  %v13932_v18 = vld [vmem:[#allocation129_spill] sm:$0xff]  ;;  %v13935_v62 = vld [vmem:[#allocation130_spill] sm:$0xff] }
  0xb9   : >> { %13922 = vst [vmem:[#allocation29_spill] sm:$0xff] %v8828_v45  ;;  %13925 = vst [vmem:[#allocation28_spill] sm:$0xff] %v8832_v49  ;;  %v8836_v12 = vadd.f32 %v13927_v3, %v13926_v47  ;;  %v13933_v63 = vld [vmem:[#allocation25_spill] sm:$0xff]  ;;  %v13936_v42 = vld [vmem:[#allocation24_spill] sm:$0xff] }
  0xba   : >> { %13931 = vst [vmem:[#allocation26_spill] sm:$0xff] %v8840_v61  ;;  %v8844_v40 = vadd.f32 %v13933_v63, %v13932_v18  ;;  %v8848_v43 = vadd.f32 %v13936_v42, %v13935_v62  ;;  %v13938_v41 = vld [vmem:[#allocation131_spill] sm:$0xff]  ;;  %v13941_v44 = vld [vmem:[#allocation132_spill] sm:$0xff]  ;;  %v13942_v49 = vld [vmem:[#allocation22_spill] sm:$0xff] }
  0xbb   : >> { %13928 = vst [vmem:[#allocation27_spill] sm:$0xff] %v8836_v12  ;;  %v13939_v45 = vld [vmem:[#allocation23_spill] sm:$0xff]  ;;  %v8856_v3 = vadd.f32 %v13942_v49, %v13941_v44  ;;  %v13944_v47 = vld [vmem:[#allocation133_spill] sm:$0xff]  ;;  %v13947_v61 = vld [vmem:[#allocation134_spill] sm:$0xff] }
  0xbc   : >> { %13934 = vst [vmem:[#allocation25_spill] sm:$0xff] %v8844_v40  ;;  %13937 = vst [vmem:[#allocation24_spill] sm:$0xff] %v8848_v43  ;;  %v8852_v46 = vadd.f32 %v13939_v45, %v13938_v41  ;;  %v13945_v59 = vld [vmem:[#allocation21_spill] sm:$0xff]  ;;  %v13948_v63 = vld [vmem:[#allocation20_spill] sm:$0xff] }
  0xbd   : >> { %13943 = vst [vmem:[#allocation22_spill] sm:$0xff] %v8856_v3  ;;  %v8860_v50 = vadd.f32 %v13945_v59, %v13944_v47  ;;  %v8864_v18 = vadd.f32 %v13948_v63, %v13947_v61  ;;  %v13950_v40 = vld [vmem:[#allocation135_spill] sm:$0xff]  ;;  %v13953_v43 = vld [vmem:[#allocation136_spill] sm:$0xff]  ;;  %v13954_v45 = vld [vmem:[#allocation18_spill] sm:$0xff] }
  0xbe   : >> { %13940 = vst [vmem:[#allocation23_spill] sm:$0xff] %v8852_v46  ;;  %v13951_v42 = vld [vmem:[#allocation19_spill] sm:$0xff]  ;;  %v8872_v41 = vadd.f32 %v13954_v45, %v13953_v43  ;;  %v13956_v46 = vld [vmem:[#allocation137_spill] sm:$0xff]  ;;  %v13959_v44 = vld [vmem:[#allocation138_spill] sm:$0xff] }
  0xbf   : >> { %13946 = vst [vmem:[#allocation21_spill] sm:$0xff] %v8860_v50  ;;  %13949 = vst [vmem:[#allocation20_spill] sm:$0xff] %v8864_v18  ;;  %v8868_v62 = vadd.f32 %v13951_v42, %v13950_v40  ;;  %v13957_v12 = vld [vmem:[#allocation17_spill] sm:$0xff]  ;;  %v13960_v3 = vld [vmem:[#allocation16_spill] sm:$0xff] }
  0xc0   : >> { %13955 = vst [vmem:[#allocation18_spill] sm:$0xff] %v8872_v41  ;;  %v8876_v49 = vadd.f32 %v13957_v12, %v13956_v46  ;;  %v8880_v47 = vadd.f32 %v13960_v3, %v13959_v44  ;;  %v13962_v59 = vld [vmem:[#allocation15_spill] sm:$0xff]  ;;  %v13965_v18 = vld [vmem:[#allocation112_spill] sm:$0xff]  ;;  %v13970_v45 = vld [vmem:[#allocation141_spill] sm:$0xff] }
  0xc1   : >> { %13952 = vst [vmem:[#allocation19_spill] sm:$0xff] %v8868_v62  ;;  %v8884_v61 = vadd.f32 %v13962_v59, %v8491_v51  ;;  %v13964_v63 = vld [vmem:[#allocation139_spill] sm:$0xff]  ;;  %v13967_v42 = vld [vmem:[#allocation140_spill] sm:$0xff]  ;;  %v13971_v41 = vld [vmem:[#allocation110_spill] sm:$0xff] }
  0xc2   : >> { %13958 = vst [vmem:[#allocation17_spill] sm:$0xff] %v8876_v49  ;;  %13961 = vst [vmem:[#allocation16_spill] sm:$0xff] %v8880_v47  ;;  %v8888_v40 = vadd.f32 %v13965_v18, %v13964_v63  ;;  %v13968_v62 = vld [vmem:[#allocation111_spill] sm:$0xff]  ;;  %v8896_v12 = vadd.f32 %v13971_v41, %v13970_v45  ;;  %v13973_v46 = vld [vmem:[#allocation109_spill] sm:$0xff] }
  0xc3   : >> { %13963 = vst [vmem:[#allocation15_spill] sm:$0xff] %v8884_v61  ;;  %v8892_v43 = vadd.f32 %v13968_v62, %v13967_v42  ;;  %v8900_v3 = vadd.f32 %v13973_v46, %v8507_v0  ;;  %v13975_v44 = vld [vmem:[#allocation142_spill] sm:$0xff]  ;;  %v13976_v47 = vld [vmem:[#allocation108_spill] sm:$0xff]  ;;  %v13978_v59 = vld [vmem:[#allocation143_spill] sm:$0xff] }
  0xc4   : >> { %13966 = vst [vmem:[#allocation53_spill] sm:$0xff] %v8888_v40  ;;  %13972 = vst [vmem:[#allocation55_spill] sm:$0xff] %v8896_v12  ;;  %v8904_v51 = vadd.f32 %v13976_v47, %v13975_v44  ;;  %v13979_v61 = vld [vmem:[#allocation107_spill] sm:$0xff]  ;;  %v13981_v63 = vld [vmem:[#allocation144_spill] sm:$0xff] }
  0xc5   : >> { %13969 = vst [vmem:[#allocation54_spill] sm:$0xff] %v8892_v43  ;;  %13974 = vst [vmem:[#allocation56_spill] sm:$0xff] %v8900_v3  ;;  %v8908_v18 = vadd.f32 %v13979_v61, %v13978_v59  ;;  %v13982_v40 = vld [vmem:[#allocation106_spill] sm:$0xff]  ;;  %v13984_v41 = vld [vmem:[#allocation105_spill] sm:$0xff] }
  0xc6   : >> { %13977 = vst [vmem:[#allocation57_spill] sm:$0xff] %v8904_v51  ;;  %v8912_v62 = vadd.f32 %v13982_v40, %v13981_v63  ;;  %v8917_v42 = vadd.f32 %v13984_v41, %v8522_v5  ;;  %v13986_v45 = vld [vmem:[#allocation145_spill] sm:$0xff]  ;;  %v13987_v0 = vld [vmem:[#allocation104_spill] sm:$0xff]  ;;  %v13989_v3 = vld [vmem:[#allocation146_spill] sm:$0xff] }
  0xc7   : >> { %13980 = vst [vmem:[#allocation58_spill] sm:$0xff] %v8908_v18  ;;  %v8921_v46 = vadd.f32 %v13987_v0, %v13986_v45  ;;  %v13990_v47 = vld [vmem:[#allocation103_spill] sm:$0xff]  ;;  %v13993_v61 = vld [vmem:[#allocation102_spill] sm:$0xff]  ;;  %v13995_v40 = vld [vmem:[#allocation101_spill] sm:$0xff] }
  0xc8   : >> { %13983 = vst [vmem:[#allocation59_spill] sm:$0xff] %v8912_v62  ;;  %13985 = vst [vmem:[#allocation51_spill] sm:$0xff] %v8917_v42  ;;  %v8925_v44 = vadd.f32 %v13990_v47, %v13989_v3  ;;  %v13992_v51 = vld [vmem:[#allocation147_spill] sm:$0xff]  ;;  %v8933_v63 = vadd.f32 %v13995_v40, %v8537_v9  ;;  %v13997_v62 = vld [vmem:[#allocation148_spill] sm:$0xff] }
  0xc9   : >> { %13988 = vst [vmem:[#allocation52_spill] sm:$0xff] %v8921_v46  ;;  %v8929_v59 = vadd.f32 %v13993_v61, %v13992_v51  ;;  %v13998_v18 = vld [vmem:[#allocation100_spill] sm:$0xff]  ;;  %v14000_v41 = vld [vmem:[#allocation149_spill] sm:$0xff]  ;;  %v14001_v42 = vld [vmem:[#allocation99_spill] sm:$0xff] }
  0xca   : >> { %13991 = vst [vmem:[#allocation113_spill] sm:$0xff] %v8925_v44  ;;  %13996 = vst [vmem:[#allocation115_spill] sm:$0xff] %v8933_v63  ;;  %v8937_v5 = vadd.f32 %v13998_v18, %v13997_v62  ;;  %v8941_v45 = vadd.f32 %v14001_v42, %v14000_v41  ;;  %v14003_v0 = vld [vmem:[#allocation150_spill] sm:$0xff]  ;;  %v14006_v47 = vld [vmem:[#allocation97_spill] sm:$0xff] }
  0xcb   : >> { %13994 = vst [vmem:[#allocation114_spill] sm:$0xff] %v8929_v59  ;;  %v14004_v46 = vld [vmem:[#allocation98_spill] sm:$0xff]  ;;  %v8949_v51 = vadd.f32 %v14006_v47, %v8552_v15  ;;  %v14008_v61 = vld [vmem:[#allocation151_spill] sm:$0xff]  ;;  %v14009_v59 = vld [vmem:[#allocation96_spill] sm:$0xff] }
  0xcc   : >> { %13999 = vst [vmem:[#allocation116_spill] sm:$0xff] %v8937_v5  ;;  %14002 = vst [vmem:[#allocation117_spill] sm:$0xff] %v8941_v45  ;;  %v8945_v3 = vadd.f32 %v14004_v46, %v14003_v0  ;;  %v8953_v9 = vadd.f32 %v14009_v59, %v14008_v61  ;;  %v14011_v40 = vld [vmem:[#allocation152_spill] sm:$0xff]  ;;  %v14012_v63 = vld [vmem:[#allocation95_spill] sm:$0xff] }
  0xcd   : >> { %14007 = vst [vmem:[#allocation119_spill] sm:$0xff] %v8949_v51  ;;  %v8957_v18 = vadd.f32 %v14012_v63, %v14011_v40  ;;  %v14014_v62 = vld [vmem:[#allocation153_spill] sm:$0xff]  ;;  %v14015_v5 = vld [vmem:[#allocation94_spill] sm:$0xff]  ;;  %v14020_v0 = vld [vmem:[#allocation92_spill] sm:$0xff] }
  0xce   : >> { %14005 = vst [vmem:[#allocation118_spill] sm:$0xff] %v8945_v3  ;;  %14010 = vst [vmem:[#allocation120_spill] sm:$0xff] %v8953_v9  ;;  %v8961_v42 = vadd.f32 %v14015_v5, %v14014_v62  ;;  %v14017_v46 = vld [vmem:[#allocation93_spill] sm:$0xff]  ;;  %v14019_v15 = vld [vmem:[#allocation154_spill] sm:$0xff] }
  0xcf   : >> { %14013 = vst [vmem:[#allocation121_spill] sm:$0xff] %v8957_v18  ;;  %v8967_v41 = vadd.f32 %v14017_v46, %v8567_v21  ;;  %v8971_v47 = vadd.f32 %v14020_v0, %v14019_v15  ;;  %v14022_v59 = vld [vmem:[#allocation155_spill] sm:$0xff]  ;;  %v14025_v63 = vld [vmem:[#allocation156_spill] sm:$0xff]  ;;  %v14026_v40 = vld [vmem:[#allocation90_spill] sm:$0xff] }
  0xd0   : >> { %14016 = vst [vmem:[#allocation122_spill] sm:$0xff] %v8961_v42  ;;  %v14023_v61 = vld [vmem:[#allocation91_spill] sm:$0xff]  ;;  %v8979_v18 = vadd.f32 %v14026_v40, %v14025_v63  ;;  %v14028_v5 = vld [vmem:[#allocation89_spill] sm:$0xff]  ;;  %v14031_v21 = vld [vmem:[#allocation88_spill] sm:$0xff] }
  0xd1   : >> { %14018 = vst [vmem:[#allocation123_spill] sm:$0xff] %v8967_v41  ;;  %14021 = vst [vmem:[#allocation124_spill] sm:$0xff] %v8971_v47  ;;  %v8975_v9 = vadd.f32 %v14023_v61, %v14022_v59  ;;  %v8983_v62 = vadd.f32 %v14028_v5, %v8582_v25  ;;  %v14030_v42 = vld [vmem:[#allocation157_spill] sm:$0xff]  ;;  %v14033_v41 = vld [vmem:[#allocation158_spill] sm:$0xff] }
  0xd2   : >> { %14027 = vst [vmem:[#allocation126_spill] sm:$0xff] %v8979_v18  ;;  %v8987_v46 = vadd.f32 %v14031_v21, %v14030_v42  ;;  %v14034_v51 = vld [vmem:[#allocation87_spill] sm:$0xff]  ;;  %v14037_v59 = vld [vmem:[#allocation86_spill] sm:$0xff]  ;;  %v14039_v63 = vld [vmem:[#allocation160_spill] sm:$0xff] }
  0xd3   : >> { %14024 = vst [vmem:[#allocation125_spill] sm:$0xff] %v8975_v9  ;;  %14029 = vst [vmem:[#allocation127_spill] sm:$0xff] %v8983_v62  ;;  %v8991_v15 = vadd.f32 %v14034_v51, %v14033_v41  ;;  %v14036_v0 = vld [vmem:[#allocation159_spill] sm:$0xff]  ;;  %v14040_v40 = vld [vmem:[#allocation85_spill] sm:$0xff] }
  0xd4   : >> { %14032 = vst [vmem:[#allocation128_spill] sm:$0xff] %v8987_v46  ;;  %v8995_v61 = vadd.f32 %v14037_v59, %v14036_v0  ;;  %v8999_v18 = vadd.f32 %v14040_v40, %v14039_v63  ;;  %v14042_v25 = vld [vmem:[#allocation161_spill] sm:$0xff]  ;;  %v14043_v5 = vld [vmem:[#allocation84_spill] sm:$0xff]  ;;  %v14045_v21 = vld [vmem:[#allocation162_spill] sm:$0xff] }
  0xd5   : >> { %14035 = vst [vmem:[#allocation129_spill] sm:$0xff] %v8991_v15  ;;  %v9003_v42 = vadd.f32 %v14043_v5, %v14042_v25  ;;  %v14046_v46 = vld [vmem:[#allocation83_spill] sm:$0xff]  ;;  %v14049_v41 = vld [vmem:[#allocation82_spill] sm:$0xff]  ;;  %v14051_v0 = vld [vmem:[#allocation81_spill] sm:$0xff] }
  0xd6   : >> { %14038 = vst [vmem:[#allocation130_spill] sm:$0xff] %v8995_v61  ;;  %14041 = vst [vmem:[#allocation131_spill] sm:$0xff] %v8999_v18  ;;  %v9007_v62 = vadd.f32 %v14046_v46, %v14045_v21  ;;  %v14048_v51 = vld [vmem:[#allocation163_spill] sm:$0xff]  ;;  %v9015_v59 = vadd.f32 %v14051_v0, %v8612_v33  ;;  %v14053_v63 = vld [vmem:[#allocation80_spill] sm:$0xff] }
  0xd7   : >> { %14044 = vst [vmem:[#allocation132_spill] sm:$0xff] %v9003_v42  ;;  %v9011_v15 = vadd.f32 %v14049_v41, %v14048_v51  ;;  %v9019_v40 = vadd.f32 %v14053_v63, %v8615_v7  ;;  %v14055_v18 = vld [vmem:[#allocation164_spill] sm:$0xff]  ;;  %v14056_v61 = vld [vmem:[#allocation79_spill] sm:$0xff]  ;;  %v14058_v5 = vld [vmem:[#allocation165_spill] sm:$0xff] }
  0xd8   : >> { %14047 = vst [vmem:[#allocation133_spill] sm:$0xff] %v9007_v62  ;;  %14052 = vst [vmem:[#allocation135_spill] sm:$0xff] %v9015_v59  ;;  %v9023_v25 = vadd.f32 %v14056_v61, %v14055_v18  ;;  %v14059_v46 = vld [vmem:[#allocation78_spill] sm:$0xff]  ;;  %v14061_v41 = vld [vmem:[#allocation77_spill] sm:$0xff] }
  0xd9   : >> { %14050 = vst [vmem:[#allocation134_spill] sm:$0xff] %v9011_v15  ;;  %14054 = vst [vmem:[#allocation136_spill] sm:$0xff] %v9019_v40  ;;  %v9027_v21 = vadd.f32 %v14059_v46, %v14058_v5  ;;  %v517_v51 = vld [vmem:[%s8262_s14 + $0x1] sm:$0xff]  ;;  %v9032_v33 = vadd.f32 %v14061_v41, %v8627_v52  ;;  %v14063_v7 = vld [vmem:[#allocation76_spill] sm:$0xff] }
  0xda   : >> { %14057 = vst [vmem:[#allocation137_spill] sm:$0xff] %v9023_v25  ;;  %v9036_v0 = vadd.f32 %v14063_v7, %v8630_v29  ;;  %v14065_v63 = vld [vmem:[#allocation75_spill] sm:$0xff]  ;;  %v14067_v61 = vld [vmem:[#allocation166_spill] sm:$0xff]  ;;  %v519_v46 = vld [vmem:[%s8262_s14 + $0x11] sm:$0xff] }
  0xdb   : >> { %14060 = vst [vmem:[#allocation138_spill] sm:$0xff] %v9027_v21  ;;  %14062 = vst [vmem:[#allocation139_spill] sm:$0xff] %v9032_v33  ;;  %v9040_v18 = vadd.f32 %v14065_v63, %v8633_v6  ;;  %v14068_v25 = vld [vmem:[#allocation74_spill] sm:$0xff]  ;;  %v518_v5 = vld [vmem:[%s8262_s14 + $0x9] sm:$0xff] }
  0xdc   : >> { %14064 = vst [vmem:[#allocation112_spill] sm:$0xff] %v9036_v0  ;;  %v9044_v40 = vadd.f32 %v14068_v25, %v14067_v61  ;;  %v520_v21 = vld [vmem:[%s8262_s14 + $0x19] sm:$0x3]  ;;  %v521_v52 = vld [vmem:[%s8262_s14 + $0x21] sm:$0xff]  ;;  %v14072_v7 = vld [vmem:[#allocation72_spill] sm:$0xff] }
  0xdd   : >> { %14066 = vst [vmem:[#allocation140_spill] sm:$0xff] %v9040_v18  ;;  %v14070_v41 = vld [vmem:[#allocation73_spill] sm:$0xff]  ;;  %v9056_v6 = vadd.f32 %v14072_v7, %v8644_v4  ;;  %v14074_v63 = vld [vmem:[#allocation71_spill] sm:$0xff]  ;;  %v14076_v61 = vld [vmem:[#allocation70_spill] sm:$0xff] }
  0xde   : >> { %14069 = vst [vmem:[#allocation111_spill] sm:$0xff] %v9044_v40  ;;  %v9052_v29 = vadd.f32 %v14070_v41, %v8641_v13  ;;  %v9060_v25 = vadd.f32 %v14074_v63, %v8647_v14  ;;  %v9064_v40 = vadd.f32 %v14076_v61, %v8650_v22  ;;  %v522_v18 = vld [vmem:[%s8262_s14 + $0x29] sm:$0xff]  ;;  %v523_v0 = vld [vmem:[%s8262_s14 + $0x31] sm:$0xff]  ;;  %v524_v33 = vld [vmem:[%s8262_s14 + $0x39] sm:$0x3] }
  0xdf   : >> { %14073 = vst [vmem:[#allocation110_spill] sm:$0xff] %v9056_v6  ;;  %v525_v13 = vld [vmem:[%s8262_s14 + $0x41] sm:$0xff]  ;;  %v14078_v41 = vld [vmem:[#allocation69_spill] sm:$0xff]  ;;  %v14080_v14 = vld [vmem:[#allocation68_spill] sm:$0xff] }
  0xe0   : >> { %14071 = vst [vmem:[#allocation141_spill] sm:$0xff] %v9052_v29  ;;  %14075 = vst [vmem:[#allocation109_spill] sm:$0xff] %v9060_v25  ;;  %v9072_v4 = vadd.f32 %v14078_v41, %v8653_v19  ;;  %v9076_v7 = vadd.f32 %v14080_v14, %v8656_v20  ;;  %v14082_v22 = vld [vmem:[#allocation67_spill] sm:$0xff]  ;;  %v14084_v61 = vld [vmem:[#allocation66_spill] sm:$0xff] }
  0xe1   : >> { %14077 = vst [vmem:[#allocation142_spill] sm:$0xff] %v9064_v40  ;;  %v9080_v63 = vadd.f32 %v14082_v22, %v8659_v8  ;;  %v9084_v40 = vadd.f32 %v14084_v61, %v8662_v26  ;;  %v526_v25 = vld [vmem:[%s8262_s14 + $0x49] sm:$0xff]  ;;  %v527_v6 = vld [vmem:[%s8262_s14 + $0x51] sm:$0xff]  ;;  %v528_v29 = vld [vmem:[%s8262_s14 + $0x59] sm:$0x3] }
  0xe2   : >> { %14079 = vst [vmem:[#allocation108_spill] sm:$0xff] %v9072_v4  ;;  %14081 = vst [vmem:[#allocation143_spill] sm:$0xff] %v9076_v7  ;;  %v529_v19 = vld [vmem:[%s8262_s14 + $0x61] sm:$0xff]  ;;  %v14086_v41 = vld [vmem:[#allocation65_spill] sm:$0xff]  ;;  %v9107_v4 = vstv %s8963_s16 }
  0xe3   : >> { %14083 = vst [vmem:[#allocation107_spill] sm:$0xff] %v9080_v63  ;;  %14085 = vst [vmem:[#allocation144_spill] sm:$0xff] %v9084_v40  ;;  %v9092_v20 = vadd.f32 %v14086_v41, %v8665_v23  ;;  %v14088_v14 = vld [vmem:[#allocation64_spill] sm:$0xff]  ;;  %v14090_v26 = vld [vmem:[#allocation63_spill] sm:$0xff]  ;;  %v9126_v15 = vmul.f32 %v9107_v4, %v517_v51  ;;  %v9142_v51 = vmul.f32 %v9107_v4, %v521_v52 }
  0xe4   : >> { %v9096_v8 = vadd.f32 %v14088_v14, %v8668_v24  ;;  %v9100_v22 = vadd.f32 %v14090_v26, %v8671_v30  ;;  %v530_v61 = vld [vmem:[%s8262_s14 + $0x69] sm:$0xff]  ;;  %v531_v40 = vld [vmem:[%s8262_s14 + $0x71] sm:$0xff]  ;;  %v532_v63 = vld [vmem:[%s8262_s14 + $0x79] sm:$0x3]  ;;  %v9158_v52 = vmul.f32 %v9107_v4, %v525_v13  ;;  %v9174_v13 = vmul.f32 %v9107_v4, %v529_v19 }
  0xe5   : >> { %14087 = vst [vmem:[#allocation106_spill] sm:$0xff] %v9092_v20  ;;  %v533_v7 = vld [vmem:[%s8262_s14 + $0x81] sm:$0xff]  ;;  %v14094_v24 = vld [vmem:[#allocation61_spill] sm:$0xff]  ;;  %v14096_v30 = vld [vmem:[#allocation60_spill] sm:$0xff] }
  0xe6   : >> { %14089 = vst [vmem:[#allocation105_spill] sm:$0xff] %v9096_v8  ;;  %14091 = vst [vmem:[#allocation145_spill] sm:$0xff] %v9100_v22  ;;  %v14092_v23 = vld [vmem:[#allocation62_spill] sm:$0xff]  ;;  %v9115_v14 = vadd.f32 %v14094_v24, %v8677_v28  ;;  %v9119_v26 = vadd.f32 %v14096_v30, %v8680_v34  ;;  %v534_v22 = vld [vmem:[%s8262_s14 + $0x89] sm:$0xff]  ;;  %v9133_v34 = vmul.f32 %v9107_v4, %v518_v5 }
  0xe7   : >> { %v9111_v41 = vadd.f32 %v14092_v23, %v8674_v27  ;;  %v535_v8 = vld [vmem:[%s8262_s14 + $0x91] sm:$0xff]  ;;  %v536_v20 = vld [vmem:[%s8262_s14 + $0x99] sm:$0x3]  ;;  %v537_v59 = vld [vmem:[%s8262_s14 + $0xa1] sm:$0xff]  ;;  %v9136_v30 = vmul.f32 %v9107_v4, %v519_v46  ;;  %v9149_v5 = vmul.f32 %v9107_v4, %v522_v18  ;;  %v9152_v46 = vmul.f32 %v9107_v4, %v523_v0 }
  0xe8   : >> { %14095 = vst [vmem:[#allocation146_spill] sm:$0xff] %v9115_v14  ;;  %14097 = vst [vmem:[#allocation103_spill] sm:$0xff] %v9119_v26  ;;  %v538_v27 = vld [vmem:[%s8262_s14 + $0xa9] sm:$0xff]  ;;  %v539_v23 = vld [vmem:[%s8262_s14 + $0xb1] sm:$0xff]  ;;  %v9139_v26 = vmul.f32 %v9107_v4, %v520_v21  ;;  %v9155_v21 = vmul.f32 %v9107_v4, %v524_v33  ;;  %v9165_v18 = vmul.f32 %v9107_v4, %v526_v25 }
  0xe9   : >> { %14093 = vst [vmem:[#allocation104_spill] sm:$0xff] %v9111_v41  ;;  %v540_v28 = vld [vmem:[%s8262_s14 + $0xb9] sm:$0x3]  ;;  %v541_v24 = vld [vmem:[%s8262_s14 + $0xc1] sm:$0xff]  ;;  %v542_v14 = vld [vmem:[%s8262_s14 + $0xc9] sm:$0xff]  ;;  %v9168_v0 = vmul.f32 %v9107_v4, %v527_v6  ;;  %v9171_v33 = vmul.f32 %v9107_v4, %v528_v29  ;;  %v9181_v25 = vmul.f32 %v9107_v4, %v530_v61  ;;  %v9184_v6 = vmul.f32 %v9107_v4, %v531_v40 }
  0xea   : >> { %v543_v41 = vld [vmem:[%s8262_s14 + $0xd1] sm:$0xff]  ;;  %v544_v62 = vld [vmem:[%s8262_s14 + $0xd9] sm:$0x3]  ;;  %v545_v42 = vld [vmem:[%s8262_s14 + $0xe1] sm:$0xff]  ;;  %v9187_v29 = vmul.f32 %v9107_v4, %v532_v63  ;;  %v9190_v19 = vmul.f32 %v9107_v4, %v533_v7  ;;  %v9197_v61 = vmul.f32 %v9107_v4, %v534_v22  ;;  %v9200_v40 = vmul.f32 %v9107_v4, %v535_v8 }
  0xeb   : >> { %v546_v9 = vld [vmem:[%s8262_s14 + $0xe9] sm:$0xff]  ;;  %v547_v47 = vld [vmem:[%s8262_s14 + $0xf1] sm:$0xff]  ;;  %v548_v3 = vld [vmem:[%s8262_s14 + $0xf9] sm:$0x3]  ;;  %v9203_v63 = vmul.f32 %v9107_v4, %v536_v20  ;;  %v9206_v7 = vmul.f32 %v9107_v4, %v537_v59  ;;  %v9213_v22 = vmul.f32 %v9107_v4, %v538_v27  ;;  %v9216_v8 = vmul.f32 %v9107_v4, %v539_v23 }
  0xec   : >> { %v549_v45 = vld [vmem:[%s8262_s14 + $0x101] sm:$0xff]  ;;  %v550_v44 = vld [vmem:[%s8262_s14 + $0x109] sm:$0xff]  ;;  %v551_v12 = vld [vmem:[%s8262_s14 + $0x111] sm:$0xff]  ;;  %14098 = vst [vmem:[#allocation147_spill] sm:$0xff] %v9187_v29  ;;  %v9219_v20 = vmul.f32 %v9107_v4, %v540_v28  ;;  %v9222_v59 = vmul.f32 %v9107_v4, %v541_v24  ;;  %v9229_v27 = vmul.f32 %v9107_v4, %v542_v14  ;;  %v9232_v23 = vmul.f32 %v9107_v4, %v543_v41 }
  0xed   : >> { %v552_v43 = vld [vmem:[%s8262_s14 + $0x119] sm:$0x3]  ;;  %v553_v49 = vld [vmem:[%s8262_s14 + $0x121] sm:$0xff]  ;;  %14099 = vst [vmem:[#allocation102_spill] sm:$0xff] %v9190_v19  ;;  %v554_v50 = vld [vmem:[%s8262_s14 + $0x129] sm:$0xff]  ;;  %v9235_v28 = vmul.f32 %v9107_v4, %v544_v62  ;;  %v9238_v24 = vmul.f32 %v9107_v4, %v545_v42  ;;  %v9245_v14 = vmul.f32 %v9107_v4, %v546_v9  ;;  %v9248_v41 = vmul.f32 %v9107_v4, %v547_v47 }
  0xee   : >> { %v555_v48 = vld [vmem:[%s8262_s14 + $0x131] sm:$0xff]  ;;  %v556_v36 = vld [vmem:[%s8262_s14 + $0x139] sm:$0x3]  ;;  %v557_v37 = vld [vmem:[%s8262_s14 + $0x141] sm:$0xff]  ;;  %14100 = vst [vmem:[#allocation101_spill] sm:$0xff] %v9197_v61  ;;  %v9251_v62 = vmul.f32 %v9107_v4, %v548_v3  ;;  %v9254_v42 = vmul.f32 %v9107_v4, %v549_v45  ;;  %v9261_v9 = vmul.f32 %v9107_v4, %v550_v44  ;;  %v9264_v47 = vmul.f32 %v9107_v4, %v551_v12 }
  0xef   : >> { %14101 = vst [vmem:[#allocation148_spill] sm:$0xff] %v9200_v40  ;;  %14102 = vst [vmem:[#allocation100_spill] sm:$0xff] %v9203_v63  ;;  %v558_v38 = vld [vmem:[%s8262_s14 + $0x149] sm:$0xff]  ;;  %v559_v19 = vld [vmem:[%s8262_s14 + $0x151] sm:$0xff]  ;;  %v9267_v3 = vmul.f32 %v9107_v4, %v552_v43  ;;  %v9270_v45 = vmul.f32 %v9107_v4, %v553_v49  ;;  %v9277_v44 = vmul.f32 %v9107_v4, %v554_v50 }
  0xf0   : >> { %14103 = vst [vmem:[#allocation149_spill] sm:$0xff] %v9206_v7  ;;  %v560_v39 = vld [vmem:[%s8262_s14 + $0x159] sm:$0x3]  ;;  %v561_v29 = vld [vmem:[%s8262_s14 + $0x161] sm:$0xff]  ;;  %14104 = vst [vmem:[#allocation99_spill] sm:$0xff] %v9213_v22  ;;  %v9280_v12 = vmul.f32 %v9107_v4, %v555_v48  ;;  %v9283_v43 = vmul.f32 %v9107_v4, %v556_v36  ;;  %v9286_v49 = vmul.f32 %v9107_v4, %v557_v37 }
  0xf1   : >> { %14105 = vst [vmem:[#allocation150_spill] sm:$0xff] %v9216_v8  ;;  %14106 = vst [vmem:[#allocation98_spill] sm:$0xff] %v9219_v20  ;;  %v562_v7 = vld [vmem:[%s8262_s14 + $0x169] sm:$0xff]  ;;  %v563_v63 = vld [vmem:[%s8262_s14 + $0x171] sm:$0xff]  ;;  %v9293_v50 = vmul.f32 %v9107_v4, %v558_v38  ;;  %v9296_v48 = vmul.f32 %v9107_v4, %v559_v19  ;;  %v9299_v36 = vmul.f32 %v9107_v4, %v560_v39 }
  0xf2   : >> { %14107 = vst [vmem:[#allocation97_spill] sm:$0xff] %v9222_v59  ;;  %v564_v40 = vld [vmem:[%s8262_s14 + $0x179] sm:$0x3]  ;;  %v565_v61 = vld [vmem:[%s8262_s14 + $0x181] sm:$0xff]  ;;  %14108 = vst [vmem:[#allocation151_spill] sm:$0xff] %v9229_v27  ;;  %v9302_v37 = vmul.f32 %v9107_v4, %v561_v29  ;;  %v9309_v38 = vmul.f32 %v9107_v4, %v562_v7  ;;  %v9312_v19 = vmul.f32 %v9107_v4, %v563_v63 }
  0xf3   : >> { %14109 = vst [vmem:[#allocation96_spill] sm:$0xff] %v9232_v23  ;;  %14110 = vst [vmem:[#allocation152_spill] sm:$0xff] %v9235_v28  ;;  %v566_v59 = vld [vmem:[%s8262_s14 + $0x189] sm:$0xff]  ;;  %v567_v20 = vld [vmem:[%s8262_s14 + $0x191] sm:$0xff]  ;;  %v9315_v39 = vmul.f32 %v9107_v4, %v564_v40  ;;  %v9318_v29 = vmul.f32 %v9107_v4, %v565_v61 }
  0xf4   : >> { %14111 = vst [vmem:[#allocation95_spill] sm:$0xff] %v9238_v24  ;;  %v568_v8 = vld [vmem:[%s8262_s14 + $0x199] sm:$0x3]  ;;  %v569_v22 = vld [vmem:[%s8262_s14 + $0x1a1] sm:$0xff]  ;;  %14112 = vst [vmem:[#allocation153_spill] sm:$0xff] %v9245_v14  ;;  %v9325_v60 = vmul.f32 %v9107_v4, %v566_v59  ;;  %v9328_v7 = vmul.f32 %v9107_v4, %v567_v20 }
  0xf5   : >> { %14113 = vst [vmem:[#allocation94_spill] sm:$0xff] %v9248_v41  ;;  %14114 = vst [vmem:[#allocation93_spill] sm:$0xff] %v9251_v62  ;;  %v570_v24 = vld [vmem:[%s8262_s14 + $0x1a9] sm:$0xff]  ;;  %v571_v28 = vld [vmem:[%s8262_s14 + $0x1b1] sm:$0xff]  ;;  %v9331_v63 = vmul.f32 %v9107_v4, %v568_v8  ;;  %v9334_v40 = vmul.f32 %v9107_v4, %v569_v22 }
  0xf6   : >> { %14115 = vst [vmem:[#allocation154_spill] sm:$0xff] %v9254_v42  ;;  %v572_v23 = vld [vmem:[%s8262_s14 + $0x1b9] sm:$0x3]  ;;  %v573_v27 = vld [vmem:[%s8262_s14 + $0x1c1] sm:$0xff]  ;;  %14116 = vst [vmem:[#allocation92_spill] sm:$0xff] %v9261_v9  ;;  %v9344_v59 = vmul.f32 %v9107_v4, %v571_v28 }
  0xf7   : >> { %14117 = vst [vmem:[#allocation155_spill] sm:$0xff] %v9264_v47  ;;  %14118 = vst [vmem:[#allocation91_spill] sm:$0xff] %v9267_v3  ;;  %v574_v42 = vld [vmem:[%s8262_s14 + $0x1c9] sm:$0xff]  ;;  %v575_v62 = vld [vmem:[%s8262_s14 + $0x1d1] sm:$0xff]  ;;  %v9347_v20 = vmul.f32 %v9107_v4, %v572_v23  ;;  %v9350_v22 = vmul.f32 %v9107_v4, %v573_v27 }
  0xf8   : >> { %14119 = vst [vmem:[#allocation156_spill] sm:$0xff] %v9270_v45  ;;  %v576_v41 = vld [vmem:[%s8262_s14 + $0x1d9] sm:$0x3]  ;;  %v577_v14 = vld [vmem:[%s8262_s14 + $0x1e1] sm:$0xff]  ;;  %14120 = vst [vmem:[#allocation90_spill] sm:$0xff] %v9277_v44 }
  0xf9   : >> { %14121 = vst [vmem:[#allocation89_spill] sm:$0xff] %v9280_v12  ;;  %14122 = vst [vmem:[#allocation157_spill] sm:$0xff] %v9283_v43  ;;  %v578_v45 = vld [vmem:[%s8262_s14 + $0x1e9] sm:$0xff]  ;;  %v579_v3 = vld [vmem:[%s8262_s14 + $0x1f1] sm:$0xff]  ;;  %v9362_v28 = vmul.f32 %v9107_v4, %v576_v41  ;;  %v9365_v23 = vmul.f32 %v9107_v4, %v577_v14 }
  0xfa   : >> { %14123 = vst [vmem:[#allocation88_spill] sm:$0xff] %v9286_v49  ;;  %v580_v47 = vld [vmem:[%s8262_s14 + $0x1f9] sm:$0x3]  ;;  %v581_v9 = vld [vmem:[%s8262_s14 + $0x201] sm:$0xff]  ;;  %14124 = vst [vmem:[#allocation158_spill] sm:$0xff] %v9293_v50 }
  0xfb   : >> { %14125 = vst [vmem:[#allocation87_spill] sm:$0xff] %v9296_v48  ;;  %14126 = vst [vmem:[#allocation159_spill] sm:$0xff] %v9299_v36  ;;  %v582_v49 = vld [vmem:[%s8262_s14 + $0x209] sm:$0xff]  ;;  %v583_v43 = vld [vmem:[%s8262_s14 + $0x211] sm:$0xff]  ;;  %v9380_v41 = vmul.f32 %v9107_v4, %v581_v9 }
  0xfc   : >> { %14127 = vst [vmem:[#allocation86_spill] sm:$0xff] %v9302_v37  ;;  %v584_v12 = vld [vmem:[%s8262_s14 + $0x219] sm:$0x3]  ;;  %v585_v44 = vld [vmem:[%s8262_s14 + $0x221] sm:$0xff]  ;;  %14128 = vst [vmem:[#allocation160_spill] sm:$0xff] %v9309_v38  ;;  %v9341_v38 = vmul.f32 %v9107_v4, %v570_v24  ;;  %v9359_v24 = vmul.f32 %v9107_v4, %v575_v62  ;;  %v9377_v62 = vmul.f32 %v9107_v4, %v580_v47 }
  0xfd   : >> { %14129 = vst [vmem:[#allocation85_spill] sm:$0xff] %v9312_v19  ;;  %14130 = vst [vmem:[#allocation161_spill] sm:$0xff] %v9315_v39  ;;  %v586_v37 = vld [vmem:[%s8262_s14 + $0x229] sm:$0xff]  ;;  %v587_v36 = vld [vmem:[%s8262_s14 + $0x231] sm:$0xff]  ;;  %v9395_v47 = vmul.f32 %v9107_v4, %v585_v44 }
  0xfe   : >> { %14131 = vst [vmem:[#allocation84_spill] sm:$0xff] %v9318_v29  ;;  %v588_v48 = vld [vmem:[%s8262_s14 + $0x239] sm:$0x3]  ;;  %v589_v50 = vld [vmem:[%s8262_s14 + $0x241] sm:$0xff]  ;;  %14132 = vst [vmem:[#allocation162_spill] sm:$0xff] %v9328_v7  ;;  %v9356_v7 = vmul.f32 %v9107_v4, %v574_v42  ;;  %v9374_v42 = vmul.f32 %v9107_v4, %v579_v3  ;;  %v9392_v3 = vmul.f32 %v9107_v4, %v584_v12 }
  0xff   : >> { %14133 = vst [vmem:[#allocation83_spill] sm:$0xff] %v9331_v63  ;;  %14134 = vst [vmem:[#allocation163_spill] sm:$0xff] %v9334_v40  ;;  %v590_v61 = vld [vmem:[%s8262_s14 + $0x249] sm:$0xff]  ;;  %v591_v29 = vld [vmem:[%s8262_s14 + $0x251] sm:$0xff]  ;;  %v9410_v12 = vmul.f32 %v9107_v4, %v589_v50 }
 0x100   : >> { %v592_v39 = vld [vmem:[%s8262_s14 + $0x259] sm:$0x3]  ;;  %v593_v19 = vld [vmem:[%s8262_s14 + $0x261] sm:$0xff]  ;;  %14135 = vst [vmem:[#allocation82_spill] sm:$0xff] %v9344_v59  ;;  %14136 = vst [vmem:[#allocation81_spill] sm:$0xff] %v9347_v20  ;;  %v9371_v59 = vmul.f32 %v9107_v4, %v578_v45  ;;  %v9389_v45 = vmul.f32 %v9107_v4, %v583_v43  ;;  %v9407_v43 = vmul.f32 %v9107_v4, %v588_v48 }
 0x101   : >> { %14137 = vst [vmem:[#allocation80_spill] sm:$0xff] %v9350_v22  ;;  %v594_v8 = vld [vmem:[%s8262_s14 + $0x269] sm:$0xff]  ;;  %v595_v40 = vld [vmem:[%s8262_s14 + $0x271] sm:$0xff]  ;;  %v596_v63 = vld [vmem:[%s8262_s14 + $0x279] sm:$0x3]  ;;  %v9425_v48 = vmul.f32 %v9107_v4, %v593_v19 }
 0x102   : >> { %14138 = vst [vmem:[#allocation164_spill] sm:$0xff] %v9359_v24  ;;  %14139 = vst [vmem:[#allocation79_spill] sm:$0xff] %v9362_v28  ;;  %v597_v27 = vld [vmem:[%s8262_s14 + $0x281] sm:$0xff]  ;;  %v598_v22 = vld [vmem:[%s8262_s14 + $0x289] sm:$0xff]  ;;  %v9386_v24 = vmul.f32 %v9107_v4, %v582_v49  ;;  %v9404_v49 = vmul.f32 %v9107_v4, %v587_v36  ;;  %v9422_v36 = vmul.f32 %v9107_v4, %v592_v39 }
 0x103   : >> { %14140 = vst [vmem:[#allocation165_spill] sm:$0xff] %v9365_v23  ;;  %v599_v20 = vld [vmem:[%s8262_s14 + $0x291] sm:$0xff]  ;;  %14141 = vst [vmem:[#allocation78_spill] sm:$0xff] %v9374_v42  ;;  %v600_v14 = vld [vmem:[%s8262_s14 + $0x299] sm:$0x3]  ;;  %v9401_v42 = vmul.f32 %v9107_v4, %v586_v37  ;;  %v9419_v37 = vmul.f32 %v9107_v4, %v591_v29  ;;  %v9437_v29 = vmul.f32 %v9107_v4, %v596_v63 }
 0x104   : >> { %14142 = vst [vmem:[#allocation77_spill] sm:$0xff] %v9377_v62  ;;  %14143 = vst [vmem:[#allocation76_spill] sm:$0xff] %v9380_v41  ;;  %v601_v23 = vld [vmem:[%s8262_s14 + $0x2a1] sm:$0xff]  ;;  %v602_v28 = vld [vmem:[%s8262_s14 + $0x2a9] sm:$0xff]  ;;  %v9440_v39 = vmul.f32 %v9107_v4, %v597_v27 }
 0x105   : >> { %14144 = vst [vmem:[#allocation75_spill] sm:$0xff] %v9389_v45  ;;  %14145 = vst [vmem:[#allocation166_spill] sm:$0xff] %v9392_v3  ;;  %v603_v9 = vld [vmem:[%s8262_s14 + $0x2b1] sm:$0xff]  ;;  %v604_v41 = vld [vmem:[%s8262_s14 + $0x2b9] sm:$0x3]  ;;  %v9416_v45 = vmul.f32 %v9107_v4, %v590_v61  ;;  %v9434_v61 = vmul.f32 %v9107_v4, %v595_v40  ;;  %v9452_v40 = vmul.f32 %v9107_v4, %v600_v14 }
 0x106   : >> { %14146 = vst [vmem:[#allocation74_spill] sm:$0xff] %v9395_v47  ;;  %v605_v62 = vld [vmem:[%s8262_s14 + $0x2c1] sm:$0xff]  ;;  %14147 = vst [vmem:[#allocation73_spill] sm:$0xff] %v9404_v49  ;;  %v606_v44 = vld [vmem:[%s8262_s14 + $0x2c9] sm:$0xff]  ;;  %v9431_v49 = vmul.f32 %v9107_v4, %v594_v8  ;;  %v9449_v8 = vmul.f32 %v9107_v4, %v599_v20  ;;  %v9455_v63 = vmul.f32 %v9107_v4, %v601_v23 }
 0x107   : >> { %14148 = vst [vmem:[#allocation72_spill] sm:$0xff] %v9407_v43  ;;  %14149 = vst [vmem:[#allocation71_spill] sm:$0xff] %v9410_v12  ;;  %v607_v47 = vld [vmem:[%s8262_s14 + $0x2d1] sm:$0xff]  ;;  %v608_v3 = vld [vmem:[%s8262_s14 + $0x2d9] sm:$0x3]  ;;  %v9470_v20 = vmul.f32 %v9107_v4, %v605_v62  ;;  %v9476_v23 = vmul.f32 %v9107_v4, %v606_v44 }
 0x108   : >> { %14150 = vst [vmem:[#allocation70_spill] sm:$0xff] %v9419_v37  ;;  %14151 = vst [vmem:[#allocation69_spill] sm:$0xff] %v9422_v36  ;;  %v609_v50 = vld [vmem:[%s8262_s14 + $0x2e1] sm:$0xff]  ;;  %v610_v12 = vld [vmem:[%s8262_s14 + $0x2e9] sm:$0xff]  ;;  %v9446_v37 = vmul.f32 %v9107_v4, %v598_v22  ;;  %v9467_v22 = vmul.f32 %v9107_v4, %v604_v41 }
 0x109   : >> { %14152 = vst [vmem:[#allocation68_spill] sm:$0xff] %v9425_v48  ;;  %v611_v43 = vld [vmem:[%s8262_s14 + $0x2f1] sm:$0xff]  ;;  %14153 = vst [vmem:[#allocation67_spill] sm:$0xff] %v9431_v49  ;;  %v612_v19 = vld [vmem:[%s8262_s14 + $0x2f9] sm:$0x3]  ;;  %v9464_v49 = vmul.f32 %v9107_v4, %v603_v9  ;;  %v9485_v9 = vmul.f32 %v9107_v4, %v609_v50  ;;  %v9488_v41 = vmul.f32 %v9107_v4, %v610_v12 }
 0x10a   : >> { %14154 = vst [vmem:[#allocation66_spill] sm:$0xff] %v9434_v61  ;;  %14155 = vst [vmem:[#allocation65_spill] sm:$0xff] %v9437_v29  ;;  %v613_v48 = vld [vmem:[%s8262_s14 + $0x301] sm:$0xff]  ;;  %v614_v36 = vld [vmem:[%s8262_s14 + $0x309] sm:$0xff]  ;;  %v9461_v61 = vmul.f32 %v9107_v4, %v602_v28  ;;  %v9482_v28 = vmul.f32 %v9107_v4, %v608_v3  ;;  %v9491_v62 = vmul.f32 %v9107_v4, %v611_v43 }
 0x10b   : >> { %14156 = vst [vmem:[#allocation64_spill] sm:$0xff] %v9440_v39  ;;  %14157 = vst [vmem:[#allocation63_spill] sm:$0xff] %v9449_v8  ;;  %v615_v29 = vld [vmem:[%s8262_s14 + $0x311] sm:$0xff]  ;;  %v616_v27 = vld [vmem:[%s8262_s14 + $0x319] sm:$0x3]  ;;  %v9497_v44 = vmul.f32 %v9107_v4, %v613_v48 }
 0x10c   : >> { %14158 = vst [vmem:[#allocation62_spill] sm:$0xff] %v9452_v40  ;;  %14159 = vst [vmem:[#allocation61_spill] sm:$0xff] %v9455_v63  ;;  %v617_v39 = vld [vmem:[%s8262_s14 + $0x321] sm:$0xff]  ;;  %v618_v14 = vld [vmem:[%s8262_s14 + $0x329] sm:$0xff]  ;;  %v9479_v63 = vmul.f32 %v9107_v4, %v607_v47  ;;  %v9500_v47 = vmul.f32 %v9107_v4, %v614_v36  ;;  %v9503_v3 = vmul.f32 %v9107_v4, %v615_v29 }
 0x10d   : >> { %14160 = vst [vmem:[#allocation60_spill] sm:$0xff] %v9470_v20  ;;  %v619_v40 = vld [vmem:[%s8262_s14 + $0x331] sm:$0xff]  ;;  %v620_v8 = vld [vmem:[%s8262_s14 + $0x339] sm:$0x3]  ;;  %v9494_v20 = vmul.f32 %v9107_v4, %v612_v19  ;;  %v9506_v50 = vmul.f32 %v9107_v4, %v616_v27  ;;  %v9509_v12 = vmul.f32 %v9107_v4, %v617_v39  ;;  %v9512_v43 = vmul.f32 %v9107_v4, %v618_v14  ;;  %v14184_v14 = vld [vmem:[#allocation150_spill] sm:$0xff] }
 0x10e   : >> { %v9515_v19 = vmul.f32 %v9107_v4, %v619_v40  ;;  %v9518_v48 = vmul.f32 %v9107_v4, %v620_v8  ;;  %v9522_v36 = vadd.f32 %v9126_v15, %v8684_v31  ;;  %v9526_v29 = vadd.f32 %v9133_v34, %v8688_v32  ;;  %v14162_v15 = vld [vmem:[#allocation50_spill] sm:$0xff]  ;;  %v14165_v34 = vld [vmem:[#allocation49_spill] sm:$0xff]  ;;  %v14183_v40 = vld [vmem:[#allocation43_spill] sm:$0xff] }
 0x10f   : >> { %v9530_v39 = vadd.f32 %v9136_v30, %v8692_v2  ;;  %v9534_v27 = vadd.f32 %v9139_v26, %v8696_v35  ;;  %v9538_v4 = vadd.f32 %v9142_v51, %v8700_v1  ;;  %v9542_v31 = vadd.f32 %v9149_v5, %v8704_v10  ;;  %v14163_v26 = vld [vmem:[#allocation147_spill] sm:$0xff]  ;;  %v14166_v30 = vld [vmem:[#allocation102_spill] sm:$0xff]  ;;  %v14168_v51 = vld [vmem:[#allocation48_spill] sm:$0xff] }
 0x110   : >> { %v9546_v32 = vadd.f32 %v9152_v46, %v8708_v11  ;;  %v9550_v2 = vadd.f32 %v9155_v21, %v8712_v16  ;;  %v9554_v35 = vadd.f32 %v9158_v52, %v8716_v17  ;;  %v9558_v1 = vadd.f32 %v9165_v18, %v8720_v55  ;;  %v14169_v5 = vld [vmem:[#allocation101_spill] sm:$0xff]  ;;  %v14171_v46 = vld [vmem:[#allocation47_spill] sm:$0xff]  ;;  %v14172_v21 = vld [vmem:[#allocation148_spill] sm:$0xff] }
 0x111   : >> { %v9562_v10 = vadd.f32 %v9168_v0, %v8724_v54  ;;  %v9566_v11 = vadd.f32 %v9171_v33, %v8728_v53  ;;  %v9570_v16 = vadd.f32 %v9174_v13, %v8732_v56  ;;  %v9574_v17 = vadd.f32 %v9181_v25, %v8736_v57  ;;  %v14174_v52 = vld [vmem:[#allocation46_spill] sm:$0xff]  ;;  %v14175_v18 = vld [vmem:[#allocation100_spill] sm:$0xff]  ;;  %v14177_v0 = vld [vmem:[#allocation45_spill] sm:$0xff] }
 0x112   : >> { %v9578_v55 = vadd.f32 %v9184_v6, %v8740_v58  ;;  %v9582_v54 = vadd.f32 %v14163_v26, %v14162_v15  ;;  %v9586_v53 = vadd.f32 %v14166_v30, %v14165_v34  ;;  %v9590_v56 = vadd.f32 %v14169_v5, %v14168_v51  ;;  %v14178_v33 = vld [vmem:[#allocation149_spill] sm:$0xff]  ;;  %v14180_v25 = vld [vmem:[#allocation44_spill] sm:$0xff]  ;;  %v14181_v6 = vld [vmem:[#allocation99_spill] sm:$0xff] }
 0x113   : >> { %v9594_v57 = vadd.f32 %v14172_v21, %v14171_v46  ;;  %v9598_v58 = vadd.f32 %v14175_v18, %v14174_v52  ;;  %v9602_v13 = vadd.f32 %v14178_v33, %v14177_v0  ;;  %v9606_v8 = vadd.f32 %v14181_v6, %v14180_v25  ;;  %v14186_v26 = vld [vmem:[#allocation42_spill] sm:$0xff]  ;;  %v14189_v51 = vld [vmem:[#allocation41_spill] sm:$0xff]  ;;  %v14192_v21 = vld [vmem:[#allocation40_spill] sm:$0xff] }
 0x114   : >> { %14161 = vst [vmem:[#allocation167_spill] sm:$0xff] %v9578_v55  ;;  %14164 = vst [vmem:[#allocation50_spill] sm:$0xff] %v9582_v54  ;;  %v9610_v15 = vadd.f32 %v14184_v14, %v14183_v40  ;;  %v14187_v34 = vld [vmem:[#allocation98_spill] sm:$0xff]  ;;  %v14190_v5 = vld [vmem:[#allocation97_spill] sm:$0xff] }
 0x115   : >> { %14167 = vst [vmem:[#allocation49_spill] sm:$0xff] %v9586_v53  ;;  %14170 = vst [vmem:[#allocation48_spill] sm:$0xff] %v9590_v56  ;;  %v9614_v30 = vadd.f32 %v14187_v34, %v14186_v26  ;;  %v9618_v46 = vadd.f32 %v14190_v5, %v14189_v51  ;;  %v14193_v52 = vld [vmem:[#allocation151_spill] sm:$0xff]  ;;  %v14196_v33 = vld [vmem:[#allocation96_spill] sm:$0xff] }
 0x116   : >> { %14173 = vst [vmem:[#allocation47_spill] sm:$0xff] %v9594_v57  ;;  %14176 = vst [vmem:[#allocation46_spill] sm:$0xff] %v9598_v58  ;;  %v9622_v18 = vadd.f32 %v14193_v52, %v14192_v21  ;;  %v14195_v0 = vld [vmem:[#allocation39_spill] sm:$0xff]  ;;  %v14198_v6 = vld [vmem:[#allocation38_spill] sm:$0xff] }
 0x117   : >> { %14179 = vst [vmem:[#allocation45_spill] sm:$0xff] %v9602_v13  ;;  %14182 = vst [vmem:[#allocation44_spill] sm:$0xff] %v9606_v8  ;;  %v9626_v25 = vadd.f32 %v14196_v33, %v14195_v0  ;;  %v14199_v8 = vld [vmem:[#allocation152_spill] sm:$0xff]  ;;  %v14201_v14 = vld [vmem:[#allocation37_spill] sm:$0xff] }
 0x118   : >> { %14185 = vst [vmem:[#allocation43_spill] sm:$0xff] %v9610_v15  ;;  %14188 = vst [vmem:[#allocation42_spill] sm:$0xff] %v9614_v30  ;;  %v9630_v40 = vadd.f32 %v14199_v8, %v14198_v6  ;;  %v14202_v15 = vld [vmem:[#allocation95_spill] sm:$0xff]  ;;  %v14204_v34 = vld [vmem:[#allocation36_spill] sm:$0xff] }
 0x119   : >> { %14191 = vst [vmem:[#allocation41_spill] sm:$0xff] %v9618_v46  ;;  %14194 = vst [vmem:[#allocation40_spill] sm:$0xff] %v9622_v18  ;;  %v9634_v26 = vadd.f32 %v14202_v15, %v14201_v14  ;;  %v14205_v30 = vld [vmem:[#allocation153_spill] sm:$0xff]  ;;  %v14207_v5 = vld [vmem:[#allocation35_spill] sm:$0xff] }
 0x11a   : >> { %14197 = vst [vmem:[#allocation39_spill] sm:$0xff] %v9626_v25  ;;  %14200 = vst [vmem:[#allocation38_spill] sm:$0xff] %v9630_v40  ;;  %v9638_v51 = vadd.f32 %v14205_v30, %v14204_v34  ;;  %v14208_v46 = vld [vmem:[#allocation94_spill] sm:$0xff]  ;;  %v14211_v18 = vld [vmem:[#allocation93_spill] sm:$0xff] }
 0x11b   : >> { %14203 = vst [vmem:[#allocation37_spill] sm:$0xff] %v9634_v26  ;;  %v9642_v21 = vadd.f32 %v14208_v46, %v14207_v5  ;;  %v14210_v52 = vld [vmem:[#allocation34_spill] sm:$0xff]  ;;  %v14213_v33 = vld [vmem:[#allocation33_spill] sm:$0xff]  ;;  %v14216_v6 = vld [vmem:[#allocation32_spill] sm:$0xff] }
 0x11c   : >> { %14206 = vst [vmem:[#allocation36_spill] sm:$0xff] %v9638_v51  ;;  %v9646_v0 = vadd.f32 %v14211_v18, %v14210_v52  ;;  %v14214_v25 = vld [vmem:[#allocation154_spill] sm:$0xff]  ;;  %v14217_v40 = vld [vmem:[#allocation92_spill] sm:$0xff]  ;;  %v14219_v14 = vld [vmem:[#allocation31_spill] sm:$0xff] }
 0x11d   : >> { %14209 = vst [vmem:[#allocation35_spill] sm:$0xff] %v9642_v21  ;;  %v9650_v8 = vadd.f32 %v14214_v25, %v14213_v33  ;;  %v9654_v15 = vadd.f32 %v14217_v40, %v14216_v6  ;;  %v14220_v26 = vld [vmem:[#allocation155_spill] sm:$0xff]  ;;  %v14222_v34 = vld [vmem:[#allocation30_spill] sm:$0xff]  ;;  %v14225_v5 = vld [vmem:[#allocation29_spill] sm:$0xff] }
 0x11e   : >> { %14212 = vst [vmem:[#allocation34_spill] sm:$0xff] %v9646_v0  ;;  %v9658_v30 = vadd.f32 %v14220_v26, %v14219_v14  ;;  %v14223_v51 = vld [vmem:[#allocation91_spill] sm:$0xff]  ;;  %v14226_v21 = vld [vmem:[#allocation156_spill] sm:$0xff]  ;;  %v14229_v0 = vld [vmem:[#allocation90_spill] sm:$0xff] }
 0x11f   : >> { %14215 = vst [vmem:[#allocation33_spill] sm:$0xff] %v9650_v8  ;;  %14218 = vst [vmem:[#allocation32_spill] sm:$0xff] %v9654_v15  ;;  %v9662_v46 = vadd.f32 %v14223_v51, %v14222_v34  ;;  %v9666_v18 = vadd.f32 %v14226_v21, %v14225_v5  ;;  %v14228_v52 = vld [vmem:[#allocation28_spill] sm:$0xff]  ;;  %v14231_v33 = vld [vmem:[#allocation27_spill] sm:$0xff] }
 0x120   : >> { %14221 = vst [vmem:[#allocation31_spill] sm:$0xff] %v9658_v30  ;;  %v9670_v25 = vadd.f32 %v14229_v0, %v14228_v52  ;;  %v14232_v8 = vld [vmem:[#allocation89_spill] sm:$0xff]  ;;  %v14234_v6 = vld [vmem:[#allocation26_spill] sm:$0xff]  ;;  %v14238_v30 = vld [vmem:[#allocation88_spill] sm:$0xff] }
 0x121   : >> { %14224 = vst [vmem:[#allocation30_spill] sm:$0xff] %v9662_v46  ;;  %14227 = vst [vmem:[#allocation29_spill] sm:$0xff] %v9666_v18  ;;  %v9674_v40 = vadd.f32 %v14232_v8, %v14231_v33  ;;  %v14235_v15 = vld [vmem:[#allocation157_spill] sm:$0xff]  ;;  %v14240_v34 = vld [vmem:[#allocation24_spill] sm:$0xff] }
 0x122   : >> { %14230 = vst [vmem:[#allocation28_spill] sm:$0xff] %v9670_v25  ;;  %v9678_v26 = vadd.f32 %v14235_v15, %v14234_v6  ;;  %v14237_v14 = vld [vmem:[#allocation25_spill] sm:$0xff]  ;;  %v14241_v46 = vld [vmem:[#allocation158_spill] sm:$0xff]  ;;  %v14243_v5 = vld [vmem:[#allocation23_spill] sm:$0xff] }
 0x123   : >> { %14233 = vst [vmem:[#allocation27_spill] sm:$0xff] %v9674_v40  ;;  %v9682_v51 = vadd.f32 %v14238_v30, %v14237_v14  ;;  %v9686_v21 = vadd.f32 %v14241_v46, %v14240_v34  ;;  %v14244_v18 = vld [vmem:[#allocation87_spill] sm:$0xff]  ;;  %v14246_v52 = vld [vmem:[#allocation22_spill] sm:$0xff]  ;;  %v14249_v33 = vld [vmem:[#allocation21_spill] sm:$0xff] }
 0x124   : >> { %14236 = vst [vmem:[#allocation26_spill] sm:$0xff] %v9678_v26  ;;  %v9690_v0 = vadd.f32 %v14244_v18, %v14243_v5  ;;  %v14247_v25 = vld [vmem:[#allocation159_spill] sm:$0xff]  ;;  %v14250_v40 = vld [vmem:[#allocation86_spill] sm:$0xff]  ;;  %v14252_v6 = vld [vmem:[#allocation20_spill] sm:$0xff] }
 0x125   : >> { %14239 = vst [vmem:[#allocation25_spill] sm:$0xff] %v9682_v51  ;;  %14242 = vst [vmem:[#allocation24_spill] sm:$0xff] %v9686_v21  ;;  %v9694_v8 = vadd.f32 %v14247_v25, %v14246_v52  ;;  %v9698_v15 = vadd.f32 %v14250_v40, %v14249_v33  ;;  %v14253_v26 = vld [vmem:[#allocation160_spill] sm:$0xff]  ;;  %v14255_v14 = vld [vmem:[#allocation19_spill] sm:$0xff] }
 0x126   : >> { %14245 = vst [vmem:[#allocation23_spill] sm:$0xff] %v9690_v0  ;;  %v9702_v30 = vadd.f32 %v14253_v26, %v14252_v6  ;;  %v14256_v51 = vld [vmem:[#allocation85_spill] sm:$0xff]  ;;  %v14258_v34 = vld [vmem:[#allocation18_spill] sm:$0xff]  ;;  %v14262_v25 = vld [vmem:[#allocation84_spill] sm:$0xff] }
 0x127   : >> { %14248 = vst [vmem:[#allocation22_spill] sm:$0xff] %v9694_v8  ;;  %14251 = vst [vmem:[#allocation21_spill] sm:$0xff] %v9698_v15  ;;  %v9706_v46 = vadd.f32 %v14256_v51, %v14255_v14  ;;  %v14259_v18 = vld [vmem:[#allocation161_spill] sm:$0xff]  ;;  %v14264_v8 = vld [vmem:[#allocation16_spill] sm:$0xff] }
 0x128   : >> { %14254 = vst [vmem:[#allocation20_spill] sm:$0xff] %v9702_v30  ;;  %v9710_v5 = vadd.f32 %v14259_v18, %v14258_v34  ;;  %v14261_v0 = vld [vmem:[#allocation17_spill] sm:$0xff]  ;;  %v9718_v40 = vadd.f32 %v9325_v60, %v14264_v8  ;;  %v14266_v33 = vld [vmem:[#allocation15_spill] sm:$0xff]  ;;  %v14267_v26 = vld [vmem:[#allocation162_spill] sm:$0xff] }
 0x129   : >> { %14257 = vst [vmem:[#allocation19_spill] sm:$0xff] %v9706_v46  ;;  %v9714_v52 = vadd.f32 %v14262_v25, %v14261_v0  ;;  %v9722_v6 = vadd.f32 %v14267_v26, %v14266_v33  ;;  %v14269_v30 = vld [vmem:[#allocation53_spill] sm:$0xff]  ;;  %v14270_v15 = vld [vmem:[#allocation83_spill] sm:$0xff]  ;;  %v14272_v14 = vld [vmem:[#allocation54_spill] sm:$0xff] }
 0x12a   : >> { %14260 = vst [vmem:[#allocation18_spill] sm:$0xff] %v9710_v5  ;;  %14265 = vst [vmem:[#allocation16_spill] sm:$0xff] %v9718_v40  ;;  %v9726_v51 = vadd.f32 %v14270_v15, %v14269_v30  ;;  %v14273_v46 = vld [vmem:[#allocation163_spill] sm:$0xff]  ;;  %v14277_v25 = vld [vmem:[#allocation56_spill] sm:$0xff] }
 0x12b   : >> { %14263 = vst [vmem:[#allocation17_spill] sm:$0xff] %v9714_v52  ;;  %14268 = vst [vmem:[#allocation15_spill] sm:$0xff] %v9722_v6  ;;  %v9730_v34 = vadd.f32 %v14273_v46, %v14272_v14  ;;  %v14275_v18 = vld [vmem:[#allocation55_spill] sm:$0xff]  ;;  %v14278_v52 = vld [vmem:[#allocation82_spill] sm:$0xff] }
 0x12c   : >> { %14271 = vst [vmem:[#allocation53_spill] sm:$0xff] %v9726_v51  ;;  %v9734_v0 = vadd.f32 %v9341_v38, %v14275_v18  ;;  %v9738_v60 = vadd.f32 %v14278_v52, %v14277_v25  ;;  %v14280_v8 = vld [vmem:[#allocation57_spill] sm:$0xff]  ;;  %v14283_v26 = vld [vmem:[#allocation58_spill] sm:$0xff]  ;;  %v14284_v6 = vld [vmem:[#allocation80_spill] sm:$0xff] }
 0x12d   : >> { %14274 = vst [vmem:[#allocation54_spill] sm:$0xff] %v9730_v34  ;;  %v14281_v40 = vld [vmem:[#allocation81_spill] sm:$0xff]  ;;  %v9746_v15 = vadd.f32 %v14284_v6, %v14283_v26  ;;  %v14286_v30 = vld [vmem:[#allocation59_spill] sm:$0xff]  ;;  %v14289_v34 = vld [vmem:[#allocation164_spill] sm:$0xff] }
 0x12e   : >> { %14276 = vst [vmem:[#allocation55_spill] sm:$0xff] %v9734_v0  ;;  %14279 = vst [vmem:[#allocation56_spill] sm:$0xff] %v9738_v60  ;;  %v9742_v33 = vadd.f32 %v14281_v40, %v14280_v8  ;;  %v9750_v46 = vadd.f32 %v9356_v7, %v14286_v30  ;;  %v14288_v14 = vld [vmem:[#allocation51_spill] sm:$0xff]  ;;  %v14291_v18 = vld [vmem:[#allocation52_spill] sm:$0xff] }
 0x12f   : >> { %14285 = vst [vmem:[#allocation58_spill] sm:$0xff] %v9746_v15  ;;  %v9754_v38 = vadd.f32 %v14289_v34, %v14288_v14  ;;  %v14292_v0 = vld [vmem:[#allocation79_spill] sm:$0xff]  ;;  %v14294_v25 = vld [vmem:[#allocation113_spill] sm:$0xff]  ;;  %v14297_v8 = vld [vmem:[#allocation114_spill] sm:$0xff] }
 0x130   : >> { %14282 = vst [vmem:[#allocation57_spill] sm:$0xff] %v9742_v33  ;;  %14287 = vst [vmem:[#allocation59_spill] sm:$0xff] %v9750_v46  ;;  %v9758_v52 = vadd.f32 %v14292_v0, %v14291_v18  ;;  %v14295_v60 = vld [vmem:[#allocation165_spill] sm:$0xff]  ;;  %v9767_v6 = vadd.f32 %v9371_v59, %v14297_v8  ;;  %v14299_v26 = vld [vmem:[#allocation115_spill] sm:$0xff] }
 0x131   : >> { %14290 = vst [vmem:[#allocation51_spill] sm:$0xff] %v9754_v38  ;;  %v9762_v40 = vadd.f32 %v14295_v60, %v14294_v25  ;;  %v14300_v7 = vld [vmem:[#allocation78_spill] sm:$0xff]  ;;  %v14302_v46 = vld [vmem:[#allocation116_spill] sm:$0xff]  ;;  %v14303_v34 = vld [vmem:[#allocation77_spill] sm:$0xff] }
 0x132   : >> { %14293 = vst [vmem:[#allocation52_spill] sm:$0xff] %v9758_v52  ;;  %14298 = vst [vmem:[#allocation102_spill] sm:$0xff] %v9767_v6  ;;  %v9771_v30 = vadd.f32 %v14300_v7, %v14299_v26  ;;  %v9775_v14 = vadd.f32 %v14303_v34, %v14302_v46  ;;  %v14305_v38 = vld [vmem:[#allocation117_spill] sm:$0xff]  ;;  %v14306_v0 = vld [vmem:[#allocation76_spill] sm:$0xff] }
 0x133   : >> { %14296 = vst [vmem:[#allocation147_spill] sm:$0xff] %v9762_v40  ;;  %v9779_v18 = vadd.f32 %v14306_v0, %v14305_v38  ;;  %v14308_v52 = vld [vmem:[#allocation118_spill] sm:$0xff]  ;;  %v14310_v25 = vld [vmem:[#allocation119_spill] sm:$0xff]  ;;  %v14313_v8 = vld [vmem:[#allocation120_spill] sm:$0xff] }
 0x134   : >> { %14301 = vst [vmem:[#allocation101_spill] sm:$0xff] %v9771_v30  ;;  %14304 = vst [vmem:[#allocation148_spill] sm:$0xff] %v9775_v14  ;;  %v9783_v60 = vadd.f32 %v9386_v24, %v14308_v52  ;;  %v14311_v40 = vld [vmem:[#allocation75_spill] sm:$0xff]  ;;  %v14314_v6 = vld [vmem:[#allocation166_spill] sm:$0xff] }
 0x135   : >> { %14307 = vst [vmem:[#allocation100_spill] sm:$0xff] %v9779_v18  ;;  %v9787_v59 = vadd.f32 %v14311_v40, %v14310_v25  ;;  %v9791_v26 = vadd.f32 %v14314_v6, %v14313_v8  ;;  %v14316_v7 = vld [vmem:[#allocation121_spill] sm:$0xff]  ;;  %v14317_v30 = vld [vmem:[#allocation74_spill] sm:$0xff]  ;;  %v14321_v0 = vld [vmem:[#allocation123_spill] sm:$0xff] }
 0x136   : >> { %14309 = vst [vmem:[#allocation149_spill] sm:$0xff] %v9783_v60  ;;  %v9795_v46 = vadd.f32 %v14317_v30, %v14316_v7  ;;  %v14319_v34 = vld [vmem:[#allocation122_spill] sm:$0xff]  ;;  %v14322_v18 = vld [vmem:[#allocation73_spill] sm:$0xff]  ;;  %v14324_v52 = vld [vmem:[#allocation124_spill] sm:$0xff] }
 0x137   : >> { %14312 = vst [vmem:[#allocation99_spill] sm:$0xff] %v9787_v59  ;;  %14315 = vst [vmem:[#allocation150_spill] sm:$0xff] %v9791_v26  ;;  %v9799_v38 = vadd.f32 %v9401_v42, %v14319_v34  ;;  %v9803_v24 = vadd.f32 %v14322_v18, %v14321_v0  ;;  %v14325_v60 = vld [vmem:[#allocation72_spill] sm:$0xff]  ;;  %v14327_v25 = vld [vmem:[#allocation125_spill] sm:$0xff] }
 0x138   : >> { %14318 = vst [vmem:[#allocation98_spill] sm:$0xff] %v9795_v46  ;;  %v9807_v40 = vadd.f32 %v14325_v60, %v14324_v52  ;;  %v14328_v59 = vld [vmem:[#allocation71_spill] sm:$0xff]  ;;  %v14330_v30 = vld [vmem:[#allocation126_spill] sm:$0xff]  ;;  %v14335_v18 = vld [vmem:[#allocation128_spill] sm:$0xff] }
 0x139   : >> { %14320 = vst [vmem:[#allocation97_spill] sm:$0xff] %v9799_v38  ;;  %14323 = vst [vmem:[#allocation151_spill] sm:$0xff] %v9803_v24  ;;  %v9811_v6 = vadd.f32 %v14328_v59, %v14327_v25  ;;  %v9817_v8 = vadd.f32 %v9416_v45, %v14330_v30  ;;  %v14332_v42 = vld [vmem:[#allocation127_spill] sm:$0xff]  ;;  %v14333_v7 = vld [vmem:[#allocation70_spill] sm:$0xff] }
 0x13a   : >> { %14326 = vst [vmem:[#allocation96_spill] sm:$0xff] %v9807_v40  ;;  %v9821_v34 = vadd.f32 %v14333_v7, %v14332_v42  ;;  %v14336_v0 = vld [vmem:[#allocation69_spill] sm:$0xff]  ;;  %v14339_v40 = vld [vmem:[#allocation68_spill] sm:$0xff]  ;;  %v14341_v25 = vld [vmem:[#allocation130_spill] sm:$0xff] }
 0x13b   : >> { %14329 = vst [vmem:[#allocation152_spill] sm:$0xff] %v9811_v6  ;;  %14331 = vst [vmem:[#allocation95_spill] sm:$0xff] %v9817_v8  ;;  %v9825_v60 = vadd.f32 %v14336_v0, %v14335_v18  ;;  %v14338_v52 = vld [vmem:[#allocation129_spill] sm:$0xff]  ;;  %v14342_v6 = vld [vmem:[#allocation67_spill] sm:$0xff] }
 0x13c   : >> { %14334 = vst [vmem:[#allocation153_spill] sm:$0xff] %v9821_v34  ;;  %v9829_v59 = vadd.f32 %v14339_v40, %v14338_v52  ;;  %v9833_v45 = vadd.f32 %v14342_v6, %v14341_v25  ;;  %v14344_v30 = vld [vmem:[#allocation131_spill] sm:$0xff]  ;;  %v14345_v8 = vld [vmem:[#allocation66_spill] sm:$0xff]  ;;  %v14347_v42 = vld [vmem:[#allocation132_spill] sm:$0xff] }
 0x13d   : >> { %14337 = vst [vmem:[#allocation94_spill] sm:$0xff] %v9825_v60  ;;  %v9837_v24 = vadd.f32 %v14345_v8, %v14344_v30  ;;  %v14348_v7 = vld [vmem:[#allocation65_spill] sm:$0xff]  ;;  %v14351_v0 = vld [vmem:[#allocation64_spill] sm:$0xff]  ;;  %v14353_v38 = vld [vmem:[#allocation134_spill] sm:$0xff] }
 0x13e   : >> { %14340 = vst [vmem:[#allocation93_spill] sm:$0xff] %v9829_v59  ;;  %14343 = vst [vmem:[#allocation154_spill] sm:$0xff] %v9833_v45  ;;  %v9841_v34 = vadd.f32 %v14348_v7, %v14347_v42  ;;  %v14350_v18 = vld [vmem:[#allocation133_spill] sm:$0xff]  ;;  %v9849_v40 = vadd.f32 %v9446_v37, %v14353_v38  ;;  %v14355_v52 = vld [vmem:[#allocation135_spill] sm:$0xff] }
 0x13f   : >> { %14346 = vst [vmem:[#allocation92_spill] sm:$0xff] %v9837_v24  ;;  %v9845_v60 = vadd.f32 %v14351_v0, %v14350_v18  ;;  %v14356_v59 = vld [vmem:[#allocation63_spill] sm:$0xff]  ;;  %v14358_v25 = vld [vmem:[#allocation136_spill] sm:$0xff]  ;;  %v14359_v8 = vld [vmem:[#allocation62_spill] sm:$0xff] }
 0x140   : >> { %14349 = vst [vmem:[#allocation155_spill] sm:$0xff] %v9841_v34  ;;  %14354 = vst [vmem:[#allocation156_spill] sm:$0xff] %v9849_v40  ;;  %v9853_v6 = vadd.f32 %v14356_v59, %v14355_v52  ;;  %v9857_v30 = vadd.f32 %v14359_v8, %v14358_v25  ;;  %v14361_v42 = vld [vmem:[#allocation137_spill] sm:$0xff]  ;;  %v14364_v18 = vld [vmem:[#allocation138_spill] sm:$0xff] }
 0x141   : >> { %14352 = vst [vmem:[#allocation91_spill] sm:$0xff] %v9845_v60  ;;  %v14362_v7 = vld [vmem:[#allocation61_spill] sm:$0xff]  ;;  %v9865_v37 = vadd.f32 %v9461_v61, %v14364_v18  ;;  %v14366_v38 = vld [vmem:[#allocation139_spill] sm:$0xff]  ;;  %v14368_v59 = vld [vmem:[#allocation112_spill] sm:$0xff] }
 0x142   : >> { %14357 = vst [vmem:[#allocation90_spill] sm:$0xff] %v9853_v6  ;;  %14360 = vst [vmem:[#allocation89_spill] sm:$0xff] %v9857_v30  ;;  %v9861_v34 = vadd.f32 %v14362_v7, %v14361_v42  ;;  %v9869_v0 = vadd.f32 %v9464_v49, %v14366_v38  ;;  %v9873_v52 = vadd.f32 %v9467_v22, %v14368_v59  ;;  %v14370_v25 = vld [vmem:[#allocation140_spill] sm:$0xff]  ;;  %v832_v6 = vld [vmem:[%s8262_s14 + $0x2] sm:$0xff] }
 0x143   : >> { %14365 = vst [vmem:[#allocation88_spill] sm:$0xff] %v9865_v37  ;;  %v14371_v8 = vld [vmem:[#allocation60_spill] sm:$0xff]  ;;  %v835_v61 = vld [vmem:[%s8262_s14 + $0x1a] sm:$0x3]  ;;  %v14373_v18 = vld [vmem:[#allocation111_spill] sm:$0xff] }
 0x144   : >> { %14363 = vst [vmem:[#allocation157_spill] sm:$0xff] %v9861_v34  ;;  %14367 = vst [vmem:[#allocation158_spill] sm:$0xff] %v9869_v0  ;;  %v9877_v30 = vadd.f32 %v14371_v8, %v14370_v25  ;;  %v833_v42 = vld [vmem:[%s8262_s14 + $0xa] sm:$0xff]  ;;  %v834_v7 = vld [vmem:[%s8262_s14 + $0x12] sm:$0xff]  ;;  %v9885_v49 = vadd.f32 %v9476_v23, %v14373_v18 }
 0x145   : >> { %14369 = vst [vmem:[#allocation87_spill] sm:$0xff] %v9873_v52  ;;  %v14375_v38 = vld [vmem:[#allocation141_spill] sm:$0xff]  ;;  %v14377_v59 = vld [vmem:[#allocation110_spill] sm:$0xff]  ;;  %v837_v0 = vld [vmem:[%s8262_s14 + $0x2a] sm:$0xff] }
 0x146   : >> { %14372 = vst [vmem:[#allocation159_spill] sm:$0xff] %v9877_v30  ;;  %14374 = vst [vmem:[#allocation86_spill] sm:$0xff] %v9885_v49  ;;  %v9889_v22 = vadd.f32 %v9479_v63, %v14375_v38  ;;  %v9893_v25 = vadd.f32 %v9482_v28, %v14377_v59  ;;  %v14379_v8 = vld [vmem:[#allocation109_spill] sm:$0xff]  ;;  %v836_v52 = vld [vmem:[%s8262_s14 + $0x22] sm:$0xff] }
 0x147   : >> { %v9897_v30 = vadd.f32 %v9485_v9, %v14379_v8  ;;  %v838_v37 = vld [vmem:[%s8262_s14 + $0x32] sm:$0xff]  ;;  %v839_v23 = vld [vmem:[%s8262_s14 + $0x3a] sm:$0x3]  ;;  %v14381_v18 = vld [vmem:[#allocation142_spill] sm:$0xff] }
 0x148   : >> { %14376 = vst [vmem:[#allocation160_spill] sm:$0xff] %v9889_v22  ;;  %14378 = vst [vmem:[#allocation85_spill] sm:$0xff] %v9893_v25  ;;  %v9905_v63 = vadd.f32 %v9488_v41, %v14381_v18  ;;  %v14383_v38 = vld [vmem:[#allocation108_spill] sm:$0xff]  ;;  %v14385_v59 = vld [vmem:[#allocation143_spill] sm:$0xff] }
 0x149   : >> { %14380 = vst [vmem:[#allocation161_spill] sm:$0xff] %v9897_v30  ;;  %v9909_v28 = vadd.f32 %v9491_v62, %v14383_v38  ;;  %v9913_v9 = vadd.f32 %v9494_v20, %v14385_v59  ;;  %v14387_v8 = vld [vmem:[#allocation107_spill] sm:$0xff]  ;;  %v842_v49 = vld [vmem:[%s8262_s14 + $0x52] sm:$0xff]  ;;  %v843_v41 = vld [vmem:[%s8262_s14 + $0x5a] sm:$0x3] }
 0x14a   : >> { %14382 = vst [vmem:[#allocation84_spill] sm:$0xff] %v9905_v63  ;;  %v9917_v30 = vadd.f32 %v9497_v44, %v14387_v8  ;;  %v840_v25 = vld [vmem:[%s8262_s14 + $0x42] sm:$0xff]  ;;  %v841_v22 = vld [vmem:[%s8262_s14 + $0x4a] sm:$0xff]  ;;  %v14393_v44 = vld [vmem:[#allocation105_spill] sm:$0xff] }
 0x14b   : >> { %14384 = vst [vmem:[#allocation162_spill] sm:$0xff] %v9909_v28  ;;  %14386 = vst [vmem:[#allocation83_spill] sm:$0xff] %v9913_v9  ;;  %v14389_v18 = vld [vmem:[#allocation144_spill] sm:$0xff]  ;;  %v14391_v38 = vld [vmem:[#allocation106_spill] sm:$0xff]  ;;  %v9933_v59 = vadd.f32 %v9506_v50, %v14393_v44 }
 0x14c   : >> { %14388 = vst [vmem:[#allocation163_spill] sm:$0xff] %v9917_v30  ;;  %v9925_v62 = vadd.f32 %v9500_v47, %v14389_v18  ;;  %v9929_v20 = vadd.f32 %v9503_v3, %v14391_v38  ;;  %v14395_v8 = vld [vmem:[#allocation145_spill] sm:$0xff]  ;;  %v844_v9 = vld [vmem:[%s8262_s14 + $0x62] sm:$0xff]  ;;  %v845_v28 = vld [vmem:[%s8262_s14 + $0x6a] sm:$0xff] }
 0x14d   : >> { %14394 = vst [vmem:[#allocation80_spill] sm:$0xff] %v9933_v59  ;;  %v9937_v30 = vadd.f32 %v9509_v12, %v14395_v8  ;;  %v846_v47 = vld [vmem:[%s8262_s14 + $0x72] sm:$0xff]  ;;  %v847_v18 = vld [vmem:[%s8262_s14 + $0x7a] sm:$0x3]  ;;  %v14399_v3 = vld [vmem:[#allocation146_spill] sm:$0xff] }
 0x14e   : >> { %14390 = vst [vmem:[#allocation82_spill] sm:$0xff] %v9925_v62  ;;  %14392 = vst [vmem:[#allocation81_spill] sm:$0xff] %v9929_v20  ;;  %v14397_v62 = vld [vmem:[#allocation104_spill] sm:$0xff]  ;;  %v9949_v38 = vadd.f32 %v9515_v19, %v14399_v3  ;;  %v14401_v50 = vld [vmem:[#allocation103_spill] sm:$0xff]  ;;  %v9960_v20 = vstv %s9813_s2 }
 0x14f   : >> { %14396 = vst [vmem:[#allocation164_spill] sm:$0xff] %v9937_v30  ;;  %v9945_v63 = vadd.f32 %v9512_v43, %v14397_v62  ;;  %v9953_v44 = vadd.f32 %v9518_v48, %v14401_v50  ;;  %v848_v12 = vld [vmem:[%s8262_s14 + $0x82] sm:$0xff]  ;;  %v849_v8 = vld [vmem:[%s8262_s14 + $0x8a] sm:$0xff]  ;;  %v850_v30 = vld [vmem:[%s8262_s14 + $0x92] sm:$0xff]  ;;  %v9967_v3 = vmul.f32 %v9960_v20, %v832_v6  ;;  %v9970_v48 = vmul.f32 %v9960_v20, %v833_v42 }
 0x150   : >> { %14400 = vst [vmem:[#allocation113_spill] sm:$0xff] %v9949_v38  ;;  %v851_v59 = vld [vmem:[%s8262_s14 + $0x9a] sm:$0x3]  ;;  %v852_v43 = vld [vmem:[%s8262_s14 + $0xa2] sm:$0xff]  ;;  %v853_v62 = vld [vmem:[%s8262_s14 + $0xaa] sm:$0xff]  ;;  %v9973_v50 = vmul.f32 %v9960_v20, %v834_v7  ;;  %v9983_v6 = vmul.f32 %v9960_v20, %v836_v52  ;;  %v9986_v42 = vmul.f32 %v9960_v20, %v837_v0  ;;  %v9989_v7 = vmul.f32 %v9960_v20, %v838_v37 }
 0x151   : >> { %14398 = vst [vmem:[#allocation79_spill] sm:$0xff] %v9945_v63  ;;  %14402 = vst [vmem:[#allocation165_spill] sm:$0xff] %v9953_v44  ;;  %v854_v63 = vld [vmem:[%s8262_s14 + $0xb2] sm:$0xff]  ;;  %v855_v19 = vld [vmem:[%s8262_s14 + $0xba] sm:$0x3]  ;;  %v9976_v44 = vmul.f32 %v9960_v20, %v835_v61  ;;  %v9992_v61 = vmul.f32 %v9960_v20, %v839_v23  ;;  %v9999_v52 = vmul.f32 %v9960_v20, %v840_v25 }
 0x152   : >> { %v856_v38 = vld [vmem:[%s8262_s14 + $0xc2] sm:$0xff]  ;;  %v857_v34 = vld [vmem:[%s8262_s14 + $0xca] sm:$0xff]  ;;  %v858_v40 = vld [vmem:[%s8262_s14 + $0xd2] sm:$0xff]  ;;  %v10002_v0 = vmul.f32 %v9960_v20, %v841_v22  ;;  %v10005_v37 = vmul.f32 %v9960_v20, %v842_v49  ;;  %v10008_v23 = vmul.f32 %v9960_v20, %v843_v41  ;;  %v10015_v25 = vmul.f32 %v9960_v20, %v844_v9 }
 0x153   : >> { %v859_v60 = vld [vmem:[%s8262_s14 + $0xda] sm:$0x3]  ;;  %v860_v24 = vld [vmem:[%s8262_s14 + $0xe2] sm:$0xff]  ;;  %v861_v45 = vld [vmem:[%s8262_s14 + $0xea] sm:$0xff]  ;;  %v10018_v22 = vmul.f32 %v9960_v20, %v845_v28  ;;  %v10021_v49 = vmul.f32 %v9960_v20, %v846_v47  ;;  %v10024_v41 = vmul.f32 %v9960_v20, %v847_v18  ;;  %v10031_v9 = vmul.f32 %v9960_v20, %v848_v12 }
 0x154   : >> { %v862_v46 = vld [vmem:[%s8262_s14 + $0xf2] sm:$0xff]  ;;  %v863_v26 = vld [vmem:[%s8262_s14 + $0xfa] sm:$0x3]  ;;  %v864_v14 = vld [vmem:[%s8262_s14 + $0x102] sm:$0xff]  ;;  %v10034_v28 = vmul.f32 %v9960_v20, %v849_v8  ;;  %v10037_v47 = vmul.f32 %v9960_v20, %v850_v30  ;;  %v10040_v18 = vmul.f32 %v9960_v20, %v851_v59  ;;  %v10047_v12 = vmul.f32 %v9960_v20, %v852_v43 }
 0x155   : >> { %v865_v15 = vld [vmem:[%s8262_s14 + $0x10a] sm:$0xff]  ;;  %v866_v33 = vld [vmem:[%s8262_s14 + $0x112] sm:$0xff]  ;;  %v867_v51 = vld [vmem:[%s8262_s14 + $0x11a] sm:$0x3]  ;;  %14403 = vst [vmem:[#allocation114_spill] sm:$0xff] %v10024_v41  ;;  %v10050_v8 = vmul.f32 %v9960_v20, %v853_v62  ;;  %v10053_v30 = vmul.f32 %v9960_v20, %v854_v63  ;;  %v10056_v59 = vmul.f32 %v9960_v20, %v855_v19  ;;  %v10063_v43 = vmul.f32 %v9960_v20, %v856_v38 }
 0x156   : >> { %v868_v5 = vld [vmem:[%s8262_s14 + $0x122] sm:$0xff]  ;;  %v869_v21 = vld [vmem:[%s8262_s14 + $0x12a] sm:$0xff]  ;;  %v870_v13 = vld [vmem:[%s8262_s14 + $0x132] sm:$0xff]  ;;  %14404 = vst [vmem:[#allocation115_spill] sm:$0xff] %v10031_v9  ;;  %v10066_v62 = vmul.f32 %v9960_v20, %v857_v34  ;;  %v10069_v63 = vmul.f32 %v9960_v20, %v858_v40  ;;  %v10072_v19 = vmul.f32 %v9960_v20, %v859_v60  ;;  %v10079_v38 = vmul.f32 %v9960_v20, %v860_v24 }
 0x157   : >> { %v871_v58 = vld [vmem:[%s8262_s14 + $0x13a] sm:$0x3]  ;;  %14405 = vst [vmem:[#allocation78_spill] sm:$0xff] %v10034_v28  ;;  %14406 = vst [vmem:[#allocation116_spill] sm:$0xff] %v10037_v47  ;;  %v872_v57 = vld [vmem:[%s8262_s14 + $0x142] sm:$0xff]  ;;  %v10082_v34 = vmul.f32 %v9960_v20, %v861_v45  ;;  %v10085_v40 = vmul.f32 %v9960_v20, %v862_v46  ;;  %v10088_v60 = vmul.f32 %v9960_v20, %v863_v26 }
 0x158   : >> { %14407 = vst [vmem:[#allocation77_spill] sm:$0xff] %v10040_v18  ;;  %v873_v56 = vld [vmem:[%s8262_s14 + $0x14a] sm:$0xff]  ;;  %v874_v53 = vld [vmem:[%s8262_s14 + $0x152] sm:$0xff]  ;;  %v875_v41 = vld [vmem:[%s8262_s14 + $0x15a] sm:$0x3]  ;;  %v10095_v24 = vmul.f32 %v9960_v20, %v864_v14  ;;  %v10098_v45 = vmul.f32 %v9960_v20, %v865_v15  ;;  %v10101_v46 = vmul.f32 %v9960_v20, %v866_v33  ;;  %v10104_v26 = vmul.f32 %v9960_v20, %v867_v51 }
 0x159   : >> { %14408 = vst [vmem:[#allocation117_spill] sm:$0xff] %v10047_v12  ;;  %14409 = vst [vmem:[#allocation76_spill] sm:$0xff] %v10050_v8  ;;  %v876_v18 = vld [vmem:[%s8262_s14 + $0x162] sm:$0xff]  ;;  %v877_v47 = vld [vmem:[%s8262_s14 + $0x16a] sm:$0xff]  ;;  %v10111_v14 = vmul.f32 %v9960_v20, %v868_v5  ;;  %v10114_v15 = vmul.f32 %v9960_v20, %v869_v21  ;;  %v10117_v33 = vmul.f32 %v9960_v20, %v870_v13 }
 0x15a   : >> { %14410 = vst [vmem:[#allocation118_spill] sm:$0xff] %v10053_v30  ;;  %14411 = vst [vmem:[#allocation119_spill] sm:$0xff] %v10056_v59  ;;  %v878_v28 = vld [vmem:[%s8262_s14 + $0x172] sm:$0xff]  ;;  %v879_v9 = vld [vmem:[%s8262_s14 + $0x17a] sm:$0x3]  ;;  %v10120_v51 = vmul.f32 %v9960_v20, %v871_v58  ;;  %v10127_v5 = vmul.f32 %v9960_v20, %v872_v57  ;;  %v10130_v21 = vmul.f32 %v9960_v20, %v873_v56 }
 0x15b   : >> { %14412 = vst [vmem:[#allocation75_spill] sm:$0xff] %v10063_v43  ;;  %14413 = vst [vmem:[#allocation120_spill] sm:$0xff] %v10066_v62  ;;  %v880_v59 = vld [vmem:[%s8262_s14 + $0x182] sm:$0xff]  ;;  %v881_v30 = vld [vmem:[%s8262_s14 + $0x18a] sm:$0xff]  ;;  %v10133_v13 = vmul.f32 %v9960_v20, %v874_v53  ;;  %v10136_v58 = vmul.f32 %v9960_v20, %v875_v41  ;;  %v10143_v57 = vmul.f32 %v9960_v20, %v876_v18 }
 0x15c   : >> { %14414 = vst [vmem:[#allocation166_spill] sm:$0xff] %v10069_v63  ;;  %14415 = vst [vmem:[#allocation121_spill] sm:$0xff] %v10072_v19  ;;  %v882_v8 = vld [vmem:[%s8262_s14 + $0x192] sm:$0xff]  ;;  %v883_v12 = vld [vmem:[%s8262_s14 + $0x19a] sm:$0x3]  ;;  %v10146_v56 = vmul.f32 %v9960_v20, %v877_v47  ;;  %v10149_v53 = vmul.f32 %v9960_v20, %v878_v28  ;;  %v10152_v41 = vmul.f32 %v9960_v20, %v879_v9 }
 0x15d   : >> { %14416 = vst [vmem:[#allocation74_spill] sm:$0xff] %v10079_v38  ;;  %14417 = vst [vmem:[#allocation122_spill] sm:$0xff] %v10082_v34  ;;  %v884_v19 = vld [vmem:[%s8262_s14 + $0x1a2] sm:$0xff]  ;;  %v885_v63 = vld [vmem:[%s8262_s14 + $0x1aa] sm:$0xff]  ;;  %v10159_v18 = vmul.f32 %v9960_v20, %v880_v59  ;;  %v10162_v47 = vmul.f32 %v9960_v20, %v881_v30  ;;  %v10165_v28 = vmul.f32 %v9960_v20, %v882_v8 }
 0x15e   : >> { %14418 = vst [vmem:[#allocation123_spill] sm:$0xff] %v10085_v40  ;;  %14419 = vst [vmem:[#allocation73_spill] sm:$0xff] %v10088_v60  ;;  %v886_v62 = vld [vmem:[%s8262_s14 + $0x1b2] sm:$0xff]  ;;  %v887_v43 = vld [vmem:[%s8262_s14 + $0x1ba] sm:$0x3]  ;;  %v10168_v9 = vmul.f32 %v9960_v20, %v883_v12  ;;  %v10175_v54 = vmul.f32 %v9960_v20, %v884_v19  ;;  %v10178_v59 = vmul.f32 %v9960_v20, %v885_v63 }
 0x15f   : >> { %14420 = vst [vmem:[#allocation124_spill] sm:$0xff] %v10095_v24  ;;  %14421 = vst [vmem:[#allocation72_spill] sm:$0xff] %v10098_v45  ;;  %v888_v60 = vld [vmem:[%s8262_s14 + $0x1c2] sm:$0xff]  ;;  %v889_v40 = vld [vmem:[%s8262_s14 + $0x1ca] sm:$0xff]  ;;  %v10181_v30 = vmul.f32 %v9960_v20, %v886_v62  ;;  %v10184_v8 = vmul.f32 %v9960_v20, %v887_v43 }
 0x160   : >> { %14422 = vst [vmem:[#allocation125_spill] sm:$0xff] %v10101_v46  ;;  %14423 = vst [vmem:[#allocation71_spill] sm:$0xff] %v10104_v26  ;;  %v890_v34 = vld [vmem:[%s8262_s14 + $0x1d2] sm:$0xff]  ;;  %v891_v38 = vld [vmem:[%s8262_s14 + $0x1da] sm:$0x3]  ;;  %v10194_v19 = vmul.f32 %v9960_v20, %v889_v40 }
 0x161   : >> { %14424 = vst [vmem:[#allocation126_spill] sm:$0xff] %v10111_v14  ;;  %14425 = vst [vmem:[#allocation127_spill] sm:$0xff] %v10114_v15  ;;  %v892_v26 = vld [vmem:[%s8262_s14 + $0x1e2] sm:$0xff]  ;;  %v893_v46 = vld [vmem:[%s8262_s14 + $0x1ea] sm:$0xff]  ;;  %v10197_v63 = vmul.f32 %v9960_v20, %v890_v34  ;;  %v10200_v43 = vmul.f32 %v9960_v20, %v891_v38 }
 0x162   : >> { %14426 = vst [vmem:[#allocation70_spill] sm:$0xff] %v10117_v33  ;;  %14427 = vst [vmem:[#allocation128_spill] sm:$0xff] %v10120_v51  ;;  %v894_v45 = vld [vmem:[%s8262_s14 + $0x1f2] sm:$0xff]  ;;  %v895_v24 = vld [vmem:[%s8262_s14 + $0x1fa] sm:$0x3] }
 0x163   : >> { %14428 = vst [vmem:[#allocation69_spill] sm:$0xff] %v10127_v5  ;;  %14429 = vst [vmem:[#allocation129_spill] sm:$0xff] %v10130_v21  ;;  %v896_v51 = vld [vmem:[%s8262_s14 + $0x202] sm:$0xff]  ;;  %v897_v33 = vld [vmem:[%s8262_s14 + $0x20a] sm:$0xff]  ;;  %v10212_v40 = vmul.f32 %v9960_v20, %v894_v45  ;;  %v10215_v34 = vmul.f32 %v9960_v20, %v895_v24 }
 0x164   : >> { %14430 = vst [vmem:[#allocation68_spill] sm:$0xff] %v10133_v13  ;;  %14431 = vst [vmem:[#allocation130_spill] sm:$0xff] %v10136_v58  ;;  %v898_v15 = vld [vmem:[%s8262_s14 + $0x212] sm:$0xff]  ;;  %v899_v14 = vld [vmem:[%s8262_s14 + $0x21a] sm:$0x3] }
 0x165   : >> { %14432 = vst [vmem:[#allocation67_spill] sm:$0xff] %v10143_v57  ;;  %14433 = vst [vmem:[#allocation131_spill] sm:$0xff] %v10146_v56  ;;  %v900_v58 = vld [vmem:[%s8262_s14 + $0x222] sm:$0xff]  ;;  %v901_v13 = vld [vmem:[%s8262_s14 + $0x22a] sm:$0xff]  ;;  %v10230_v45 = vmul.f32 %v9960_v20, %v899_v14 }
 0x166   : >> { %14434 = vst [vmem:[#allocation66_spill] sm:$0xff] %v10149_v53  ;;  %14435 = vst [vmem:[#allocation132_spill] sm:$0xff] %v10152_v41  ;;  %v902_v21 = vld [vmem:[%s8262_s14 + $0x232] sm:$0xff]  ;;  %v903_v5 = vld [vmem:[%s8262_s14 + $0x23a] sm:$0x3] }
 0x167   : >> { %14436 = vst [vmem:[#allocation65_spill] sm:$0xff] %v10159_v18  ;;  %14437 = vst [vmem:[#allocation133_spill] sm:$0xff] %v10162_v47  ;;  %v904_v41 = vld [vmem:[%s8262_s14 + $0x242] sm:$0xff]  ;;  %v905_v53 = vld [vmem:[%s8262_s14 + $0x24a] sm:$0xff]  ;;  %v10191_v18 = vmul.f32 %v9960_v20, %v888_v60  ;;  %v10209_v60 = vmul.f32 %v9960_v20, %v893_v46  ;;  %v10227_v46 = vmul.f32 %v9960_v20, %v898_v15 }
 0x168   : >> { %14438 = vst [vmem:[#allocation64_spill] sm:$0xff] %v10165_v28  ;;  %14439 = vst [vmem:[#allocation134_spill] sm:$0xff] %v10168_v9  ;;  %v906_v56 = vld [vmem:[%s8262_s14 + $0x252] sm:$0xff]  ;;  %v907_v57 = vld [vmem:[%s8262_s14 + $0x25a] sm:$0x3]  ;;  %v10245_v15 = vmul.f32 %v9960_v20, %v903_v5 }
 0x169   : >> { %14440 = vst [vmem:[#allocation135_spill] sm:$0xff] %v10175_v54  ;;  %14441 = vst [vmem:[#allocation63_spill] sm:$0xff] %v10178_v59  ;;  %v908_v12 = vld [vmem:[%s8262_s14 + $0x262] sm:$0xff]  ;;  %v909_v9 = vld [vmem:[%s8262_s14 + $0x26a] sm:$0xff]  ;;  %v10206_v59 = vmul.f32 %v9960_v20, %v892_v26  ;;  %v10224_v26 = vmul.f32 %v9960_v20, %v897_v33  ;;  %v10242_v33 = vmul.f32 %v9960_v20, %v902_v21 }
 0x16a   : >> { %14442 = vst [vmem:[#allocation136_spill] sm:$0xff] %v10181_v30  ;;  %14443 = vst [vmem:[#allocation62_spill] sm:$0xff] %v10184_v8  ;;  %v910_v28 = vld [vmem:[%s8262_s14 + $0x272] sm:$0xff]  ;;  %v911_v47 = vld [vmem:[%s8262_s14 + $0x27a] sm:$0x3]  ;;  %v10260_v21 = vmul.f32 %v9960_v20, %v907_v57 }
 0x16b   : >> { %14444 = vst [vmem:[#allocation137_spill] sm:$0xff] %v10194_v19  ;;  %14445 = vst [vmem:[#allocation61_spill] sm:$0xff] %v10197_v63  ;;  %v912_v62 = vld [vmem:[%s8262_s14 + $0x282] sm:$0xff]  ;;  %v913_v8 = vld [vmem:[%s8262_s14 + $0x28a] sm:$0xff]  ;;  %v10221_v19 = vmul.f32 %v9960_v20, %v896_v51  ;;  %v10239_v51 = vmul.f32 %v9960_v20, %v901_v13  ;;  %v10257_v13 = vmul.f32 %v9960_v20, %v906_v56 }
 0x16c   : >> { %14446 = vst [vmem:[#allocation138_spill] sm:$0xff] %v10200_v43  ;;  %v914_v30 = vld [vmem:[%s8262_s14 + $0x292] sm:$0xff]  ;;  %14447 = vst [vmem:[#allocation139_spill] sm:$0xff] %v10206_v59  ;;  %v915_v38 = vld [vmem:[%s8262_s14 + $0x29a] sm:$0x3]  ;;  %v10275_v56 = vmul.f32 %v9960_v20, %v911_v47 }
 0x16d   : >> { %14448 = vst [vmem:[#allocation112_spill] sm:$0xff] %v10209_v60  ;;  %14449 = vst [vmem:[#allocation140_spill] sm:$0xff] %v10212_v40  ;;  %v916_v43 = vld [vmem:[%s8262_s14 + $0x2a2] sm:$0xff]  ;;  %v917_v63 = vld [vmem:[%s8262_s14 + $0x2aa] sm:$0xff]  ;;  %v10236_v60 = vmul.f32 %v9960_v20, %v900_v58  ;;  %v10254_v58 = vmul.f32 %v9960_v20, %v905_v53  ;;  %v10272_v53 = vmul.f32 %v9960_v20, %v910_v28 }
 0x16e   : >> { %14450 = vst [vmem:[#allocation60_spill] sm:$0xff] %v10215_v34  ;;  %14451 = vst [vmem:[#allocation111_spill] sm:$0xff] %v10224_v26  ;;  %v918_v24 = vld [vmem:[%s8262_s14 + $0x2b2] sm:$0xff]  ;;  %v919_v34 = vld [vmem:[%s8262_s14 + $0x2ba] sm:$0x3]  ;;  %v10251_v26 = vmul.f32 %v9960_v20, %v904_v41  ;;  %v10269_v41 = vmul.f32 %v9960_v20, %v909_v9  ;;  %v10287_v9 = vmul.f32 %v9960_v20, %v914_v30 }
 0x16f   : >> { %14452 = vst [vmem:[#allocation141_spill] sm:$0xff] %v10227_v46  ;;  %14453 = vst [vmem:[#allocation110_spill] sm:$0xff] %v10230_v45  ;;  %v920_v40 = vld [vmem:[%s8262_s14 + $0x2c2] sm:$0xff]  ;;  %v921_v14 = vld [vmem:[%s8262_s14 + $0x2ca] sm:$0xff]  ;;  %v10290_v28 = vmul.f32 %v9960_v20, %v915_v38 }
 0x170   : >> { %14454 = vst [vmem:[#allocation109_spill] sm:$0xff] %v10239_v51  ;;  %14455 = vst [vmem:[#allocation142_spill] sm:$0xff] %v10242_v33  ;;  %v922_v45 = vld [vmem:[%s8262_s14 + $0x2d2] sm:$0xff]  ;;  %v923_v46 = vld [vmem:[%s8262_s14 + $0x2da] sm:$0x3]  ;;  %v10266_v51 = vmul.f32 %v9960_v20, %v908_v12  ;;  %v10284_v12 = vmul.f32 %v9960_v20, %v913_v8  ;;  %v10305_v8 = vmul.f32 %v9960_v20, %v919_v34 }
 0x171   : >> { %14456 = vst [vmem:[#allocation108_spill] sm:$0xff] %v10245_v15  ;;  %14457 = vst [vmem:[#allocation143_spill] sm:$0xff] %v10254_v58  ;;  %v924_v5 = vld [vmem:[%s8262_s14 + $0x2e2] sm:$0xff]  ;;  %v925_v15 = vld [vmem:[%s8262_s14 + $0x2ea] sm:$0xff]  ;;  %v10281_v58 = vmul.f32 %v9960_v20, %v912_v62  ;;  %v10302_v62 = vmul.f32 %v9960_v20, %v918_v24  ;;  %v10311_v38 = vmul.f32 %v9960_v20, %v920_v40 }
 0x172   : >> { %14458 = vst [vmem:[#allocation107_spill] sm:$0xff] %v10257_v13  ;;  %14459 = vst [vmem:[#allocation144_spill] sm:$0xff] %v10260_v21  ;;  %v926_v33 = vld [vmem:[%s8262_s14 + $0x2f2] sm:$0xff]  ;;  %v927_v57 = vld [vmem:[%s8262_s14 + $0x2fa] sm:$0x3]  ;;  %v10323_v24 = vmul.f32 %v9960_v20, %v924_v5  ;;  %v10326_v34 = vmul.f32 %v9960_v20, %v925_v15 }
 0x173   : >> { %14460 = vst [vmem:[#allocation106_spill] sm:$0xff] %v10266_v51  ;;  %14461 = vst [vmem:[#allocation105_spill] sm:$0xff] %v10269_v41  ;;  %v928_v21 = vld [vmem:[%s8262_s14 + $0x302] sm:$0xff]  ;;  %v929_v13 = vld [vmem:[%s8262_s14 + $0x30a] sm:$0xff]  ;;  %v10296_v41 = vmul.f32 %v9960_v20, %v916_v43  ;;  %v10299_v51 = vmul.f32 %v9960_v20, %v917_v63  ;;  %v10317_v43 = vmul.f32 %v9960_v20, %v922_v45 }
 0x174   : >> { %14462 = vst [vmem:[#allocation145_spill] sm:$0xff] %v10272_v53  ;;  %14463 = vst [vmem:[#allocation104_spill] sm:$0xff] %v10275_v56  ;;  %v930_v53 = vld [vmem:[%s8262_s14 + $0x312] sm:$0xff]  ;;  %v931_v47 = vld [vmem:[%s8262_s14 + $0x31a] sm:$0x3]  ;;  %v10320_v63 = vmul.f32 %v9960_v20, %v923_v46  ;;  %v10332_v40 = vmul.f32 %v9960_v20, %v927_v57  ;;  %v10338_v45 = vmul.f32 %v9960_v20, %v929_v13 }
 0x175   : >> { %14464 = vst [vmem:[#allocation146_spill] sm:$0xff] %v10281_v58  ;;  %14465 = vst [vmem:[#allocation103_spill] sm:$0xff] %v10284_v12  ;;  %v932_v56 = vld [vmem:[%s8262_s14 + $0x322] sm:$0xff]  ;;  %v933_v30 = vld [vmem:[%s8262_s14 + $0x32a] sm:$0xff]  ;;  %v10341_v46 = vmul.f32 %v9960_v20, %v930_v53  ;;  %v10344_v5 = vmul.f32 %v9960_v20, %v931_v47  ;;  %v10360_v13 = vadd.f32 %v9967_v3, %v9522_v36  }
 0x176   : >> { %14466 = vst [vmem:[#allocation168_spill] sm:$0xff] %v10287_v9  ;;  %14467 = vst [vmem:[#allocation169_spill] sm:$0xff] %v10290_v28  ;;  %v934_v9 = vld [vmem:[%s8262_s14 + $0x332] sm:$0xff]  ;;  %v935_v12 = vld [vmem:[%s8262_s14 + $0x33a] sm:$0x3]  ;;  %v10314_v28 = vmul.f32 %v9960_v20, %v921_v14  ;;  %v10335_v14 = vmul.f32 %v9960_v20, %v928_v21  ;;  %v10347_v15 = vmul.f32 %v9960_v20, %v932_v56 }
 0x177   : >> { %14468 = vst [vmem:[#allocation170_spill] sm:$0xff] %v10305_v8  ;;  %v10329_v8 = vmul.f32 %v9960_v20, %v926_v33  ;;  %v10350_v33 = vmul.f32 %v9960_v20, %v933_v30  ;;  %v10353_v57 = vmul.f32 %v9960_v20, %v934_v9  ;;  %v10356_v21 = vmul.f32 %v9960_v20, %v935_v12  ;;  %v14493_v3 = vld [vmem:[#allocation78_spill] sm:$0xff]  ;;  %v14516_v9 = vld [vmem:[#allocation40_spill] sm:$0xff] }
 0x178   : >> { %14470 = vst [vmem:[#allocation172_spill] sm:$0xff] %v10360_v13  ;;  %v10364_v53 = vadd.f32 %v9970_v48, %v9526_v29   ;;  %v10368_v56 = vadd.f32 %v9973_v50, %v9530_v39   ;;  %v10376_v20 = vadd.f32 %v9983_v6, %v9538_v4   ;;  %v10380_v36 = vadd.f32 %v9986_v42, %v9542_v31   ;;  %v14495_v48 = vld [vmem:[#allocation47_spill] sm:$0xff]  ;;  %v14496_v50 = vld [vmem:[#allocation116_spill] sm:$0xff]  ;;  %v14499_v6 = vld [vmem:[#allocation77_spill] sm:$0xff] }
 0x179   : >> { %14469 = vst [vmem:[#allocation171_spill] sm:$0xff] %v10353_v57  ;;  %v10388_v29 = vadd.f32 %v9992_v61, %v9550_v2   ;;  %v10392_v39 = vadd.f32 %v9999_v52, %v9554_v35   ;;  %v10396_v61 = vadd.f32 %v10002_v0, %v9558_v1   ;;  %v10408_v4 = vadd.f32 %v10015_v25, %v9570_v16   ;;  %v14487_v2 = vld [vmem:[#allocation114_spill] sm:$0xff]  ;;  %v14489_v1 = vld [vmem:[#allocation49_spill] sm:$0xff]  ;;  %v14507_v52 = vld [vmem:[#allocation43_spill] sm:$0xff] }
 0x17a   : >> { %14471 = vst [vmem:[#allocation173_spill] sm:$0xff] %v10364_v53  ;;  %14472 = vst [vmem:[#allocation174_spill] sm:$0xff] %v10368_v56  ;;  %v10372_v56 = vadd.f32 %v9976_v44, %v9534_v27   ;;  %v10384_v53 = vadd.f32 %v9989_v7, %v9546_v32   ;;  %v10400_v27 = vadd.f32 %v10005_v37, %v9562_v10   ;;  %v14484_v31 = vmov %v9578_v55  ;;  %v14486_v32 = vld [vmem:[#allocation50_spill] sm:$0xff]  ;;  %v14490_v10 = vld [vmem:[#allocation115_spill] sm:$0xff] }
 0x17b   : >> { %14474 = vst [vmem:[#allocation176_spill] sm:$0xff] %v10376_v20  ;;  %14475 = vst [vmem:[#allocation177_spill] sm:$0xff] %v10380_v36  ;;  %v10412_v37 = vadd.f32 %v10018_v22, %v9574_v17   ;;  %v10416_v36 = vadd.f32 %v10021_v49, %v14484_v31   ;;  %v10420_v35 = vadd.f32 %v14487_v2, %v14486_v32   ;;  %v14492_v44 = vld [vmem:[#allocation48_spill] sm:$0xff]  ;;  %v14498_v17 = vld [vmem:[#allocation46_spill] sm:$0xff] }
 0x17c   : >> { %14473 = vst [vmem:[#allocation175_spill] sm:$0xff] %v10372_v56  ;;  %14476 = vst [vmem:[#allocation178_spill] sm:$0xff] %v10384_v53  ;;  %v10428_v16 = vadd.f32 %v14493_v3, %v14492_v44   ;;  %v10432_v32 = vadd.f32 %v14496_v50, %v14495_v48   ;;  %v10436_v31 = vadd.f32 %v14499_v6, %v14498_v17   ;;  %v14501_v42 = vld [vmem:[#allocation45_spill] sm:$0xff]  ;;  %v14508_v0 = vld [vmem:[#allocation118_spill] sm:$0xff] }
 0x17d   : >> { %14477 = vst [vmem:[#allocation179_spill] sm:$0xff] %v10388_v29  ;;  %14478 = vst [vmem:[#allocation180_spill] sm:$0xff] %v10392_v39  ;;  %v10404_v39 = vadd.f32 %v10008_v23, %v9566_v11   ;;  %v10424_v11 = vadd.f32 %v14490_v10, %v14489_v1   ;;  %v14502_v7 = vld [vmem:[#allocation117_spill] sm:$0xff]  ;;  %v14510_v23 = vld [vmem:[#allocation42_spill] sm:$0xff] }
 0x17e   : >> { %14479 = vst [vmem:[#allocation181_spill] sm:$0xff] %v10396_v61  ;;  %14480 = vst [vmem:[#allocation182_spill] sm:$0xff] %v10400_v27  ;;  %v10440_v30 = vadd.f32 %v14502_v7, %v14501_v42   ;;  %v14505_v61 = vld [vmem:[#allocation76_spill] sm:$0xff]  ;;  %v14511_v25 = vld [vmem:[#allocation119_spill] sm:$0xff] }
 0x17f   : >> { %14481 = vst [vmem:[#allocation183_spill] sm:$0xff] %v10404_v39  ;;  %14482 = vst [vmem:[#allocation184_spill] sm:$0xff] %v10408_v4  ;;  %v10452_v27 = vadd.f32 %v14511_v25, %v14510_v23   ;;  %v14513_v22 = vld [vmem:[#allocation41_spill] sm:$0xff]  ;;  %v14514_v49 = vld [vmem:[#allocation75_spill] sm:$0xff] }
 0x180   : >> { %14483 = vst [vmem:[#allocation185_spill] sm:$0xff] %v10412_v37  ;;  %14485 = vst [vmem:[#allocation186_spill] sm:$0xff] %v10416_v36  ;;  %v10448_v37 = vadd.f32 %v14508_v0, %v14507_v52   ;;  %v10456_v12 = vadd.f32 %v14514_v49, %v14513_v22   ;;  %v14517_v47 = vld [vmem:[#allocation120_spill] sm:$0xff]  ;;  %v14520_v13 = vld [vmem:[#allocation166_spill] sm:$0xff] }
 0x181   : >> { %14488 = vst [vmem:[#allocation187_spill] sm:$0xff] %v10420_v35  ;;  %14491 = vst [vmem:[#allocation188_spill] sm:$0xff] %v10424_v11  ;;  %v14504_v35 = vld [vmem:[#allocation44_spill] sm:$0xff]  ;;  %v10460_v25 = vadd.f32 %v14517_v47, %v14516_v9   ;;  %v14522_v56 = vld [vmem:[#allocation38_spill] sm:$0xff] }
 0x182   : >> { %14494 = vst [vmem:[#allocation189_spill] sm:$0xff] %v10428_v16  ;;  %14497 = vst [vmem:[#allocation190_spill] sm:$0xff] %v10432_v32  ;;  %v10444_v29 = vadd.f32 %v14505_v61, %v14504_v35   ;;  %v14523_v20 = vld [vmem:[#allocation121_spill] sm:$0xff]  ;;  %v14528_v39 = vld [vmem:[#allocation36_spill] sm:$0xff] }
 0x183   : >> { %14500 = vst [vmem:[#allocation191_spill] sm:$0xff] %v10436_v31  ;;  %14503 = vst [vmem:[#allocation192_spill] sm:$0xff] %v10440_v30  ;;  %v14519_v30 = vld [vmem:[#allocation39_spill] sm:$0xff]  ;;  %v10468_v23 = vadd.f32 %v14523_v20, %v14522_v56   ;;  %v14525_v36 = vld [vmem:[#allocation37_spill] sm:$0xff] }
 0x184   : >> { %14506 = vst [vmem:[#allocation193_spill] sm:$0xff] %v10444_v29  ;;  %14509 = vst [vmem:[#allocation194_spill] sm:$0xff] %v10448_v37  ;;  %v10464_v53 = vadd.f32 %v14520_v13, %v14519_v30   ;;  %v14526_v29 = vld [vmem:[#allocation74_spill] sm:$0xff]  ;;  %v14531_v31 = vld [vmem:[#allocation35_spill] sm:$0xff] }
 0x185   : >> { %14512 = vst [vmem:[#allocation195_spill] sm:$0xff] %v10452_v27  ;;  %14515 = vst [vmem:[#allocation196_spill] sm:$0xff] %v10456_v12  ;;  %v10472_v22 = vadd.f32 %v14526_v29, %v14525_v36   ;;  %v14529_v27 = vld [vmem:[#allocation122_spill] sm:$0xff]  ;;  %v14532_v32 = vld [vmem:[#allocation123_spill] sm:$0xff] }
 0x186   : >> { %14518 = vst [vmem:[#allocation197_spill] sm:$0xff] %v10460_v25  ;;  %14521 = vst [vmem:[#allocation198_spill] sm:$0xff] %v10464_v53  ;;  %v10476_v4 = vadd.f32 %v14529_v27, %v14528_v39   ;;  %v10480_v20 = vadd.f32 %v14532_v32, %v14531_v31   ;;  %v14534_v2 = vld [vmem:[#allocation34_spill] sm:$0xff]  ;;  %v14535_v1 = vld [vmem:[#allocation73_spill] sm:$0xff] }
 0x187   : >> { %14524 = vst [vmem:[#allocation199_spill] sm:$0xff] %v10468_v23  ;;  %14527 = vst [vmem:[#allocation200_spill] sm:$0xff] %v10472_v22  ;;  %v10484_v10 = vadd.f32 %v14535_v1, %v14534_v2   ;;  %v14537_v11 = vld [vmem:[#allocation33_spill] sm:$0xff]  ;;  %v14538_v44 = vld [vmem:[#allocation124_spill] sm:$0xff] }
 0x188   : >> { %14530 = vst [vmem:[#allocation201_spill] sm:$0xff] %v10476_v4  ;;  %14533 = vst [vmem:[#allocation202_spill] sm:$0xff] %v10480_v20  ;;  %v10488_v3 = vadd.f32 %v14538_v44, %v14537_v11   ;;  %v14540_v16 = vld [vmem:[#allocation32_spill] sm:$0xff]  ;;  %v14543_v50 = vld [vmem:[#allocation31_spill] sm:$0xff] }
 0x189   : >> { %14536 = vst [vmem:[#allocation203_spill] sm:$0xff] %v10484_v10  ;;  %v14541_v48 = vld [vmem:[#allocation72_spill] sm:$0xff]  ;;  %v14544_v6 = vld [vmem:[#allocation125_spill] sm:$0xff]  ;;  %v14546_v42 = vld [vmem:[#allocation30_spill] sm:$0xff] }
 0x18a   : >> { %14539 = vst [vmem:[#allocation204_spill] sm:$0xff] %v10488_v3  ;;  %v10492_v17 = vadd.f32 %v14541_v48, %v14540_v16   ;;  %v10496_v16 = vadd.f32 %v14544_v6, %v14543_v50   ;;  %v14547_v7 = vld [vmem:[#allocation71_spill] sm:$0xff]  ;;  %v14549_v61 = vld [vmem:[#allocation29_spill] sm:$0xff]  ;;  %v14550_v52 = vld [vmem:[#allocation126_spill] sm:$0xff] }
 0x18b   : >> { %v10500_v35 = vadd.f32 %v14547_v7, %v14546_v42   ;;  %v10504_v0 = vadd.f32 %v14550_v52, %v14549_v61   ;;  %v14552_v37 = vld [vmem:[#allocation28_spill] sm:$0xff]  ;;  %v14553_v23 = vld [vmem:[#allocation127_spill] sm:$0xff]  ;;  %v14556_v22 = vld [vmem:[#allocation70_spill] sm:$0xff]  ;;  %v14598_v61 = vmov %v10175_v54 }
 0x18c   : >> { %14542 = vst [vmem:[#allocation205_spill] sm:$0xff] %v10492_v17  ;;  %14545 = vst [vmem:[#allocation206_spill] sm:$0xff] %v10496_v16  ;;  %v10508_v13 = vadd.f32 %v14553_v23, %v14552_v37   ;;  %v14555_v25 = vld [vmem:[#allocation27_spill] sm:$0xff]  ;;  %v14558_v17 = vld [vmem:[#allocation26_spill] sm:$0xff] }
 0x18d   : >> { %14548 = vst [vmem:[#allocation207_spill] sm:$0xff] %v10500_v35  ;;  %14551 = vst [vmem:[#allocation208_spill] sm:$0xff] %v10504_v0  ;;  %v10512_v12 = vadd.f32 %v14556_v22, %v14555_v25   ;;  %v14559_v49 = vld [vmem:[#allocation128_spill] sm:$0xff]  ;;  %v14561_v9 = vld [vmem:[#allocation25_spill] sm:$0xff] }
 0x18e   : >> { %14554 = vst [vmem:[#allocation209_spill] sm:$0xff] %v10508_v13  ;;  %v10516_v11 = vadd.f32 %v14559_v49, %v14558_v17   ;;  %v14562_v47 = vld [vmem:[#allocation69_spill] sm:$0xff]  ;;  %v14564_v30 = vld [vmem:[#allocation24_spill] sm:$0xff]  ;;  %v14567_v56 = vld [vmem:[#allocation23_spill] sm:$0xff] }
 0x18f   : >> { %14557 = vst [vmem:[#allocation210_spill] sm:$0xff] %v10512_v12  ;;  %v10520_v10 = vadd.f32 %v14562_v47, %v14561_v9   ;;  %v14565_v53 = vld [vmem:[#allocation129_spill] sm:$0xff]  ;;  %v14568_v20 = vld [vmem:[#allocation68_spill] sm:$0xff]  ;;  %v14570_v13 = vld [vmem:[#allocation22_spill] sm:$0xff] }
 0x190   : >> { %14560 = vst [vmem:[#allocation211_spill] sm:$0xff] %v10516_v11  ;;  %v10524_v9 = vadd.f32 %v14565_v53, %v14564_v30   ;;  %v10528_v36 = vadd.f32 %v14568_v20, %v14567_v56   ;;  %v14571_v29 = vld [vmem:[#allocation130_spill] sm:$0xff]  ;;  %v14573_v12 = vld [vmem:[#allocation21_spill] sm:$0xff]  ;;  %v14574_v39 = vld [vmem:[#allocation67_spill] sm:$0xff] }
 0x191   : >> { %14563 = vst [vmem:[#allocation212_spill] sm:$0xff] %v10520_v10  ;;  %v10532_v7 = vadd.f32 %v14571_v29, %v14570_v13   ;;  %v10536_v6 = vadd.f32 %v14574_v39, %v14573_v12   ;;  %v14576_v27 = vld [vmem:[#allocation20_spill] sm:$0xff]  ;;  %v14577_v4 = vld [vmem:[#allocation131_spill] sm:$0xff]  ;;  %v14580_v2 = vld [vmem:[#allocation66_spill] sm:$0xff]  ;;  %v14621_v12 = vmov %v10206_v59 }
 0x192   : >> { %14566 = vst [vmem:[#allocation213_spill] sm:$0xff] %v10524_v9  ;;  %14569 = vst [vmem:[#allocation214_spill] sm:$0xff] %v10528_v36  ;;  %v10540_v31 = vadd.f32 %v14577_v4, %v14576_v27   ;;  %v14579_v32 = vld [vmem:[#allocation19_spill] sm:$0xff]  ;;  %v14582_v1 = vld [vmem:[#allocation18_spill] sm:$0xff] }
 0x193   : >> { %14572 = vst [vmem:[#allocation215_spill] sm:$0xff] %v10532_v7  ;;  %14575 = vst [vmem:[#allocation216_spill] sm:$0xff] %v10536_v6  ;;  %v10544_v4 = vadd.f32 %v14580_v2, %v14579_v32   ;;  %v14583_v10 = vld [vmem:[#allocation132_spill] sm:$0xff]  ;;  %v14585_v11 = vld [vmem:[#allocation17_spill] sm:$0xff] }
 0x194   : >> { %14578 = vst [vmem:[#allocation217_spill] sm:$0xff] %v10540_v31  ;;  %v10548_v3 = vadd.f32 %v14583_v10, %v14582_v1   ;;  %v14586_v44 = vld [vmem:[#allocation65_spill] sm:$0xff]  ;;  %v14588_v16 = vld [vmem:[#allocation16_spill] sm:$0xff]  ;;  %v14591_v50 = vld [vmem:[#allocation15_spill] sm:$0xff] }
 0x195   : >> { %14581 = vst [vmem:[#allocation218_spill] sm:$0xff] %v10544_v4  ;;  %v10552_v2 = vadd.f32 %v14586_v44, %v14585_v11   ;;  %v14589_v48 = vld [vmem:[#allocation133_spill] sm:$0xff]  ;;  %v14592_v6 = vld [vmem:[#allocation64_spill] sm:$0xff]  ;;  %v14595_v7 = vld [vmem:[#allocation134_spill] sm:$0xff] }
 0x196   : >> { %14584 = vst [vmem:[#allocation219_spill] sm:$0xff] %v10548_v3  ;;  %v10556_v1 = vadd.f32 %v14589_v48, %v14588_v16   ;;  %v10560_v0 = vadd.f32 %v14592_v6, %v14591_v50   ;;  %v14594_v42 = vld [vmem:[#allocation53_spill] sm:$0xff]  ;;  %v14597_v35 = vld [vmem:[#allocation54_spill] sm:$0xff]  ;;  %v14600_v3 = vld [vmem:[#allocation55_spill] sm:$0xff] }
 0x197   : >> { %14587 = vst [vmem:[#allocation220_spill] sm:$0xff] %v10552_v2  ;;  %v10564_v52 = vadd.f32 %v14595_v7, %v14594_v42   ;;  %v10568_v37 = vadd.f32 %v14598_v61, %v14597_v35   ;;  %v14601_v23 = vld [vmem:[#allocation63_spill] sm:$0xff]  ;;  %v14603_v25 = vld [vmem:[#allocation56_spill] sm:$0xff]  ;;  %v14606_v17 = vld [vmem:[#allocation57_spill] sm:$0xff] }
 0x198   : >> { %14590 = vst [vmem:[#allocation221_spill] sm:$0xff] %v10556_v1  ;;  %14593 = vst [vmem:[#allocation222_spill] sm:$0xff] %v10560_v0  ;;  %v10572_v50 = vadd.f32 %v14601_v23, %v14600_v3   ;;  %v14604_v22 = vld [vmem:[#allocation136_spill] sm:$0xff]  ;;  %v14607_v9 = vld [vmem:[#allocation62_spill] sm:$0xff] }
 0x199   : >> { %14596 = vst [vmem:[#allocation223_spill] sm:$0xff] %v10564_v52  ;;  %14599 = vst [vmem:[#allocation224_spill] sm:$0xff] %v10568_v37  ;;  %v10576_v49 = vadd.f32 %v14604_v22, %v14603_v25   ;;  %v10580_v48 = vadd.f32 %v14607_v9, %v14606_v17   ;;  %v14609_v0 = vld [vmem:[#allocation58_spill] sm:$0xff]  ;;  %v14611_v52 = vld [vmem:[#allocation59_spill] sm:$0xff] }
 0x19a   : >> { %14602 = vst [vmem:[#allocation225_spill] sm:$0xff] %v10572_v50  ;;  %v10584_v47 = vadd.f32 %v10191_v18, %v14609_v0   ;;  %v14612_v30 = vld [vmem:[#allocation137_spill] sm:$0xff]  ;;  %v14614_v56 = vld [vmem:[#allocation51_spill] sm:$0xff]  ;;  %v14617_v13 = vld [vmem:[#allocation52_spill] sm:$0xff] }
 0x19b   : >> { %14605 = vst [vmem:[#allocation226_spill] sm:$0xff] %v10576_v49  ;;  %14608 = vst [vmem:[#allocation227_spill] sm:$0xff] %v10580_v48  ;;  %v10588_v53 = vadd.f32 %v14612_v30, %v14611_v52   ;;  %v14615_v20 = vld [vmem:[#allocation61_spill] sm:$0xff]  ;;  %v14618_v29 = vld [vmem:[#allocation138_spill] sm:$0xff] }
 0x19c   : >> { %14610 = vst [vmem:[#allocation228_spill] sm:$0xff] %v10584_v47  ;;  %v10592_v36 = vadd.f32 %v14615_v20, %v14614_v56   ;;  %v10596_v44 = vadd.f32 %v14618_v29, %v14617_v13   ;;  %v14620_v49 = vld [vmem:[#allocation147_spill] sm:$0xff]  ;;  %v14623_v27 = vld [vmem:[#allocation102_spill] sm:$0xff]  ;;  %v14624_v4 = vld [vmem:[#allocation112_spill] sm:$0xff] }
 0x19d   : >> { %14613 = vst [vmem:[#allocation229_spill] sm:$0xff] %v10588_v53  ;;  %v10600_v39 = vadd.f32 %v14621_v12, %v14620_v49   ;;  %v10604_v42 = vadd.f32 %v14624_v4, %v14623_v27   ;;  %v14626_v18 = vld [vmem:[#allocation101_spill] sm:$0xff]  ;;  %v14627_v47 = vld [vmem:[#allocation140_spill] sm:$0xff]  ;;  %v14637_v48 = vld [vmem:[#allocation99_spill] sm:$0xff] }
 0x19e   : >> { %14616 = vst [vmem:[#allocation230_spill] sm:$0xff] %v10592_v36  ;;  %14619 = vst [vmem:[#allocation231_spill] sm:$0xff] %v10596_v44  ;;  %v10608_v31 = vadd.f32 %v14627_v47, %v14626_v18   ;;  %v14629_v32 = vld [vmem:[#allocation148_spill] sm:$0xff]  ;;  %v14634_v11 = vld [vmem:[#allocation149_spill] sm:$0xff] }
 0x19f   : >> { %14622 = vst [vmem:[#allocation232_spill] sm:$0xff] %v10600_v39  ;;  %14625 = vst [vmem:[#allocation233_spill] sm:$0xff] %v10604_v42  ;;  %v14630_v2 = vld [vmem:[#allocation60_spill] sm:$0xff]  ;;  %v14635_v44 = vld [vmem:[#allocation111_spill] sm:$0xff] }
 0x1a0   : >> { %14628 = vst [vmem:[#allocation234_spill] sm:$0xff] %v10608_v31  ;;  %v10612_v1 = vadd.f32 %v14630_v2, %v14629_v32   ;;  %v14632_v10 = vld [vmem:[#allocation100_spill] sm:$0xff]  ;;  %v10620_v16 = vadd.f32 %v14635_v44, %v14634_v11   ;;  %v14638_v50 = vld [vmem:[#allocation141_spill] sm:$0xff]  ;;  %v14640_v6 = vld [vmem:[#allocation150_spill] sm:$0xff] }
 0x1a1   : >> { %v10616_v39 = vadd.f32 %v10221_v19, %v14632_v10   ;;  %v10624_v37 = vadd.f32 %v14638_v50, %v14637_v48   ;;  %v14641_v42 = vld [vmem:[#allocation110_spill] sm:$0xff]  ;;  %v14645_v61 = vld [vmem:[#allocation97_spill] sm:$0xff]  ;;  %v14648_v23 = vld [vmem:[#allocation151_spill] sm:$0xff] }
 0x1a2   : >> { %14631 = vst [vmem:[#allocation235_spill] sm:$0xff] %v10612_v1  ;;  %14636 = vst [vmem:[#allocation237_spill] sm:$0xff] %v10620_v16  ;;  %v10628_v36 = vadd.f32 %v14641_v42, %v14640_v6   ;;  %v14643_v7 = vld [vmem:[#allocation98_spill] sm:$0xff]  ;;  %v14646_v3 = vld [vmem:[#allocation109_spill] sm:$0xff] }
 0x1a3   : >> { %14633 = vst [vmem:[#allocation236_spill] sm:$0xff] %v10616_v39  ;;  %14639 = vst [vmem:[#allocation238_spill] sm:$0xff] %v10624_v37  ;;  %v10632_v35 = vadd.f32 %v10236_v60, %v14643_v7   ;;  %v10636_v19 = vadd.f32 %v14646_v3, %v14645_v61   ;;  %v14649_v25 = vld [vmem:[#allocation142_spill] sm:$0xff]  ;;  %v14651_v17 = vld [vmem:[#allocation96_spill] sm:$0xff] }
 0x1a4   : >> { %14642 = vst [vmem:[#allocation239_spill] sm:$0xff] %v10628_v36  ;;  %v10640_v22 = vadd.f32 %v14649_v25, %v14648_v23   ;;  %v14652_v9 = vld [vmem:[#allocation108_spill] sm:$0xff]  ;;  %v14656_v0 = vld [vmem:[#allocation95_spill] sm:$0xff]  ;;  %v14659_v60 = vld [vmem:[#allocation153_spill] sm:$0xff] }
 0x1a5   : >> { %14644 = vst [vmem:[#allocation240_spill] sm:$0xff] %v10632_v35  ;;  %14647 = vst [vmem:[#allocation241_spill] sm:$0xff] %v10636_v19  ;;  %v10644_v32 = vadd.f32 %v14652_v9, %v14651_v17   ;;  %v14654_v37 = vld [vmem:[#allocation152_spill] sm:$0xff]  ;;  %v14657_v52 = vld [vmem:[#allocation143_spill] sm:$0xff] }
 0x1a6   : >> { %14650 = vst [vmem:[#allocation242_spill] sm:$0xff] %v10640_v22  ;;  %v10648_v31 = vadd.f32 %v10251_v26, %v14654_v37   ;;  %v10652_v30 = vadd.f32 %v14657_v52, %v14656_v0   ;;  %v14660_v35 = vld [vmem:[#allocation107_spill] sm:$0xff]  ;;  %v14662_v53 = vld [vmem:[#allocation94_spill] sm:$0xff]  ;;  %v14663_v56 = vld [vmem:[#allocation144_spill] sm:$0xff] }
 0x1a7   : >> { %14653 = vst [vmem:[#allocation243_spill] sm:$0xff] %v10644_v32  ;;  %v10656_v29 = vadd.f32 %v14660_v35, %v14659_v60   ;;  %v10660_v20 = vadd.f32 %v14663_v56, %v14662_v53   ;;  %v14665_v36 = vld [vmem:[#allocation93_spill] sm:$0xff]  ;;  %v14666_v13 = vld [vmem:[#allocation106_spill] sm:$0xff]  ;;  %v14671_v39 = vld [vmem:[#allocation92_spill] sm:$0xff] }
 0x1a8   : >> { %14655 = vst [vmem:[#allocation244_spill] sm:$0xff] %v10648_v31  ;;  %14658 = vst [vmem:[#allocation245_spill] sm:$0xff] %v10652_v30  ;;  %v10664_v27 = vadd.f32 %v14666_v13, %v14665_v36   ;;  %v14668_v49 = vld [vmem:[#allocation154_spill] sm:$0xff]  ;;  %v14669_v12 = vld [vmem:[#allocation105_spill] sm:$0xff]  ;;  %v14678_v31 = vmov %v10281_v58 }
 0x1a9   : >> { %14661 = vst [vmem:[#allocation246_spill] sm:$0xff] %v10656_v29  ;;  %14664 = vst [vmem:[#allocation247_spill] sm:$0xff] %v10660_v20  ;;  %v10668_v26 = vadd.f32 %v14669_v12, %v14668_v49   ;;  %v14672_v4 = vld [vmem:[#allocation145_spill] sm:$0xff]  ;;  %v14674_v30 = vld [vmem:[#allocation155_spill] sm:$0xff] }
 0x1aa   : >> { %14667 = vst [vmem:[#allocation248_spill] sm:$0xff] %v10664_v27  ;;  %v10672_v25 = vadd.f32 %v14672_v4, %v14671_v39   ;;  %v14675_v18 = vld [vmem:[#allocation104_spill] sm:$0xff]  ;;  %v14677_v29 = vld [vmem:[#allocation91_spill] sm:$0xff]  ;;  %v14683_v27 = vld [vmem:[#allocation90_spill] sm:$0xff] }
 0x1ab   : >> { %14670 = vst [vmem:[#allocation249_spill] sm:$0xff] %v10668_v26  ;;  %v10676_v47 = vadd.f32 %v14675_v18, %v14674_v30   ;;  %v10680_v23 = vadd.f32 %v14678_v31, %v14677_v29   ;;  %v14680_v32 = vld [vmem:[#allocation156_spill] sm:$0xff]  ;;  %v14681_v2 = vld [vmem:[#allocation103_spill] sm:$0xff]  ;;  %v14686_v26 = vld [vmem:[#allocation89_spill] sm:$0xff] }
 0x1ac   : >> { %14673 = vst [vmem:[#allocation250_spill] sm:$0xff] %v10672_v25  ;;  %v10684_v22 = vadd.f32 %v14681_v2, %v14680_v32   ;;  %v14684_v1 = vld [vmem:[#allocation168_spill] sm:$0xff]  ;;  %v14687_v11 = vld [vmem:[#allocation169_spill] sm:$0xff]  ;;  %v14693_v48 = vld [vmem:[#allocation158_spill] sm:$0xff] }
 0x1ad   : >> { %14676 = vst [vmem:[#allocation251_spill] sm:$0xff] %v10676_v47  ;;  %14679 = vst [vmem:[#allocation252_spill] sm:$0xff] %v10680_v23  ;;  %v10688_v10 = vadd.f32 %v14684_v1, %v14683_v27   ;;  %v10692_v20 = vadd.f32 %v14687_v11, %v14686_v26   ;;  %v14689_v44 = vld [vmem:[#allocation157_spill] sm:$0xff]  ;;  %v14691_v16 = vld [vmem:[#allocation88_spill] sm:$0xff]  ;;  %v10704_v17 = vadd.f32 %v10302_v62, %v14693_v48  }
 0x1ae   : >> { %14682 = vst [vmem:[#allocation253_spill] sm:$0xff] %v10684_v22  ;;  %v10696_v19 = vadd.f32 %v10296_v41, %v14689_v44   ;;  %v10700_v18 = vadd.f32 %v10299_v51, %v14691_v16   ;;  %v14695_v50 = vld [vmem:[#allocation87_spill] sm:$0xff]  ;;  %v14696_v6 = vld [vmem:[#allocation170_spill] sm:$0xff]  ;;  %v14702_v3 = vld [vmem:[#allocation160_spill] sm:$0xff] }
 0x1af   : >> { %14685 = vst [vmem:[#allocation254_spill] sm:$0xff] %v10688_v10  ;;  %14688 = vst [vmem:[#allocation255_spill] sm:$0xff] %v10692_v20  ;;  %v10708_v16 = vadd.f32 %v14696_v6, %v14695_v50   ;;  %v14698_v42 = vld [vmem:[#allocation159_spill] sm:$0xff]  ;;  %v14700_v61 = vld [vmem:[#allocation86_spill] sm:$0xff]  ;;  %v10720_v13 = vadd.f32 %v10317_v43, %v14702_v3  }
 0x1b0   : >> { %14690 = vst [vmem:[#allocation256_spill] sm:$0xff] %v10696_v19  ;;  %14692 = vst [vmem:[#allocation257_spill] sm:$0xff] %v10700_v18  ;;  %v10712_v7 = vadd.f32 %v10311_v38, %v14698_v42   ;;  %v10716_v41 = vadd.f32 %v10314_v28, %v14700_v61   ;;  %v14704_v51 = vld [vmem:[#allocation85_spill] sm:$0xff]  ;;  %v14708_v19 = vld [vmem:[#allocation84_spill] sm:$0xff] }
 0x1b1   : >> { %14694 = vst [vmem:[#allocation258_spill] sm:$0xff] %v10704_v17  ;;  %14697 = vst [vmem:[#allocation259_spill] sm:$0xff] %v10708_v16  ;;  %v10724_v12 = vadd.f32 %v10320_v63, %v14704_v51   ;;  %v14706_v62 = vld [vmem:[#allocation161_spill] sm:$0xff]  ;;  %v10732_v10 = vadd.f32 %v10326_v34, %v14708_v19   ;;  %v14710_v38 = vld [vmem:[#allocation162_spill] sm:$0xff] }
 0x1b2   : >> { %14699 = vst [vmem:[#allocation260_spill] sm:$0xff] %v10712_v7  ;;  %14701 = vst [vmem:[#allocation261_spill] sm:$0xff] %v10716_v41  ;;  %v10728_v11 = vadd.f32 %v10323_v24, %v14706_v62   ;;  %v10736_v9 = vadd.f32 %v10329_v8, %v14710_v38   ;;  %v14712_v28 = vld [vmem:[#allocation83_spill] sm:$0xff]  ;;  %v14716_v63 = vld [vmem:[#allocation82_spill] sm:$0xff] }
 0x1b3   : >> { %14703 = vst [vmem:[#allocation262_spill] sm:$0xff] %v10720_v13  ;;  %14705 = vst [vmem:[#allocation263_spill] sm:$0xff] %v10724_v12  ;;  %v10740_v8 = vadd.f32 %v10332_v40, %v14712_v28   ;;  %v14714_v43 = vld [vmem:[#allocation163_spill] sm:$0xff]  ;;  %v10748_v6 = vadd.f32 %v10338_v45, %v14716_v63   ;;  %v14718_v24 = vld [vmem:[#allocation81_spill] sm:$0xff] }
 0x1b4   : >> { %14707 = vst [vmem:[#allocation264_spill] sm:$0xff] %v10728_v11  ;;  %14709 = vst [vmem:[#allocation265_spill] sm:$0xff] %v10732_v10  ;;  %v10744_v7 = vadd.f32 %v10335_v14, %v14714_v43   ;;  %v10752_v34 = vadd.f32 %v10341_v46, %v14718_v24   ;;  %v14720_v23 = vld [vmem:[#allocation80_spill] sm:$0xff]  ;;  %v14729_v40 = vld [vmem:[#allocation113_spill] sm:$0xff]  ;;  %v14754_v24 = vmov %v10676_v47 }
 0x1b5   : >> { %14711 = vst [vmem:[#allocation266_spill] sm:$0xff] %v10736_v9  ;;  %14713 = vst [vmem:[#allocation267_spill] sm:$0xff] %v10740_v8  ;;  %v10756_v4 = vadd.f32 %v10344_v5, %v14720_v23   ;;  %v14723_v25 = vld [vmem:[#allocation164_spill] sm:$0xff]  ;;  %v14726_v8 = vld [vmem:[#allocation79_spill] sm:$0xff] }
 0x1b6   : >> { %14715 = vst [vmem:[#allocation268_spill] sm:$0xff] %v10744_v7  ;;  %14717 = vst [vmem:[#allocation269_spill] sm:$0xff] %v10748_v6  ;;  %v10760_v3 = vadd.f32 %v10347_v15, %v14723_v25   ;;  %v10764_v2 = vadd.f32 %v10350_v33, %v14726_v8   ;;  %v14730_v14 = vld [vmem:[#allocation171_spill] sm:$0xff]  ;;  %v14733_v45 = vld [vmem:[#allocation165_spill] sm:$0xff]  ;;  %v14747_v5 = vmov %v10752_v34 }
 0x1b7   : >> { %14719 = vst [vmem:[#allocation270_spill] sm:$0xff] %v10752_v34  ;;  %14721 = vst [vmem:[#allocation271_spill] sm:$0xff] %v10756_v4  ;;  %v10768_v1 = vadd.f32 %v14730_v14, %v14729_v40   ;;  %v10772_v0 = vadd.f32 %v10356_v21, %v14733_v45   ;;  %v14745_v57 = vmov %v10756_v4  ;;  %v14749_v14 = vmov %v10716_v41  ;;  %v14751_v19 = vld [vmem:[#allocation256_spill] sm:$0xff]  ;;  %v14752_v21 = vld [vmem:[#allocation254_spill] sm:$0xff] }
 0x1b8   : >> { %14724 = vst [vmem:[#allocation272_spill] sm:$0xff] %v10760_v3  ;;  %14727 = vst [vmem:[#allocation273_spill] sm:$0xff] %v10764_v2  ;;  %v14741_v58 = vmov %v10764_v2  ;;  %v14743_v59 = vmov %v10760_v3  ;;  %v14746_v4 = vmov %v14745_v57  ;;  %v14753_v23 = vld [vmem:[#allocation252_spill] sm:$0xff]  ;;  %v14755_v25 = vld [vmem:[#allocation250_spill] sm:$0xff] }
 0x1b9   : >> { %14731 = vst [vmem:[#allocation274_spill] sm:$0xff] %v10768_v1  ;;  %14734 = vst [vmem:[#allocation275_spill] sm:$0xff] %v10772_v0  ;;  %v14737_v54 = vmov %v10772_v0  ;;  %v14739_v55 = vmov %v10768_v1  ;;  %v14742_v2 = vmov %v14741_v58  ;;  %v14744_v3 = vmov %v14743_v59  ;;  %v14750_v15 = vld [vmem:[#allocation260_spill] sm:$0xff]  ;;  %v14756_v26 = vld [vmem:[#allocation249_spill] sm:$0xff] }
 0x1ba   : >> { %v14738_v0 = vmov %v14737_v54  ;;  %v14740_v1 = vmov %v14739_v55  ;;  %v14757_v27 = vld [vmem:[#allocation248_spill] sm:$0xff]  ;;  %v14758_v28 = vld [vmem:[#allocation247_spill] sm:$0xff]  ;;  %v14759_v29 = vld [vmem:[#allocation246_spill] sm:$0xff]  ;;  %v11116_v26 = vstv (%p10777_p6), %s1197_s19 }
 0x1bb   : >> { %v14760_v30 = vld [vmem:[#allocation245_spill] sm:$0xff]  ;;  %v14761_v31 = vld [vmem:[#allocation244_spill] sm:$0xff]  ;;  %v14762_v32 = vld [vmem:[#allocation243_spill] sm:$0xff] }
 0x1bc   : >> { %v14748_v8 = vld [vmem:[#allocation267_spill] sm:$0xff]  ;;  %v14763_v33 = vld [vmem:[#allocation242_spill] sm:$0xff]  ;;  %v14764_v34 = vld [vmem:[#allocation241_spill] sm:$0xff] }
 0x1bd   : >> { %v14765_v35 = vld [vmem:[#allocation240_spill] sm:$0xff]  ;;  %v14766_v36 = vld [vmem:[#allocation239_spill] sm:$0xff]  ;;  %v14767_v37 = vld [vmem:[#allocation238_spill] sm:$0xff] }
 0x1be   : >> { %v14768_v38 = vld [vmem:[#allocation237_spill] sm:$0xff]  ;;  %v14769_v39 = vld [vmem:[#allocation236_spill] sm:$0xff]  ;;  %v14770_v40 = vld [vmem:[#allocation235_spill] sm:$0xff] }
 0x1bf   : >> { %v14771_v41 = vld [vmem:[#allocation234_spill] sm:$0xff]  ;;  %v14772_v42 = vld [vmem:[#allocation233_spill] sm:$0xff]  ;;  %v14773_v43 = vld [vmem:[#allocation232_spill] sm:$0xff] }
 0x1c0   : >> { %v14774_v44 = vld [vmem:[#allocation231_spill] sm:$0xff]  ;;  %v14775_v45 = vld [vmem:[#allocation230_spill] sm:$0xff]  ;;  %v14776_v46 = vld [vmem:[#allocation229_spill] sm:$0xff] }
 0x1c1   : >> { %v14777_v47 = vld [vmem:[#allocation228_spill] sm:$0xff]  ;;  %v14778_v48 = vld [vmem:[#allocation227_spill] sm:$0xff]  ;;  %v14779_v49 = vld [vmem:[#allocation226_spill] sm:$0xff] }
 0x1c2   : >> { %v14780_v50 = vld [vmem:[#allocation225_spill] sm:$0xff]  ;;  %v14781_v51 = vld [vmem:[#allocation224_spill] sm:$0xff]  ;;  %v14782_v52 = vld [vmem:[#allocation223_spill] sm:$0xff] }
 0x1c3   : >> { %v14783_v60 = vld [vmem:[#allocation222_spill] sm:$0xff]  ;;  %v14785_v53 = vld [vmem:[#allocation221_spill] sm:$0xff]  ;;  %v14787_v56 = vld [vmem:[#allocation220_spill] sm:$0xff] }
 0x1c4   : >> { %14784 = vst [vmem:[#allocation15_spill] sm:$0xff] %v14783_v60  ;;  %14786 = vst [vmem:[#allocation16_spill] sm:$0xff] %v14785_v53  ;;  %v14789_v61 = vld [vmem:[#allocation219_spill] sm:$0xff]  ;;  %v14791_v62 = vld [vmem:[#allocation218_spill] sm:$0xff] }
 0x1c5   : >> { %14788 = vst [vmem:[#allocation17_spill] sm:$0xff] %v14787_v56  ;;  %14790 = vst [vmem:[#allocation18_spill] sm:$0xff] %v14789_v61  ;;  %v14793_v63 = vld [vmem:[#allocation217_spill] sm:$0xff]  ;;  %v14795_v57 = vld [vmem:[#allocation216_spill] sm:$0xff] }
 0x1c6   : >> { %14792 = vst [vmem:[#allocation19_spill] sm:$0xff] %v14791_v62  ;;  %14794 = vst [vmem:[#allocation20_spill] sm:$0xff] %v14793_v63  ;;  %v14797_v54 = vld [vmem:[#allocation215_spill] sm:$0xff]  ;;  %v14799_v60 = vld [vmem:[#allocation214_spill] sm:$0xff] }
 0x1c7   : >> { %14796 = vst [vmem:[#allocation21_spill] sm:$0xff] %v14795_v57  ;;  %14798 = vst [vmem:[#allocation22_spill] sm:$0xff] %v14797_v54  ;;  %v14801_v53 = vld [vmem:[#allocation213_spill] sm:$0xff]  ;;  %v14803_v56 = vld [vmem:[#allocation212_spill] sm:$0xff] }
 0x1c8   : >> { %14800 = vst [vmem:[#allocation23_spill] sm:$0xff] %v14799_v60  ;;  %14802 = vst [vmem:[#allocation24_spill] sm:$0xff] %v14801_v53  ;;  %v14805_v61 = vld [vmem:[#allocation211_spill] sm:$0xff]  ;;  %v14807_v62 = vld [vmem:[#allocation210_spill] sm:$0xff] }
 0x1c9   : >> { %14804 = vst [vmem:[#allocation25_spill] sm:$0xff] %v14803_v56  ;;  %14806 = vst [vmem:[#allocation26_spill] sm:$0xff] %v14805_v61  ;;  %v14809_v63 = vld [vmem:[#allocation209_spill] sm:$0xff]  ;;  %v14811_v57 = vld [vmem:[#allocation208_spill] sm:$0xff] }
 0x1ca   : >> { %14808 = vst [vmem:[#allocation27_spill] sm:$0xff] %v14807_v62  ;;  %14810 = vst [vmem:[#allocation28_spill] sm:$0xff] %v14809_v63  ;;  %v14813_v54 = vld [vmem:[#allocation207_spill] sm:$0xff]  ;;  %v14815_v60 = vld [vmem:[#allocation206_spill] sm:$0xff] }
 0x1cb   : >> { %14812 = vst [vmem:[#allocation29_spill] sm:$0xff] %v14811_v57  ;;  %14814 = vst [vmem:[#allocation30_spill] sm:$0xff] %v14813_v54  ;;  %v14817_v53 = vld [vmem:[#allocation205_spill] sm:$0xff]  ;;  %v14819_v56 = vld [vmem:[#allocation204_spill] sm:$0xff] }
 0x1cc   : >> { %14816 = vst [vmem:[#allocation31_spill] sm:$0xff] %v14815_v60  ;;  %14818 = vst [vmem:[#allocation32_spill] sm:$0xff] %v14817_v53  ;;  %v14821_v61 = vld [vmem:[#allocation203_spill] sm:$0xff]  ;;  %v14823_v62 = vld [vmem:[#allocation202_spill] sm:$0xff] }
 0x1cd   : >> { %14820 = vst [vmem:[#allocation33_spill] sm:$0xff] %v14819_v56  ;;  %14822 = vst [vmem:[#allocation34_spill] sm:$0xff] %v14821_v61  ;;  %v14825_v63 = vld [vmem:[#allocation201_spill] sm:$0xff]  ;;  %v14827_v57 = vld [vmem:[#allocation200_spill] sm:$0xff] }
 0x1ce   : >> { %14824 = vst [vmem:[#allocation35_spill] sm:$0xff] %v14823_v62  ;;  %14826 = vst [vmem:[#allocation36_spill] sm:$0xff] %v14825_v63  ;;  %v14829_v54 = vld [vmem:[#allocation199_spill] sm:$0xff]  ;;  %v14831_v60 = vld [vmem:[#allocation198_spill] sm:$0xff] }
 0x1cf   : >> { %14828 = vst [vmem:[#allocation37_spill] sm:$0xff] %v14827_v57  ;;  %14830 = vst [vmem:[#allocation38_spill] sm:$0xff] %v14829_v54  ;;  %v14833_v53 = vld [vmem:[#allocation197_spill] sm:$0xff]  ;;  %v14835_v56 = vld [vmem:[#allocation196_spill] sm:$0xff] }
 0x1d0   : >> { %14832 = vst [vmem:[#allocation39_spill] sm:$0xff] %v14831_v60  ;;  %14834 = vst [vmem:[#allocation40_spill] sm:$0xff] %v14833_v53  ;;  %v14837_v61 = vld [vmem:[#allocation195_spill] sm:$0xff]  ;;  %v14839_v62 = vld [vmem:[#allocation194_spill] sm:$0xff] }
 0x1d1   : >> { %14836 = vst [vmem:[#allocation41_spill] sm:$0xff] %v14835_v56  ;;  %14838 = vst [vmem:[#allocation42_spill] sm:$0xff] %v14837_v61  ;;  %v14841_v63 = vld [vmem:[#allocation193_spill] sm:$0xff]  ;;  %v14843_v57 = vld [vmem:[#allocation192_spill] sm:$0xff] }
 0x1d2   : >> { %14840 = vst [vmem:[#allocation43_spill] sm:$0xff] %v14839_v62  ;;  %14842 = vst [vmem:[#allocation44_spill] sm:$0xff] %v14841_v63  ;;  %v14845_v54 = vld [vmem:[#allocation191_spill] sm:$0xff]  ;;  %v14847_v60 = vld [vmem:[#allocation190_spill] sm:$0xff] }
 0x1d3   : >> { %14844 = vst [vmem:[#allocation45_spill] sm:$0xff] %v14843_v57  ;;  %14846 = vst [vmem:[#allocation46_spill] sm:$0xff] %v14845_v54  ;;  %v14849_v53 = vld [vmem:[#allocation189_spill] sm:$0xff]  ;;  %v14851_v56 = vld [vmem:[#allocation188_spill] sm:$0xff] }
 0x1d4   : >> { %14848 = vst [vmem:[#allocation47_spill] sm:$0xff] %v14847_v60  ;;  %14850 = vst [vmem:[#allocation48_spill] sm:$0xff] %v14849_v53  ;;  %v14853_v61 = vld [vmem:[#allocation187_spill] sm:$0xff]  ;;  %v14855_v62 = vld [vmem:[#allocation186_spill] sm:$0xff] }
 0x1d5   : >> { %14852 = vst [vmem:[#allocation49_spill] sm:$0xff] %v14851_v56  ;;  %14854 = vst [vmem:[#allocation50_spill] sm:$0xff] %v14853_v61  ;;  %v14857_v63 = vld [vmem:[#allocation185_spill] sm:$0xff]  ;;  %v14859_v57 = vld [vmem:[#allocation184_spill] sm:$0xff]  ;;  %90 = sbr.rel (!%p10777_p6) target bundleno = 89 (0x59), region = 123 }
 0x1d6   : >> { %14856 = vst [vmem:[#allocation51_spill] sm:$0xff] %v14855_v62  ;;  %14858 = vst [vmem:[#allocation52_spill] sm:$0xff] %v14857_v63  ;;  %v14861_v54 = vld [vmem:[#allocation183_spill] sm:$0xff]  ;;  %v14863_v60 = vld [vmem:[#allocation182_spill] sm:$0xff] }
 0x1d7   : >> { %14860 = vst [vmem:[#allocation53_spill] sm:$0xff] %v14859_v57  ;;  %14862 = vst [vmem:[#allocation54_spill] sm:$0xff] %v14861_v54  ;;  %v14864_v61 = vld [vmem:[#allocation181_spill] sm:$0xff]  ;;  %v14865_v62 = vld [vmem:[#allocation180_spill] sm:$0xff] }
 0x1d8   : >> { %v14866_v63 = vld [vmem:[#allocation179_spill] sm:$0xff]  ;;  %v14867_v53 = vld [vmem:[#allocation178_spill] sm:$0xff]  ;;  %v14868_v54 = vld [vmem:[#allocation177_spill] sm:$0xff] }
 0x1d9   : >> { %14869 = vst [vmem:[#allocation55_spill] sm:$0xff] %v14868_v54  ;;  %v14870_v56 = vld [vmem:[#allocation176_spill] sm:$0xff]  ;;  %v14873_v57 = vld [vmem:[#allocation174_spill] sm:$0xff]  ;;  %v14875_v55 = vld [vmem:[#allocation173_spill] sm:$0xff] }
 0x1da   : >> { %14871 = vst [vmem:[#allocation56_spill] sm:$0xff] %v14870_v56  ;;  %v14872_v56 = vld [vmem:[#allocation175_spill] sm:$0xff]  ;;  %14874 = vst [vmem:[#allocation57_spill] sm:$0xff] %v14873_v57  ;;  %v14877_v58 = vld [vmem:[#allocation172_spill] sm:$0xff] }
 0x1db   : >> { %14876 = vst [vmem:[#allocation58_spill] sm:$0xff] %v14875_v55  ;;  %14878 = vst [vmem:[#allocation59_spill] sm:$0xff] %v14877_v58  ;;  %v14880_v54 = vld [vmem:[#allocation176_spill] sm:$0xff] (%p10777_p6) }
 0x1dc   : > { %v14881_v59 = vld [vmem:[#allocation172_spill] sm:$0xff]  ;;  %s11591_s22 = smov (%p82_p7), 0  }
 0x1dd   : > { %v1145_v57 = vmax.f32 %v14881_v59, %v14880_v54  ;;  %v14882_v55 = vld [vmem:[#allocation184_spill] sm:$0xff] }
 0x1de   : > { %v14883_v58 = vld [vmem:[#allocation180_spill] sm:$0xff] }
 0x1df   : > { %v1149_v0 = vmax.f32 %v14883_v58, %v14882_v55  ;;  %v14884_v1 = vld [vmem:[#allocation192_spill] sm:$0xff]  ;;  %v1211_v17 = vrot.slane %v1145_v57, 1 }
 0x1e0   : > { %v14885_v2 = vld [vmem:[#allocation188_spill] sm:$0xff] }
 0x1e1   : > { %v1153_v3 = vmax.f32 %v14885_v2, %v14884_v1  ;;  %v14886_v4 = vld [vmem:[#allocation200_spill] sm:$0xff]  ;;  %v1212_v37 = vrot.slane %v1149_v0, 1  ;;  %v1237_v39 = vmax.f32 %v1145_v57, %v1211_v17 }
 0x1e2   : > { %v14887_v5 = vld [vmem:[#allocation196_spill] sm:$0xff] }
 0x1e3   : > { %v1157_v6 = vmax.f32 %v14887_v5, %v14886_v4  ;;  %v14888_v7 = vld [vmem:[#allocation208_spill] sm:$0xff]  ;;  %v1213_v52 = vrot.slane %v1153_v3, 1  ;;  %v1238_v30 = vmax.f32 %v1149_v0, %v1212_v37  ;;  %v1251_v44 = vadd.f32 %v11116_v26, %v1237_v39 }
 0x1e4   : > { %v14889_v8 = vld [vmem:[#allocation204_spill] sm:$0xff] }
 0x1e5   : > { %v1161_v9 = vmax.f32 %v14889_v8, %v14888_v7  ;;  %v14890_v10 = vld [vmem:[#allocation216_spill] sm:$0xff]  ;;  %v1214_v35 = vrot.slane %v1157_v6, 1  ;;  %v1239_v18 = vmax.f32 %v1153_v3, %v1213_v52  ;;  %v1252_v16 = vadd.f32 %v11116_v26, %v1238_v30 }
 0x1e6   : > { %v14891_v11 = vld [vmem:[#allocation212_spill] sm:$0xff]  ;;  %v11126_v38 = vmax.f32 %v1251_v44, 0.0 }
 0x1e7   : > { %v1165_v12 = vmax.f32 %v14891_v11, %v14890_v10  ;;  %v14892_v46 = vld [vmem:[#allocation224_spill] sm:$0xff]  ;;  %v1215_v20 = vrot.slane %v1161_v9, 1  ;;  %v1240_v47 = vmax.f32 %v1157_v6, %v1214_v35  ;;  %v1253_v48 = vadd.f32 %v11116_v26, %v1239_v18 }
 0x1e8   : > { %v14893_v15 = vld [vmem:[#allocation220_spill] sm:$0xff]  ;;  %v1265_v28 = vmax.f32 %v1252_v16, 0.0 }
 0x1e9   : > { %v1169_v33 = vmax.f32 %v14893_v15, %v14892_v46  ;;  %v14894_v59 = vld [vmem:[#allocation232_spill] sm:$0xff]  ;;  %v1216_v36 = vrot.slane %v1165_v12, 1  ;;  %v1241_v29 = vmax.f32 %v1161_v9, %v1215_v20  ;;  %v1254_v50 = vadd.f32 %v11116_v26, %v1240_v47 }
 0x1ea   : > { %v14895_v21 = vld [vmem:[#allocation228_spill] sm:$0xff]  ;;  %v1266_v43 = vmax.f32 %v1253_v48, 0.0  ;;  %v11128_v14 = vrot.slane %v1265_v28, 7 }
 0x1eb   : > { %v1173_v22 = vmax.f32 %v14895_v21, %v14894_v59  ;;  %v1217_v13 = vrot.slane %v1169_v33, 1  ;;  %v1242_v31 = vmax.f32 %v1165_v12, %v1216_v36  ;;  %v1255_v42 = vadd.f32 %v11116_v26, %v1241_v29  ;;  %v14896_v57 = vld [vmem:[#allocation240_spill] sm:$0xff] }
 0x1ec   : > { %v1267_v24 = vmax.f32 %v1254_v50, 0.0  ;;  %v11130_v45 = vrot.slane %v1266_v43, 6  ;;  %v1293_v62 = vsel %vm1292_vm0, %v11128_v14, %v11126_v38  ;;  %v14897_v55 = vld [vmem:[#allocation236_spill] sm:$0xff]  ;;  %v1329_v20 = vsel %vm1298_vm2, %v11128_v14, %v11126_v38 }
 0x1ed   : > { %v1218_v49 = vrot.slane %v1173_v22, 1  ;;  %v1243_v32 = vmax.f32 %v1169_v33, %v1217_v13  ;;  %v1256_v41 = vadd.f32 %v11116_v26, %v1242_v31  ;;  %v1268_v34 = vmax.f32 %v1255_v42, 0.0  ;;  %v14898_v0 = vld [vmem:[#allocation248_spill] sm:$0xff] }
 0x1ee   : > { %v11132_v60 = vrot.slane %v1267_v24, 5  ;;  %v1296_v54 = vsel %vm1295_vm1, %v11130_v45, %v1293_v62  ;;  %v1177_v58 = vmax.f32 %v14897_v55, %v14896_v57  ;;  %v14899_v1 = vld [vmem:[#allocation244_spill] sm:$0xff]  ;;  %v1330_v47 = vsel %vm1301_vm3, %v11130_v45, %v1329_v20  ;;  %v14913_v20 = vld [vmem:[#allocation197_spill] sm:$0xff] }
 0x1ef   : > { %v1244_v27 = vmax.f32 %v1173_v22, %v1218_v49  ;;  %v1257_v51 = vadd.f32 %v11116_v26, %v1243_v32  ;;  %v1269_v23 = vmax.f32 %v1256_v41, 0.0  ;;  %v11134_v53 = vrot.slane %v1268_v34, 4  ;;  %v14900_v4 = vld [vmem:[#allocation256_spill] sm:$0xff] }
 0x1f0   : > { %v1181_v2 = vmax.f32 %v14899_v1, %v14898_v0  ;;  %v1299_v3 = vsel %vm1298_vm2, %v11132_v60, %v1296_v54  ;;  %v14901_v5 = vld [vmem:[#allocation252_spill] sm:$0xff]  ;;  %v1219_v15 = vrot.slane %v1177_v58, 1  ;;  %v1349_v24 = vsel %vm1304_vm4, %v11128_v14, %v11126_v38 }
 0x1f1   : > { %v1258_v19 = vadd.f32 %v11116_v26, %v1244_v27  ;;  %v1270_v25 = vmax.f32 %v1257_v51, 0.0  ;;  %v11136_v61 = vrot.slane %v1269_v23, 3  ;;  %v1185_v6 = vmax.f32 %v14901_v5, %v14900_v4  ;;  %v14902_v7 = vld [vmem:[#allocation264_spill] sm:$0xff] }
 0x1f2   : > { %v14903_v8 = vld [vmem:[#allocation260_spill] sm:$0xff]  ;;  %v1302_v46 = vsel %vm1301_vm3, %v11134_v53, %v1299_v3  ;;  %v1220_v33 = vrot.slane %v1181_v2, 1  ;;  %v1245_v52 = vmax.f32 %v1177_v58, %v1219_v15  ;;  %v1331_v27 = vsel %vm1304_vm4, %v11132_v60, %v1330_v47 }
 0x1f3   : > { %v1271_v40 = vmax.f32 %v1258_v19, 0.0  ;;  %v11141_v63 = vrot.slane %v1270_v25, 2  ;;  %v1189_v9 = vmax.f32 %v14903_v8, %v14902_v7  ;;  %v14904_v10 = vld [vmem:[#allocation272_spill] sm:$0xff]  ;;  %v1305_v59 = vsel %vm1304_vm4, %v11136_v61, %v1302_v46  ;;  %v14907_v46 = vld [vmem:[#allocation173_spill] sm:$0xff] }
 0x1f4   : > { %v14905_v11 = vld [vmem:[#allocation268_spill] sm:$0xff]  ;;  %v1221_v21 = vrot.slane %v1185_v6, 1  ;;  %v1246_v35 = vmax.f32 %v1181_v2, %v1220_v33  ;;  %v1259_v30 = vadd.f32 %v11116_v26, %v1245_v52  ;;  %v1332_v48 = vsel %vm1307_vm5, %v11134_v53, %v1331_v27  ;;  %v14920_v27 = vld [vmem:[#allocation233_spill] sm:$0xff] }
 0x1f5   : > { %v11143_v56 = vrot.slane %v1271_v40, 1  ;;  %v1193_v12 = vmax.f32 %v14905_v11, %v14904_v10  ;;  %v1222_v22 = vrot.slane %v1189_v9, 1  ;;  %v1308_v37 = vsel %vm1307_vm5, %v11141_v63, %v1305_v59 }
 0x1f6   : > { %v1247_v13 = vmax.f32 %v1185_v6, %v1221_v21  ;;  %v1260_v18 = vadd.f32 %v11116_v26, %v1246_v35  ;;  %v1272_v44 = vmax.f32 %v1259_v30, 0.0  ;;  %v1333_v19 = vsel %vm1310_vm6, %v11136_v61, %v1332_v48  ;;  %v14912_v35 = vld [vmem:[#allocation201_spill] sm:$0xff] }
 0x1f7   : > { %v1223_v17 = vrot.slane %v1193_v12, 1  ;;  %v1311_v36 = vsel %vm1310_vm6, %v11143_v56, %v1308_v37  ;;  %v1248_v49 = vmax.f32 %v1189_v9, %v1222_v22  ;;  %v1334_v50 = vsel %vm1292_vm0, %v11143_v56, %v11141_v63  ;;  %5237 = vst.msk [vmem:[%s11171_s21 + $0xe] sm:$0xfc] %vm1344_vm9, %v1333_v19  ;;  %v14910_v22 = vld [vmem:[#allocation193_spill] sm:$0xff] }
 0x1f8   : > { %1325 = vst.msk [vmem:[%s11171_s21] sm:$0xff] %vm1324_vm7, %v1311_v36  ;;  %v1261_v29 = vadd.f32 %v11116_v26, %v1247_v13  ;;  %v1273_v16 = vmax.f32 %v1260_v18, 0.0  ;;  %v1335_v43 = vsel %vm1295_vm1, %v1272_v44, %v1334_v50  ;;  %v1350_v40 = vsel %vm1307_vm5, %v11130_v45, %v1349_v24  ;;  %v14914_v13 = vld [vmem:[#allocation209_spill] sm:$0xff] }
 0x1f9   : > { %v1249_v39 = vmax.f32 %v1193_v12, %v1223_v17  ;;  %v1262_v31 = vadd.f32 %v11116_v26, %v1248_v49  ;;  %v1351_v57 = vsel %vm1310_vm6, %v11132_v60, %v1350_v40  ;;  %v1352_v0 = vsel %vm1292_vm0, %v11136_v61, %v11134_v53  ;;  %v14906_v12 = vld [vmem:[#allocation177_spill] sm:$0xff] }
 0x1fa   : > { %v1274_v42 = vmax.f32 %v1261_v29, 0.0  ;;  %v1312_v28 = vrot.slane %v1273_v16, 7  ;;  %5240 = vst.msk [vmem:[%s11171_s21 + $0x1c] sm:$0xf0] %vm1364_vm11, %v1351_v57  ;;  %v1353_v3 = vsel %vm1295_vm1, %v11141_v63, %v1352_v0  ;;  %v1370_v4 = vsel %vm1310_vm6, %v11128_v14, %v11126_v38  ;;  %v14911_v17 = vld [vmem:[#allocation189_spill] sm:$0xff] }
 0x1fb   : > { %v1263_v32 = vadd.f32 %v11116_v26, %v1249_v39  ;;  %v1275_v41 = vmax.f32 %v1262_v31, 0.0  ;;  %v1354_v7 = vsel %vm1298_vm2, %v11143_v56, %v1353_v3  ;;  %5244 = vst.msk [vmem:[%s11171_s21 + $0x2a] sm:$0xc0] %vm1385_vm13, %v1370_v4  ;;  %v1371_v38 = vsel %vm1292_vm0, %v11132_v60, %v11130_v45  ;;  %v14908_v45 = vld [vmem:[#allocation185_spill] sm:$0xff] }
 0x1fc   : > { %v1314_v34 = vrot.slane %v1274_v42, 6  ;;  %v1313_v62 = vsel %vm1292_vm0, %v1312_v28, %v1272_v44  ;;  %v1336_v54 = vsel %vm1298_vm2, %v1312_v28, %v1335_v43  ;;  %v1355_v8 = vsel %vm1301_vm3, %v1272_v44, %v1354_v7  ;;  %v14909_v60 = vld [vmem:[#allocation181_spill] sm:$0xff] }
 0x1fd   : > { %v1276_v51 = vmax.f32 %v1263_v32, 0.0  ;;  %v1316_v23 = vrot.slane %v1275_v41, 5  ;;  %v1356_v9 = vsel %vm1304_vm4, %v1312_v28, %v1355_v8  ;;  %v1372_v10 = vsel %vm1295_vm1, %v11134_v53, %v1371_v38  ;;  %v14915_v49 = vld [vmem:[#allocation205_spill] sm:$0xff] }
 0x1fe   : > { %v1315_v55 = vsel %vm1295_vm1, %v1314_v34, %v1313_v62  ;;  %v1337_v58 = vsel %vm1301_vm3, %v1314_v34, %v1336_v54  ;;  %v1146_v15 = vmax.f32 %v14907_v46, %v14906_v12  ;;  %v1357_v33 = vsel %vm1307_vm5, %v1314_v34, %v1356_v9  ;;  %v14916_v30 = vld [vmem:[#allocation217_spill] sm:$0xff] }
 0x1ff   : > { %v1318_v25 = vrot.slane %v1276_v51, 4  ;;  %v1317_v1 = vsel %vm1298_vm2, %v1316_v23, %v1315_v55  ;;  %v1338_v2 = vsel %vm1304_vm4, %v1316_v23, %v1337_v58  ;;  %v1378_v14 = vsel %vm1292_vm0, %v1316_v23, %v1314_v34  ;;  %v14917_v18 = vld [vmem:[#allocation213_spill] sm:$0xff] }
 0x200   : > { %v1373_v59 = vsel %vm1298_vm2, %v11136_v61, %v1372_v10  ;;  %v1150_v21 = vmax.f32 %v14909_v60, %v14908_v45  ;;  %v1154_v37 = vmax.f32 %v14911_v17, %v14910_v22  ;;  %v1358_v53 = vsel %vm1310_vm6, %v1316_v23, %v1357_v33  ;;  %v14918_v29 = vld [vmem:[#allocation225_spill] sm:$0xff] }
 0x201   : > { %5242 = vst.msk [vmem:[%s11171_s21 + $0x2c] sm:$0x1] %vm1367_vm12, %v1318_v25  ;;  %v1319_v5 = vsel %vm1301_vm3, %v1318_v25, %v1317_v1  ;;  %v1339_v6 = vsel %vm1307_vm5, %v1318_v25, %v1338_v2  ;;  %v1379_v11 = vsel %vm1295_vm1, %v1318_v25, %v1378_v14  ;;  %v1374_v52 = vsel %vm1301_vm3, %v11141_v63, %v1373_v59  ;;  %v14919_v31 = vld [vmem:[#allocation221_spill] sm:$0xff] }
 0x202   : > { %1327 = vst.msk [vmem:[%s11171_s21 + $0x8] sm:$0x1f] %vm1326_vm8, %v1319_v5  ;;  %v1158_v36 = vmax.f32 %v14913_v20, %v14912_v35  ;;  %v1162_v61 = vmax.f32 %v14915_v49, %v14914_v13  ;;  %v1375_v39 = vsel %vm1304_vm4, %v11143_v56, %v1374_v52  ;;  %v1166_v47 = vmax.f32 %v14917_v18, %v14916_v30  ;;  %v14921_v63 = vld [vmem:[#allocation229_spill] sm:$0xff] }
 0x203   : > { %5238 = vst.msk [vmem:[%s11171_s21 + $0x16] sm:$0x7f] %vm1346_vm10, %v1339_v6  ;;  %v1170_v32 = vmax.f32 %v14919_v31, %v14918_v29  ;;  %v1174_v16 = vmax.f32 %v14921_v63, %v14920_v27  ;;  %v1376_v48 = vsel %vm1307_vm5, %v1272_v44, %v1375_v39  ;;  %v1403_v50 = vrot.slane %v1146_v15, 1  ;;  %v14922_v46 = vld [vmem:[#allocation241_spill] sm:$0xff] }
 0x204   : > { %5246 = vst.msk [vmem:[%s11171_s21 + $0x3a] sm:$0x7] %vm1388_vm14, %v1379_v11  ;;  %v1404_v42 = vrot.slane %v1150_v21, 1  ;;  %v1405_v41 = vrot.slane %v1154_v37, 1  ;;  %v1377_v51 = vsel %vm1310_vm6, %v1312_v28, %v1376_v48  ;;  %v1406_v19 = vrot.slane %v1158_v36, 1  ;;  %v14925_v52 = vld [vmem:[#allocation245_spill] sm:$0xff] }
 0x205   : > { %5241 = vst.msk [vmem:[%s11171_s21 + $0x24] sm:$0xff] %vm1324_vm7, %v1358_v53  ;;  %v1407_v43 = vrot.slane %v1162_v61, 1  ;;  %v1408_v24 = vrot.slane %v1166_v47, 1  ;;  %5245 = vst.msk [vmem:[%s11171_s21 + $0x32] sm:$0xff] %vm1324_vm7, %v1377_v51  ;;  %v1409_v56 = vrot.slane %v1170_v32, 1  ;;  %v1410_v34 = vrot.slane %v1174_v16, 1 }
 0x206   : > { %v1429_v23 = vmax.f32 %v1146_v15, %v1403_v50  ;;  %v1430_v25 = vmax.f32 %v1150_v21, %v1404_v42  ;;  %v1431_v40 = vmax.f32 %v1154_v37, %v1405_v41  ;;  %v1432_v62 = vmax.f32 %v1158_v36, %v1406_v19  ;;  %v14923_v15 = vld [vmem:[#allocation237_spill] sm:$0xff] }
 0x207   : > { %v1433_v54 = vmax.f32 %v1162_v61, %v1407_v43  ;;  %v1434_v57 = vmax.f32 %v1166_v47, %v1408_v24  ;;  %v1435_v55 = vmax.f32 %v1170_v32, %v1409_v56  ;;  %v1436_v44 = vmax.f32 %v1174_v16, %v1410_v34  ;;  %v14924_v53 = vld [vmem:[#allocation249_spill] sm:$0xff] }
 0x208   : > { %v1442_v58 = vadd.f32 %v1429_v23, %v11116_v26  ;;  %v1443_v0 = vadd.f32 %v1430_v25, %v11116_v26  ;;  %v1444_v28 = vadd.f32 %v1431_v40, %v11116_v26  ;;  %v1445_v1 = vadd.f32 %v1432_v62, %v11116_v26  ;;  %v14926_v36 = vld [vmem:[#allocation257_spill] sm:$0xff] }
 0x209   : > { %v1446_v2 = vadd.f32 %v1433_v54, %v11116_v26  ;;  %v1447_v3 = vadd.f32 %v1434_v57, %v11116_v26  ;;  %v1448_v4 = vadd.f32 %v1435_v55, %v11116_v26  ;;  %v1449_v5 = vadd.f32 %v1436_v44, %v11116_v26  ;;  %v14927_v13 = vld [vmem:[#allocation253_spill] sm:$0xff] }
 0x20a   : > { %v11278_v6 = vmax.f32 %v1442_v58, 0.0  ;;  %v1456_v7 = vmax.f32 %v1443_v0, 0.0  ;;  %v1457_v8 = vmax.f32 %v1444_v28, 0.0  ;;  %v1458_v38 = vmax.f32 %v1445_v1, 0.0  ;;  %v14928_v61 = vld [vmem:[#allocation265_spill] sm:$0xff] }
 0x20b   : > { %v1459_v14 = vmax.f32 %v1446_v2, 0.0  ;;  %v1460_v9 = vmax.f32 %v1447_v3, 0.0  ;;  %v1461_v10 = vmax.f32 %v1448_v4, 0.0  ;;  %v1462_v11 = vmax.f32 %v1449_v5, 0.0  ;;  %v14929_v39 = vld [vmem:[#allocation261_spill] sm:$0xff] }
 0x20c   : > { %v1482_v12 = vrot.slane %v1456_v7, 7  ;;  %v1178_v33 = vmax.f32 %v14923_v15, %v14922_v46  ;;  %v11282_v59 = vrot.slane %v1457_v8, 6  ;;  %v11284_v45 = vrot.slane %v1458_v38, 5  ;;  %v14930_v18 = vld [vmem:[#allocation273_spill] sm:$0xff] }
 0x20d   : > { %v11286_v60 = vrot.slane %v1459_v14, 4  ;;  %v11288_v21 = vrot.slane %v1460_v9, 3  ;;  %v11292_v17 = vrot.slane %v1461_v10, 2  ;;  %v11294_v37 = vrot.slane %v1462_v11, 1  ;;  %v14931_v47 = vld [vmem:[#allocation269_spill] sm:$0xff] }
 0x20e   : > { %v1483_v22 = vsel %vm1292_vm0, %v1482_v12, %v11278_v6  ;;  %v1182_v35 = vmax.f32 %v14925_v52, %v14924_v53  ;;  %v1186_v49 = vmax.f32 %v14927_v13, %v14926_v36  ;;  %v1190_v30 = vmax.f32 %v14929_v39, %v14928_v61 }
 0x20f   : > { %v1485_v20 = vsel %vm1295_vm1, %v11282_v59, %v1483_v22  ;;  %v1194_v29 = vmax.f32 %v14931_v47, %v14930_v18  ;;  %v1411_v32 = vrot.slane %v1178_v33, 1  ;;  %v1511_v63 = vsel %vm1298_vm2, %v1482_v12, %v11278_v6 }
 0x210   : > { %v1487_v31 = vsel %vm1298_vm2, %v11284_v45, %v1485_v20  ;;  %v1412_v27 = vrot.slane %v1182_v35, 1  ;;  %v1413_v48 = vrot.slane %v1186_v49, 1  ;;  %v1414_v50 = vrot.slane %v1190_v30, 1 }
 0x211   : > { %v1489_v16 = vsel %vm1301_vm3, %v11286_v60, %v1487_v31  ;;  %v1415_v42 = vrot.slane %v1194_v29, 1  ;;  %v1437_v51 = vmax.f32 %v1178_v33, %v1411_v32  ;;  %v1512_v43 = vsel %vm1301_vm3, %v11282_v59, %v1511_v63  ;;  %v14933_v31 = vld [vmem:[#allocation174_spill] sm:$0xff] }
 0x212   : > { %v1491_v41 = vsel %vm1304_vm4, %v11288_v21, %v1489_v16  ;;  %v1438_v19 = vmax.f32 %v1182_v35, %v1412_v27  ;;  %v1439_v56 = vmax.f32 %v1186_v49, %v1413_v48  ;;  %v1440_v34 = vmax.f32 %v1190_v30, %v1414_v50  ;;  %v14934_v16 = vld [vmem:[#allocation186_spill] sm:$0xff] }
 0x213   : > { %v1493_v24 = vsel %vm1307_vm5, %v11292_v17, %v1491_v41  ;;  %v1441_v23 = vmax.f32 %v1194_v29, %v1415_v42  ;;  %v1450_v40 = vadd.f32 %v1437_v51, %v11116_v26  ;;  %v1513_v54 = vsel %vm1304_vm4, %v11284_v45, %v1512_v43  ;;  %v14932_v29 = vld [vmem:[#allocation178_spill] sm:$0xff] }
 0x214   : > { %v1495_v25 = vsel %vm1310_vm6, %v11294_v37, %v1493_v24  ;;  %v1451_v62 = vadd.f32 %v1438_v19, %v11116_v26  ;;  %v1452_v57 = vadd.f32 %v1439_v56, %v11116_v26  ;;  %v1453_v55 = vadd.f32 %v1440_v34, %v11116_v26  ;;  %v14935_v48 = vld [vmem:[#allocation182_spill] sm:$0xff] }
 0x215   : > { %5248 = vst.msk [vmem:[%s11171_s21 + $0x40] sm:$0xff] %vm1324_vm7, %v1495_v25  ;;  %v1454_v44 = vadd.f32 %v1441_v23, %v11116_v26  ;;  %v1514_v58 = vsel %vm1307_vm5, %v11286_v60, %v1513_v54  ;;  %v1463_v0 = vmax.f32 %v1450_v40, 0.0  ;;  %v1516_v2 = vsel %vm1292_vm0, %v11294_v37, %v11292_v17  ;;  %v14936_v42 = vld [vmem:[#allocation194_spill] sm:$0xff] }
 0x216   : > { %v1464_v28 = vmax.f32 %v1451_v62, 0.0  ;;  %v1515_v1 = vsel %vm1310_vm6, %v11288_v21, %v1514_v58  ;;  %v1465_v3 = vmax.f32 %v1452_v57, 0.0  ;;  %v1466_v4 = vmax.f32 %v1453_v55, 0.0  ;;  %v14937_v41 = vld [vmem:[#allocation190_spill] sm:$0xff] }
 0x217   : > { %v1467_v5 = vmax.f32 %v1454_v44, 0.0  ;;  %5251 = vst.msk [vmem:[%s11171_s21 + $0x4e] sm:$0xfc] %vm1344_vm9, %v1515_v1  ;;  %v1529_v7 = vsel %vm1304_vm4, %v1482_v12, %v11278_v6  ;;  %v1517_v38 = vsel %vm1295_vm1, %v1463_v0, %v1516_v2  ;;  %v1532_v9 = vsel %vm1292_vm0, %v11288_v21, %v11286_v60  ;;  %v14938_v19 = vld [vmem:[#allocation202_spill] sm:$0xff] }
 0x218   : > { %v1496_v8 = vrot.slane %v1464_v28, 7  ;;  %v1530_v14 = vsel %vm1307_vm5, %v11282_v59, %v1529_v7  ;;  %v1498_v10 = vrot.slane %v1465_v3, 6  ;;  %v1500_v11 = vrot.slane %v1466_v4, 5  ;;  %v14939_v43 = vld [vmem:[#allocation198_spill] sm:$0xff] }
 0x219   : > { %v1502_v46 = vrot.slane %v1467_v5, 4  ;;  %v1531_v15 = vsel %vm1310_vm6, %v11284_v45, %v1530_v14  ;;  %v1533_v53 = vsel %vm1295_vm1, %v11292_v17, %v1532_v9  ;;  %v1548_v52 = vsel %vm1310_vm6, %v1482_v12, %v11278_v6  ;;  %v14940_v56 = vld [vmem:[#allocation210_spill] sm:$0xff] }
 0x21a   : > { %v1497_v33 = vsel %vm1292_vm0, %v1496_v8, %v1463_v0  ;;  %v1518_v22 = vsel %vm1298_vm2, %v1496_v8, %v1517_v38  ;;  %5254 = vst.msk [vmem:[%s11171_s21 + $0x5c] sm:$0xf0] %vm1364_vm11, %v1531_v15  ;;  %v1534_v36 = vsel %vm1298_vm2, %v11294_v37, %v1533_v53  ;;  %v1549_v13 = vsel %vm1292_vm0, %v11284_v45, %v11282_v59  ;;  %v14941_v34 = vld [vmem:[#allocation206_spill] sm:$0xff] }
 0x21b   : > { %v1499_v35 = vsel %vm1295_vm1, %v1498_v10, %v1497_v33  ;;  %5256 = vst.msk [vmem:[%s11171_s21 + $0x6c] sm:$0x1] %vm1367_vm12, %v1502_v46  ;;  %v1519_v20 = vsel %vm1301_vm3, %v1498_v10, %v1518_v22  ;;  %v1535_v12 = vsel %vm1301_vm3, %v1463_v0, %v1534_v36  ;;  %v1550_v61 = vsel %vm1295_vm1, %v11286_v60, %v1549_v13  ;;  %v14942_v25 = vld [vmem:[#allocation218_spill] sm:$0xff] }
 0x21c   : > { %5258 = vst.msk [vmem:[%s11171_s21 + $0x6a] sm:$0xc0] %vm1385_vm13, %v1548_v52  ;;  %v1501_v49 = vsel %vm1298_vm2, %v1500_v11, %v1499_v35  ;;  %v1520_v6 = vsel %vm1304_vm4, %v1500_v11, %v1519_v20  ;;  %v1536_v18 = vsel %vm1304_vm4, %v1496_v8, %v1535_v12  ;;  %v1551_v59 = vsel %vm1298_vm2, %v11288_v21, %v1550_v61  ;;  %v14943_v40 = vld [vmem:[#allocation214_spill] sm:$0xff] }
 0x21d   : > { %v1503_v39 = vsel %vm1301_vm3, %v1502_v46, %v1501_v49  ;;  %v1521_v30 = vsel %vm1307_vm5, %v1502_v46, %v1520_v6  ;;  %v1537_v45 = vsel %vm1307_vm5, %v1498_v10, %v1536_v18  ;;  %v1552_v47 = vsel %vm1301_vm3, %v11292_v17, %v1551_v59  ;;  %v14944_v54 = vld [vmem:[#allocation226_spill] sm:$0xff] }
 0x21e   : > { %5249 = vst.msk [vmem:[%s11171_s21 + $0x48] sm:$0x1f] %vm1326_vm8, %v1503_v39  ;;  %v1556_v60 = vsel %vm1292_vm0, %v1500_v11, %v1498_v10  ;;  %v1147_v32 = vmax.f32 %v14933_v31, %v14932_v29  ;;  %v1538_v27 = vsel %vm1310_vm6, %v1500_v11, %v1537_v45  ;;  %v1553_v21 = vsel %vm1304_vm4, %v11294_v37, %v1552_v47  ;;  %v14945_v57 = vld [vmem:[#allocation222_spill] sm:$0xff] }
 0x21f   : > { %5252 = vst.msk [vmem:[%s11171_s21 + $0x56] sm:$0x7f] %vm1346_vm10, %v1521_v30  ;;  %v1557_v63 = vsel %vm1295_vm1, %v1502_v46, %v1556_v60  ;;  %v1151_v50 = vmax.f32 %v14935_v48, %v14934_v16  ;;  %v1554_v17 = vsel %vm1307_vm5, %v1463_v0, %v1553_v21  ;;  %v1155_v51 = vmax.f32 %v14937_v41, %v14936_v42  ;;  %v14946_v44 = vld [vmem:[#allocation234_spill] sm:$0xff] }
 0x220   : > { %5255 = vst.msk [vmem:[%s11171_s21 + $0x64] sm:$0xff] %vm1324_vm7, %v1538_v27  ;;  %v1159_v24 = vmax.f32 %v14939_v43, %v14938_v19  ;;  %v1163_v37 = vmax.f32 %v14941_v34, %v14940_v56  ;;  %v1555_v23 = vsel %vm1310_vm6, %v1496_v8, %v1554_v17  ;;  %v1167_v62 = vmax.f32 %v14943_v40, %v14942_v25  ;;  %v14947_v58 = vld [vmem:[#allocation230_spill] sm:$0xff] }
 0x221   : > { %5260 = vst.msk [vmem:[%s11171_s21 + $0x7a] sm:$0x7] %vm1388_vm14, %v1557_v63  ;;  %v1171_v55 = vmax.f32 %v14945_v57, %v14944_v54  ;;  %v1175_v0 = vmax.f32 %v14947_v58, %v14946_v44  ;;  %v1579_v28 = vrot.slane %v1147_v32, 1  ;;  %v1580_v1 = vrot.slane %v1151_v50, 1  ;;  %v14948_v31 = vld [vmem:[#allocation242_spill] sm:$0xff] }
 0x222   : > { %5259 = vst.msk [vmem:[%s11171_s21 + $0x72] sm:$0xff] %vm1324_vm7, %v1555_v23  ;;  %v1581_v2 = vrot.slane %v1155_v51, 1  ;;  %v1582_v3 = vrot.slane %v1159_v24, 1  ;;  %v1583_v4 = vrot.slane %v1163_v37, 1  ;;  %v1584_v5 = vrot.slane %v1167_v62, 1  ;;  %v14950_v17 = vld [vmem:[#allocation250_spill] sm:$0xff] }
 0x223   : > { %v1585_v7 = vrot.slane %v1171_v55, 1  ;;  %v1586_v38 = vrot.slane %v1175_v0, 1  ;;  %v1605_v8 = vmax.f32 %v1147_v32, %v1579_v28  ;;  %v1606_v14 = vmax.f32 %v1151_v50, %v1580_v1  ;;  %v14949_v32 = vld [vmem:[#allocation238_spill] sm:$0xff] }
 0x224   : > { %v1607_v9 = vmax.f32 %v1155_v51, %v1581_v2  ;;  %v1608_v10 = vmax.f32 %v1159_v24, %v1582_v3  ;;  %v1609_v11 = vmax.f32 %v1163_v37, %v1583_v4  ;;  %v1610_v46 = vmax.f32 %v1167_v62, %v1584_v5  ;;  %v14951_v42 = vld [vmem:[#allocation246_spill] sm:$0xff] }
 0x225   : > { %v1611_v15 = vmax.f32 %v1171_v55, %v1585_v7  ;;  %v1612_v33 = vmax.f32 %v1175_v0, %v1586_v38  ;;  %v1618_v22 = vadd.f32 %v1605_v8, %v11116_v26  ;;  %v1619_v53 = vadd.f32 %v1606_v14, %v11116_v26  ;;  %v14952_v51 = vld [vmem:[#allocation258_spill] sm:$0xff] }
 0x226   : > { %v1620_v52 = vadd.f32 %v1607_v9, %v11116_v26  ;;  %v1621_v35 = vadd.f32 %v1608_v10, %v11116_v26  ;;  %v1622_v20 = vadd.f32 %v1609_v11, %v11116_v26  ;;  %v1623_v36 = vadd.f32 %v1610_v46, %v11116_v26  ;;  %v14953_v19 = vld [vmem:[#allocation254_spill] sm:$0xff] }
 0x227   : > { %v1624_v13 = vadd.f32 %v1611_v15, %v11116_v26  ;;  %v1625_v49 = vadd.f32 %v1612_v33, %v11116_v26  ;;  %v11421_v6 = vmax.f32 %v1618_v22, 0.0  ;;  %v1632_v12 = vmax.f32 %v1619_v53, 0.0  ;;  %v14954_v24 = vld [vmem:[#allocation266_spill] sm:$0xff] }
 0x228   : > { %v1633_v61 = vmax.f32 %v1620_v52, 0.0  ;;  %v1634_v39 = vmax.f32 %v1621_v35, 0.0  ;;  %v1635_v30 = vmax.f32 %v1622_v20, 0.0  ;;  %v1636_v18 = vmax.f32 %v1623_v36, 0.0  ;;  %v14955_v56 = vld [vmem:[#allocation262_spill] sm:$0xff] }
 0x229   : > { %v1637_v59 = vmax.f32 %v1624_v13, 0.0  ;;  %v1638_v45 = vmax.f32 %v1625_v49, 0.0  ;;  %v1658_v47 = vrot.slane %v1632_v12, 7  ;;  %v1179_v27 = vmax.f32 %v14949_v32, %v14948_v31  ;;  %v14956_v23 = vld [vmem:[#allocation274_spill] sm:$0xff] }
 0x22a   : > { %v11423_v60 = vrot.slane %v1633_v61, 6  ;;  %v1662_v29 = vrot.slane %v1634_v39, 5  ;;  %v11427_v21 = vrot.slane %v1635_v30, 4  ;;  %v11429_v63 = vrot.slane %v1636_v18, 3  ;;  %v14957_v25 = vld [vmem:[#allocation270_spill] sm:$0xff] }
 0x22b   : > { %v11431_v16 = vrot.slane %v1637_v59, 2  ;;  %v11433_v48 = vrot.slane %v1638_v45, 1  ;;  %v1659_v50 = vsel %vm1292_vm0, %v1658_v47, %v11421_v6  ;;  %v1183_v41 = vmax.f32 %v14951_v42, %v14950_v17 }
 0x22c   : > { %v1187_v43 = vmax.f32 %v14953_v19, %v14952_v51  ;;  %v1191_v34 = vmax.f32 %v14955_v56, %v14954_v24  ;;  %v1661_v37 = vsel %vm1295_vm1, %v11423_v60, %v1659_v50  ;;  %v1195_v40 = vmax.f32 %v14957_v25, %v14956_v23 }
 0x22d   : > { %v1587_v62 = vrot.slane %v1179_v27, 1  ;;  %v1687_v54 = vsel %vm1298_vm2, %v1658_v47, %v11421_v6  ;;  %v1663_v57 = vsel %vm1298_vm2, %v1662_v29, %v1661_v37  ;;  %v1588_v55 = vrot.slane %v1183_v41, 1 }
 0x22e   : > { %v1589_v44 = vrot.slane %v1187_v43, 1  ;;  %v1590_v58 = vrot.slane %v1191_v34, 1  ;;  %v1665_v0 = vsel %vm1301_vm3, %v11427_v21, %v1663_v57  ;;  %v1591_v28 = vrot.slane %v1195_v40, 1 }
 0x22f   : > { %v1613_v1 = vmax.f32 %v1179_v27, %v1587_v62  ;;  %v1688_v2 = vsel %vm1301_vm3, %v11423_v60, %v1687_v54  ;;  %v1667_v3 = vsel %vm1304_vm4, %v11429_v63, %v1665_v0  ;;  %v1614_v4 = vmax.f32 %v1183_v41, %v1588_v55  ;;  %v14958_v62 = vld [vmem:[#allocation179_spill] sm:$0xff] }
 0x230   : > { %v1615_v5 = vmax.f32 %v1187_v43, %v1589_v44  ;;  %v1616_v7 = vmax.f32 %v1191_v34, %v1590_v58  ;;  %v1669_v38 = vsel %vm1307_vm5, %v11431_v16, %v1667_v3  ;;  %v1617_v8 = vmax.f32 %v1195_v40, %v1591_v28  ;;  %v14959_v54 = vld [vmem:[#allocation175_spill] sm:$0xff] }
 0x231   : > { %v1626_v14 = vadd.f32 %v1613_v1, %v11116_v26  ;;  %v1689_v9 = vsel %vm1304_vm4, %v1662_v29, %v1688_v2  ;;  %v1671_v10 = vsel %vm1310_vm6, %v11433_v48, %v1669_v38  ;;  %v1627_v11 = vadd.f32 %v1614_v4, %v11116_v26  ;;  %v14960_v44 = vld [vmem:[#allocation187_spill] sm:$0xff] }
 0x232   : > { %v1628_v46 = vadd.f32 %v1615_v5, %v11116_v26  ;;  %v1629_v15 = vadd.f32 %v1616_v7, %v11116_v26  ;;  %5262 = vst.msk [vmem:[%s11171_s21 + $0x80] sm:$0xff] %vm1324_vm7, %v1671_v10  ;;  %v1630_v33 = vadd.f32 %v1617_v8, %v11116_v26  ;;  %v1690_v53 = vsel %vm1307_vm5, %v11427_v21, %v1689_v9  ;;  %v14961_v58 = vld [vmem:[#allocation183_spill] sm:$0xff] }
 0x233   : > { %v1639_v22 = vmax.f32 %v1626_v14, 0.0  ;;  %v1692_v52 = vsel %vm1292_vm0, %v11433_v48, %v11431_v16  ;;  %v1640_v35 = vmax.f32 %v1627_v11, 0.0  ;;  %v1691_v13 = vsel %vm1310_vm6, %v11429_v63, %v1690_v53  ;;  %v14962_v28 = vld [vmem:[#allocation195_spill] sm:$0xff] }
 0x234   : > { %v1641_v20 = vmax.f32 %v1628_v46, 0.0  ;;  %v1642_v36 = vmax.f32 %v1629_v15, 0.0  ;;  %v1643_v49 = vmax.f32 %v1630_v33, 0.0  ;;  %5265 = vst.msk [vmem:[%s11171_s21 + $0x8e] sm:$0xfc] %vm1344_vm9, %v1691_v13  ;;  %v1705_v61 = vsel %vm1304_vm4, %v1658_v47, %v11421_v6  ;;  %v14963_v1 = vld [vmem:[#allocation191_spill] sm:$0xff] }
 0x235   : > { %v1693_v12 = vsel %vm1295_vm1, %v1639_v22, %v1692_v52  ;;  %v1708_v39 = vsel %vm1292_vm0, %v11429_v63, %v11427_v21  ;;  %v1672_v30 = vrot.slane %v1640_v35, 7  ;;  %v1706_v45 = vsel %vm1307_vm5, %v11423_v60, %v1705_v61  ;;  %v14965_v4 = vld [vmem:[#allocation199_spill] sm:$0xff] }
 0x236   : > { %v1674_v18 = vrot.slane %v1641_v20, 6  ;;  %v1676_v59 = vrot.slane %v1642_v36, 5  ;;  %v1678_v31 = vrot.slane %v1643_v49, 4  ;;  %v1707_v32 = vsel %vm1310_vm6, %v1662_v29, %v1706_v45  ;;  %v14966_v7 = vld [vmem:[#allocation211_spill] sm:$0xff] }
 0x237   : > { %v1709_v27 = vsel %vm1295_vm1, %v11431_v16, %v1708_v39  ;;  %v1724_v50 = vsel %vm1310_vm6, %v1658_v47, %v11421_v6  ;;  %v1673_v17 = vsel %vm1292_vm0, %v1672_v30, %v1639_v22  ;;  %v1694_v42 = vsel %vm1298_vm2, %v1672_v30, %v1693_v12  ;;  %5268 = vst.msk [vmem:[%s11171_s21 + $0x9c] sm:$0xf0] %vm1364_vm11, %v1707_v32  ;;  %v14967_v38 = vld [vmem:[#allocation207_spill] sm:$0xff] }
 0x238   : > { %v1710_v41 = vsel %vm1298_vm2, %v11433_v48, %v1709_v27  ;;  %5272 = vst.msk [vmem:[%s11171_s21 + $0xaa] sm:$0xc0] %vm1385_vm13, %v1724_v50  ;;  %v1725_v51 = vsel %vm1292_vm0, %v1662_v29, %v11423_v60  ;;  %v1675_v19 = vsel %vm1295_vm1, %v1674_v18, %v1673_v17  ;;  %v1695_v6 = vsel %vm1301_vm3, %v1674_v18, %v1694_v42  ;;  %v14968_v14 = vld [vmem:[#allocation219_spill] sm:$0xff] }
 0x239   : > { %5270 = vst.msk [vmem:[%s11171_s21 + $0xac] sm:$0x1] %vm1367_vm12, %v1678_v31  ;;  %v1711_v47 = vsel %vm1301_vm3, %v1639_v22, %v1710_v41  ;;  %v1726_v43 = vsel %vm1295_vm1, %v11427_v21, %v1725_v51  ;;  %v1677_v24 = vsel %vm1298_vm2, %v1676_v59, %v1675_v19  ;;  %v1696_v56 = vsel %vm1304_vm4, %v1676_v59, %v1695_v6  ;;  %v14969_v9 = vld [vmem:[#allocation215_spill] sm:$0xff] }
 0x23a   : > { %v1712_v34 = vsel %vm1304_vm4, %v1672_v30, %v1711_v47  ;;  %v1727_v60 = vsel %vm1298_vm2, %v11429_v63, %v1726_v43  ;;  %v1679_v29 = vsel %vm1301_vm3, %v1678_v31, %v1677_v24  ;;  %v1697_v37 = vsel %vm1307_vm5, %v1678_v31, %v1696_v56  ;;  %v14970_v11 = vld [vmem:[#allocation227_spill] sm:$0xff] }
 0x23b   : > { %v1713_v23 = vsel %vm1307_vm5, %v1674_v18, %v1712_v34  ;;  %v1728_v25 = vsel %vm1301_vm3, %v11431_v16, %v1727_v60  ;;  %5263 = vst.msk [vmem:[%s11171_s21 + $0x88] sm:$0x1f] %vm1326_vm8, %v1679_v29  ;;  %v1732_v40 = vsel %vm1292_vm0, %v1676_v59, %v1674_v18  ;;  %v1148_v57 = vmax.f32 %v14959_v54, %v14958_v62  ;;  %v14971_v46 = vld [vmem:[#allocation223_spill] sm:$0xff] }
 0x23c   : > { %5266 = vst.msk [vmem:[%s11171_s21 + $0x96] sm:$0x7f] %vm1346_vm10, %v1697_v37  ;;  %v1714_v21 = vsel %vm1310_vm6, %v1676_v59, %v1713_v23  ;;  %v1729_v63 = vsel %vm1304_vm4, %v11433_v48, %v1728_v25  ;;  %v1733_v16 = vsel %vm1295_vm1, %v1678_v31, %v1732_v40  ;;  %v1152_v0 = vmax.f32 %v14961_v58, %v14960_v44  ;;  %v14964_v48 = vld [vmem:[#allocation203_spill] sm:$0xff] }
 0x23d   : > { %5269 = vst.msk [vmem:[%s11171_s21 + $0xa4] sm:$0xff] %vm1324_vm7, %v1714_v21  ;;  %v1730_v55 = vsel %vm1307_vm5, %v1639_v22, %v1729_v63  ;;  %v1156_v2 = vmax.f32 %v14963_v1, %v14962_v28  ;;  %v1160_v5 = vmax.f32 %v14965_v4, %v14964_v48  ;;  %v1164_v8 = vmax.f32 %v14967_v38, %v14966_v7  ;;  %v14972_v33 = vld [vmem:[#allocation235_spill] sm:$0xff] }
 0x23e   : > { %v1731_v3 = vsel %vm1310_vm6, %v1672_v30, %v1730_v55  ;;  %5274 = vst.msk [vmem:[%s11171_s21 + $0xba] sm:$0x7] %vm1388_vm14, %v1733_v16  ;;  %v1168_v10 = vmax.f32 %v14969_v9, %v14968_v14  ;;  %v1172_v15 = vmax.f32 %v14971_v46, %v14970_v11  ;;  %v14973_v22 = vld [vmem:[#allocation231_spill] sm:$0xff]  ;;  %v1755_v52 = vrot.slane %v1148_v57, 1 }
 0x23f   : > { %5273 = vst.msk [vmem:[%s11171_s21 + $0xb2] sm:$0xff] %vm1324_vm7, %v1731_v3  ;;  %v1176_v53 = vmax.f32 %v14973_v22, %v14972_v33  ;;  %v1756_v35 = vrot.slane %v1152_v0, 1  ;;  %v1757_v20 = vrot.slane %v1156_v2, 1  ;;  %v1758_v36 = vrot.slane %v1160_v5, 1  ;;  %v14974_v21 = vld [vmem:[#allocation243_spill] sm:$0xff] }
 0x240   : > { %v1759_v13 = vrot.slane %v1164_v8, 1  ;;  %v1760_v49 = vrot.slane %v1168_v10, 1  ;;  %v1761_v12 = vrot.slane %v1172_v15, 1  ;;  %v1781_v39 = vmax.f32 %v1148_v57, %v1755_v52  ;;  %v14975_v63 = vld [vmem:[#allocation239_spill] sm:$0xff] }
 0x241   : > { %v1762_v61 = vrot.slane %v1176_v53, 1  ;;  %v1782_v30 = vmax.f32 %v1152_v0, %v1756_v35  ;;  %v1783_v18 = vmax.f32 %v1156_v2, %v1757_v20  ;;  %v1784_v59 = vmax.f32 %v1160_v5, %v1758_v36  ;;  %v14976_v58 = vld [vmem:[#allocation251_spill] sm:$0xff] }
 0x242   : > { %v1785_v45 = vmax.f32 %v1164_v8, %v1759_v13  ;;  %v1786_v31 = vmax.f32 %v1168_v10, %v1760_v49  ;;  %v1787_v32 = vmax.f32 %v1172_v15, %v1761_v12  ;;  %v1794_v50 = vadd.f32 %v1781_v39, %v11116_v26  ;;  %v14977_v0 = vld [vmem:[#allocation247_spill] sm:$0xff] }
 0x243   : > { %v1788_v27 = vmax.f32 %v1176_v53, %v1762_v61  ;;  %v1795_v17 = vadd.f32 %v1782_v30, %v11116_v26  ;;  %v1796_v42 = vadd.f32 %v1783_v18, %v11116_v26  ;;  %v1797_v41 = vadd.f32 %v1784_v59, %v11116_v26  ;;  %v14978_v2 = vld [vmem:[#allocation259_spill] sm:$0xff] }
 0x244   : > { %v1798_v51 = vadd.f32 %v1785_v45, %v11116_v26  ;;  %v1799_v19 = vadd.f32 %v1786_v31, %v11116_v26  ;;  %v1800_v6 = vadd.f32 %v1787_v32, %v11116_v26  ;;  %v1807_v43 = vmax.f32 %v1794_v50, 0.0  ;;  %v14979_v3 = vld [vmem:[#allocation255_spill] sm:$0xff] }
 0x245   : > { %v1801_v47 = vadd.f32 %v1788_v27, %v11116_v26  ;;  %v1808_v24 = vmax.f32 %v1795_v17, 0.0  ;;  %v1809_v56 = vmax.f32 %v1796_v42, 0.0  ;;  %v1810_v34 = vmax.f32 %v1797_v41, 0.0  ;;  %v14980_v4 = vld [vmem:[#allocation267_spill] sm:$0xff] }
 0x246   : > { %v1811_v60 = vmax.f32 %v1798_v51, 0.0  ;;  %v1812_v29 = vmax.f32 %v1799_v19, 0.0  ;;  %v1813_v37 = vmax.f32 %v1800_v6, 0.0  ;;  %v1180_v40 = vmax.f32 %v14975_v63, %v14974_v21  ;;  %v14981_v5 = vld [vmem:[#allocation263_spill] sm:$0xff] }
 0x247   : > { %v1814_v23 = vmax.f32 %v1801_v47, 0.0  ;;  %v1834_v25 = vrot.slane %v1808_v24, 7  ;;  %v1836_v62 = vrot.slane %v1809_v56, 6  ;;  %v1838_v54 = vrot.slane %v1810_v34, 5  ;;  %v14982_v38 = vld [vmem:[#allocation275_spill] sm:$0xff] }
 0x248   : > { %v1840_v57 = vrot.slane %v1811_v60, 4  ;;  %v1842_v16 = vrot.slane %v1812_v29, 3  ;;  %v1844_v44 = vrot.slane %v1813_v37, 2  ;;  %v1184_v28 = vmax.f32 %v14977_v0, %v14976_v58  ;;  %v14983_v8 = vld [vmem:[#allocation271_spill] sm:$0xff] }
 0x249   : > { %v1835_v55 = vsel %vm1292_vm0, %v1834_v25, %v1807_v43  ;;  %v1188_v48 = vmax.f32 %v14979_v3, %v14978_v2  ;;  %v1192_v7 = vmax.f32 %v14981_v5, %v14980_v4  ;;  %v1196_v14 = vmax.f32 %v14983_v8, %v14982_v38 }
 0x24a   : > { %v1837_v1 = vsel %vm1295_vm1, %v1836_v62, %v1835_v55  ;;  %v1846_v10 = vrot.slane %v1814_v23, 1  ;;  %v1763_v11 = vrot.slane %v1180_v40, 1  ;;  %v1764_v46 = vrot.slane %v1184_v28, 1 }
 0x24b   : > { %v1839_v9 = vsel %vm1298_vm2, %v1838_v54, %v1837_v1  ;;  %v1765_v33 = vrot.slane %v1188_v48, 1  ;;  %v1766_v22 = vrot.slane %v1192_v7, 1  ;;  %v1767_v53 = vrot.slane %v1196_v14, 1 }
 0x24c   : > { %v1841_v15 = vsel %vm1301_vm3, %v1840_v57, %v1839_v9  ;;  %v1789_v35 = vmax.f32 %v1180_v40, %v1763_v11  ;;  %v1790_v20 = vmax.f32 %v1184_v28, %v1764_v46 }
 0x24d   : > { %v1843_v52 = vsel %vm1304_vm4, %v1842_v16, %v1841_v15  ;;  %v1791_v13 = vmax.f32 %v1188_v48, %v1765_v33  ;;  %v1792_v49 = vmax.f32 %v1192_v7, %v1766_v22  ;;  %v1793_v12 = vmax.f32 %v1196_v14, %v1767_v53 }
 0x24e   : > { %v1845_v36 = vsel %vm1307_vm5, %v1844_v44, %v1843_v52  ;;  %v1802_v39 = vadd.f32 %v1789_v35, %v11116_v26  ;;  %v1803_v30 = vadd.f32 %v1790_v20, %v11116_v26 }
 0x24f   : > { %v1847_v61 = vsel %vm1310_vm6, %v1846_v10, %v1845_v36  ;;  %v1804_v18 = vadd.f32 %v1791_v13, %v11116_v26  ;;  %v1805_v59 = vadd.f32 %v1792_v49, %v11116_v26  ;;  %v1806_v45 = vadd.f32 %v1793_v12, %v11116_v26 }
 0x250   : > { %5276 = vst.msk [vmem:[%s11171_s21 + $0xc0] sm:$0xff] %vm1324_vm7, %v1847_v61  ;;  %v1815_v31 = vmax.f32 %v1802_v39, 0.0  ;;  %v1816_v32 = vmax.f32 %v1803_v30, 0.0 }
 0x251   : > { %v1817_v27 = vmax.f32 %v1804_v18, 0.0  ;;  %v1818_v50 = vmax.f32 %v1805_v59, 0.0  ;;  %v1819_v17 = vmax.f32 %v1806_v45, 0.0 }
 0x252   : > { %v1848_v42 = vrot.slane %v1816_v32, 7  ;;  %84 = sbr.rel (!%p82_p7) target bundleno = 52 (0x34), region = 134 }
 0x253   : > { %v1850_v41 = vrot.slane %v1817_v27, 6  ;;  %v1852_v51 = vrot.slane %v1818_v50, 5  ;;  %v1854_v19 = vrot.slane %v1819_v17, 4 }
 0x254   : > { %v1849_v6 = vsel %vm1292_vm0, %v1848_v42, %v1815_v31 }
 0x255   : > { %v1851_v47 = vsel %vm1295_vm1, %v1850_v41, %v1849_v6 }
 0x256   : > { %v1853_v43 = vsel %vm1298_vm2, %v1852_v51, %v1851_v47 }
 0x257   : > { %v1855_v24 = vsel %vm1301_vm3, %v1854_v19, %v1853_v43 }
 0x258   : > { %5277 = vst.msk [vmem:[%s11171_s21 + $0xc8] sm:$0x1f] %vm1326_vm8, %v1855_v24 }
 0x259 LB: > { %v11596_v26 = vmov 0.0   ;;  %v11598_v56 = vmov 0.0   ;;  %v11600_v34 = vmov 0.0   ;;  %v11602_v60 = vmov 0.0   ;;  %s11640_s0 = smov 0   ;;  %s7560_s22 = sphi %s11591_s22, %s1867_s22  }
 0x25a   : > { %v11604_v29 = vmov 0.0   ;;  %v11606_v37 = vmov 0.0   ;;  %v11608_v23 = vmov 0.0   ;;  %v11610_v25 = vmov 0.0  }
 0x25b   : > { %v11612_v21 = vmov 0.0   ;;  %v11614_v63 = vmov 0.0   ;;  %v11616_v40 = vmov 0.0   ;;  %v11618_v62 = vmov 0.0  }
 0x25c   : > { %v11620_v54 = vmov 0.0   ;;  %v11622_v57 = vmov 0.0   ;;  %v11624_v55 = vmov 0.0   ;;  %v11626_v16 = vmov 0.0  }
 0x25d   : > { %v11628_v44 = vmov 0.0   ;;  %v11630_v58 = vmov 0.0   ;;  %v11632_v0 = vmov 0.0   ;;  %v11634_v28 = vmov 0.0  }
 0x25e   : > { %v11636_v1 = vmov 0.0   ;;  %v11638_v2 = vmov 0.0  }
 0x25f LB: >> { %s5279_s23 = sshll.u32 %s7560_s22, 3  ;;  %s5278_s24 = smul.u32 208, %s7652_s0  ;;  %vm2021_vm15 = vcmask 1046528   ;;  %vm2146_vm9 = vcmask 1045504   ;;  %s7652_s0 = sphi %s11640_s0, %s1873_s0   ;;  %v7648_v2 = vphi %v11638_v2, %v15138_v2   ;;  %v7644_v1 = vphi %v11636_v1, %v15137_v1   ;;  %v7640_v28 = vphi %v11634_v28, %v15136_v28   ;;  %v7636_v0 = vphi %v11632_v0, %v15135_v0   ;;  %v7632_v58 = vphi %v11630_v58, %v15134_v58   ;;  %v7628_v44 = vphi %v11628_v44, %v15133_v44   ;;  %v7624_v16 = vphi %v11626_v16, %v15132_v16   ;;  %v7620_v55 = vphi %v11624_v55, %v15131_v55   ;;  %v7616_v57 = vphi %v11622_v57, %v15130_v57   ;;  %v7612_v54 = vphi %v11620_v54, %v15129_v54   ;;  %v7608_v62 = vphi %v11618_v62, %v15128_v62   ;;  %v7604_v40 = vphi %v11616_v40, %v15127_v40   ;;  %v7600_v63 = vphi %v11614_v63, %v15126_v63   ;;  %v7596_v21 = vphi %v11612_v21, %v15125_v21   ;;  %v7592_v25 = vphi %v11610_v25, %v15124_v25   ;;  %v7588_v23 = vphi %v11608_v23, %v15123_v23   ;;  %v7584_v37 = vphi %v11606_v37, %v15122_v37   ;;  %v7580_v29 = vphi %v11604_v29, %v15121_v29   ;;  %v7576_v60 = vphi %v11602_v60, %v15120_v60   ;;  %v7572_v34 = vphi %v11600_v34, %v15119_v34   ;;  %v7568_v56 = vphi %v11598_v56, %v15118_v56   ;;  %v7564_v26 = vphi %v11596_v26, %v15117_v26  }
 0x260   : >> { %s1926_s25 = sadd.s32 %s7652_s0, %s5279_s23  ;;  %s1873_s0 = sadd.s32 1, %s7652_s0  }
 0x261   : >> { %s11712_s26 = smul.u32 9, %s1926_s25  ;;  %s11715_s4 = scalar_lea.vmem [#allocation2], %s5278_s24 }
 0x262   : >> { %v11718_v3 = vld [vmem:[%s11715_s4] sm:$0xff]  ;;  %v11721_v48 = vld [vmem:[%s11715_s4 + $0x8] sm:$0x1f]  ;;  %v11724_v4 = vld [vmem:[%s11715_s4 + $0x10] sm:$0xff]  ;;  %p12644_p8 = scmp.ge.s32.totalorder %s1873_s0, 8  }
 0x263   : >> { %s1928_s3 = sld [smem:[#allocation9 + %s11712_s26]]  ;;  %14984 = vst [vmem:[#allocation276_spill] sm:$0xff] %v11724_v4  ;;  %v11727_v5 = vld [vmem:[%s11715_s4 + $0x18] sm:$0x1f]  ;;  %v11730_v7 = vld [vmem:[%s11715_s4 + $0x20] sm:$0xff]  ;;  %v11736_v8 = vld [vmem:[%s11715_s4 + $0x30] sm:$0xff] }
 0x264   : >> { %14985 = vst [vmem:[#allocation277_spill] sm:$0xff] %v11727_v5  ;;  %14986 = vst [vmem:[#allocation278_spill] sm:$0xff] %v11730_v7  ;;  %v11733_v38 = vld [vmem:[%s11715_s4 + $0x28] sm:$0x1f]  ;;  %v11739_v14 = vld [vmem:[%s11715_s4 + $0x38] sm:$0x1f] }
 0x265   : >> { %14987 = vst [vmem:[#allocation279_spill] sm:$0xff] %v11733_v38  ;;  %14988 = vst [vmem:[#allocation280_spill] sm:$0xff] %v11736_v8  ;;  %v11742_v9 = vld [vmem:[%s11715_s4 + $0x40] sm:$0xff]  ;;  %v11745_v10 = vld [vmem:[%s11715_s4 + $0x48] sm:$0x1f]  ;;  %s1974_s27 = sadd.s32 1, %s11712_s26 }
 0x266   : >> { %14989 = vst [vmem:[#allocation281_spill] sm:$0xff] %v11739_v14  ;;  %14990 = vst [vmem:[#allocation282_spill] sm:$0xff] %v11742_v9  ;;  %v11748_v11 = vld [vmem:[%s11715_s4 + $0x50] sm:$0xff]  ;;  %v11752_v46 = vld [vmem:[%s11715_s4 + $0x58] sm:$0x1f]  ;;  %s2099_s28 = sadd.s32 2, %s11712_s26 }
 0x267   : >> { %14991 = vst [vmem:[#allocation283_spill] sm:$0xff] %v11745_v10  ;;  %14992 = vst [vmem:[#allocation284_spill] sm:$0xff] %v11748_v11  ;;  %v11755_v15 = vld [vmem:[%s11715_s4 + $0x60] sm:$0xff]  ;;  %v11758_v33 = vld [vmem:[%s11715_s4 + $0x68] sm:$0x1f]  ;;  %s2224_s29 = sadd.s32 3, %s11712_s26 }
 0x268   : >> { %14993 = vst [vmem:[#allocation285_spill] sm:$0xff] %v11752_v46  ;;  %14994 = vst [vmem:[#allocation286_spill] sm:$0xff] %v11755_v15  ;;  %v11762_v53 = vld [vmem:[%s11715_s4 + $0x70] sm:$0xff]  ;;  %v11765_v52 = vld [vmem:[%s11715_s4 + $0x78] sm:$0x1f]  ;;  %s2271_s30 = sadd.s32 4, %s11712_s26 }
 0x269   : >> { %14995 = vst [vmem:[#allocation287_spill] sm:$0xff] %v11758_v33  ;;  %v1929_v22 = vstv %s1928_s3  ;;  %14996 = vst [vmem:[#allocation288_spill] sm:$0xff] %v11762_v53  ;;  %v11768_v35 = vld [vmem:[%s11715_s4 + $0x80] sm:$0xff]  ;;  %v11777_v12 = vld [vmem:[%s11715_s4 + $0x88] sm:$0x1f]  ;;  %s11799_s10 = sld [smem:[#allocation9 + %s1974_s27]] }
 0x26a   : >> { %14997 = vst [vmem:[#allocation289_spill] sm:$0xff] %v11765_v52  ;;  %14998 = vst [vmem:[#allocation290_spill] sm:$0xff] %v11768_v35  ;;  %v1930_v20 = vmul.f32 %v1929_v22, %v11718_v3  ;;  %v1931_v36 = vmul.f32 %v1929_v22, %v11721_v48  ;;  %v1932_v13 = vmul.f32 %v1929_v22, %v11724_v4  ;;  %v11780_v61 = vld [vmem:[%s11715_s4 + $0x90] sm:$0xff]  ;;  %v11783_v39 = vld [vmem:[%s11715_s4 + $0x98] sm:$0x1f]  ;;  %s11801_s11 = sld [smem:[#allocation9 + %s2099_s28]] }
 0x26b   : >> { %v1933_v49 = vmul.f32 %v1929_v22, %v11727_v5  ;;  %14999 = vst [vmem:[#allocation291_spill] sm:$0xff] %v11777_v12  ;;  %15000 = vst [vmem:[#allocation292_spill] sm:$0xff] %v11780_v61  ;;  %v1934_v30 = vmul.f32 %v1929_v22, %v11730_v7  ;;  %v1935_v18 = vmul.f32 %v1929_v22, %v11733_v38  ;;  %v11790_v31 = vld [vmem:[%s11715_s4 + $0xa0] sm:$0xff]  ;;  %v11793_v32 = vld [vmem:[%s11715_s4 + $0xa8] sm:$0x1f]  ;;  %s11807_s12 = sld [smem:[#allocation9 + %s2224_s29]] }
 0x26c   : >> { %15001 = vst [vmem:[#allocation293_spill] sm:$0xff] %v11783_v39  ;;  %v1936_v59 = vmul.f32 %v1929_v22, %v11736_v8  ;;  %v1937_v45 = vmul.f32 %v1929_v22, %v11739_v14  ;;  %15002 = vst [vmem:[#allocation294_spill] sm:$0xff] %v11790_v31  ;;  %v1938_v27 = vmul.f32 %v1929_v22, %v11742_v9  ;;  %s11809_s13 = sld [smem:[#allocation9 + %s2271_s30]]  ;;  %s2395_s14 = sadd.s32 5, %s11712_s26 }
 0x26d   : >> { %15003 = vst [vmem:[#allocation295_spill] sm:$0xff] %v11793_v32  ;;  %v1939_v50 = vmul.f32 %v1929_v22, %v11745_v10  ;;  %v1940_v17 = vmul.f32 %v1929_v22, %v11748_v11  ;;  %v1941_v42 = vmul.f32 %v1929_v22, %v11752_v46  ;;  %v1942_v41 = vmul.f32 %v1929_v22, %v11755_v15  ;;  %s12213_s15 = sld [smem:[#allocation9 + %s2395_s14]]  ;;  %s2519_s16 = sadd.s32 6, %s11712_s26 }
 0x26e   : >> { %v1943_v51 = vmul.f32 %v1929_v22, %v11758_v33  ;;  %v1944_v19 = vmul.f32 %v1929_v22, %v11762_v53  ;;  %v1945_v6 = vmul.f32 %v1929_v22, %v11765_v52  ;;  %v1946_v47 = vmul.f32 %v1929_v22, %v11768_v35  ;;  %s2566_s17 = sadd.s32 7, %s11712_s26  ;;  %s2690_s2 = sadd.s32 8, %s11712_s26 }
 0x26f   : >> { %v1947_v43 = vmul.f32 %v1929_v22, %v11777_v12  ;;  %v1948_v24 = vmul.f32 %v1929_v22, %v11780_v61  ;;  %v1949_v46 = vmul.f32 %v1929_v22, %v11783_v39  ;;  %v1950_v15 = vmul.f32 %v1929_v22, %v11790_v31  ;;  %s12317_s1 = sld [smem:[#allocation9 + %s2519_s16]]  ;;  %s2814_s21 = smul.u32 (%p12644_p8), 176, %s7560_s22 }
 0x270   : >> { %v1951_v33 = vmul.f32 %v1929_v22, %v11793_v32  ;;  %v11817_v11 = vadd.f32 %v7648_v2, %v1930_v20  ;;  %v11820_v52 = vadd.f32 %v7644_v1, %v1931_v36  ;;  %v11823_v53 = vadd.f32 %v7640_v28, %v1932_v13  ;;  %s12321_s18 = sld [smem:[#allocation9 + %s2566_s17]]  ;;  %s1867_s22 = sadd.s32 (%p12644_p8), 1, %s7560_s22  }
 0x271   : >> { %v11826_v35 = vadd.f32 %v7636_v0, %v1933_v49  ;;  %v11829_v12 = vadd.f32 %v7632_v58, %v1934_v30  ;;  %v11832_v39 = vadd.f32 %v7628_v44, %v1935_v18  ;;  %v11835_v31 = vadd.f32 %v7624_v16, %v1936_v59  ;;  %v15006_v49 = vld [vmem:[#allocation284_spill] sm:$0xff]  ;;  %v15007_v18 = vld [vmem:[#allocation285_spill] sm:$0xff]  ;;  %s12323_s19 = sld [smem:[#allocation9 + %s2690_s2]]  ;;  %s2815_s23 = scalar_lea.vmem (%p12644_p8), [#allocation3], %s2814_s21 }
 0x272   : >> { %v11838_v2 = vadd.f32 %v7620_v55, %v1937_v45  ;;  %v11841_v1 = vadd.f32 %v7616_v57, %v1938_v27  ;;  %v11844_v0 = vadd.f32 %v7612_v54, %v1939_v50  ;;  %v11847_v58 = vadd.f32 %v7608_v62, %v1940_v17  ;;  %v15008_v45 = vld [vmem:[#allocation286_spill] sm:$0xff]  ;;  %v15009_v50 = vld [vmem:[#allocation287_spill] sm:$0xff]  ;;  %p1864_p9 = scmp.ge.s32.totalorder (%p12644_p8), %s1867_s22, 8  }
 0x273   : >> { %v11850_v44 = vadd.f32 %v7604_v40, %v1941_v42  ;;  %v11853_v16 = vadd.f32 %v7600_v63, %v1942_v41  ;;  %v11856_v55 = vadd.f32 %v7596_v21, %v1943_v51  ;;  %v11859_v57 = vadd.f32 %v7592_v25, %v1944_v19  ;;  %v15010_v42 = vld [vmem:[#allocation288_spill] sm:$0xff]  ;;  %v15011_v51 = vld [vmem:[#allocation289_spill] sm:$0xff] }
 0x274   : >> { %v11862_v54 = vadd.f32 %v7588_v23, %v1945_v6  ;;  %v11865_v62 = vadd.f32 %v7584_v37, %v1946_v47  ;;  %v11868_v28 = vadd.f32 %v7580_v29, %v1947_v43  ;;  %v11871_v40 = vadd.f32 %v7576_v60, %v1948_v24  ;;  %v15012_v6 = vld [vmem:[#allocation290_spill] sm:$0xff]  ;;  %v15013_v43 = vld [vmem:[#allocation291_spill] sm:$0xff] }
 0x275   : >> { %v11874_v63 = vadd.f32 %v7572_v34, %v1949_v46  ;;  %v11877_v21 = vadd.f32 %v7568_v56, %v1950_v15  ;;  %v11880_v25 = vadd.f32 %v7564_v26, %v1951_v33  ;;  %v1976_v23 = vstv %s11799_s10 }
 0x276   : >> { %v11884_v22 = vstv %s11801_s11  ;;  %v11887_v37 = vstv %s11807_s12  ;;  %v11890_v20 = vstv %s11809_s13  ;;  %v1977_v29 = vmul.f32 %v1976_v23, %v11718_v3 }
 0x277   : >> { %15004 = vst [vmem:[#allocation296_spill] sm:$0xff] %v11887_v37  ;;  %15005 = vst [vmem:[#allocation297_spill] sm:$0xff] %v11890_v20  ;;  %v1978_v60 = vmul.f32 %v1976_v23, %v11721_v48  ;;  %v1979_v34 = vmul.f32 %v1976_v23, %v11724_v4  ;;  %v1980_v46 = vmul.f32 %v1976_v23, %v11727_v5  ;;  %v15014_v37 = vld [vmem:[#allocation293_spill] sm:$0xff] }
 0x278   : >> { %v1981_v56 = vmul.f32 %v1976_v23, %v11730_v7  ;;  %v1982_v26 = vmul.f32 %v1976_v23, %v11733_v38  ;;  %v1983_v15 = vmul.f32 %v1976_v23, %v11736_v8  ;;  %v1984_v33 = vmul.f32 %v1976_v23, %v11739_v14 }
 0x279   : >> { %v1985_v36 = vmul.f32 %v1976_v23, %v11742_v9  ;;  %v1986_v13 = vmul.f32 %v1976_v23, %v11745_v10  ;;  %v1987_v30 = vmul.f32 %v1976_v23, %v15006_v49  ;;  %v1988_v59 = vmul.f32 %v1976_v23, %v15007_v18  ;;  %v15015_v9 = vld [vmem:[#allocation294_spill] sm:$0xff] }
 0x27a   : >> { %v1989_v27 = vmul.f32 %v1976_v23, %v15008_v45  ;;  %v1990_v17 = vmul.f32 %v1976_v23, %v15009_v50  ;;  %v1991_v41 = vmul.f32 %v1976_v23, %v15010_v42  ;;  %v1992_v19 = vmul.f32 %v1976_v23, %v15011_v51 }
 0x27b   : >> { %v1993_v47 = vmul.f32 %v1976_v23, %v15012_v6  ;;  %v1994_v24 = vmul.f32 %v1976_v23, %v15013_v43  ;;  %v1995_v20 = vmul.f32 %v1976_v23, %v11780_v61  ;;  %v1996_v10 = vmul.f32 %v1976_v23, %v15014_v37 }
 0x27c   : >> { %v1997_v49 = vmul.f32 %v1976_v23, %v15015_v9  ;;  %v1998_v18 = vmul.f32 %v1976_v23, %v11793_v32  ;;  %v2022_v14 = vrot.slane %v1977_v29, 1  ;;  %v2023_v45 = vrot.slane %v1978_v60, 1 }
 0x27d   : >> { %v2025_v8 = vrot.slane %v1979_v34, 1  ;;  %v2026_v50 = vrot.slane %v1980_v46, 1  ;;  %v2028_v38 = vrot.slane %v1981_v56, 1  ;;  %v2029_v42 = vrot.slane %v1982_v26, 1 }
 0x27e   : >> { %v2024_v51 = vsel %vm2021_vm15, %v2022_v14, %v2023_v45  ;;  %v2031_v7 = vrot.slane %v1983_v15, 1  ;;  %v2032_v6 = vrot.slane %v1984_v33, 1  ;;  %v2034_v5 = vrot.slane %v1985_v36, 1 }
 0x27f   : >> { %v2027_v43 = vsel %vm2021_vm15, %v2025_v8, %v2026_v50  ;;  %v2030_v61 = vsel %vm2021_vm15, %v2028_v38, %v2029_v42  ;;  %v2035_v37 = vrot.slane %v1986_v13, 1  ;;  %v2037_v4 = vrot.slane %v1987_v30, 1 }
 0x280   : >> { %v2033_v9 = vsel %vm2021_vm15, %v2031_v7, %v2032_v6  ;;  %v2038_v23 = vrot.slane %v1988_v59, 1  ;;  %v2040_v29 = vrot.slane %v1989_v27, 1  ;;  %v2041_v60 = vrot.slane %v1990_v17, 1 }
 0x281   : >> { %v2036_v34 = vsel %vm2021_vm15, %v2034_v5, %v2035_v37  ;;  %v2043_v46 = vrot.slane %v1991_v41, 1  ;;  %v2044_v56 = vrot.slane %v1992_v19, 1  ;;  %v2046_v26 = vrot.slane %v1993_v47, 1  ;;  %v15022_v41 = vld [vmem:[#allocation282_spill] sm:$0xff] }
 0x282   : >> { %v2039_v14 = vsel %vm2021_vm15, %v2037_v4, %v2038_v23  ;;  %v2042_v15 = vsel %vm2021_vm15, %v2040_v29, %v2041_v60  ;;  %v2047_v33 = vrot.slane %v1994_v24, 1  ;;  %v2049_v8 = vrot.slane %v1995_v20, 1 }
 0x283   : >> { %v2045_v38 = vsel %vm2021_vm15, %v2043_v46, %v2044_v56  ;;  %v2050_v36 = vrot.slane %v1996_v10, 1  ;;  %v2052_v13 = vrot.slane %v1997_v49, 1  ;;  %v2053_v30 = vrot.slane %v1998_v18, 1  ;;  %v15028_v46 = vld [vmem:[#allocation288_spill] sm:$0xff] }
 0x284   : >> { %v2048_v7 = vsel %vm2021_vm15, %v2046_v26, %v2047_v33  ;;  %v11924_v59 = vadd.f32 %v2024_v51, %v11817_v11  ;;  %v11927_v5 = vadd.f32 %v2023_v45, %v11820_v52  ;;  %v11930_v27 = vadd.f32 %v2027_v43, %v11823_v53  ;;  %v15023_v51 = vld [vmem:[#allocation283_spill] sm:$0xff]  ;;  %v15025_v43 = vld [vmem:[#allocation285_spill] sm:$0xff] }
 0x285   : >> { %v2051_v4 = vsel %vm2021_vm15, %v2049_v8, %v2050_v36  ;;  %v2054_v20 = vsel %vm2021_vm15, %v2052_v13, %v2053_v30  ;;  %v11935_v17 = vadd.f32 %v2026_v50, %v11826_v35  ;;  %v11938_v10 = vadd.f32 %v2030_v61, %v11829_v12  ;;  %v15029_v26 = vld [vmem:[#allocation289_spill] sm:$0xff]  ;;  %v15031_v8 = vld [vmem:[#allocation291_spill] sm:$0xff] }
 0x286   : >> { %v11941_v49 = vadd.f32 %v2029_v42, %v11832_v39  ;;  %v11944_v11 = vadd.f32 %v2033_v9, %v11835_v31  ;;  %v11947_v52 = vadd.f32 %v2032_v6, %v11838_v2  ;;  %v11950_v53 = vadd.f32 %v2036_v34, %v11841_v1  ;;  %v15021_v42 = vld [vmem:[#allocation281_spill] sm:$0xff]  ;;  %v15024_v6 = vld [vmem:[#allocation284_spill] sm:$0xff] }
 0x287   : >> { %v11953_v18 = vadd.f32 %v2035_v37, %v11844_v0  ;;  %v11956_v35 = vadd.f32 %v2039_v14, %v11847_v58  ;;  %v11959_v12 = vadd.f32 %v2038_v23, %v11850_v44  ;;  %v11962_v61 = vadd.f32 %v2042_v15, %v11853_v16  ;;  %v15026_v23 = vld [vmem:[#allocation286_spill] sm:$0xff] }
 0x288   : >> { %v11965_v9 = vadd.f32 %v2041_v60, %v11856_v55  ;;  %v11968_v39 = vadd.f32 %v2045_v38, %v11859_v57  ;;  %v11971_v31 = vadd.f32 %v2044_v56, %v11862_v54  ;;  %v11974_v2 = vadd.f32 %v2048_v7, %v11865_v62  ;;  %v15016_v54 = vld [vmem:[#allocation276_spill] sm:$0xff]  ;;  %v15027_v60 = vld [vmem:[#allocation287_spill] sm:$0xff]  ;;  %v15030_v15 = vld [vmem:[#allocation290_spill] sm:$0xff] }
 0x289   : >> { %v11977_v1 = vadd.f32 %v2047_v33, %v11868_v28  ;;  %v11980_v0 = vadd.f32 %v2051_v4, %v11871_v40  ;;  %v11983_v58 = vadd.f32 %v2050_v36, %v11874_v63  ;;  %v11986_v44 = vadd.f32 %v2054_v20, %v11877_v21  ;;  %v15017_v28 = vld [vmem:[#allocation277_spill] sm:$0xff]  ;;  %v15018_v63 = vld [vmem:[#allocation278_spill] sm:$0xff]  ;;  %v15019_v21 = vld [vmem:[#allocation279_spill] sm:$0xff] }
 0x28a   : >> { %v11989_v16 = vadd.f32 %v2053_v30, %v11880_v25  ;;  %v2102_v55 = vmul.f32 %v11884_v22, %v11718_v3  ;;  %v2103_v57 = vmul.f32 %v11884_v22, %v11721_v48  ;;  %v2104_v62 = vmul.f32 %v11884_v22, %v15016_v54  ;;  %v15020_v25 = vld [vmem:[#allocation280_spill] sm:$0xff]  ;;  %v15033_v30 = vld [vmem:[#allocation293_spill] sm:$0xff]  ;;  %v15034_v4 = vld [vmem:[#allocation294_spill] sm:$0xff] }
 0x28b   : >> { %v2105_v40 = vmul.f32 %v11884_v22, %v15017_v28  ;;  %v2106_v37 = vmul.f32 %v11884_v22, %v15018_v63  ;;  %v2107_v45 = vmul.f32 %v11884_v22, %v15019_v21  ;;  %v2108_v50 = vmul.f32 %v11884_v22, %v15020_v25  ;;  %v15032_v36 = vld [vmem:[#allocation292_spill] sm:$0xff] }
 0x28c   : >> { %v2109_v3 = vmul.f32 %v11884_v22, %v15021_v42  ;;  %v2110_v48 = vmul.f32 %v11884_v22, %v15022_v41  ;;  %v2111_v19 = vmul.f32 %v11884_v22, %v15023_v51  ;;  %v2112_v47 = vmul.f32 %v11884_v22, %v15024_v6 }
 0x28d   : >> { %v2113_v24 = vmul.f32 %v11884_v22, %v15025_v43  ;;  %v2114_v29 = vmul.f32 %v11884_v22, %v15026_v23  ;;  %v2115_v34 = vmul.f32 %v11884_v22, %v15027_v60  ;;  %v2116_v56 = vmul.f32 %v11884_v22, %v15028_v46 }
 0x28e   : >> { %v2117_v14 = vmul.f32 %v11884_v22, %v15029_v26  ;;  %v2118_v33 = vmul.f32 %v11884_v22, %v15030_v15  ;;  %v2119_v38 = vmul.f32 %v11884_v22, %v15031_v8  ;;  %v2120_v13 = vmul.f32 %v11884_v22, %v15032_v36 }
 0x28f   : >> { %v2121_v7 = vmul.f32 %v11884_v22, %v15033_v30  ;;  %v2122_v20 = vmul.f32 %v11884_v22, %v15034_v4  ;;  %v2123_v46 = vmul.f32 %v11884_v22, %v11793_v32  ;;  %v2147_v60 = vrot.slane %v2102_v55, 2 }
 0x290   : >> { %v2148_v26 = vrot.slane %v2103_v57, 2  ;;  %v2150_v23 = vrot.slane %v2104_v62, 2  ;;  %v2151_v43 = vrot.slane %v2105_v40, 2  ;;  %v2153_v15 = vrot.slane %v2106_v37, 2 }
 0x291   : >> { %v2154_v6 = vrot.slane %v2107_v45, 2  ;;  %v2156_v51 = vrot.slane %v2108_v50, 2  ;;  %v2157_v8 = vrot.slane %v2109_v3, 2  ;;  %v2159_v41 = vrot.slane %v2110_v48, 2 }
 0x292   : >> { %v2149_v36 = vsel %vm2146_vm9, %v2147_v60, %v2148_v26  ;;  %v2152_v42 = vsel %vm2146_vm9, %v2150_v23, %v2151_v43  ;;  %v2160_v30 = vrot.slane %v2111_v19, 2  ;;  %v2162_v25 = vrot.slane %v2112_v47, 2 }
 0x293   : >> { %v2155_v4 = vsel %vm2146_vm9, %v2153_v15, %v2154_v6  ;;  %v2158_v21 = vsel %vm2146_vm9, %v2156_v51, %v2157_v8  ;;  %v2163_v22 = vrot.slane %v2113_v24, 2  ;;  %v2165_v55 = vrot.slane %v2114_v29, 2 }
 0x294   : >> { %v2161_v57 = vsel %vm2146_vm9, %v2159_v41, %v2160_v30  ;;  %v2166_v62 = vrot.slane %v2115_v34, 2  ;;  %v2168_v40 = vrot.slane %v2116_v56, 2  ;;  %v2169_v37 = vrot.slane %v2117_v14, 2 }
 0x295   : >> { %v2164_v45 = vsel %vm2146_vm9, %v2162_v25, %v2163_v22  ;;  %v2171_v50 = vrot.slane %v2118_v33, 2  ;;  %v2172_v3 = vrot.slane %v2119_v38, 2  ;;  %v2174_v48 = vrot.slane %v2120_v13, 2 }
 0x296   : >> { %v2167_v23 = vsel %vm2146_vm9, %v2165_v55, %v2166_v62  ;;  %v2170_v19 = vsel %vm2146_vm9, %v2168_v40, %v2169_v37  ;;  %v2175_v47 = vrot.slane %v2121_v7, 2  ;;  %v2177_v60 = vrot.slane %v2122_v20, 2  ;;  %v15047_v40 = vld [vmem:[#allocation288_spill] sm:$0xff] }
 0x297   : >> { %v2173_v51 = vsel %vm2146_vm9, %v2171_v50, %v2172_v3  ;;  %v2178_v24 = vrot.slane %v2123_v46, 2  ;;  %v2202_v29 = vadd.f32 %v2149_v36, %v11924_v59  ;;  %v2203_v41 = vadd.f32 %v2148_v26, %v11927_v5  ;;  %v15042_v36 = vld [vmem:[#allocation283_spill] sm:$0xff] }
 0x298   : >> { %v2176_v34 = vsel %vm2146_vm9, %v2174_v48, %v2175_v47  ;;  %v2204_v25 = vadd.f32 %v2152_v42, %v11930_v27  ;;  %v2205_v56 = vadd.f32 %v2151_v43, %v11935_v17  ;;  %v2206_v14 = vadd.f32 %v2155_v4, %v11938_v10  ;;  %v15037_v42 = vld [vmem:[#allocation280_spill] sm:$0xff]  ;;  %v15041_v43 = vld [vmem:[#allocation282_spill] sm:$0xff]  ;;  %v15044_v4 = vld [vmem:[#allocation285_spill] sm:$0xff] }
 0x299   : >> { %v2179_v15 = vsel %vm2146_vm9, %v2177_v60, %v2178_v24  ;;  %v2207_v33 = vadd.f32 %v2154_v6, %v11941_v49  ;;  %v2208_v38 = vadd.f32 %v2158_v21, %v11944_v11  ;;  %v2209_v46 = vadd.f32 %v2157_v8, %v11947_v52  ;;  %v15035_v21 = vld [vmem:[#allocation296_spill] sm:$0xff]  ;;  %v12081_v6 = vld [vmem:[%s11715_s4 + $0xb0] sm:$0xff] }
 0x29a   : >> { %v2210_v59 = vadd.f32 %v2161_v57, %v11950_v53  ;;  %v2211_v5 = vadd.f32 %v2160_v30, %v11953_v18  ;;  %v2212_v26 = vadd.f32 %v2164_v45, %v11956_v35  ;;  %v2213_v27 = vadd.f32 %v2163_v22, %v11959_v12  ;;  %15039 = vst [vmem:[#allocation276_spill] sm:$0xff] %v12081_v6  ;;  %v15043_v30 = vld [vmem:[#allocation284_spill] sm:$0xff]  ;;  %v15045_v22 = vld [vmem:[#allocation286_spill] sm:$0xff]  ;;  %v15046_v57 = vld [vmem:[#allocation287_spill] sm:$0xff] }
 0x29b   : >> { %v2214_v17 = vadd.f32 %v2167_v23, %v11962_v61  ;;  %v2215_v10 = vadd.f32 %v2166_v62, %v11965_v9  ;;  %v2216_v49 = vadd.f32 %v2170_v19, %v11968_v39  ;;  %v2217_v11 = vadd.f32 %v2169_v37, %v11971_v31  ;;  %v15048_v45 = vld [vmem:[#allocation289_spill] sm:$0xff]  ;;  %v15050_v23 = vld [vmem:[#allocation291_spill] sm:$0xff] }
 0x29c   : >> { %v2218_v52 = vadd.f32 %v2173_v51, %v11974_v2  ;;  %v2219_v53 = vadd.f32 %v2172_v3, %v11977_v1  ;;  %v2220_v18 = vadd.f32 %v2176_v34, %v11980_v0  ;;  %v2221_v35 = vadd.f32 %v2175_v47, %v11983_v58  ;;  %v15036_v2 = vld [vmem:[#allocation279_spill] sm:$0xff]  ;;  %v15038_v58 = vld [vmem:[#allocation281_spill] sm:$0xff]  ;;  %v15049_v3 = vld [vmem:[#allocation290_spill] sm:$0xff] }
 0x29d   : >> { %v2222_v12 = vadd.f32 %v2179_v15, %v11986_v44  ;;  %v2223_v61 = vadd.f32 %v2178_v24, %v11989_v16  ;;  %v2227_v9 = vmul.f32 %v15035_v21, %v15016_v54  ;;  %v2228_v39 = vmul.f32 %v15035_v21, %v15017_v28  ;;  %v12084_v16 = vld [vmem:[%s11715_s4 + $0xb8] sm:$0x1f]  ;;  %v15051_v47 = vld [vmem:[#allocation292_spill] sm:$0xff]  ;;  %v15052_v51 = vld [vmem:[#allocation293_spill] sm:$0xff] }
 0x29e   : >> { %v2229_v31 = vmul.f32 %v15035_v21, %v15018_v63  ;;  %v2230_v1 = vmul.f32 %v15035_v21, %v15036_v2  ;;  %v2231_v0 = vmul.f32 %v15035_v21, %v15037_v42  ;;  %v2232_v44 = vmul.f32 %v15035_v21, %v15038_v58  ;;  %15040 = vst [vmem:[#allocation277_spill] sm:$0xff] %v12084_v16  ;;  %v15053_v34 = vld [vmem:[#allocation294_spill] sm:$0xff] }
 0x29f   : >> { %v2233_v8 = vmul.f32 %v15035_v21, %v15041_v43  ;;  %v2234_v13 = vmul.f32 %v15035_v21, %v15042_v36  ;;  %v2235_v7 = vmul.f32 %v15035_v21, %v15043_v30  ;;  %v2236_v20 = vmul.f32 %v15035_v21, %v15044_v4 }
 0x2a0   : >> { %v2237_v55 = vmul.f32 %v15035_v21, %v15045_v22  ;;  %v2238_v62 = vmul.f32 %v15035_v21, %v15046_v57  ;;  %v2239_v37 = vmul.f32 %v15035_v21, %v15047_v40  ;;  %v2240_v50 = vmul.f32 %v15035_v21, %v15048_v45 }
 0x2a1   : >> { %v2241_v48 = vmul.f32 %v15035_v21, %v15049_v3  ;;  %v2242_v19 = vmul.f32 %v15035_v21, %v15050_v23  ;;  %v2243_v60 = vmul.f32 %v15035_v21, %v15051_v47  ;;  %v2244_v24 = vmul.f32 %v15035_v21, %v15052_v51 }
 0x2a2   : >> { %v2245_v15 = vmul.f32 %v15035_v21, %v15053_v34  ;;  %v2246_v40 = vmul.f32 %v15035_v21, %v11793_v32  ;;  %v2247_v45 = vmul.f32 %v15035_v21, %v12081_v6  ;;  %v2248_v3 = vmul.f32 %v15035_v21, %v12084_v16 }
 0x2a3   : >> { %v12118_v57 = vadd.f32 %v2227_v9, %v2202_v29  ;;  %v12120_v23 = vadd.f32 %v2228_v39, %v2203_v41  ;;  %v12122_v47 = vadd.f32 %v2229_v31, %v2204_v25  ;;  %v12124_v22 = vadd.f32 %v2230_v1, %v2205_v56  ;;  %v15056_v9 = vld [vmem:[#allocation285_spill] sm:$0xff]  ;;  %v15057_v31 = vld [vmem:[#allocation286_spill] sm:$0xff] }
 0x2a4   : >> { %v12126_v51 = vadd.f32 %v2231_v0, %v2206_v14  ;;  %v12128_v34 = vadd.f32 %v2232_v44, %v2207_v33  ;;  %v12130_v4 = vadd.f32 %v2233_v8, %v2208_v38  ;;  %v12132_v32 = vadd.f32 %v2234_v13, %v2209_v46  ;;  %v15058_v0 = vld [vmem:[#allocation287_spill] sm:$0xff]  ;;  %v15059_v8 = vld [vmem:[#allocation288_spill] sm:$0xff] }
 0x2a5   : >> { %v12134_v6 = vadd.f32 %v2235_v7, %v2210_v59  ;;  %v12136_v30 = vadd.f32 %v2236_v20, %v2211_v5  ;;  %v12138_v29 = vadd.f32 %v2237_v55, %v2212_v26  ;;  %v12140_v41 = vadd.f32 %v2238_v62, %v2213_v27  ;;  %v15060_v7 = vld [vmem:[#allocation289_spill] sm:$0xff]  ;;  %v15061_v55 = vld [vmem:[#allocation290_spill] sm:$0xff] }
 0x2a6   : >> { %v12142_v25 = vadd.f32 %v2239_v37, %v2214_v17  ;;  %v12144_v56 = vadd.f32 %v2240_v50, %v2215_v10  ;;  %v12146_v14 = vadd.f32 %v2241_v48, %v2216_v49  ;;  %v12148_v33 = vadd.f32 %v2242_v19, %v2217_v11  ;;  %v15054_v17 = vld [vmem:[#allocation297_spill] sm:$0xff]  ;;  %v15065_v19 = vld [vmem:[#allocation294_spill] sm:$0xff] }
 0x2a7   : >> { %v12150_v38 = vadd.f32 %v2243_v60, %v2218_v52  ;;  %v12152_v46 = vadd.f32 %v2244_v24, %v2219_v53  ;;  %v12154_v59 = vadd.f32 %v2245_v15, %v2220_v18  ;;  %v12156_v5 = vadd.f32 %v2246_v40, %v2221_v35  ;;  %v15062_v40 = vld [vmem:[#allocation291_spill] sm:$0xff] }
 0x2a8   : >> { %v12158_v26 = vadd.f32 %v2247_v45, %v2222_v12  ;;  %v12160_v27 = vadd.f32 %v2248_v3, %v2223_v61  ;;  %v2274_v10 = vmul.f32 %v15054_v17, %v15016_v54  ;;  %v2275_v49 = vmul.f32 %v15054_v17, %v15017_v28  ;;  %v15055_v61 = vld [vmem:[#allocation284_spill] sm:$0xff]  ;;  %v15064_v3 = vld [vmem:[#allocation293_spill] sm:$0xff]  ;;  %v15066_v24 = vld [vmem:[#allocation295_spill] sm:$0xff] }
 0x2a9   : >> { %v2276_v11 = vmul.f32 %v15054_v17, %v15018_v63  ;;  %v2277_v52 = vmul.f32 %v15054_v17, %v15036_v2  ;;  %v2278_v53 = vmul.f32 %v15054_v17, %v15037_v42  ;;  %v2279_v18 = vmul.f32 %v15054_v17, %v15038_v58  ;;  %v15063_v45 = vld [vmem:[#allocation292_spill] sm:$0xff] }
 0x2aa   : >> { %v2280_v35 = vmul.f32 %v15054_v17, %v15041_v43  ;;  %v2281_v12 = vmul.f32 %v15054_v17, %v15042_v36  ;;  %v2282_v21 = vmul.f32 %v15054_v17, %v15055_v61  ;;  %v2283_v39 = vmul.f32 %v15054_v17, %v15056_v9 }
 0x2ab   : >> { %v2284_v1 = vmul.f32 %v15054_v17, %v15057_v31  ;;  %v2285_v44 = vmul.f32 %v15054_v17, %v15058_v0  ;;  %v2286_v13 = vmul.f32 %v15054_v17, %v15059_v8  ;;  %v2287_v20 = vmul.f32 %v15054_v17, %v15060_v7  ;;  %v15067_v7 = vld [vmem:[#allocation276_spill] sm:$0xff] }
 0x2ac   : >> { %v2288_v62 = vmul.f32 %v15054_v17, %v15061_v55  ;;  %v2289_v37 = vmul.f32 %v15054_v17, %v15062_v40  ;;  %v2290_v50 = vmul.f32 %v15054_v17, %v15063_v45  ;;  %v2291_v48 = vmul.f32 %v15054_v17, %v15064_v3 }
 0x2ad   : >> { %v2292_v60 = vmul.f32 %v15054_v17, %v15065_v19  ;;  %v2293_v15 = vmul.f32 %v15054_v17, %v15066_v24  ;;  %v2294_v8 = vmul.f32 %v15054_v17, %v15067_v7  ;;  %v2295_v55 = vmul.f32 %v15054_v17, %v12084_v16 }
 0x2ae   : >> { %v2318_v40 = vrot.slane %v2274_v10, 1  ;;  %v2319_v0 = vrot.slane %v2275_v49, 1  ;;  %v2321_v31 = vrot.slane %v2276_v11, 1  ;;  %v2322_v45 = vrot.slane %v2277_v52, 1 }
 0x2af   : >> { %v2324_v9 = vrot.slane %v2278_v53, 1  ;;  %v2325_v61 = vrot.slane %v2279_v18, 1  ;;  %v2327_v3 = vrot.slane %v2280_v35, 1  ;;  %v2328_v36 = vrot.slane %v2281_v12, 1 }
 0x2b0   : >> { %v2320_v19 = vsel %vm2021_vm15, %v2318_v40, %v2319_v0  ;;  %v2323_v43 = vsel %vm2021_vm15, %v2321_v31, %v2322_v45  ;;  %v2330_v58 = vrot.slane %v2282_v21, 1  ;;  %v2331_v24 = vrot.slane %v2283_v39, 1 }
 0x2b1   : >> { %v2326_v7 = vsel %vm2021_vm15, %v2324_v9, %v2325_v61  ;;  %v2329_v42 = vsel %vm2021_vm15, %v2327_v3, %v2328_v36  ;;  %v2333_v17 = vrot.slane %v2284_v1, 1  ;;  %v2334_v10 = vrot.slane %v2285_v44, 1 }
 0x2b2   : >> { %v2332_v49 = vsel %vm2021_vm15, %v2330_v58, %v2331_v24  ;;  %v2336_v11 = vrot.slane %v2286_v13, 1  ;;  %v2337_v52 = vrot.slane %v2287_v20, 1  ;;  %v2339_v53 = vrot.slane %v2288_v62, 1 }
 0x2b3   : >> { %v2335_v18 = vsel %vm2021_vm15, %v2333_v17, %v2334_v10  ;;  %v2340_v35 = vrot.slane %v2289_v37, 1  ;;  %v2342_v12 = vrot.slane %v2290_v50, 1  ;;  %v2343_v40 = vrot.slane %v2291_v48, 1  ;;  %v15075_v17 = vld [vmem:[#allocation287_spill] sm:$0xff] }
 0x2b4   : >> { %v2338_v21 = vsel %vm2021_vm15, %v2336_v11, %v2337_v52  ;;  %v2345_v39 = vrot.slane %v2292_v60, 1  ;;  %v2346_v9 = vrot.slane %v2293_v15, 1  ;;  %v2348_v31 = vrot.slane %v2294_v8, 1  ;;  %v15073_v60 = vld [vmem:[#allocation285_spill] sm:$0xff]  ;;  %v15074_v15 = vld [vmem:[#allocation286_spill] sm:$0xff] }
 0x2b5   : >> { %v2341_v1 = vsel %vm2021_vm15, %v2339_v53, %v2340_v35  ;;  %v2344_v44 = vsel %vm2021_vm15, %v2342_v12, %v2343_v40  ;;  %v2349_v58 = vrot.slane %v2295_v55, 1  ;;  %v12219_v13 = vadd.f32 %v2320_v19, %v12118_v57  ;;  %v15072_v19 = vld [vmem:[#allocation284_spill] sm:$0xff]  ;;  %v15077_v11 = vld [vmem:[#allocation289_spill] sm:$0xff]  ;;  %v15078_v53 = vld [vmem:[#allocation290_spill] sm:$0xff] }
 0x2b6   : >> { %v2347_v20 = vsel %vm2021_vm15, %v2345_v39, %v2346_v9  ;;  %v12223_v62 = vadd.f32 %v2319_v0, %v12120_v23  ;;  %v12226_v37 = vadd.f32 %v2323_v43, %v12122_v47  ;;  %v12229_v50 = vadd.f32 %v2322_v45, %v12124_v22  ;;  %v15069_v0 = vld [vmem:[#allocation281_spill] sm:$0xff] }
 0x2b7   : >> { %v2350_v8 = vsel %vm2021_vm15, %v2348_v31, %v2349_v58  ;;  %v12233_v3 = vadd.f32 %v2326_v7, %v12126_v51  ;;  %v12236_v55 = vadd.f32 %v2325_v61, %v12128_v34  ;;  %v12239_v57 = vadd.f32 %v2329_v42, %v12130_v4  ;;  %v15070_v7 = vld [vmem:[#allocation282_spill] sm:$0xff]  ;;  %v15081_v39 = vld [vmem:[#allocation293_spill] sm:$0xff] }
 0x2b8   : >> { %v12242_v23 = vadd.f32 %v2328_v36, %v12132_v32  ;;  %v12245_v43 = vadd.f32 %v2332_v49, %v12134_v6  ;;  %v12248_v22 = vadd.f32 %v2331_v24, %v12136_v30  ;;  %v12251_v47 = vadd.f32 %v2335_v18, %v12138_v29  ;;  %v15082_v31 = vld [vmem:[#allocation294_spill] sm:$0xff] }
 0x2b9   : >> { %v12254_v51 = vadd.f32 %v2334_v10, %v12140_v41  ;;  %v12257_v34 = vadd.f32 %v2338_v21, %v12142_v25  ;;  %v12260_v42 = vadd.f32 %v2337_v52, %v12144_v56  ;;  %v12263_v32 = vadd.f32 %v2341_v1, %v12146_v14  ;;  %v15076_v10 = vld [vmem:[#allocation288_spill] sm:$0xff] }
 0x2ba   : >> { %v12266_v6 = vadd.f32 %v2340_v35, %v12148_v33  ;;  %v12269_v36 = vadd.f32 %v2344_v44, %v12150_v38  ;;  %v12272_v30 = vadd.f32 %v2343_v40, %v12152_v46  ;;  %v12275_v4 = vadd.f32 %v2347_v20, %v12154_v59  ;;  %v15068_v59 = vld [vmem:[#allocation280_spill] sm:$0xff]  ;;  %v15079_v35 = vld [vmem:[#allocation291_spill] sm:$0xff] }
 0x2bb   : >> { %v12278_v29 = vadd.f32 %v2346_v9, %v12156_v5  ;;  %v12281_v41 = vadd.f32 %v2350_v8, %v12158_v26  ;;  %v12284_v25 = vadd.f32 %v2349_v58, %v12160_v27  ;;  %v2397_v56 = vstv %s12213_s15  ;;  %v15071_v26 = vld [vmem:[#allocation283_spill] sm:$0xff]  ;;  %v15080_v40 = vld [vmem:[#allocation292_spill] sm:$0xff] }
 0x2bc   : >> { %v2398_v14 = vmul.f32 %v2397_v56, %v15016_v54  ;;  %v2399_v33 = vmul.f32 %v2397_v56, %v15017_v28  ;;  %v2400_v38 = vmul.f32 %v2397_v56, %v15018_v63  ;;  %v2401_v46 = vmul.f32 %v2397_v56, %v15036_v2  ;;  %v15083_v44 = vld [vmem:[#allocation295_spill] sm:$0xff]  ;;  %v15084_v20 = vld [vmem:[#allocation276_spill] sm:$0xff] }
 0x2bd   : >> { %v2402_v61 = vmul.f32 %v2397_v56, %v15068_v59  ;;  %v2403_v5 = vmul.f32 %v2397_v56, %v15069_v0  ;;  %v2404_v45 = vmul.f32 %v2397_v56, %v15070_v7  ;;  %v2405_v48 = vmul.f32 %v2397_v56, %v15071_v26 }
 0x2be   : >> { %v2406_v27 = vmul.f32 %v2397_v56, %v15072_v19  ;;  %v2407_v24 = vmul.f32 %v2397_v56, %v15073_v60  ;;  %v2408_v54 = vmul.f32 %v2397_v56, %v15074_v15  ;;  %v2409_v28 = vmul.f32 %v2397_v56, %v15075_v17 }
 0x2bf   : >> { %v2410_v49 = vmul.f32 %v2397_v56, %v15076_v10  ;;  %v2411_v52 = vmul.f32 %v2397_v56, %v15077_v11  ;;  %v2412_v18 = vmul.f32 %v2397_v56, %v15078_v53  ;;  %v2413_v12 = vmul.f32 %v2397_v56, %v15079_v35 }
 0x2c0   : >> { %v2414_v21 = vmul.f32 %v2397_v56, %v15080_v40  ;;  %v2415_v9 = vmul.f32 %v2397_v56, %v15081_v39  ;;  %v2416_v1 = vmul.f32 %v2397_v56, %v15082_v31  ;;  %v2417_v58 = vmul.f32 %v2397_v56, %v15083_v44 }
 0x2c1   : >> { %v2418_v8 = vmul.f32 %v2397_v56, %v15084_v20  ;;  %v2419_v17 = vmul.f32 %v2397_v56, %v12084_v16  ;;  %v2442_v10 = vrot.slane %v2398_v14, 2  ;;  %v2443_v11 = vrot.slane %v2399_v33, 2 }
 0x2c2   : >> { %v2445_v53 = vrot.slane %v2400_v38, 2  ;;  %v2446_v15 = vrot.slane %v2401_v46, 2  ;;  %v2448_v35 = vrot.slane %v2402_v61, 2  ;;  %v2449_v60 = vrot.slane %v2403_v5, 2 }
 0x2c3   : >> { %v2444_v40 = vsel %vm2146_vm9, %v2442_v10, %v2443_v11  ;;  %v2451_v19 = vrot.slane %v2404_v45, 2  ;;  %v2452_v39 = vrot.slane %v2405_v48, 2  ;;  %v2454_v26 = vrot.slane %v2406_v27, 2 }
 0x2c4   : >> { %v2447_v44 = vsel %vm2146_vm9, %v2445_v53, %v2446_v15  ;;  %v2450_v20 = vsel %vm2146_vm9, %v2448_v35, %v2449_v60  ;;  %v2455_v31 = vrot.slane %v2407_v24, 2  ;;  %v2457_v56 = vrot.slane %v2408_v54, 2 }
 0x2c5   : >> { %v2453_v14 = vsel %vm2146_vm9, %v2451_v19, %v2452_v39  ;;  %v2458_v33 = vrot.slane %v2409_v28, 2  ;;  %v2460_v38 = vrot.slane %v2410_v49, 2  ;;  %v2461_v46 = vrot.slane %v2411_v52, 2 }
 0x2c6   : >> { %v2456_v61 = vsel %vm2146_vm9, %v2454_v26, %v2455_v31  ;;  %v2463_v5 = vrot.slane %v2412_v18, 2  ;;  %v2464_v45 = vrot.slane %v2413_v12, 2  ;;  %v2466_v48 = vrot.slane %v2414_v21, 2 }
 0x2c7   : >> { %v2459_v27 = vsel %vm2146_vm9, %v2457_v56, %v2458_v33  ;;  %v2462_v10 = vsel %vm2146_vm9, %v2460_v38, %v2461_v46  ;;  %v2467_v24 = vrot.slane %v2415_v9, 2  ;;  %v2469_v54 = vrot.slane %v2416_v1, 2  ;;  %v15090_v56 = vld [vmem:[#allocation286_spill] sm:$0xff] }
 0x2c8   : >> { %v2465_v19 = vsel %vm2146_vm9, %v2463_v5, %v2464_v45  ;;  %v2470_v28 = vrot.slane %v2417_v58, 2  ;;  %v2472_v49 = vrot.slane %v2418_v8, 2  ;;  %v2473_v26 = vrot.slane %v2419_v17, 2  ;;  %v15093_v5 = vld [vmem:[#allocation289_spill] sm:$0xff] }
 0x2c9   : >> { %v2468_v52 = vsel %vm2146_vm9, %v2466_v48, %v2467_v24  ;;  %v2497_v53 = vadd.f32 %v2444_v40, %v12219_v13  ;;  %v2498_v18 = vadd.f32 %v2443_v11, %v12223_v62  ;;  %v2499_v35 = vadd.f32 %v2447_v44, %v12226_v37  ;;  %v12367_v44 = vld [vmem:[%s11715_s4 + $0xc0] sm:$0xff]  ;;  %v15094_v48 = vld [vmem:[#allocation290_spill] sm:$0xff] }
 0x2ca   : >> { %v2471_v12 = vsel %vm2146_vm9, %v2469_v54, %v2470_v28  ;;  %v2474_v21 = vsel %vm2146_vm9, %v2472_v49, %v2473_v26  ;;  %v2500_v9 = vadd.f32 %v2446_v15, %v12229_v50  ;;  %v2501_v1 = vadd.f32 %v2450_v20, %v12233_v3  ;;  %15089 = vst [vmem:[#allocation296_spill] sm:$0xff] %v12367_v44  ;;  %v12370_v20 = vld [vmem:[%s11715_s4 + $0xc8] sm:$0x1f] }
 0x2cb   : >> { %v2502_v58 = vadd.f32 %v2449_v60, %v12236_v55  ;;  %v2503_v17 = vadd.f32 %v2453_v14, %v12239_v57  ;;  %v2504_v8 = vadd.f32 %v2452_v39, %v12242_v23  ;;  %v2505_v13 = vadd.f32 %v2456_v61, %v12245_v43  ;;  %v15096_v54 = vld [vmem:[#allocation292_spill] sm:$0xff] }
 0x2cc   : >> { %v2506_v62 = vadd.f32 %v2455_v31, %v12248_v22  ;;  %v2507_v37 = vadd.f32 %v2459_v27, %v12251_v47  ;;  %v2508_v11 = vadd.f32 %v2458_v33, %v12254_v51  ;;  %v2509_v50 = vadd.f32 %v2462_v10, %v12257_v34  ;;  %v15091_v33 = vld [vmem:[#allocation287_spill] sm:$0xff] }
 0x2cd   : >> { %v2510_v3 = vadd.f32 %v2461_v46, %v12260_v42  ;;  %v2511_v55 = vadd.f32 %v2465_v19, %v12263_v32  ;;  %v2512_v57 = vadd.f32 %v2464_v45, %v12266_v6  ;;  %v2513_v23 = vadd.f32 %v2468_v52, %v12269_v36  ;;  %v15092_v46 = vld [vmem:[#allocation288_spill] sm:$0xff]  ;;  %v15095_v10 = vld [vmem:[#allocation291_spill] sm:$0xff] }
 0x2ce   : >> { %v2514_v60 = vadd.f32 %v2467_v24, %v12272_v30  ;;  %v2515_v43 = vadd.f32 %v2471_v12, %v12275_v4  ;;  %v2516_v22 = vadd.f32 %v2470_v28, %v12278_v29  ;;  %v2517_v47 = vadd.f32 %v2474_v21, %v12281_v41  ;;  %v15086_v29 = vld [vmem:[#allocation283_spill] sm:$0xff]  ;;  %v15087_v41 = vld [vmem:[#allocation284_spill] sm:$0xff]  ;;  %v15097_v28 = vld [vmem:[#allocation293_spill] sm:$0xff] }
 0x2cf   : >> { %v2518_v51 = vadd.f32 %v2473_v26, %v12284_v25  ;;  %v2521_v34 = vstv %s12317_s1  ;;  %v12353_v42 = vstv %s12321_s18  ;;  %v12356_v32 = vstv %s12323_s19  ;;  %v15088_v25 = vld [vmem:[#allocation285_spill] sm:$0xff]  ;;  %v15098_v26 = vld [vmem:[#allocation294_spill] sm:$0xff]  ;;  %v15099_v12 = vld [vmem:[#allocation295_spill] sm:$0xff] }
 0x2d0   : >> { %15085 = vst [vmem:[#allocation278_spill] sm:$0xff] %v12356_v32  ;;  %v2522_v6 = vmul.f32 %v2521_v34, %v15018_v63  ;;  %v2523_v36 = vmul.f32 %v2521_v34, %v15036_v2  ;;  %v2524_v30 = vmul.f32 %v2521_v34, %v15068_v59  ;;  %v2525_v4 = vmul.f32 %v2521_v34, %v15069_v0  ;;  %v15100_v32 = vld [vmem:[#allocation276_spill] sm:$0xff] }
 0x2d1   : >> { %v2526_v15 = vmul.f32 %v2521_v34, %v15070_v7  ;;  %v2527_v40 = vmul.f32 %v2521_v34, %v15086_v29  ;;  %v2528_v39 = vmul.f32 %v2521_v34, %v15087_v41  ;;  %v2529_v31 = vmul.f32 %v2521_v34, %v15088_v25 }
 0x2d2   : >> { %v2530_v14 = vmul.f32 %v2521_v34, %v15090_v56  ;;  %v2531_v38 = vmul.f32 %v2521_v34, %v15091_v33  ;;  %v2532_v61 = vmul.f32 %v2521_v34, %v15092_v46  ;;  %v2533_v45 = vmul.f32 %v2521_v34, %v15093_v5 }
 0x2d3   : >> { %v2534_v27 = vmul.f32 %v2521_v34, %v15094_v48  ;;  %v2535_v24 = vmul.f32 %v2521_v34, %v15095_v10  ;;  %v2536_v19 = vmul.f32 %v2521_v34, %v15096_v54  ;;  %v2537_v49 = vmul.f32 %v2521_v34, %v15097_v28 }
 0x2d4   : >> { %v2538_v52 = vmul.f32 %v2521_v34, %v15098_v26  ;;  %v2539_v21 = vmul.f32 %v2521_v34, %v15099_v12  ;;  %v2540_v56 = vmul.f32 %v2521_v34, %v15100_v32  ;;  %v2541_v33 = vmul.f32 %v2521_v34, %v12084_v16 }
 0x2d5   : >> { %v2542_v46 = vmul.f32 %v2521_v34, %v12367_v44  ;;  %v2543_v5 = vmul.f32 %v2521_v34, %v12370_v20  ;;  %v12386_v25 = vadd.f32 %v2522_v6, %v2497_v53  ;;  %v12388_v48 = vadd.f32 %v2523_v36, %v2498_v18  ;;  %v15104_v34 = vld [vmem:[#allocation288_spill] sm:$0xff]  ;;  %v15105_v6 = vld [vmem:[#allocation289_spill] sm:$0xff]  ;;  %v15106_v36 = vld [vmem:[#allocation290_spill] sm:$0xff] }
 0x2d6   : >> { %v12390_v10 = vadd.f32 %v2524_v30, %v2499_v35  ;;  %v12392_v54 = vadd.f32 %v2525_v4, %v2500_v9  ;;  %v12394_v28 = vadd.f32 %v2526_v15, %v2501_v1  ;;  %v12396_v26 = vadd.f32 %v2527_v40, %v2502_v58  ;;  %v15107_v4 = vld [vmem:[#allocation291_spill] sm:$0xff] }
 0x2d7   : >> { %v12398_v12 = vadd.f32 %v2528_v39, %v2503_v17  ;;  %v12400_v32 = vadd.f32 %v2529_v31, %v2504_v8  ;;  %v12402_v16 = vadd.f32 %v2530_v14, %v2505_v13  ;;  %v12404_v44 = vadd.f32 %v2531_v38, %v2506_v62  ;;  %v15110_v31 = vld [vmem:[#allocation294_spill] sm:$0xff]  ;;  %v15111_v14 = vld [vmem:[#allocation295_spill] sm:$0xff]  ;;  %v15112_v38 = vld [vmem:[#allocation276_spill] sm:$0xff] }
 0x2d8   : >> { %v12406_v53 = vadd.f32 %v2532_v61, %v2507_v37  ;;  %v12408_v18 = vadd.f32 %v2533_v45, %v2508_v11  ;;  %v12410_v35 = vadd.f32 %v2534_v27, %v2509_v50  ;;  %v12412_v9 = vadd.f32 %v2535_v24, %v2510_v3  ;;  %v15113_v61 = vld [vmem:[#allocation277_spill] sm:$0xff]  ;;  %v15114_v45 = vld [vmem:[#allocation296_spill] sm:$0xff] }
 0x2d9   : >> { %v12414_v1 = vadd.f32 %v2536_v19, %v2511_v55  ;;  %v12416_v58 = vadd.f32 %v2537_v49, %v2512_v57  ;;  %v12418_v17 = vadd.f32 %v2538_v52, %v2513_v23  ;;  %v12420_v8 = vadd.f32 %v2539_v21, %v2514_v60 }
 0x2da   : >> { %v12422_v13 = vadd.f32 %v2540_v56, %v2515_v43  ;;  %v12424_v62 = vadd.f32 %v2541_v33, %v2516_v22  ;;  %v12426_v37 = vadd.f32 %v2542_v46, %v2517_v47  ;;  %v12428_v11 = vadd.f32 %v2543_v5, %v2518_v51  ;;  %v15101_v22 = vld [vmem:[#allocation285_spill] sm:$0xff]  ;;  %v15102_v47 = vld [vmem:[#allocation286_spill] sm:$0xff]  ;;  %v15103_v51 = vld [vmem:[#allocation287_spill] sm:$0xff] }
 0x2db   : >> { %v2569_v50 = vmul.f32 %v12353_v42, %v15018_v63  ;;  %v2570_v3 = vmul.f32 %v12353_v42, %v15036_v2  ;;  %v2571_v55 = vmul.f32 %v12353_v42, %v15068_v59  ;;  %v2572_v57 = vmul.f32 %v12353_v42, %v15069_v0 }
 0x2dc   : >> { %v2573_v23 = vmul.f32 %v12353_v42, %v15070_v7  ;;  %v2574_v60 = vmul.f32 %v12353_v42, %v15086_v29  ;;  %v2575_v43 = vmul.f32 %v12353_v42, %v15087_v41  ;;  %v2576_v63 = vmul.f32 %v12353_v42, %v15101_v22  ;;  %v15108_v29 = vld [vmem:[#allocation292_spill] sm:$0xff]  ;;  %v15109_v41 = vld [vmem:[#allocation293_spill] sm:$0xff] }
 0x2dd   : >> { %v2577_v2 = vmul.f32 %v12353_v42, %v15102_v47  ;;  %v2578_v59 = vmul.f32 %v12353_v42, %v15103_v51  ;;  %v2579_v0 = vmul.f32 %v12353_v42, %v15104_v34  ;;  %v2580_v7 = vmul.f32 %v12353_v42, %v15105_v6 }
 0x2de   : >> { %v2581_v30 = vmul.f32 %v12353_v42, %v15106_v36  ;;  %v2582_v15 = vmul.f32 %v12353_v42, %v15107_v4  ;;  %v2583_v40 = vmul.f32 %v12353_v42, %v15108_v29  ;;  %v2584_v39 = vmul.f32 %v12353_v42, %v15109_v41 }
 0x2df   : >> { %v2585_v56 = vmul.f32 %v12353_v42, %v15110_v31  ;;  %v2586_v33 = vmul.f32 %v12353_v42, %v15111_v14  ;;  %v2587_v46 = vmul.f32 %v12353_v42, %v15112_v38  ;;  %v2588_v5 = vmul.f32 %v12353_v42, %v15113_v61 }
 0x2e0   : >> { %v2589_v27 = vmul.f32 %v12353_v42, %v15114_v45  ;;  %v2590_v24 = vmul.f32 %v12353_v42, %v12370_v20  ;;  %v2613_v19 = vrot.slane %v2569_v50, 1  ;;  %v2614_v49 = vrot.slane %v2570_v3, 1 }
 0x2e1   : >> { %v2616_v52 = vrot.slane %v2571_v55, 1  ;;  %v2617_v21 = vrot.slane %v2572_v57, 1  ;;  %v2619_v22 = vrot.slane %v2573_v23, 1  ;;  %v2620_v47 = vrot.slane %v2574_v60, 1 }
 0x2e2   : >> { %v2615_v51 = vsel %vm2021_vm15, %v2613_v19, %v2614_v49  ;;  %v2622_v34 = vrot.slane %v2575_v43, 1  ;;  %v2623_v6 = vrot.slane %v2576_v63, 1  ;;  %v2625_v36 = vrot.slane %v2577_v2, 1 }
 0x2e3   : >> { %v2618_v4 = vsel %vm2021_vm15, %v2616_v52, %v2617_v21  ;;  %v2621_v29 = vsel %vm2021_vm15, %v2619_v22, %v2620_v47  ;;  %v2626_v41 = vrot.slane %v2578_v59, 1  ;;  %v2628_v31 = vrot.slane %v2579_v0, 1 }
 0x2e4   : >> { %v2624_v14 = vsel %vm2021_vm15, %v2622_v34, %v2623_v6  ;;  %v2629_v42 = vrot.slane %v2580_v7, 1  ;;  %v2631_v50 = vrot.slane %v2581_v30, 1  ;;  %v2632_v3 = vrot.slane %v2582_v15, 1 }
 0x2e5   : >> { %v2627_v55 = vsel %vm2021_vm15, %v2625_v36, %v2626_v41  ;;  %v2634_v57 = vrot.slane %v2583_v40, 1  ;;  %v2635_v23 = vrot.slane %v2584_v39, 1  ;;  %v2637_v60 = vrot.slane %v2585_v56, 1 }
 0x2e6   : >> { %v2630_v43 = vsel %vm2021_vm15, %v2628_v31, %v2629_v42  ;;  %v2633_v63 = vsel %vm2021_vm15, %v2631_v50, %v2632_v3  ;;  %v2638_v2 = vrot.slane %v2586_v33, 1  ;;  %v2640_v19 = vrot.slane %v2587_v46, 1  ;;  %v6516_v50 = vld [vmem:[%s11715_s4 + $0x70] sm:$0xff] }
 0x2e7   : >> { %v2636_v52 = vsel %vm2021_vm15, %v2634_v57, %v2635_v23  ;;  %v2641_v59 = vrot.slane %v2588_v5, 1  ;;  %v2643_v0 = vrot.slane %v2589_v27, 1  ;;  %v2644_v22 = vrot.slane %v2590_v24, 1  ;;  %v15115_v27 = vld [vmem:[#allocation278_spill] sm:$0xff] }
 0x2e8   : >> { %v2639_v7 = vsel %vm2021_vm15, %v2637_v60, %v2638_v2  ;;  %v12484_v30 = vadd.f32 %v2615_v51, %v12386_v25  ;;  %v12487_v15 = vadd.f32 %v2614_v49, %v12388_v48  ;;  %v12490_v40 = vadd.f32 %v2618_v4, %v12390_v10  ;;  %v6508_v49 = vld [vmem:[%s11715_s4 + $0x30] sm:$0xff]  ;;  %v6511_v51 = vld [vmem:[%s11715_s4 + $0x48] sm:$0x1f]  ;;  %v6513_v4 = vld [vmem:[%s11715_s4 + $0x58] sm:$0x1f] }
 0x2e9   : >> { %v2642_v39 = vsel %vm2021_vm15, %v2640_v19, %v2641_v59  ;;  %v2645_v56 = vsel %vm2021_vm15, %v2643_v0, %v2644_v22  ;;  %v12495_v33 = vadd.f32 %v2617_v21, %v12392_v54  ;;  %v12498_v46 = vadd.f32 %v2621_v29, %v12394_v28  ;;  %v6509_v21 = vld [vmem:[%s11715_s4 + $0x38] sm:$0x1f]  ;;  %v6522_v0 = vld [vmem:[%s11715_s4 + $0xa0] sm:$0xff] }
 0x2ea   : >> { %v12501_v5 = vadd.f32 %v2620_v47, %v12396_v26  ;;  %v12504_v25 = vadd.f32 %v2624_v14, %v12398_v12  ;;  %v12507_v48 = vadd.f32 %v2623_v6, %v12400_v32  ;;  %v12510_v10 = vadd.f32 %v2627_v55, %v12402_v16  ;;  %v6512_v6 = vld [vmem:[%s11715_s4 + $0x50] sm:$0xff]  ;;  %v6515_v14 = vld [vmem:[%s11715_s4 + $0x68] sm:$0x1f]  ;;  %v6517_v55 = vld [vmem:[%s11715_s4 + $0x78] sm:$0x1f] }
 0x2eb   : >> { %v12513_v54 = vadd.f32 %v2626_v41, %v12404_v44  ;;  %v12516_v28 = vadd.f32 %v2630_v43, %v12406_v53  ;;  %v12519_v26 = vadd.f32 %v2629_v42, %v12408_v18  ;;  %v12522_v12 = vadd.f32 %v2633_v63, %v12410_v35  ;;  %v6514_v41 = vld [vmem:[%s11715_s4 + $0x60] sm:$0xff]  ;;  %v6519_v43 = vld [vmem:[%s11715_s4 + $0x88] sm:$0x1f] }
 0x2ec   : >> { %v12525_v32 = vadd.f32 %v2632_v3, %v12412_v9  ;;  %v12528_v16 = vadd.f32 %v2636_v52, %v12414_v1  ;;  %v12531_v44 = vadd.f32 %v2635_v23, %v12416_v58  ;;  %v12534_v53 = vadd.f32 %v2639_v7, %v12418_v17  ;;  %v6506_v17 = vld [vmem:[%s11715_s4 + $0x20] sm:$0xff]  ;;  %v6521_v52 = vld [vmem:[%s11715_s4 + $0x98] sm:$0x1f]  ;;  %v6523_v7 = vld [vmem:[%s11715_s4 + $0xa8] sm:$0x1f] }
 0x2ed   : >> { %v12537_v18 = vadd.f32 %v2638_v2, %v12420_v8  ;;  %v12540_v35 = vadd.f32 %v2642_v39, %v12422_v13  ;;  %v12543_v9 = vadd.f32 %v2641_v59, %v12424_v62  ;;  %v12546_v1 = vadd.f32 %v2645_v56, %v12426_v37  ;;  %v6507_v8 = vld [vmem:[%s11715_s4 + $0x28] sm:$0x1f]  ;;  %v6518_v23 = vld [vmem:[%s11715_s4 + $0x80] sm:$0xff]  ;;  %v6520_v2 = vld [vmem:[%s11715_s4 + $0x90] sm:$0xff] }
 0x2ee   : >> { %v12549_v58 = vadd.f32 %v2644_v22, %v12428_v11  ;;  %v2693_v24 = vmul.f32 %v6506_v17, %v15115_v27  ;;  %v12555_v13 = vmul.f32 %v6507_v8, %v15115_v27  ;;  %v2695_v62 = vmul.f32 %v6508_v49, %v15115_v27  ;;  %v6510_v11 = vld [vmem:[%s11715_s4 + $0x40] sm:$0xff] }
 0x2ef   : >> { %v12561_v37 = vmul.f32 %v6509_v21, %v15115_v27  ;;  %v2697_v47 = vmul.f32 %v6510_v11, %v15115_v27  ;;  %v12567_v34 = vmul.f32 %v6511_v51, %v15115_v27  ;;  %v2699_v36 = vmul.f32 %v6512_v6, %v15115_v27 }
 0x2f0   : >> { %v12573_v29 = vmul.f32 %v6513_v4, %v15115_v27  ;;  %v2701_v31 = vmul.f32 %v6514_v41, %v15115_v27  ;;  %v12579_v42 = vmul.f32 %v6515_v14, %v15115_v27  ;;  %v2703_v3 = vmul.f32 %v6516_v50, %v15115_v27 }
 0x2f1   : >> { %v2704_v57 = vmul.f32 %v6517_v55, %v15115_v27  ;;  %v2705_v60 = vmul.f32 %v6518_v23, %v15115_v27  ;;  %v2706_v63 = vmul.f32 %v6519_v43, %v15115_v27  ;;  %v2707_v19 = vmul.f32 %v6520_v2, %v15115_v27 }
 0x2f2   : >> { %v2708_v59 = vmul.f32 %v6521_v52, %v15115_v27  ;;  %v2709_v22 = vmul.f32 %v6522_v0, %v15115_v27  ;;  %v2710_v39 = vmul.f32 %v6523_v7, %v15115_v27  ;;  %v2711_v56 = vmul.f32 %v15115_v27, %v15112_v38 }
 0x2f3   : >> { %v2712_v17 = vmul.f32 %v15115_v27, %v15113_v61  ;;  %v2713_v8 = vmul.f32 %v15115_v27, %v15114_v45  ;;  %v2714_v49 = vmul.f32 %v15115_v27, %v12370_v20  ;;  %v2737_v21 = vrot.slane %v2693_v24, 2 }
 0x2f4   : >> { %v2738_v11 = vrot.slane %v12555_v13, 2  ;;  %v2740_v51 = vrot.slane %v2695_v62, 2  ;;  %v2741_v6 = vrot.slane %v12561_v37, 2  ;;  %v2743_v4 = vrot.slane %v2697_v47, 2 }
 0x2f5   : >> { %v2744_v41 = vrot.slane %v12567_v34, 2  ;;  %v2746_v14 = vrot.slane %v2699_v36, 2  ;;  %v2747_v38 = vrot.slane %v12573_v29, 2  ;;  %v2749_v50 = vrot.slane %v2701_v31, 2 }
 0x2f6   : >> { %v2739_v61 = vsel %vm2146_vm9, %v2737_v21, %v2738_v11  ;;  %v2742_v45 = vsel %vm2146_vm9, %v2740_v51, %v2741_v6  ;;  %v2750_v55 = vrot.slane %v12579_v42, 2  ;;  %v2752_v20 = vrot.slane %v2703_v3, 2 }
 0x2f7   : >> { %v2745_v27 = vsel %vm2146_vm9, %v2743_v4, %v2744_v41  ;;  %v2748_v24 = vsel %vm2146_vm9, %v2746_v14, %v2747_v38  ;;  %v2753_v13 = vrot.slane %v2704_v57, 2  ;;  %v2755_v62 = vrot.slane %v2705_v60, 2 }
 0x2f8   : >> { %v2751_v37 = vsel %vm2146_vm9, %v2749_v50, %v2750_v55  ;;  %v2756_v47 = vrot.slane %v2706_v63, 2  ;;  %v2758_v34 = vrot.slane %v2707_v19, 2  ;;  %v2759_v36 = vrot.slane %v2708_v59, 2 }
 0x2f9   : >> { %v2754_v29 = vsel %vm2146_vm9, %v2752_v20, %v2753_v13  ;;  %v2761_v31 = vrot.slane %v2709_v22, 2  ;;  %v2762_v23 = vrot.slane %v2710_v39, 2  ;;  %v2764_v43 = vrot.slane %v2711_v56, 2 }
 0x2fa   : >> { %v2757_v2 = vsel %vm2146_vm9, %v2755_v62, %v2756_v47  ;;  %v2760_v42 = vsel %vm2146_vm9, %v2758_v34, %v2759_v36  ;;  %v2765_v3 = vrot.slane %v2712_v17, 2  ;;  %v2767_v52 = vrot.slane %v2713_v8, 2 }
 0x2fb   : >> { %v2763_v0 = vsel %vm2146_vm9, %v2761_v31, %v2762_v23  ;;  %v2768_v57 = vrot.slane %v2714_v49, 2  ;;  %v2792_v7 = vadd.f32 %v2739_v61, %v12484_v30   ;;  %v2793_v51 = vadd.f32 %v2738_v11, %v12487_v15  }
 0x2fc   : >> { %v2766_v60 = vsel %vm2146_vm9, %v2764_v43, %v2765_v3  ;;  %v2794_v19 = vadd.f32 %v2742_v45, %v12490_v40   ;;  %v2795_v59 = vadd.f32 %v2741_v6, %v12495_v33   ;;  %v2796_v22 = vadd.f32 %v2745_v27, %v12498_v46  }
 0x2fd   : >> { %v2769_v63 = vsel %vm2146_vm9, %v2767_v52, %v2768_v57  ;;  %v2797_v39 = vadd.f32 %v2744_v41, %v12501_v5   ;;  %v2798_v17 = vadd.f32 %v2748_v24, %v12504_v25   ;;  %v2799_v8 = vadd.f32 %v2747_v38, %v12507_v48   ;;  %2817 = vst.msk [vmem:[%s2815_s23] sm:$0xff] (%p12644_p8), %vm1324_vm7, %v2792_v7 }
 0x2fe   : >> { %v2800_v30 = vadd.f32 %v2751_v37, %v12510_v10   ;;  %v2801_v15 = vadd.f32 %v2750_v55, %v12513_v54   ;;  %v2802_v49 = vadd.f32 %v2754_v29, %v12516_v28   ;;  %v2803_v11 = vadd.f32 %v2753_v13, %v12519_v26   ;;  %2819 = vst.msk [vmem:[%s2815_s23 + $0x8] sm:$0x7] (%p12644_p8), %vm1388_vm14, %v2793_v51 }
 0x2ff   : >> { %v2804_v33 = vadd.f32 %v2757_v2, %v12522_v12   ;;  %v2805_v46 = vadd.f32 %v2756_v47, %v12525_v32   ;;  %v2806_v6 = vadd.f32 %v2760_v42, %v12528_v16   ;;  %v2807_v5 = vadd.f32 %v2759_v36, %v12531_v44   ;;  %2820 = vst.msk [vmem:[%s2815_s23 + $0x10] sm:$0xff] (%p12644_p8), %vm1324_vm7, %v2794_v19 }
 0x300   : >> { %v2808_v4 = vadd.f32 %v2763_v0, %v12534_v53   ;;  %v2809_v48 = vadd.f32 %v2762_v23, %v12537_v18   ;;  %v2810_v10 = vadd.f32 %v2766_v60, %v12540_v35   ;;  %v2811_v41 = vadd.f32 %v2765_v3, %v12543_v9   ;;  %1872 = sbr.rel (!%p12644_p8) target bundleno = 607 (0x25f), region = 145  ;;  %2821 = vst.msk [vmem:[%s2815_s23 + $0x18] sm:$0x7] (%p12644_p8), %vm1388_vm14, %v2795_v59 }
 0x301   : >> { %v2812_v14 = vadd.f32 %v2769_v63, %v12546_v1   ;;  %v2813_v38 = vadd.f32 %v2768_v57, %v12549_v58   ;;  %v15123_v23 = vmov %v2807_v5  ;;  %v15124_v25 = vmov %v2806_v6  ;;  %2822 = vst.msk [vmem:[%s2815_s23 + $0x20] sm:$0xff] (%p12644_p8), %vm1324_vm7, %v2796_v22  ;;  %2824 = vst.msk [vmem:[%s2815_s23 + $0x30] sm:$0xff] (%p12644_p8), %vm1324_vm7, %v2798_v17 }
 0x302   : >> { %v15119_v34 = vmov %v2811_v41  ;;  %v15120_v60 = vmov %v2810_v10  ;;  %v15121_v29 = vmov %v2809_v48  ;;  %v15122_v37 = vmov %v2808_v4  ;;  %2823 = vst.msk [vmem:[%s2815_s23 + $0x28] sm:$0x7] (%p12644_p8), %vm1388_vm14, %v2797_v39  ;;  %2825 = vst.msk [vmem:[%s2815_s23 + $0x38] sm:$0x7] (%p12644_p8), %vm1388_vm14, %v2799_v8 }
 0x303   : >> { %v15117_v26 = vmov %v2813_v38  ;;  %v15118_v56 = vmov %v2812_v14  ;;  %v15125_v21 = vmov %v2805_v46  ;;  %v15126_v63 = vmov %v2804_v33  ;;  %2826 = vst.msk [vmem:[%s2815_s23 + $0x40] sm:$0xff] (%p12644_p8), %vm1324_vm7, %v2800_v30  ;;  %2828 = vst.msk [vmem:[%s2815_s23 + $0x50] sm:$0xff] (%p12644_p8), %vm1324_vm7, %v2802_v49 }
 0x304   : >> { %v15127_v40 = vmov %v2803_v11  ;;  %v15128_v62 = vmov %v2802_v49  ;;  %v15129_v54 = vmov %v2801_v15  ;;  %v15130_v57 = vmov %v2800_v30  ;;  %2827 = vst.msk [vmem:[%s2815_s23 + $0x48] sm:$0x7] (%p12644_p8), %vm1388_vm14, %v2801_v15  ;;  %2829 = vst.msk [vmem:[%s2815_s23 + $0x58] sm:$0x7] (%p12644_p8), %vm1388_vm14, %v2803_v11 }
 0x305   : >> { %v15131_v55 = vmov %v2799_v8  ;;  %v15132_v16 = vmov %v2798_v17  ;;  %v15133_v44 = vmov %v2797_v39  ;;  %v15134_v58 = vmov %v2796_v22  ;;  %2830 = vst.msk [vmem:[%s2815_s23 + $0x60] sm:$0xff] (%p12644_p8), %vm1324_vm7, %v2804_v33  ;;  %2832 = vst.msk [vmem:[%s2815_s23 + $0x70] sm:$0xff] (%p12644_p8), %vm1324_vm7, %v2806_v6 }
 0x306   : >> { %v15135_v0 = vmov %v2795_v59  ;;  %v15136_v28 = vmov %v2794_v19  ;;  %v15137_v1 = vmov %v2793_v51  ;;  %v15138_v2 = vmov %v2792_v7  ;;  %2831 = vst.msk [vmem:[%s2815_s23 + $0x68] sm:$0x7] (%p12644_p8), %vm1388_vm14, %v2805_v46  ;;  %2833 = vst.msk [vmem:[%s2815_s23 + $0x78] sm:$0x7] (%p12644_p8), %vm1388_vm14, %v2807_v5 }
 0x307   : > { %2834 = vst.msk [vmem:[%s2815_s23 + $0x80] sm:$0xff] %vm1324_vm7, %v2808_v4  ;;  %2836 = vst.msk [vmem:[%s2815_s23 + $0x90] sm:$0xff] %vm1324_vm7, %v2810_v10  ;;  %1866 = sbr.rel (!%p1864_p9) target bundleno = 601 (0x259), region = 156  ;;  %s12722_s0 = sld [smem:[#allocation10]] (%p1864_p9)  ;;  %v7658_v28 = vmov (%p1864_p9), 0.0|0.0   ;;  %vm2929_vm10 = vcmask (%p1864_p9), 63490  }
 0x308   : > { %2835 = vst.msk [vmem:[%s2815_s23 + $0x88] sm:$0x7] %vm1388_vm14, %v2809_v48  ;;  %2837 = vst.msk [vmem:[%s2815_s23 + $0x98] sm:$0x7] %vm1388_vm14, %v2811_v41  ;;  %5391 = vmatprep.subr.bf16.mxu0 (%p1864_p9), %v7658_v28  ;;  %s12746_s22 = sld [smem:[#allocation10 + $0x1]] (%p1864_p9)  ;;  %s12798_s24 = sld [smem:[#allocation10 + $0x2]] (%p1864_p9) }
 0x309   : > { %2838 = vst.msk [vmem:[%s2815_s23 + $0xa0] sm:$0xff] %vm1324_vm7, %v2812_v14  ;;  %s12841_s25 = sld [smem:[#allocation10 + $0x3]] (%p1864_p9)  ;;  %s12882_s26 = sld [smem:[#allocation10 + $0x4]] (%p1864_p9) }
 0x30a   : > { %2839 = vst.msk [vmem:[%s2815_s23 + $0xa8] sm:$0x7] %vm1388_vm14, %v2813_v38  ;;  %s12923_s3 = sld [smem:[#allocation10 + $0x5]] (%p1864_p9)  ;;  %s12966_s4 = sld [smem:[#allocation10 + $0x6]] (%p1864_p9) }
 0x30b   :  { %s13007_s27 = sld [smem:[#allocation10 + $0x7]] (%p1864_p9) }
 0x30d   :  { %v12726_v23 = vstv (%p1864_p9), %s12722_s0 }
 0x311   :  { %v2840_v40 = vld [vmem:[#allocation3] sm:$0xff]  ;;  %v2842_v25 = vld [vmem:[#allocation3 + $0x10] sm:$0xff]  ;;  %v2841_v21 = vld [vmem:[#allocation3 + $0x8] sm:$0x7] }
 0x312   :  { %v2844_v54 = vld [vmem:[#allocation3 + $0x20] sm:$0xff]  ;;  %v2846_v26 = vld [vmem:[#allocation3 + $0x30] sm:$0xff]  ;;  %v2860_v16 = vmax.f32 %v2840_v40, %v2842_v25  ;;  %v2843_v50 = vld [vmem:[#allocation3 + $0x18] sm:$0x7] }
 0x313   :  { %v2848_v12 = vld [vmem:[#allocation3 + $0x40] sm:$0xff]  ;;  %v2850_v32 = vld [vmem:[#allocation3 + $0x50] sm:$0xff]  ;;  %v2862_v35 = vmax.f32 %v2844_v54, %v2846_v26  ;;  %v2845_v20 = vld [vmem:[#allocation3 + $0x28] sm:$0x7]  ;;  %v2861_v47 = vmax.f32 %v2841_v21, %v2843_v50 }
 0x314   :  { %v2852_v44 = vld [vmem:[#allocation3 + $0x60] sm:$0xff]  ;;  %v2854_v53 = vld [vmem:[#allocation3 + $0x70] sm:$0xff]  ;;  %v2864_v9 = vmax.f32 %v2848_v12, %v2850_v32  ;;  %v2876_v56 = vrot.slane %v2860_v16, 1  ;;  %v2847_v27 = vld [vmem:[#allocation3 + $0x38] sm:$0x7] }
 0x315   :  { %v2856_v18 = vld [vmem:[#allocation3 + $0x80] sm:$0xff]  ;;  %v2858_v1 = vld [vmem:[#allocation3 + $0x90] sm:$0xff]  ;;  %v2866_v58 = vmax.f32 %v2852_v44, %v2854_v53  ;;  %v2877_v45 = vrot.slane %v2862_v35, 1  ;;  %v2849_v62 = vld [vmem:[#allocation3 + $0x48] sm:$0x7]  ;;  %v2863_v34 = vmax.f32 %v2845_v20, %v2847_v27  ;;  %v2955_v39 = vrot.slane %v2861_v47, 1 }
 0x316   :  { %v2868_v61 = vmax.f32 %v2856_v18, %v2858_v1  ;;  %v2878_v55 = vrot.slane %v2864_v9, 1  ;;  %v2886_v13 = vmax.f32 %v2860_v16, %v2876_v56  ;;  %v2851_v37 = vld [vmem:[#allocation3 + $0x58] sm:$0x7]  ;;  %v2853_v43 = vld [vmem:[#allocation3 + $0x68] sm:$0x7]  ;;  %v2996_v18 = vld [vmem:[#allocation3 + $0xb0] sm:$0xff] }
 0x317   :  { %v2879_v24 = vrot.slane %v2866_v58, 1  ;;  %v2887_v29 = vmax.f32 %v2862_v35, %v2877_v45  ;;  %v2855_v2 = vld [vmem:[#allocation3 + $0x78] sm:$0x7]  ;;  %v2857_v52 = vld [vmem:[#allocation3 + $0x88] sm:$0x7]  ;;  %v2865_v57 = vmax.f32 %v2849_v62, %v2851_v37  ;;  %v2956_v17 = vrot.slane %v2863_v34, 1 }
 0x318   :  { %v2880_v36 = vrot.slane %v2868_v61, 1  ;;  %v2888_v31 = vmax.f32 %v2864_v9, %v2878_v55  ;;  %v2892_v3 = vadd.f32 %v12726_v23, %v2886_v13  ;;  %v2859_v0 = vld [vmem:[#allocation3 + $0x98] sm:$0x7]  ;;  %v2867_v7 = vmax.f32 %v2853_v43, %v2855_v2  ;;  %v2998_v35 = vld [vmem:[#allocation3 + $0xc0] sm:$0xff]  ;;  %v3000_v9 = vld [vmem:[#allocation3 + $0xd0] sm:$0xff] }
 0x319   :  { %v2889_v42 = vmax.f32 %v2866_v58, %v2879_v24  ;;  %v2893_v60 = vadd.f32 %v12726_v23, %v2887_v29  ;;  %v2869_v59 = vmax.f32 %v2857_v52, %v2859_v0  ;;  %v2957_v49 = vrot.slane %v2865_v57, 1  ;;  %v3002_v50 = vld [vmem:[#allocation3 + $0xe0] sm:$0xff]  ;;  %v3008_v13 = vld [vmem:[#allocation3 + $0x110] sm:$0xff] }
 0x31a   :  { %v2890_v51 = vmax.f32 %v2868_v61, %v2880_v36  ;;  %v2894_v19 = vadd.f32 %v12726_v23, %v2888_v31  ;;  %v2897_v63 = vmax.f32 %v2892_v3, 0.0  ;;  %v2958_v33 = vrot.slane %v2867_v7, 1  ;;  %v3004_v61 = vld [vmem:[#allocation3 + $0xf0] sm:$0xff]  ;;  %v3006_v45 = vld [vmem:[#allocation3 + $0x100] sm:$0xff] }
 0x31b   :  { %v2895_v22 = vadd.f32 %v12726_v23, %v2889_v42  ;;  %v2898_v30 = vmax.f32 %v2893_v60, 0.0  ;;  %v2959_v46 = vrot.slane %v2869_v59, 1  ;;  %v2965_v6 = vmax.f32 %v2861_v47, %v2955_v39  ;;  %v3010_v36 = vld [vmem:[#allocation3 + $0x120] sm:$0xff]  ;;  %v3012_v29 = vld [vmem:[#allocation3 + $0x130] sm:$0xff] }
 0x31c   :  { %v2896_v8 = vadd.f32 %v12726_v23, %v2890_v51  ;;  %v2899_v15 = vmax.f32 %v2894_v19, 0.0  ;;  %v2966_v10 = vmax.f32 %v2863_v34, %v2956_v17  ;;  %v2967_v14 = vmax.f32 %v2865_v57, %v2957_v49  ;;  %v3014_v31 = vld [vmem:[#allocation3 + $0x140] sm:$0xff] }
 0x31d   :  { %v2900_v11 = vmax.f32 %v2895_v22, 0.0  ;;  %v2907_v4 = vrot.slane %v2898_v30, 7  ;;  %v2968_v38 = vmax.f32 %v2867_v7, %v2958_v33  ;;  %v2969_v40 = vmax.f32 %v2869_v59, %v2959_v46  ;;  %v2997_v22 = vld [vmem:[#allocation3 + $0xb8] sm:$0x7] }
 0x31e   :  { %v2901_v5 = vmax.f32 %v2896_v8, 0.0  ;;  %v2910_v48 = vrot.slane %v2899_v15, 6  ;;  %v2970_v24 = vadd.f32 %v2965_v6, %v12726_v23  ;;  %v2971_v62 = vadd.f32 %v2966_v10, %v12726_v23 }
 0x31f   :  { %v2913_v41 = vrot.slane %v2900_v11, 5  ;;  %v2909_v25 = vsel %vm1292_vm0, %v2907_v4, %v2897_v63  ;;  %v2922_v26 = vsel %vm1298_vm2, %v2907_v4, %v2897_v63  ;;  %v2931_v12 = vsel %vm1304_vm4, %v2907_v4, %v2897_v63 }
 0x320   :  { %v2916_v54 = vrot.slane %v2901_v5, 4  ;;  %v2912_v32 = vsel %vm1295_vm1, %v2910_v48, %v2909_v25  ;;  %v2923_v16 = vsel %vm1301_vm3, %v2910_v48, %v2922_v26  ;;  %v2932_v44 = vsel %vm1307_vm5, %v2910_v48, %v2931_v12  ;;  %v3001_v5 = vld [vmem:[#allocation3 + $0xd8] sm:$0x7]  ;;  %v3007_v26 = vld [vmem:[#allocation3 + $0x108] sm:$0x7] }
 0x321   :  { %v2941_v53 = vsel %vm1310_vm6, %v2907_v4, %v2897_v63  ;;  %v2915_v1 = vsel %vm1298_vm2, %v2913_v41, %v2912_v32  ;;  %v2925_v58 = vsel %vm1304_vm4, %v2913_v41, %v2923_v16  ;;  %v2934_v56 = vsel %vm1310_vm6, %v2913_v41, %v2932_v44  ;;  %v2999_v63 = vld [vmem:[#allocation3 + $0xc8] sm:$0x7] }
 0x322   :  { %2940 = vst.msk [vmem:[#allocation4 + $0xe] sm:$0x1] %vm1367_vm12, %v2916_v54  ;;  %v2942_v21 = vsel %vm1292_vm0, %v2913_v41, %v2910_v48  ;;  %v2918_v55 = vsel %vm1301_vm3, %v2916_v54, %v2915_v1  ;;  %v2927_v20 = vsel %vm1307_vm5, %v2916_v54, %v2925_v58  ;;  %v2972_v37 = vadd.f32 %v2967_v14, %v12726_v23  ;;  %v3003_v4 = vld [vmem:[#allocation3 + $0xe8] sm:$0x7]  ;;  %v3005_v48 = vld [vmem:[#allocation3 + $0xf8] sm:$0x7] }
 0x323   :  { %2947 = vst.msk [vmem:[#allocation4 + $0x9] sm:$0xc0] %vm1385_vm13, %v2941_v53  ;;  %v2943_v27 = vsel %vm1295_vm1, %v2916_v54, %v2942_v21  ;;  %v2973_v47 = vadd.f32 %v2968_v38, %v12726_v23  ;;  %v2974_v34 = vadd.f32 %v2969_v40, %v12726_v23  ;;  %v2975_v43 = vmax.f32 %v2970_v24, 0.0  ;;  %v3009_v53 = vld [vmem:[#allocation3 + $0x118] sm:$0x7] }
 0x324   :  { %2938 = vst.msk [vmem:[#allocation4 + $0x6] sm:$0xf0] %vm1364_vm11, %v2934_v56  ;;  %v3016_v2 = vmax.f32 %v2996_v18, %v2998_v35  ;;  %v3018_v42 = vmax.f32 %v3000_v9, %v3002_v50  ;;  %v3020_v3 = vmax.f32 %v3004_v61, %v3006_v45  ;;  %v2976_v52 = vmax.f32 %v2971_v62, 0.0  ;;  %v3011_v18 = vld [vmem:[#allocation3 + $0x128] sm:$0x7] }
 0x325   :  { %2921 = vst.msk [vmem:[#allocation4] sm:$0x1f] %vm1326_vm8, %v2918_v55  ;;  %v2977_v0 = vmax.f32 %v2972_v37, 0.0  ;;  %v2978_v57 = vmax.f32 %v2973_v47, 0.0  ;;  %v2979_v7 = vmax.f32 %v2974_v34, 0.0  ;;  %v3022_v51 = vmax.f32 %v3008_v13, %v3010_v36 }
 0x326   :  { %2930 = vst.msk [vmem:[#allocation4 + $0x3] sm:$0x7c] %vm2929_vm10, %v2927_v20  ;;  %v3024_v60 = vmax.f32 %v3012_v29, %v3014_v31  ;;  %v3032_v19 = vrot.slane %v3016_v2, 1  ;;  %v3033_v59 = vrot.slane %v3018_v42, 1  ;;  %v2985_v39 = vrot.slane %v2976_v52, 7 }
 0x327   :  { %2949 = vst.msk [vmem:[#allocation4 + $0x11] sm:$0x7] %vm1388_vm14, %v2943_v27  ;;  %v2987_v23 = vrot.slane %v2977_v0, 6  ;;  %v2989_v17 = vrot.slane %v2978_v57, 5  ;;  %v2991_v8 = vrot.slane %v2979_v7, 4  ;;  %v3034_v30 = vrot.slane %v3020_v3, 1 }
 0x328   :  { %v3035_v15 = vrot.slane %v3022_v51, 1  ;;  %v3036_v49 = vrot.slane %v3024_v60, 1  ;;  %v3042_v11 = vmax.f32 %v3016_v2, %v3032_v19  ;;  %v2986_v33 = vsel %vm1292_vm0, %v2985_v39, %v2975_v43  ;;  %v3013_v56 = vld [vmem:[#allocation3 + $0x138] sm:$0x7]  ;;  %v3015_v21 = vld [vmem:[#allocation3 + $0x148] sm:$0x7] }
 0x329   :  { %v3043_v46 = vmax.f32 %v3018_v42, %v3033_v59  ;;  %v12762_v6 = vstv %s12746_s22  ;;  %v12764_v10 = vmax.f32 %v2997_v22, %v2999_v63  ;;  %v2988_v38 = vsel %vm1295_vm1, %v2987_v23, %v2986_v33  ;;  %v3141_v19 = vld [vmem:[#allocation3 + $0x170] sm:$0xff]  ;;  %v3143_v59 = vld [vmem:[#allocation3 + $0x180] sm:$0xff] }
 0x32a   :  { %v3044_v40 = vmax.f32 %v3020_v3, %v3034_v30  ;;  %v3045_v25 = vmax.f32 %v3022_v51, %v3035_v15  ;;  %v3046_v54 = vmax.f32 %v3024_v60, %v3036_v49  ;;  %v2990_v32 = vsel %vm1298_vm2, %v2989_v17, %v2988_v38  ;;  %v3139_v60 = vld [vmem:[#allocation3 + $0x160] sm:$0xff]  ;;  %v3145_v17 = vld [vmem:[#allocation3 + $0x190] sm:$0xff] }
 0x32b   :  { %v3048_v16 = vadd.f32 %v12762_v6, %v3042_v11  ;;  %v3049_v44 = vadd.f32 %v12762_v6, %v3043_v46  ;;  %v2992_v35 = vsel %vm1301_vm3, %v2991_v8, %v2990_v32  ;;  %v3019_v45 = vmax.f32 %v3001_v5, %v3003_v4  ;;  %v3147_v8 = vld [vmem:[#allocation3 + $0x1a0] sm:$0xff]  ;;  %v3149_v30 = vld [vmem:[#allocation3 + $0x1b0] sm:$0xff] }
 0x32c   :  { %v3050_v9 = vadd.f32 %v12762_v6, %v3044_v40  ;;  %v3051_v1 = vadd.f32 %v12762_v6, %v3045_v25  ;;  %v3052_v58 = vadd.f32 %v12762_v6, %v3046_v54  ;;  %2994 = vst.msk [vmem:[#allocation4 + $0x14] sm:$0x1f] %vm1326_vm8, %v2992_v35  ;;  %v3021_v55 = vmax.f32 %v3005_v48, %v3007_v26  ;;  %v3151_v46 = vld [vmem:[#allocation3 + $0x1c0] sm:$0xff]  ;;  %v3153_v5 = vld [vmem:[#allocation3 + $0x1d0] sm:$0xff] }
 0x32d   :  { %v3996_v41 = vld [vmem:[#allocation4] sm:$0xff]  ;;  %v3997_v14 = vld [vmem:[#allocation4 + $0x8] sm:$0xff]  ;;  %v3053_v50 = vmax.f32 %v3048_v16, 0.0  ;;  %v3054_v61 = vmax.f32 %v3049_v44, 0.0  ;;  %v3023_v13 = vmax.f32 %v3009_v53, %v3011_v18  ;;  %v3025_v37 = vmax.f32 %v3013_v56, %v3015_v21  ;;  %v3157_v38 = vld [vmem:[#allocation3 + $0x1f0] sm:$0xff] }
 0x32e   :  { %v5392_v12 = vpack.c.bf16 %v3997_v14, %v3996_v41  ;;  %v3055_v20 = vmax.f32 %v3050_v9, 0.0  ;;  %v3056_v27 = vmax.f32 %v3051_v1, 0.0  ;;  %v3057_v24 = vmax.f32 %v3052_v58, 0.0  ;;  %v3155_v14 = vld [vmem:[#allocation3 + $0x1e0] sm:$0xff] }
 0x32f   :  { %v3063_v62 = vrot.slane %v3054_v61, 7  ;;  %v3098_v47 = vrot.slane %v12764_v10, 1  ;;  %v3099_v34 = vrot.slane %v3019_v45, 1  ;;  %v3100_v43 = vrot.slane %v3021_v55, 1  ;;  %v3142_v61 = vld [vmem:[#allocation3 + $0x178] sm:$0x7] }
 0x330   :  { %5393 = vmatpush1.bf16.msra.mxu0 %v5392_v12  ;;  %v3065_v36 = vrot.slane %v3055_v20, 6  ;;  %v3067_v29 = vrot.slane %v3056_v27, 5  ;;  %v3069_v31 = vrot.slane %v3057_v24, 4  ;;  %v3101_v11 = vrot.slane %v3023_v13, 1 }
 0x331   :  { %5394 = vmatprep.subr.bf16.mxu0 %v7658_v28  ;;  %v3064_v2 = vsel %vm1292_vm0, %v3063_v62, %v3053_v50  ;;  %v3073_v42 = vsel %vm1298_vm2, %v3063_v62, %v3053_v50  ;;  %v3079_v3 = vsel %vm1304_vm4, %v3063_v62, %v3053_v50  ;;  %v3086_v52 = vsel %vm1310_vm6, %v3063_v62, %v3053_v50  ;;  %v3140_v50 = vld [vmem:[#allocation3 + $0x168] sm:$0x7] }
 0x332   :  { %v3066_v0 = vsel %vm1295_vm1, %v3065_v36, %v3064_v2  ;;  %v3074_v57 = vsel %vm1301_vm3, %v3065_v36, %v3073_v42  ;;  %3085 = vst.msk [vmem:[#allocation4 + $0x27] sm:$0x1] %vm1367_vm12, %v3069_v31  ;;  %v3080_v7 = vsel %vm1307_vm5, %v3065_v36, %v3079_v3  ;;  %v3087_v51 = vsel %vm1292_vm0, %v3067_v29, %v3065_v36 }
 0x333   :  { %3091 = vst.msk [vmem:[#allocation4 + $0x22] sm:$0xc0] %vm1385_vm13, %v3086_v52  ;;  %v3068_v22 = vsel %vm1298_vm2, %v3067_v29, %v3066_v0  ;;  %v3075_v63 = vsel %vm1304_vm4, %v3067_v29, %v3074_v57  ;;  %v3081_v39 = vsel %vm1310_vm6, %v3067_v29, %v3080_v7  ;;  %v3088_v23 = vsel %vm1295_vm1, %v3069_v31, %v3087_v51  ;;  %v3148_v57 = vld [vmem:[#allocation3 + $0x1a8] sm:$0x7]  ;;  %v3150_v7 = vld [vmem:[#allocation3 + $0x1b8] sm:$0x7] }
 0x334   :  { %v3070_v15 = vsel %vm1301_vm3, %v3069_v31, %v3068_v22  ;;  %v3076_v49 = vsel %vm1307_vm5, %v3069_v31, %v3075_v63  ;;  %3084 = vst.msk [vmem:[#allocation4 + $0x1f] sm:$0xf0] %vm1364_vm11, %v3081_v39  ;;  %v3102_v33 = vrot.slane %v3025_v37, 1  ;;  %v3108_v4 = vmax.f32 %v12764_v10, %v3098_v47 }
 0x335   :  { %3092 = vst.msk [vmem:[#allocation4 + $0x2a] sm:$0x7] %vm1388_vm14, %v3088_v23  ;;  %v3109_v48 = vmax.f32 %v3019_v45, %v3099_v34  ;;  %v3110_v41 = vmax.f32 %v3021_v55, %v3100_v43  ;;  %v3159_v40 = vmax.f32 %v3139_v60, %v3141_v19  ;;  %v3111_v25 = vmax.f32 %v3023_v13, %v3101_v11  ;;  %v3144_v45 = vld [vmem:[#allocation3 + $0x188] sm:$0x7]  ;;  %v3998_v55 = vld [vmem:[#allocation4 + $0x10] sm:$0xff] }
 0x336   :  { %3072 = vst.msk [vmem:[#allocation4 + $0x19] sm:$0x1f] %vm1326_vm8, %v3070_v15  ;;  %v3112_v54 = vmax.f32 %v3025_v37, %v3102_v33  ;;  %v3161_v26 = vmax.f32 %v3143_v59, %v3145_v17  ;;  %v3163_v12 = vmax.f32 %v3147_v8, %v3149_v30  ;;  %v3113_v32 = vadd.f32 %v3108_v4, %v12762_v6  ;;  %v3152_v19 = vld [vmem:[#allocation3 + $0x1c8] sm:$0x7]  ;;  %v3154_v59 = vld [vmem:[#allocation3 + $0x1d8] sm:$0x7] }
 0x337   :  { %3078 = vst.msk [vmem:[#allocation4 + $0x1c] sm:$0x7c] %vm2929_vm10, %v3076_v49  ;;  %v3114_v16 = vadd.f32 %v3109_v48, %v12762_v6  ;;  %v3115_v44 = vadd.f32 %v3110_v41, %v12762_v6  ;;  %v3165_v53 = vmax.f32 %v3151_v46, %v3153_v5  ;;  %v3116_v10 = vadd.f32 %v3111_v25, %v12762_v6  ;;  %v3156_v30 = vld [vmem:[#allocation3 + $0x1e8] sm:$0x7]  ;;  %v3158_v15 = vld [vmem:[#allocation3 + $0x1f8] sm:$0x7] }
 0x338   :  { %v3117_v18 = vadd.f32 %v3112_v54, %v12762_v6  ;;  %v3167_v35 = vmax.f32 %v3155_v14, %v3157_v38  ;;  %v3175_v9 = vrot.slane %v3159_v40, 1  ;;  %v3118_v1 = vmax.f32 %v3113_v32, 0.0  ;;  %v3146_v6 = vld [vmem:[#allocation3 + $0x198] sm:$0x7] }
 0x339   :  { %v3119_v58 = vmax.f32 %v3114_v16, 0.0  ;;  %v3120_v56 = vmax.f32 %v3115_v44, 0.0  ;;  %v3176_v21 = vrot.slane %v3161_v26, 1  ;;  %v3121_v20 = vmax.f32 %v3116_v10, 0.0 }
 0x33a   :  { %v3122_v27 = vmax.f32 %v3117_v18, 0.0  ;;  %v3177_v24 = vrot.slane %v3163_v12, 1  ;;  %v3178_v13 = vrot.slane %v3165_v53, 1  ;;  %v3179_v47 = vrot.slane %v3167_v35, 1 }
 0x33b   :  { %v3128_v62 = vrot.slane %v3119_v58, 7  ;;  %v3130_v37 = vrot.slane %v3120_v56, 6  ;;  %v3185_v34 = vmax.f32 %v3159_v40, %v3175_v9  ;;  %v3132_v29 = vrot.slane %v3121_v20, 5 }
 0x33c   :  { %v3134_v31 = vrot.slane %v3122_v27, 4  ;;  %v3186_v43 = vmax.f32 %v3161_v26, %v3176_v21  ;;  %v3187_v2 = vmax.f32 %v3163_v12, %v3177_v24  ;;  %v3188_v52 = vmax.f32 %v3165_v53, %v3178_v13 }
 0x33d   :  { %v3129_v3 = vsel %vm1292_vm0, %v3128_v62, %v3118_v1  ;;  %v3189_v0 = vmax.f32 %v3167_v35, %v3179_v47  ;;  %v12808_v60 = vstv %s12798_s24  ;;  %v3160_v22 = vmax.f32 %v3140_v50, %v3142_v61  ;;  %v3286_v62 = vld [vmem:[#allocation3 + $0x230] sm:$0xff] }
 0x33e   :  { %v3999_v36 = vld [vmem:[#allocation4 + $0x18] sm:$0xff]  ;;  %v3131_v51 = vsel %vm1295_vm1, %v3130_v37, %v3129_v3  ;;  %v3162_v63 = vmax.f32 %v3144_v45, %v3146_v6  ;;  %v3191_v23 = vadd.f32 %v12808_v60, %v3185_v34  ;;  %v3192_v17 = vadd.f32 %v12808_v60, %v3186_v43  ;;  %v4000_v58 = vld [vmem:[#allocation4 + $0x20] sm:$0xff]  ;;  %v3282_v45 = vld [vmem:[#allocation3 + $0x210] sm:$0xff] }
 0x33f   :  { %v5395_v42 = vpack.c.bf16 %v3999_v36, %v3998_v55  ;;  %v3133_v39 = vsel %vm1298_vm2, %v3132_v29, %v3131_v51  ;;  %v3193_v8 = vadd.f32 %v12808_v60, %v3187_v2  ;;  %v3194_v11 = vadd.f32 %v12808_v60, %v3188_v52  ;;  %v3284_v55 = vld [vmem:[#allocation3 + $0x220] sm:$0xff]  ;;  %v3290_v47 = vld [vmem:[#allocation3 + $0x250] sm:$0xff] }
 0x340   :  { %v3135_v49 = vsel %vm1301_vm3, %v3134_v31, %v3133_v39  ;;  %v3195_v33 = vadd.f32 %v12808_v60, %v3189_v0  ;;  %v3164_v46 = vmax.f32 %v3148_v57, %v3150_v7  ;;  %v3196_v5 = vmax.f32 %v3191_v23, 0.0  ;;  %v3288_v37 = vld [vmem:[#allocation3 + $0x240] sm:$0xff]  ;;  %v3294_v2 = vld [vmem:[#allocation3 + $0x270] sm:$0xff] }
 0x341   :  { %5396 = vmatpush1.bf16.msra.mxu0 %v5395_v42  ;;  %3137 = vst.msk [vmem:[#allocation4 + $0x2d] sm:$0x1f] %vm1326_vm8, %v3135_v49  ;;  %v3197_v4 = vmax.f32 %v3192_v17, 0.0  ;;  %v3198_v48 = vmax.f32 %v3193_v8, 0.0  ;;  %v3166_v41 = vmax.f32 %v3152_v19, %v3154_v59  ;;  %v3199_v14 = vmax.f32 %v3194_v11, 0.0  ;;  %v3292_v43 = vld [vmem:[#allocation3 + $0x260] sm:$0xff] }
 0x342   :  { %5397 = vmatprep.subr.bf16.mxu0 %v7658_v28  ;;  %v3200_v38 = vmax.f32 %v3195_v33, 0.0  ;;  %v3168_v40 = vmax.f32 %v3156_v30, %v3158_v15  ;;  %v3241_v25 = vrot.slane %v3160_v22, 1  ;;  %v3242_v12 = vrot.slane %v3162_v63, 1  ;;  %v3296_v57 = vld [vmem:[#allocation3 + $0x280] sm:$0xff]  ;;  %v3298_v7 = vld [vmem:[#allocation3 + $0x290] sm:$0xff] }
 0x343   :  { %v3206_v54 = vrot.slane %v3197_v4, 7  ;;  %v3208_v26 = vrot.slane %v3198_v48, 6  ;;  %v3243_v32 = vrot.slane %v3164_v46, 1  ;;  %v3210_v16 = vrot.slane %v3199_v14, 5  ;;  %v3300_v51 = vld [vmem:[#allocation3 + $0x2a0] sm:$0xff] }
 0x344   :  { %v3212_v44 = vrot.slane %v3200_v38, 4  ;;  %v3244_v53 = vrot.slane %v3166_v41, 1  ;;  %v3245_v10 = vrot.slane %v3168_v40, 1  ;;  %v3251_v29 = vmax.f32 %v3160_v22, %v3241_v25  ;;  %v3283_v48 = vld [vmem:[#allocation3 + $0x218] sm:$0x7] }
 0x345   :  { %v3207_v18 = vsel %vm1292_vm0, %v3206_v54, %v3196_v5  ;;  %v3216_v35 = vsel %vm1298_vm2, %v3206_v54, %v3196_v5  ;;  %v3222_v9 = vsel %vm1304_vm4, %v3206_v54, %v3196_v5  ;;  %v3229_v1 = vsel %vm1310_vm6, %v3206_v54, %v3196_v5  ;;  %v3287_v54 = vld [vmem:[#allocation3 + $0x238] sm:$0x7] }
 0x346   :  { %v3209_v56 = vsel %vm1295_vm1, %v3208_v26, %v3207_v18  ;;  %v3217_v21 = vsel %vm1301_vm3, %v3208_v26, %v3216_v35  ;;  %v3223_v50 = vsel %vm1307_vm5, %v3208_v26, %v3222_v9  ;;  %3228 = vst.msk [vmem:[#allocation4 + $0x40] sm:$0x1] %vm1367_vm12, %v3212_v44  ;;  %v3230_v61 = vsel %vm1292_vm0, %v3210_v16, %v3208_v26 }
 0x347   :  { %3234 = vst.msk [vmem:[#allocation4 + $0x3b] sm:$0xc0] %vm1385_vm13, %v3229_v1  ;;  %v3211_v20 = vsel %vm1298_vm2, %v3210_v16, %v3209_v56  ;;  %v3218_v27 = vsel %vm1304_vm4, %v3210_v16, %v3217_v21  ;;  %v3224_v24 = vsel %vm1310_vm6, %v3210_v16, %v3223_v50  ;;  %v3231_v13 = vsel %vm1295_vm1, %v3212_v44, %v3230_v61  ;;  %v3289_v16 = vld [vmem:[#allocation3 + $0x248] sm:$0x7]  ;;  %v3291_v1 = vld [vmem:[#allocation3 + $0x258] sm:$0x7] }
 0x348   :  { %v4001_v34 = vld [vmem:[#allocation4 + $0x28] sm:$0xff]  ;;  %v3213_v6 = vsel %vm1301_vm3, %v3212_v44, %v3211_v20  ;;  %v3219_v36 = vsel %vm1307_vm5, %v3212_v44, %v3218_v27  ;;  %3227 = vst.msk [vmem:[#allocation4 + $0x38] sm:$0xf0] %vm1364_vm11, %v3224_v24  ;;  %v3252_v31 = vmax.f32 %v3162_v63, %v3242_v12  ;;  %v3253_v3 = vmax.f32 %v3164_v46, %v3243_v32  ;;  %v3299_v24 = vld [vmem:[#allocation3 + $0x298] sm:$0x7] }
 0x349   :  { %3235 = vst.msk [vmem:[#allocation4 + $0x43] sm:$0x7] %vm1388_vm14, %v3231_v13  ;;  %v5398_v42 = vpack.c.bf16 %v4001_v34, %v4000_v58  ;;  %v3254_v52 = vmax.f32 %v3166_v41, %v3244_v53  ;;  %v3255_v0 = vmax.f32 %v3168_v40, %v3245_v10  ;;  %v3256_v19 = vadd.f32 %v3251_v29, %v12808_v60  ;;  %v3285_v41 = vld [vmem:[#allocation3 + $0x228] sm:$0x7] }
 0x34a   :  { %3215 = vst.msk [vmem:[#allocation4 + $0x32] sm:$0x1f] %vm1326_vm8, %v3213_v6  ;;  %v3257_v59 = vadd.f32 %v3252_v31, %v12808_v60  ;;  %v3302_v39 = vmax.f32 %v3282_v45, %v3284_v55  ;;  %v3304_v22 = vmax.f32 %v3286_v62, %v3288_v37  ;;  %v3258_v63 = vadd.f32 %v3253_v3, %v12808_v60  ;;  %v3293_v61 = vld [vmem:[#allocation3 + $0x268] sm:$0x7]  ;;  %v3295_v45 = vld [vmem:[#allocation3 + $0x278] sm:$0x7] }
 0x34b   :  { %3221 = vst.msk [vmem:[#allocation4 + $0x35] sm:$0x7c] %vm2929_vm10, %v3219_v36  ;;  %5399 = vmatpush1.bf16.msra.mxu0 %v5398_v42  ;;  %v3259_v23 = vadd.f32 %v3254_v52, %v12808_v60  ;;  %v3260_v17 = vadd.f32 %v3255_v0, %v12808_v60  ;;  %v3306_v8 = vmax.f32 %v3290_v47, %v3292_v43  ;;  %v3261_v30 = vmax.f32 %v3256_v19, 0.0  ;;  %v3297_v55 = vld [vmem:[#allocation3 + $0x288] sm:$0x7] }
 0x34c   :  { %5400 = vmatprep.subr.bf16.mxu0 %v7658_v28  ;;  %v3262_v15 = vmax.f32 %v3257_v59, 0.0  ;;  %v3308_v49 = vmax.f32 %v3294_v2, %v3296_v57  ;;  %v3310_v11 = vmax.f32 %v3298_v7, %v3300_v51  ;;  %v3263_v33 = vmax.f32 %v3258_v63, 0.0  ;;  %v3301_v13 = vld [vmem:[#allocation3 + $0x2a8] sm:$0x7] }
 0x34d   :  { %v3264_v46 = vmax.f32 %v3259_v23, 0.0  ;;  %v3265_v5 = vmax.f32 %v3260_v17, 0.0  ;;  %v3318_v4 = vrot.slane %v3302_v39, 1  ;;  %v3319_v38 = vrot.slane %v3304_v22, 1 }
 0x34e   :  { %v3271_v14 = vrot.slane %v3262_v15, 7  ;;  %v3320_v40 = vrot.slane %v3306_v8, 1  ;;  %v3321_v25 = vrot.slane %v3308_v49, 1  ;;  %v3273_v26 = vrot.slane %v3263_v33, 6 }
 0x34f   :  { %v3275_v60 = vrot.slane %v3264_v46, 5  ;;  %v3277_v12 = vrot.slane %v3265_v5, 4  ;;  %v3322_v32 = vrot.slane %v3310_v11, 1  ;;  %v3328_v18 = vmax.f32 %v3302_v39, %v3318_v4 }
 0x350   :  { %v3272_v10 = vsel %vm1292_vm0, %v3271_v14, %v3261_v30  ;;  %v3329_v35 = vmax.f32 %v3304_v22, %v3319_v38  ;;  %v3330_v9 = vmax.f32 %v3306_v8, %v3320_v40  ;;  %v3331_v21 = vmax.f32 %v3308_v49, %v3321_v25  ;;  %v3427_v14 = vld [vmem:[#allocation3 + $0x2d0] sm:$0xff]  ;;  %v3429_v38 = vld [vmem:[#allocation3 + $0x2e0] sm:$0xff] }
 0x351   :  { %v3274_v56 = vsel %vm1295_vm1, %v3273_v26, %v3272_v10  ;;  %v3332_v50 = vmax.f32 %v3310_v11, %v3322_v32  ;;  %v12851_v27 = vstv %s12841_s25  ;;  %v3303_v62 = vmax.f32 %v3283_v48, %v3285_v41  ;;  %v3425_v41 = vld [vmem:[#allocation3 + $0x2c0] sm:$0xff]  ;;  %v3435_v32 = vld [vmem:[#allocation3 + $0x310] sm:$0xff] }
 0x352   :  { %v4002_v44 = vld [vmem:[#allocation4 + $0x30] sm:$0xff]  ;;  %v4003_v53 = vld [vmem:[#allocation4 + $0x38] sm:$0xff]  ;;  %v3276_v20 = vsel %vm1298_vm2, %v3275_v60, %v3274_v56  ;;  %v3305_v37 = vmax.f32 %v3287_v54, %v3289_v16  ;;  %v3334_v34 = vadd.f32 %v12851_v27, %v3328_v18  ;;  %v3335_v6 = vadd.f32 %v12851_v27, %v3329_v35  ;;  %v3437_v18 = vld [vmem:[#allocation3 + $0x320] sm:$0xff] }
 0x353   :  { %v5401_v58 = vpack.c.bf16 %v4003_v53, %v4002_v44  ;;  %v3278_v47 = vsel %vm1301_vm3, %v3277_v12, %v3276_v20  ;;  %v3336_v36 = vadd.f32 %v12851_v27, %v3330_v9  ;;  %v3337_v29 = vadd.f32 %v12851_v27, %v3331_v21  ;;  %v3431_v60 = vld [vmem:[#allocation3 + $0x2f0] sm:$0xff]  ;;  %v3433_v12 = vld [vmem:[#allocation3 + $0x300] sm:$0xff] }
 0x354   :  { %3280 = vst.msk [vmem:[#allocation4 + $0x46] sm:$0x1f] %vm1326_vm8, %v3278_v47  ;;  %v3338_v31 = vadd.f32 %v12851_v27, %v3332_v50  ;;  %v3307_v43 = vmax.f32 %v3291_v1, %v3293_v61  ;;  %v3309_v2 = vmax.f32 %v3295_v45, %v3297_v55  ;;  %v3339_v42 = vmax.f32 %v3334_v34, 0.0  ;;  %v3439_v35 = vld [vmem:[#allocation3 + $0x330] sm:$0xff]  ;;  %v3441_v56 = vld [vmem:[#allocation3 + $0x340] sm:$0xff] }
 0x355   :  { %5402 = vmatpush1.bf16.msra.mxu0 %v5401_v58  ;;  %v3340_v3 = vmax.f32 %v3335_v6, 0.0  ;;  %v3341_v52 = vmax.f32 %v3336_v36, 0.0  ;;  %v3311_v0 = vmax.f32 %v3299_v24, %v3301_v13  ;;  %v3342_v57 = vmax.f32 %v3337_v29, 0.0  ;;  %v3443_v21 = vld [vmem:[#allocation3 + $0x350] sm:$0xff]  ;;  %v3426_v29 = vld [vmem:[#allocation3 + $0x2c8] sm:$0x7] }
 0x356   :  { %5403 = vmatprep.subr.bf16.mxu0 %v7658_v28  ;;  %v3343_v7 = vmax.f32 %v3338_v31, 0.0  ;;  %v3384_v51 = vrot.slane %v3303_v62, 1  ;;  %v3385_v19 = vrot.slane %v3305_v37, 1  ;;  %v3386_v22 = vrot.slane %v3307_v43, 1 }
 0x357   :  { %v3349_v59 = vrot.slane %v3340_v3, 7  ;;  %v3351_v39 = vrot.slane %v3341_v52, 6  ;;  %v3387_v63 = vrot.slane %v3309_v2, 1  ;;  %v3353_v23 = vrot.slane %v3342_v57, 5  ;;  %v3428_v3 = vld [vmem:[#allocation3 + $0x2d8] sm:$0x7] }
 0x358   :  { %v3355_v17 = vrot.slane %v3343_v7, 4  ;;  %v3388_v8 = vrot.slane %v3311_v0, 1  ;;  %v3394_v30 = vmax.f32 %v3303_v62, %v3384_v51  ;;  %v3395_v53 = vmax.f32 %v3305_v37, %v3385_v19 }
 0x359   :  { %v3350_v15 = vsel %vm1292_vm0, %v3349_v59, %v3339_v42  ;;  %v3359_v49 = vsel %vm1298_vm2, %v3349_v59, %v3339_v42  ;;  %v3365_v11 = vsel %vm1304_vm4, %v3349_v59, %v3339_v42  ;;  %v3372_v33 = vsel %vm1310_vm6, %v3349_v59, %v3339_v42 }
 0x35a   :  { %v3352_v46 = vsel %vm1295_vm1, %v3351_v39, %v3350_v15  ;;  %3371 = vst.msk [vmem:[#allocation4 + $0x59] sm:$0x1] %vm1367_vm12, %v3355_v17  ;;  %v3360_v5 = vsel %vm1301_vm3, %v3351_v39, %v3359_v49  ;;  %v3366_v4 = vsel %vm1307_vm5, %v3351_v39, %v3365_v11  ;;  %v3373_v48 = vsel %vm1292_vm0, %v3353_v23, %v3351_v39  ;;  %v3432_v15 = vld [vmem:[#allocation3 + $0x2f8] sm:$0x7] }
 0x35b   :  { %3377 = vst.msk [vmem:[#allocation4 + $0x54] sm:$0xc0] %vm1385_vm13, %v3372_v33  ;;  %v3354_v40 = vsel %vm1298_vm2, %v3353_v23, %v3352_v46  ;;  %v3361_v25 = vsel %vm1304_vm4, %v3353_v23, %v3360_v5  ;;  %v3367_v54 = vsel %vm1310_vm6, %v3353_v23, %v3366_v4  ;;  %v3374_v26 = vsel %vm1295_vm1, %v3355_v17, %v3373_v48  ;;  %v4004_v52 = vld [vmem:[#allocation4 + $0x40] sm:$0xff]  ;;  %v3434_v46 = vld [vmem:[#allocation3 + $0x308] sm:$0x7] }
 0x35c   :  { %v3356_v16 = vsel %vm1301_vm3, %v3355_v17, %v3354_v40  ;;  %v3362_v44 = vsel %vm1307_vm5, %v3355_v17, %v3361_v25  ;;  %3370 = vst.msk [vmem:[#allocation4 + $0x51] sm:$0xf0] %vm1364_vm11, %v3367_v54  ;;  %v3396_v10 = vmax.f32 %v3307_v43, %v3386_v22  ;;  %v3397_v9 = vmax.f32 %v3309_v2, %v3387_v63  ;;  %v3436_v5 = vld [vmem:[#allocation3 + $0x318] sm:$0x7]  ;;  %v3438_v4 = vld [vmem:[#allocation3 + $0x328] sm:$0x7] }
 0x35d   :  { %3378 = vst.msk [vmem:[#allocation4 + $0x5c] sm:$0x7] %vm1388_vm14, %v3374_v26  ;;  %v3398_v1 = vmax.f32 %v3311_v0, %v3388_v8  ;;  %v3399_v58 = vadd.f32 %v3394_v30, %v12851_v27  ;;  %v3445_v50 = vmax.f32 %v3425_v41, %v3427_v14  ;;  %v3400_v61 = vadd.f32 %v3395_v53, %v12851_v27  ;;  %v3430_v30 = vld [vmem:[#allocation3 + $0x2e8] sm:$0x7]  ;;  %v3440_v25 = vld [vmem:[#allocation3 + $0x338] sm:$0x7] }
 0x35e   :  { %3358 = vst.msk [vmem:[#allocation4 + $0x4b] sm:$0x1f] %vm1326_vm8, %v3356_v16  ;;  %v3401_v45 = vadd.f32 %v3396_v10, %v12851_v27  ;;  %v3447_v55 = vmax.f32 %v3429_v38, %v3431_v60  ;;  %v3449_v20 = vmax.f32 %v3433_v12, %v3435_v32  ;;  %v3402_v24 = vadd.f32 %v3397_v9, %v12851_v27  ;;  %v3442_v54 = vld [vmem:[#allocation3 + $0x348] sm:$0x7]  ;;  %v3444_v26 = vld [vmem:[#allocation3 + $0x358] sm:$0x7] }
 0x35f   :  { %3364 = vst.msk [vmem:[#allocation4 + $0x4e] sm:$0x7c] %vm2929_vm10, %v3362_v44  ;;  %v3403_v13 = vadd.f32 %v3398_v1, %v12851_v27  ;;  %v3404_v62 = vmax.f32 %v3399_v58, 0.0  ;;  %v3451_v37 = vmax.f32 %v3437_v18, %v3439_v35  ;;  %v3405_v47 = vmax.f32 %v3400_v61, 0.0 }
 0x360   :  { %v3406_v34 = vmax.f32 %v3401_v45, 0.0  ;;  %v3453_v6 = vmax.f32 %v3441_v56, %v3443_v21  ;;  %v3461_v36 = vrot.slane %v3445_v50, 1  ;;  %v3407_v31 = vmax.f32 %v3402_v24, 0.0 }
 0x361   :  { %v3408_v43 = vmax.f32 %v3403_v13, 0.0  ;;  %v3462_v2 = vrot.slane %v3447_v55, 1  ;;  %v3463_v42 = vrot.slane %v3449_v20, 1  ;;  %v3414_v0 = vrot.slane %v3405_v47, 7 }
 0x362   :  { %v3416_v57 = vrot.slane %v3406_v34, 6  ;;  %v3464_v7 = vrot.slane %v3451_v37, 1  ;;  %v3465_v51 = vrot.slane %v3453_v6, 1  ;;  %v3418_v19 = vrot.slane %v3407_v31, 5 }
 0x363   :  { %v3420_v27 = vrot.slane %v3408_v43, 4  ;;  %v3471_v59 = vmax.f32 %v3445_v50, %v3461_v36  ;;  %v3472_v39 = vmax.f32 %v3447_v55, %v3462_v2  ;;  %v3415_v63 = vsel %vm1292_vm0, %v3414_v0, %v3404_v62  ;;  %v3568_v43 = vld [vmem:[#allocation3 + $0x370] sm:$0xff]  ;;  %v3570_v2 = vld [vmem:[#allocation3 + $0x380] sm:$0xff] }
 0x364   :  { %v3473_v23 = vmax.f32 %v3449_v20, %v3463_v42  ;;  %v3474_v17 = vmax.f32 %v3451_v37, %v3464_v7  ;;  %v3475_v8 = vmax.f32 %v3453_v6, %v3465_v51  ;;  %v3417_v11 = vsel %vm1295_vm1, %v3416_v57, %v3415_v63  ;;  %v3572_v57 = vld [vmem:[#allocation3 + $0x390] sm:$0xff]  ;;  %v3574_v7 = vld [vmem:[#allocation3 + $0x3a0] sm:$0xff] }
 0x365   :  { %v4005_v22 = vld [vmem:[#allocation4 + $0x48] sm:$0xff]  ;;  %v12891_v33 = vstv %s12882_s26  ;;  %v3446_v48 = vmax.f32 %v3426_v29, %v3428_v3  ;;  %v3419_v41 = vsel %vm1298_vm2, %v3418_v19, %v3417_v11  ;;  %v3448_v16 = vmax.f32 %v3430_v30, %v3432_v15  ;;  %v3576_v51 = vld [vmem:[#allocation3 + $0x3b0] sm:$0xff]  ;;  %v3578_v63 = vld [vmem:[#allocation3 + $0x3c0] sm:$0xff] }
 0x366   :  { %v5404_v49 = vpack.c.bf16 %v4005_v22, %v4004_v52  ;;  %v3477_v14 = vadd.f32 %v12891_v33, %v3471_v59  ;;  %v3478_v38 = vadd.f32 %v12891_v33, %v3472_v39  ;;  %v3479_v40 = vadd.f32 %v12891_v33, %v3473_v23  ;;  %v4006_v34 = vld [vmem:[#allocation4 + $0x50] sm:$0xff] }
 0x367   :  { %v3421_v60 = vsel %vm1301_vm3, %v3420_v27, %v3419_v41  ;;  %v3480_v12 = vadd.f32 %v12891_v33, %v3474_v17  ;;  %v3481_v32 = vadd.f32 %v12891_v33, %v3475_v8  ;;  %v3450_v18 = vmax.f32 %v3434_v46, %v3436_v5  ;;  %v3580_v23 = vld [vmem:[#allocation3 + $0x3d0] sm:$0xff]  ;;  %v3586_v46 = vld [vmem:[#allocation3 + $0x400] sm:$0xff] }
 0x368   :  { %5405 = vmatpush1.bf16.msra.mxu0 %v5404_v49  ;;  %3423 = vst.msk [vmem:[#allocation4 + $0x5f] sm:$0x1f] %vm1326_vm8, %v3421_v60  ;;  %v3482_v44 = vmax.f32 %v3477_v14, 0.0  ;;  %v3483_v53 = vmax.f32 %v3478_v38, 0.0  ;;  %v3484_v10 = vmax.f32 %v3479_v40, 0.0  ;;  %v3452_v1 = vmax.f32 %v3438_v4, %v3440_v25  ;;  %v3582_v49 = vld [vmem:[#allocation3 + $0x3e0] sm:$0xff] }
 0x369   :  { %5406 = vmatprep.subr.bf16.mxu0 %v7658_v28  ;;  %v3485_v35 = vmax.f32 %v3480_v12, 0.0  ;;  %v3486_v9 = vmax.f32 %v3481_v32, 0.0  ;;  %v3454_v58 = vmax.f32 %v3442_v54, %v3444_v26  ;;  %v3527_v50 = vrot.slane %v3446_v48, 1  ;;  %v3584_v11 = vld [vmem:[#allocation3 + $0x3f0] sm:$0xff] }
 0x36a   :  { %v3492_v56 = vrot.slane %v3483_v53, 7  ;;  %v3494_v21 = vrot.slane %v3484_v10, 6  ;;  %v3528_v61 = vrot.slane %v3448_v16, 1  ;;  %v3529_v20 = vrot.slane %v3450_v18, 1  ;;  %v3569_v10 = vld [vmem:[#allocation3 + $0x378] sm:$0x7] }
 0x36b   :  { %v3496_v45 = vrot.slane %v3485_v35, 5  ;;  %v3498_v55 = vrot.slane %v3486_v9, 4  ;;  %v3530_v24 = vrot.slane %v3452_v1, 1  ;;  %v3531_v39 = vrot.slane %v3454_v58, 1 }
 0x36c   :  { %v3493_v13 = vsel %vm1292_vm0, %v3492_v56, %v3482_v44  ;;  %v3502_v62 = vsel %vm1298_vm2, %v3492_v56, %v3482_v44  ;;  %v3508_v37 = vsel %vm1304_vm4, %v3492_v56, %v3482_v44  ;;  %v3515_v47 = vsel %vm1310_vm6, %v3492_v56, %v3482_v44  ;;  %v3573_v56 = vld [vmem:[#allocation3 + $0x398] sm:$0x7] }
 0x36d   :  { %v3495_v6 = vsel %vm1295_vm1, %v3494_v21, %v3493_v13  ;;  %v3503_v36 = vsel %vm1301_vm3, %v3494_v21, %v3502_v62  ;;  %v3509_v29 = vsel %vm1307_vm5, %v3494_v21, %v3508_v37  ;;  %3514 = vst.msk [vmem:[#allocation4 + $0x72] sm:$0x1] %vm1367_vm12, %v3498_v55  ;;  %v3516_v31 = vsel %vm1292_vm0, %v3496_v45, %v3494_v21 }
 0x36e   :  { %3520 = vst.msk [vmem:[#allocation4 + $0x6d] sm:$0xc0] %vm1385_vm13, %v3515_v47  ;;  %v3497_v42 = vsel %vm1298_vm2, %v3496_v45, %v3495_v6  ;;  %v3504_v3 = vsel %vm1304_vm4, %v3496_v45, %v3503_v36  ;;  %v3510_v52 = vsel %vm1310_vm6, %v3496_v45, %v3509_v29  ;;  %v3517_v0 = vsel %vm1295_vm1, %v3498_v55, %v3516_v31  ;;  %v3577_v29 = vld [vmem:[#allocation3 + $0x3b8] sm:$0x7]  ;;  %v3579_v31 = vld [vmem:[#allocation3 + $0x3c8] sm:$0x7] }
 0x36f   :  { %v4007_v19 = vld [vmem:[#allocation4 + $0x58] sm:$0xff]  ;;  %v3499_v27 = vsel %vm1301_vm3, %v3498_v55, %v3497_v42  ;;  %v3505_v59 = vsel %vm1307_vm5, %v3498_v55, %v3504_v3  ;;  %3513 = vst.msk [vmem:[#allocation4 + $0x6a] sm:$0xf0] %vm1364_vm11, %v3510_v52  ;;  %v3537_v22 = vmax.f32 %v3446_v48, %v3527_v50  ;;  %v3538_v8 = vmax.f32 %v3448_v16, %v3528_v61  ;;  %v3583_v3 = vld [vmem:[#allocation3 + $0x3e8] sm:$0x7] }
 0x370   :  { %3521 = vst.msk [vmem:[#allocation4 + $0x75] sm:$0x7] %vm1388_vm14, %v3517_v0  ;;  %v5407_v17 = vpack.c.bf16 %v4007_v19, %v4006_v34  ;;  %v3539_v30 = vmax.f32 %v3450_v18, %v3529_v20  ;;  %v3540_v15 = vmax.f32 %v3452_v1, %v3530_v24  ;;  %v3541_v5 = vmax.f32 %v3454_v58, %v3531_v39  ;;  %v3571_v18 = vld [vmem:[#allocation3 + $0x388] sm:$0x7]  ;;  %v3581_v42 = vld [vmem:[#allocation3 + $0x3d8] sm:$0x7] }
 0x371   :  { %3501 = vst.msk [vmem:[#allocation4 + $0x64] sm:$0x1f] %vm1326_vm8, %v3499_v27  ;;  %v3542_v4 = vadd.f32 %v3537_v22, %v12891_v33  ;;  %v3588_v41 = vmax.f32 %v3568_v43, %v3570_v2  ;;  %v3590_v14 = vmax.f32 %v3572_v57, %v3574_v7  ;;  %v3543_v48 = vadd.f32 %v3538_v8, %v12891_v33  ;;  %v3585_v27 = vld [vmem:[#allocation3 + $0x3f8] sm:$0x7] }
 0x372   :  { %3507 = vst.msk [vmem:[#allocation4 + $0x67] sm:$0x7c] %vm2929_vm10, %v3505_v59  ;;  %5408 = vmatpush1.bf16.msra.mxu0 %v5407_v17  ;;  %v3544_v38 = vadd.f32 %v3539_v30, %v12891_v33  ;;  %v3545_v40 = vadd.f32 %v3540_v15, %v12891_v33  ;;  %v3592_v25 = vmax.f32 %v3576_v51, %v3578_v63  ;;  %v12933_v2 = vstv %s12923_s3  ;;  %v3587_v59 = vld [vmem:[#allocation3 + $0x408] sm:$0x7] }
 0x373   :  { %5409 = vmatprep.subr.bf16.mxu0 %v7658_v28  ;;  %v3546_v54 = vadd.f32 %v3541_v5, %v12891_v33  ;;  %v3547_v26 = vmax.f32 %v3542_v4, 0.0  ;;  %v3594_v60 = vmax.f32 %v3580_v23, %v3582_v49  ;;  %v3596_v12 = vmax.f32 %v3584_v11, %v3586_v46  ;;  %v3575_v33 = vld [vmem:[#allocation3 + $0x3a8] sm:$0x7] }
 0x374   :  { %v3548_v32 = vmax.f32 %v3543_v48, 0.0  ;;  %v3549_v16 = vmax.f32 %v3544_v38, 0.0  ;;  %v3550_v44 = vmax.f32 %v3545_v40, 0.0  ;;  %v3604_v53 = vrot.slane %v3588_v41, 1 }
 0x375   :  { %v3551_v35 = vmax.f32 %v3546_v54, 0.0  ;;  %v3605_v9 = vrot.slane %v3590_v14, 1  ;;  %v3606_v1 = vrot.slane %v3592_v25, 1  ;;  %v3607_v58 = vrot.slane %v3594_v60, 1 }
 0x376   :  { %v3557_v21 = vrot.slane %v3548_v32, 7  ;;  %v3559_v50 = vrot.slane %v3549_v16, 6  ;;  %v3561_v61 = vrot.slane %v3550_v44, 5  ;;  %v3608_v45 = vrot.slane %v3596_v12, 1 }
 0x377   :  { %v3563_v24 = vrot.slane %v3551_v35, 4  ;;  %v3614_v13 = vmax.f32 %v3588_v41, %v3604_v53  ;;  %v3615_v62 = vmax.f32 %v3590_v14, %v3605_v9  ;;  %v3616_v37 = vmax.f32 %v3592_v25, %v3606_v1  ;;  %v3713_v35 = vld [vmem:[#allocation3 + $0x430] sm:$0xff]  ;;  %v3715_v9 = vld [vmem:[#allocation3 + $0x440] sm:$0xff] }
 0x378   :  { %v4008_v55 = vld [vmem:[#allocation4 + $0x60] sm:$0xff]  ;;  %v3558_v34 = vsel %vm1292_vm0, %v3557_v21, %v3547_v26  ;;  %v3617_v6 = vmax.f32 %v3594_v60, %v3607_v58  ;;  %v3618_v36 = vmax.f32 %v3596_v12, %v3608_v45  ;;  %v3589_v52 = vmax.f32 %v3569_v10, %v3571_v18  ;;  %v3721_v45 = vld [vmem:[#allocation3 + $0x470] sm:$0xff] }
 0x379   :  { %v4009_v20 = vld [vmem:[#allocation4 + $0x68] sm:$0xff]  ;;  %v3560_v43 = vsel %vm1295_vm1, %v3559_v50, %v3558_v34  ;;  %v3591_v0 = vmax.f32 %v3573_v56, %v3575_v33  ;;  %v3620_v7 = vadd.f32 %v12933_v2, %v3614_v13  ;;  %v3621_v51 = vadd.f32 %v12933_v2, %v3615_v62  ;;  %v3711_v18 = vld [vmem:[#allocation3 + $0x420] sm:$0xff]  ;;  %v3717_v50 = vld [vmem:[#allocation3 + $0x450] sm:$0xff] }
 0x37a   :  { %v5410_v47 = vpack.c.bf16 %v4009_v20, %v4008_v55  ;;  %v3562_v57 = vsel %vm1298_vm2, %v3561_v61, %v3560_v43  ;;  %v3622_v19 = vadd.f32 %v12933_v2, %v3616_v37  ;;  %v3623_v22 = vadd.f32 %v12933_v2, %v3617_v6  ;;  %v3719_v61 = vld [vmem:[#allocation3 + $0x460] sm:$0xff]  ;;  %v3725_v62 = vld [vmem:[#allocation3 + $0x490] sm:$0xff] }
 0x37b   :  { %v3564_v39 = vsel %vm1301_vm3, %v3563_v24, %v3562_v57  ;;  %v3624_v63 = vadd.f32 %v12933_v2, %v3618_v36  ;;  %v3593_v23 = vmax.f32 %v3577_v29, %v3579_v31  ;;  %v3625_v17 = vmax.f32 %v3620_v7, 0.0  ;;  %v3723_v13 = vld [vmem:[#allocation3 + $0x480] sm:$0xff]  ;;  %v3729_v36 = vld [vmem:[#allocation3 + $0x4b0] sm:$0xff] }
 0x37c   :  { %5411 = vmatpush1.bf16.msra.mxu0 %v5410_v47  ;;  %3566 = vst.msk [vmem:[#allocation4 + $0x78] sm:$0x1f] %vm1326_vm8, %v3564_v39  ;;  %v3626_v8 = vmax.f32 %v3621_v51, 0.0  ;;  %v3627_v30 = vmax.f32 %v3622_v19, 0.0  ;;  %v3595_v15 = vmax.f32 %v3581_v42, %v3583_v3  ;;  %v3628_v49 = vmax.f32 %v3623_v22, 0.0  ;;  %v3727_v6 = vld [vmem:[#allocation3 + $0x4a0] sm:$0xff] }
 0x37d   :  { %5412 = vmatprep.subr.bf16.mxu0 %v7658_v28  ;;  %v3629_v11 = vmax.f32 %v3624_v63, 0.0  ;;  %v3597_v46 = vmax.f32 %v3585_v27, %v3587_v59  ;;  %v3670_v5 = vrot.slane %v3589_v52, 1  ;;  %v3671_v14 = vrot.slane %v3591_v0, 1 }
 0x37e   :  { %v3635_v4 = vrot.slane %v3626_v8, 7  ;;  %v3637_v41 = vrot.slane %v3627_v30, 6  ;;  %v3672_v48 = vrot.slane %v3593_v23, 1  ;;  %v3639_v38 = vrot.slane %v3628_v49, 5  ;;  %v3714_v8 = vld [vmem:[#allocation3 + $0x438] sm:$0x7] }
 0x37f   :  { %v3641_v40 = vrot.slane %v3629_v11, 4  ;;  %v3673_v25 = vrot.slane %v3595_v15, 1  ;;  %v3674_v54 = vrot.slane %v3597_v46, 1  ;;  %v3680_v20 = vmax.f32 %v3589_v52, %v3670_v5  ;;  %v3716_v30 = vld [vmem:[#allocation3 + $0x448] sm:$0x7] }
 0x380   :  { %v3636_v26 = vsel %vm1292_vm0, %v3635_v4, %v3625_v17  ;;  %v3645_v60 = vsel %vm1298_vm2, %v3635_v4, %v3625_v17  ;;  %v3651_v12 = vsel %vm1304_vm4, %v3635_v4, %v3625_v17  ;;  %v3658_v32 = vsel %vm1310_vm6, %v3635_v4, %v3625_v17  ;;  %v3712_v17 = vld [vmem:[#allocation3 + $0x428] sm:$0x7] }
 0x381   :  { %v3638_v16 = vsel %vm1295_vm1, %v3637_v41, %v3636_v26  ;;  %3657 = vst.msk [vmem:[#allocation4 + $0x8b] sm:$0x1] %vm1367_vm12, %v3641_v40  ;;  %v3646_v44 = vsel %vm1301_vm3, %v3637_v41, %v3645_v60  ;;  %v3652_v53 = vsel %vm1307_vm5, %v3637_v41, %v3651_v12  ;;  %v3659_v10 = vsel %vm1292_vm0, %v3639_v38, %v3637_v41 }
 0x382   :  { %3663 = vst.msk [vmem:[#allocation4 + $0x86] sm:$0xc0] %vm1385_vm13, %v3658_v32  ;;  %v3640_v1 = vsel %vm1298_vm2, %v3639_v38, %v3638_v16  ;;  %v3647_v58 = vsel %vm1304_vm4, %v3639_v38, %v3646_v44  ;;  %v3653_v56 = vsel %vm1310_vm6, %v3639_v38, %v3652_v53  ;;  %v3660_v21 = vsel %vm1295_vm1, %v3641_v40, %v3659_v10  ;;  %v3718_v38 = vld [vmem:[#allocation3 + $0x458] sm:$0x7]  ;;  %v3720_v32 = vld [vmem:[#allocation3 + $0x468] sm:$0x7] }
 0x383   :  { %v3642_v33 = vsel %vm1301_vm3, %v3641_v40, %v3640_v1  ;;  %v3648_v55 = vsel %vm1307_vm5, %v3641_v40, %v3647_v58  ;;  %3656 = vst.msk [vmem:[#allocation4 + $0x83] sm:$0xf0] %vm1364_vm11, %v3653_v56  ;;  %v3681_v24 = vmax.f32 %v3591_v0, %v3671_v14  ;;  %v3682_v37 = vmax.f32 %v3593_v23, %v3672_v48  ;;  %v3728_v56 = vld [vmem:[#allocation3 + $0x4a8] sm:$0x7] }
 0x384   :  { %3664 = vst.msk [vmem:[#allocation4 + $0x8e] sm:$0x7] %vm1388_vm14, %v3660_v21  ;;  %v3683_v47 = vmax.f32 %v3595_v15, %v3673_v25  ;;  %v3684_v34 = vmax.f32 %v3597_v46, %v3674_v54  ;;  %v3731_v29 = vmax.f32 %v3711_v18, %v3713_v35  ;;  %v3685_v31 = vadd.f32 %v3680_v20, %v12933_v2  ;;  %v4010_v15 = vld [vmem:[#allocation4 + $0x70] sm:$0xff]  ;;  %v3722_v18 = vld [vmem:[#allocation3 + $0x478] sm:$0x7] }
 0x385   :  { %3644 = vst.msk [vmem:[#allocation4 + $0x7d] sm:$0x1f] %vm1326_vm8, %v3642_v33  ;;  %v3686_v43 = vadd.f32 %v3681_v24, %v12933_v2  ;;  %v3733_v42 = vmax.f32 %v3715_v9, %v3717_v50  ;;  %v3735_v3 = vmax.f32 %v3719_v61, %v3721_v45  ;;  %v3687_v52 = vadd.f32 %v3682_v37, %v12933_v2  ;;  %v3724_v35 = vld [vmem:[#allocation3 + $0x488] sm:$0x7]  ;;  %v3726_v9 = vld [vmem:[#allocation3 + $0x498] sm:$0x7] }
 0x386   :  { %3650 = vst.msk [vmem:[#allocation4 + $0x80] sm:$0x7c] %vm2929_vm10, %v3648_v55  ;;  %v3688_v0 = vadd.f32 %v3683_v47, %v12933_v2  ;;  %v3689_v57 = vadd.f32 %v3684_v34, %v12933_v2  ;;  %v3737_v7 = vmax.f32 %v3723_v13, %v3725_v62  ;;  %v3690_v51 = vmax.f32 %v3685_v31, 0.0  ;;  %v3730_v21 = vld [vmem:[#allocation3 + $0x4b8] sm:$0x7] }
 0x387   :  { %v3691_v19 = vmax.f32 %v3686_v43, 0.0  ;;  %v3739_v27 = vmax.f32 %v3727_v6, %v3729_v36  ;;  %v3747_v59 = vrot.slane %v3731_v29, 1  ;;  %v3692_v39 = vmax.f32 %v3687_v52, 0.0 }
 0x388   :  { %v3693_v22 = vmax.f32 %v3688_v0, 0.0  ;;  %v3694_v63 = vmax.f32 %v3689_v57, 0.0  ;;  %v3748_v23 = vrot.slane %v3733_v42, 1  ;;  %v3749_v11 = vrot.slane %v3735_v3, 1 }
 0x389   :  { %v3700_v49 = vrot.slane %v3691_v19, 7  ;;  %v3750_v46 = vrot.slane %v3737_v7, 1  ;;  %v3751_v5 = vrot.slane %v3739_v27, 1  ;;  %v3702_v41 = vrot.slane %v3692_v39, 6 }
 0x38a   :  { %v3704_v2 = vrot.slane %v3693_v22, 5  ;;  %v3706_v14 = vrot.slane %v3694_v63, 4  ;;  %v3757_v48 = vmax.f32 %v3731_v29, %v3747_v59  ;;  %v3758_v26 = vmax.f32 %v3733_v42, %v3748_v23 }
 0x38b   :  { %v4013_v4 = vld [vmem:[#allocation4 + $0x88] sm:$0xff]  ;;  %v3701_v54 = vsel %vm1292_vm0, %v3700_v49, %v3690_v51  ;;  %v3759_v60 = vmax.f32 %v3735_v3, %v3749_v11  ;;  %v3760_v12 = vmax.f32 %v3737_v7, %v3750_v46  ;;  %v3761_v10 = vmax.f32 %v3739_v27, %v3751_v5  ;;  %v3856_v49 = vld [vmem:[#allocation3 + $0x4e0] sm:$0xff]  ;;  %v3858_v11 = vld [vmem:[#allocation3 + $0x4f0] sm:$0xff] }
 0x38c   :  { %v4011_v40 = vld [vmem:[#allocation4 + $0x78] sm:$0xff]  ;;  %v3703_v53 = vsel %vm1295_vm1, %v3702_v41, %v3701_v54  ;;  %v12975_v58 = vstv %s12966_s4  ;;  %v3732_v50 = vmax.f32 %v3712_v17, %v3714_v8  ;;  %v3734_v61 = vmax.f32 %v3716_v30, %v3718_v38 }
 0x38d   :  { %v4012_v25 = vld [vmem:[#allocation4 + $0x80] sm:$0xff]  ;;  %v5413_v16 = vpack.c.bf16 %v4011_v40, %v4010_v15  ;;  %v3705_v1 = vsel %vm1298_vm2, %v3704_v2, %v3703_v53  ;;  %v3763_v33 = vadd.f32 %v12975_v58, %v3757_v48  ;;  %v3764_v55 = vadd.f32 %v12975_v58, %v3758_v26  ;;  %v3854_v15 = vld [vmem:[#allocation3 + $0x4d0] sm:$0xff] }
 0x38e   :  { %v5416_v44 = vpack.c.bf16 %v4013_v4, %v4012_v25  ;;  %v3707_v45 = vsel %vm1301_vm3, %v3706_v14, %v3705_v1  ;;  %v3765_v20 = vadd.f32 %v12975_v58, %v3759_v60  ;;  %v3766_v24 = vadd.f32 %v12975_v58, %v3760_v12  ;;  %v3860_v2 = vld [vmem:[#allocation3 + $0x500] sm:$0xff]  ;;  %v3862_v14 = vld [vmem:[#allocation3 + $0x510] sm:$0xff] }
 0x38f   :  { %5414 = vmatpush1.bf16.msra.mxu0 %v5413_v16  ;;  %3709 = vst.msk [vmem:[#allocation4 + $0x91] sm:$0x1f] %vm1326_vm8, %v3707_v45  ;;  %v3767_v13 = vadd.f32 %v12975_v58, %v3761_v10  ;;  %v3736_v62 = vmax.f32 %v3720_v32, %v3722_v18  ;;  %v3738_v37 = vmax.f32 %v3724_v35, %v3726_v9  ;;  %v3768_v47 = vmax.f32 %v3763_v33, 0.0  ;;  %v3864_v48 = vld [vmem:[#allocation3 + $0x520] sm:$0xff]  ;;  %v3866_v26 = vld [vmem:[#allocation3 + $0x530] sm:$0xff] }
 0x390   :  { %5415 = vmatprep.subr.bf16.mxu0 %v7658_v28  ;;  %v3769_v34 = vmax.f32 %v3764_v55, 0.0  ;;  %v3770_v6 = vmax.f32 %v3765_v20, 0.0  ;;  %v3740_v36 = vmax.f32 %v3728_v56, %v3730_v21  ;;  %v3771_v29 = vmax.f32 %v3766_v24, 0.0  ;;  %v3868_v60 = vld [vmem:[#allocation3 + $0x540] sm:$0xff] }
 0x391   :  { %v3772_v31 = vmax.f32 %v3767_v13, 0.0  ;;  %v3813_v43 = vrot.slane %v3732_v50, 1  ;;  %v3814_v42 = vrot.slane %v3734_v61, 1  ;;  %v3815_v0 = vrot.slane %v3736_v62, 1  ;;  %v3872_v53 = vld [vmem:[#allocation3 + $0x560] sm:$0xff] }
 0x392   :  { %v3778_v3 = vrot.slane %v3769_v34, 7  ;;  %v3780_v52 = vrot.slane %v3770_v6, 6  ;;  %v3816_v57 = vrot.slane %v3738_v37, 1  ;;  %v3782_v7 = vrot.slane %v3771_v29, 5 }
 0x393   :  { %5417 = vmatpush1.bf16.msra.mxu0 %v5416_v44  ;;  %v3784_v51 = vrot.slane %v3772_v31, 4  ;;  %v3817_v19 = vrot.slane %v3740_v36, 1  ;;  %v3823_v27 = vmax.f32 %v3732_v50, %v3813_v43  ;;  %v3824_v25 = vmax.f32 %v3734_v61, %v3814_v42  ;;  %v3870_v44 = vld [vmem:[#allocation3 + $0x550] sm:$0xff] }
 0x394   :  { %5418 = vmatprep.subr.bf16.mxu0 %v7658_v28  ;;  %v3779_v59 = vsel %vm1292_vm0, %v3778_v3, %v3768_v47  ;;  %v3788_v39 = vsel %vm1298_vm2, %v3778_v3, %v3768_v47  ;;  %v3794_v22 = vsel %vm1304_vm4, %v3778_v3, %v3768_v47  ;;  %v3801_v63 = vsel %vm1310_vm6, %v3778_v3, %v3768_v47 }
 0x395   :  { %v3781_v23 = vsel %vm1295_vm1, %v3780_v52, %v3779_v59  ;;  %v3789_v17 = vsel %vm1301_vm3, %v3780_v52, %v3788_v39  ;;  %3800 = vst.msk [vmem:[#allocation4 + $0xa4] sm:$0x1] %vm1367_vm12, %v3784_v51  ;;  %v3795_v8 = vsel %vm1307_vm5, %v3780_v52, %v3794_v22  ;;  %v3802_v30 = vsel %vm1292_vm0, %v3782_v7, %v3780_v52  ;;  %v3859_v22 = vld [vmem:[#allocation3 + $0x4f8] sm:$0x7] }
 0x396   :  { %3806 = vst.msk [vmem:[#allocation4 + $0x9f] sm:$0xc0] %vm1385_vm13, %v3801_v63  ;;  %v3783_v46 = vsel %vm1298_vm2, %v3782_v7, %v3781_v23  ;;  %v3790_v5 = vsel %vm1304_vm4, %v3782_v7, %v3789_v17  ;;  %v3796_v4 = vsel %vm1310_vm6, %v3782_v7, %v3795_v8  ;;  %v3803_v41 = vsel %vm1295_vm1, %v3784_v51, %v3802_v30  ;;  %v3861_v63 = vld [vmem:[#allocation3 + $0x508] sm:$0x7]  ;;  %v3863_v23 = vld [vmem:[#allocation3 + $0x518] sm:$0x7] }
 0x397   :  { %v3785_v38 = vsel %vm1301_vm3, %v3784_v51, %v3783_v46  ;;  %v3791_v40 = vsel %vm1307_vm5, %v3784_v51, %v3790_v5  ;;  %3799 = vst.msk [vmem:[#allocation4 + $0x9c] sm:$0xf0] %vm1364_vm11, %v3796_v4  ;;  %v3825_v54 = vmax.f32 %v3736_v62, %v3815_v0  ;;  %v3826_v12 = vmax.f32 %v3738_v37, %v3816_v57  ;;  %v3869_v46 = vld [vmem:[#allocation3 + $0x548] sm:$0x7] }
 0x398   :  { %3807 = vst.msk [vmem:[#allocation4 + $0xa7] sm:$0x7] %vm1388_vm14, %v3803_v41  ;;  %v3827_v32 = vmax.f32 %v3740_v36, %v3817_v19  ;;  %v3828_v16 = vadd.f32 %v3823_v27, %v12975_v58  ;;  %v3874_v10 = vmax.f32 %v3854_v15, %v3856_v49  ;;  %v3829_v18 = vadd.f32 %v3824_v25, %v12975_v58  ;;  %v3857_v19 = vld [vmem:[#allocation3 + $0x4e8] sm:$0x7] }
 0x399   :  { %3787 = vst.msk [vmem:[#allocation4 + $0x96] sm:$0x1f] %vm1326_vm8, %v3785_v38  ;;  %v3830_v35 = vadd.f32 %v3825_v54, %v12975_v58  ;;  %v3876_v9 = vmax.f32 %v3858_v11, %v3860_v2  ;;  %v3878_v1 = vmax.f32 %v3862_v14, %v3864_v48  ;;  %v3831_v56 = vadd.f32 %v3826_v12, %v12975_v58  ;;  %v3865_v49 = vld [vmem:[#allocation3 + $0x528] sm:$0x7]  ;;  %v3867_v11 = vld [vmem:[#allocation3 + $0x538] sm:$0x7] }
 0x39a   :  { %3793 = vst.msk [vmem:[#allocation4 + $0x99] sm:$0x7c] %vm2929_vm10, %v3791_v40  ;;  %v3832_v21 = vadd.f32 %v3827_v32, %v12975_v58  ;;  %v3833_v50 = vmax.f32 %v3828_v16, 0.0  ;;  %v3880_v61 = vmax.f32 %v3866_v26, %v3868_v60  ;;  %v3834_v45 = vmax.f32 %v3829_v18, 0.0  ;;  %v3855_v58 = vld [vmem:[#allocation3 + $0x4d8] sm:$0x7] }
 0x39b   :  { %v3835_v33 = vmax.f32 %v3830_v35, 0.0  ;;  %v3882_v55 = vmax.f32 %v3870_v44, %v3872_v53  ;;  %v3890_v20 = vrot.slane %v3874_v10, 1  ;;  %v3836_v24 = vmax.f32 %v3831_v56, 0.0  ;;  %v3871_v2 = vld [vmem:[#allocation3 + $0x558] sm:$0x7] }
 0x39c   :  { %v3837_v13 = vmax.f32 %v3832_v21, 0.0  ;;  %v3891_v62 = vrot.slane %v3876_v9, 1  ;;  %v3892_v37 = vrot.slane %v3878_v1, 1  ;;  %v3843_v47 = vrot.slane %v3834_v45, 7  ;;  %v3873_v14 = vld [vmem:[#allocation3 + $0x568] sm:$0x7] }
 0x39d   :  { %v3845_v34 = vrot.slane %v3835_v33, 6  ;;  %v3893_v6 = vrot.slane %v3880_v61, 1  ;;  %v3894_v36 = vrot.slane %v3882_v55, 1  ;;  %v3847_v29 = vrot.slane %v3836_v24, 5 }
 0x39e   :  { %v3849_v31 = vrot.slane %v3837_v13, 4  ;;  %v3900_v43 = vmax.f32 %v3874_v10, %v3890_v20  ;;  %v3901_v42 = vmax.f32 %v3876_v9, %v3891_v62  ;;  %v3844_v0 = vsel %vm1292_vm0, %v3843_v47, %v3833_v50  ;;  %v4022_v47 = vld [vmem:[%s13507_s5 + $0x8] sm:$0xff] }
 0x39f   :  { %v3902_v57 = vmax.f32 %v3878_v1, %v3892_v37  ;;  %v3903_v7 = vmax.f32 %v3880_v61, %v3893_v6  ;;  %v3904_v51 = vmax.f32 %v3882_v55, %v3894_v36  ;;  %v3846_v59 = vsel %vm1295_vm1, %v3845_v34, %v3844_v0 }
 0x3a0   :  { %v4014_v3 = vld [vmem:[#allocation4 + $0x90] sm:$0xff]  ;;  %v13016_v39 = vstv %s13007_s27  ;;  %v3848_v17 = vsel %vm1298_vm2, %v3847_v29, %v3846_v59  ;;  %v3875_v48 = vmax.f32 %v3855_v58, %v3857_v19  ;;  %v3877_v54 = vmax.f32 %v3859_v22, %v3861_v63  ;;  %v4053_v58 = vld [vmem:[%s13508_s6] sm:$0xff] }
 0x3a1   :  { %v4015_v52 = vld [vmem:[#allocation4 + $0x98] sm:$0xff]  ;;  %v3906_v8 = vadd.f32 %v13016_v39, %v3900_v43  ;;  %v3907_v30 = vadd.f32 %v13016_v39, %v3901_v42  ;;  %v3908_v15 = vadd.f32 %v13016_v39, %v3902_v57  ;;  %v3850_v5 = vsel %vm1301_vm3, %v3849_v31, %v3848_v17  ;;  %v4054_v17 = vld [vmem:[%s13508_s6 + $0x8] sm:$0xff] }
 0x3a2   :  { %v5419_v27 = vpack.c.bf16 %v4015_v52, %v4014_v3  ;;  %v3909_v4 = vadd.f32 %v13016_v39, %v3903_v7  ;;  %v3910_v41 = vadd.f32 %v13016_v39, %v3904_v51  ;;  %3852 = vst.msk [vmem:[#allocation4 + $0xaa] sm:$0x1f] %vm1326_vm8, %v3850_v5  ;;  %v3879_v12 = vmax.f32 %v3863_v23, %v3865_v49  ;;  %v4055_v3 = vld [vmem:[%s13508_s6 + $0x10] sm:$0xff] }
 0x3a3   :  { %v3911_v38 = vmax.f32 %v3906_v8, 0.0  ;;  %v3912_v40 = vmax.f32 %v3907_v30, 0.0  ;;  %v3913_v25 = vmax.f32 %v3908_v15, 0.0  ;;  %v3881_v32 = vmax.f32 %v3867_v11, %v3869_v46  ;;  %v4056_v8 = vld [vmem:[%s13508_s6 + $0x18] sm:$0xff]  ;;  %v4016_v30 = vld [vmem:[#allocation4 + $0xa0] sm:$0xff] }
 0x3a4   :  { %5420 = vmatpush1.bf16.msra.mxu0 %v5419_v27  ;;  %v3914_v26 = vmax.f32 %v3909_v4, 0.0  ;;  %v3915_v60 = vmax.f32 %v3910_v41, 0.0  ;;  %v3883_v53 = vmax.f32 %v3871_v2, %v3873_v14  ;;  %v3956_v10 = vrot.slane %v3875_v48, 1 }
 0x3a5   :  { %5421 = vmatprep.subr.bf16.mxu0 %v7658_v28  ;;  %v3921_v16 = vrot.slane %v3912_v40, 7  ;;  %v3923_v44 = vrot.slane %v3913_v25, 6  ;;  %v3957_v9 = vrot.slane %v3877_v54, 1  ;;  %v3958_v1 = vrot.slane %v3879_v12, 1  ;;  %v4058_v25 = vld [vmem:[%s13508_s6 + $0x28] sm:$0xff] }
 0x3a6   :  { %v3925_v18 = vrot.slane %v3914_v26, 5  ;;  %v3927_v35 = vrot.slane %v3915_v60, 4  ;;  %v3959_v36 = vrot.slane %v3881_v32, 1  ;;  %v3960_v29 = vrot.slane %v3883_v53, 1 }
 0x3a7   :  { %v3922_v56 = vsel %vm1292_vm0, %v3921_v16, %v3911_v38  ;;  %v3931_v21 = vsel %vm1298_vm2, %v3921_v16, %v3911_v38  ;;  %v3937_v50 = vsel %vm1304_vm4, %v3921_v16, %v3911_v38  ;;  %v3944_v61 = vsel %vm1310_vm6, %v3921_v16, %v3911_v38  ;;  %v4057_v38 = vld [vmem:[%s13508_s6 + $0x20] sm:$0xff] }
 0x3a8   :  { %v3924_v45 = vsel %vm1295_vm1, %v3923_v44, %v3922_v56  ;;  %3943 = vst.msk [vmem:[#allocation4 + $0xbd] sm:$0x1] %vm1367_vm12, %v3927_v35  ;;  %v3932_v33 = vsel %vm1301_vm3, %v3923_v44, %v3931_v21  ;;  %v3938_v55 = vsel %vm1307_vm5, %v3923_v44, %v3937_v50  ;;  %v3945_v20 = vsel %vm1292_vm0, %v3925_v18, %v3923_v44  ;;  %v4062_v44 = vld [vmem:[%s13508_s6 + $0x48] sm:$0xff]  ;;  %v4065_v21 = vld [vmem:[%s13508_s6 + $0x60] sm:$0xff] }
 0x3a9   :  { %3949 = vst.msk [vmem:[#allocation4 + $0xb8] sm:$0xc0] %vm1385_vm13, %v3944_v61  ;;  %v3926_v24 = vsel %vm1298_vm2, %v3925_v18, %v3924_v45  ;;  %v3933_v13 = vsel %vm1304_vm4, %v3925_v18, %v3932_v33  ;;  %v3939_v62 = vsel %vm1310_vm6, %v3925_v18, %v3938_v55  ;;  %v3946_v37 = vsel %vm1295_vm1, %v3927_v35, %v3945_v20  ;;  %v4024_v18 = vld [vmem:[%s13507_s5 + $0x18] sm:$0xff]  ;;  %v4026_v56 = vld [vmem:[%s13507_s5 + $0x28] sm:$0xff]  ;;  %v4025_v61 = vld [vmem:[%s13507_s5 + $0x20] sm:$0xff] }
 0x3aa   :  { %v3928_v34 = vsel %vm1301_vm3, %v3927_v35, %v3926_v24  ;;  %v3934_v6 = vsel %vm1307_vm5, %v3927_v35, %v3933_v13  ;;  %3942 = vst.msk [vmem:[#allocation4 + $0xb5] sm:$0xf0] %vm1364_vm11, %v3939_v62  ;;  %v3966_v31 = vmax.f32 %v3875_v48, %v3956_v10  ;;  %v3967_v43 = vmax.f32 %v3877_v54, %v3957_v9  ;;  %v4063_v35 = vld [vmem:[%s13508_s6 + $0x50] sm:$0xff]  ;;  %v4064_v9 = vld [vmem:[%s13508_s6 + $0x58] sm:$0xff]  ;;  %v4066_v50 = vld [vmem:[%s13508_s6 + $0x68] sm:$0xff] }
 0x3ab   :  { %3950 = vst.msk [vmem:[#allocation4 + $0xc0] sm:$0x7] %vm1388_vm14, %v3946_v37  ;;  %v3968_v42 = vmax.f32 %v3879_v12, %v3958_v1  ;;  %vm4149_vm4 = vcmask 588800   ;;  %v3969_v52 = vmax.f32 %v3881_v32, %v3959_v36  ;;  %v3970_v0 = vmax.f32 %v3883_v53, %v3960_v29  ;;  %v4059_v12 = vld [vmem:[%s13508_s6 + $0x30] sm:$0xff]  ;;  %v4060_v32 = vld [vmem:[%s13508_s6 + $0x38] sm:$0xff]  ;;  %v4021_v53 = vld [vmem:[%s13507_s5] sm:$0xff] }
 0x3ac   :  { %3930 = vst.msk [vmem:[#allocation4 + $0xaf] sm:$0x1f] %vm1326_vm8, %v3928_v34  ;;  %5287 = vmatprep.mubr.msk.f32.mxu0 %vm4149_vm4, %v4022_v47  ;;  %v3971_v57 = vadd.f32 %v3966_v31, %v13016_v39  ;;  %v3972_v7 = vadd.f32 %v3967_v43, %v13016_v39  ;;  %v7659_v19 = vmov 0   ;;  %v7660_v16 = vmov 0.0   ;;  %v4023_v1 = vld [vmem:[%s13507_s5 + $0x10] sm:$0xff]  ;;  %v4028_v45 = vld [vmem:[%s13507_s5 + $0x38] sm:$0xff] }
 0x3ad   :  { %3936 = vst.msk [vmem:[#allocation4 + $0xb2] sm:$0x7c] %vm2929_vm10, %v3934_v6  ;;  %v3973_v51 = vadd.f32 %v3968_v42, %v13016_v39  ;;  %6524 = vset.pattern.permute.xlu0 %v7659_v19  ;;  %6525 = vset.pattern.permute.xlu1 %v7659_v19  ;;  %v3974_v27 = vadd.f32 %v3969_v52, %v13016_v39  ;;  %v4067_v33 = vld [vmem:[%s13508_s6 + $0x70] sm:$0xff]  ;;  %v4068_v55 = vld [vmem:[%s13508_s6 + $0x78] sm:$0xff]  ;;  %v4030_v24 = vld [vmem:[%s13507_s5 + $0x48] sm:$0xff] }
 0x3ae   :  { %v3975_v59 = vadd.f32 %v3970_v0, %v13016_v39  ;;  %4071 = vperm.xlu0 %6524, %v4053_v58   ;;  %4081 = vperm.xlu1 %6525, %v4055_v3   ;;  %v3976_v22 = vmax.f32 %v3971_v57, 0.0  ;;  %v3977_v63 = vmax.f32 %v3972_v7, 0.0  ;;  %v4027_v20 = vld [vmem:[%s13507_s5 + $0x30] sm:$0xff]  ;;  %v4375_v13 = vld [vmem:[%s13510_s8] sm:$0xff]  ;;  %v4376_v62 = vld [vmem:[%s13510_s8 + $0x8] sm:$0xff] }
 0x3af   :  { %v3978_v23 = vmax.f32 %v3973_v51, 0.0  ;;  %v3979_v15 = vmax.f32 %v3974_v27, 0.0  ;;  %v4029_v37 = vld [vmem:[%s13507_s5 + $0x40] sm:$0xff]  ;;  %v4032_v47 = vld [vmem:[%s13507_s5 + $0x58] sm:$0xff]  ;;  %v4377_v34 = vld [vmem:[%s13510_s8 + $0x10] sm:$0xff] }
 0x3b0   :  { %v3980_v49 = vmax.f32 %v3975_v59, 0.0  ;;  %v3986_v11 = vrot.slane %v3977_v63, 7  ;;  %v4378_v6 = vld [vmem:[%s13510_s8 + $0x18] sm:$0xff]  ;;  %v4031_v36 = vld [vmem:[%s13507_s5 + $0x50] sm:$0xff]  ;;  %v4034_v29 = vld [vmem:[%s13507_s5 + $0x68] sm:$0xff] }
 0x3b1   :  { %v3988_v46 = vrot.slane %v3978_v23, 6  ;;  %v3990_v41 = vrot.slane %v3979_v15, 5  ;;  %v4379_v31 = vld [vmem:[%s13510_s8 + $0x20] sm:$0xff]  ;;  %v4380_v43 = vld [vmem:[%s13510_s8 + $0x28] sm:$0xff]  ;;  %v4036_v58 = vld [vmem:[%s13507_s5 + $0x78] sm:$0xff] }
 0x3b2   :  { %v3992_v2 = vrot.slane %v3980_v49, 4  ;;  %4076 = vperm.xlu0 %6524, %v4054_v17   ;;  %4086 = vperm.xlu1 %6525, %v4056_v8   ;;  %v3987_v48 = vsel %vm1292_vm0, %v3986_v11, %v3976_v22  ;;  %v4033_v42 = vld [vmem:[%s13507_s5 + $0x60] sm:$0xff]  ;;  %v4381_v3 = vld [vmem:[%s13510_s8 + $0x30] sm:$0xff]  ;;  %v4382_v52 = vld [vmem:[%s13510_s8 + $0x38] sm:$0xff] }
 0x3b3   :  { %v4017_v5 = vld [vmem:[#allocation4 + $0xa8] sm:$0xff]  ;;  %v3989_v40 = vsel %vm1295_vm1, %v3988_v46, %v3987_v48  ;;  %v4035_v0 = vld [vmem:[%s13507_s5 + $0x70] sm:$0xff]  ;;  %v4383_v7 = vld [vmem:[%s13510_s8 + $0x40] sm:$0xff] }
 0x3b4   :  { %v4018_v39 = vld [vmem:[#allocation4 + $0xb0] sm:$0xff]  ;;  %v4019_v4 = vld [vmem:[#allocation4 + $0xb8] sm:$0xff]  ;;  %v5422_v14 = vpack.c.bf16 %v4017_v5, %v4016_v30  ;;  %v3991_v26 = vsel %vm1298_vm2, %v3990_v41, %v3989_v40  ;;  %v4038_v57 = vld [vmem:[%s13507_s5 + $0x88] sm:$0xff] }
 0x3b5   :  { %v5425_v54 = vpack.c.bf16 %v4019_v4, %v4018_v39  ;;  %v3993_v60 = vsel %vm1301_vm3, %v3992_v2, %v3991_v26  ;;  %v4384_v51 = vld [vmem:[%s13510_s8 + $0x48] sm:$0xff]  ;;  %v4037_v19 = vld [vmem:[%s13507_s5 + $0x80] sm:$0xff]  ;;  %v4040_v27 = vld [vmem:[%s13507_s5 + $0x98] sm:$0xff] }
 0x3b6   :  { %5423 = vmatpush1.bf16.msra.mxu0 %v5422_v14  ;;  %4091 = vperm.xlu0 %6524, %v4057_v38   ;;  %3995 = vst.msk [vmem:[#allocation4 + $0xc3] sm:$0x1f] %vm1326_vm8, %v3993_v60  ;;  %v4385_v59 = vld [vmem:[%s13510_s8 + $0x50] sm:$0xff]  ;;  %v4386_v22 = vld [vmem:[%s13510_s8 + $0x58] sm:$0xff]  ;;  %v4042_v23 = vld [vmem:[%s13507_s5 + $0xa8] sm:$0xff] }
 0x3b7   :  { %5424 = vmatprep.subr.bf16.mxu0 %v7658_v28  ;;  %4096 = vperm.xlu1 %6525, %v4058_v25   ;;  %v4061_v28 = vld [vmem:[%s13508_s6 + $0x40] sm:$0xff]  ;;  %v4039_v63 = vld [vmem:[%s13507_s5 + $0x90] sm:$0xff]  ;;  %v4388_v8 = vld [vmem:[%s13510_s8 + $0x68] sm:$0xff] }
 0x3b8   :  { %v4387_v17 = vld [vmem:[%s13510_s8 + $0x60] sm:$0xff]  ;;  %v4044_v15 = vld [vmem:[%s13507_s5 + $0xb8] sm:$0xff]  ;;  %v4389_v49 = vld [vmem:[%s13510_s8 + $0x70] sm:$0xff] }
 0x3b9   :  { %v4041_v30 = vld [vmem:[%s13507_s5 + $0xa0] sm:$0xff]  ;;  %v4390_v11 = vld [vmem:[%s13510_s8 + $0x78] sm:$0xff]  ;;  %v4043_v46 = vld [vmem:[%s13507_s5 + $0xb0] sm:$0xff] }
 0x3ba   :  { %5426 = vmatpush1.bf16.msra.mxu0 %v5425_v54  ;;  %4101 = vperm.xlu0 %6524, %v4059_v12   ;;  %v4046_v5 = vld [vmem:[%s13507_s5 + $0xc8] sm:$0xff]  ;;  %v4045_v39 = vld [vmem:[%s13507_s5 + $0xc0] sm:$0xff]  ;;  %v4048_v4 = vld [vmem:[%s13507_s5 + $0xd8] sm:$0xff] }
 0x3bb   :  { %4246 = vmatprep.subr.mxu0 %v7660_v16  ;;  %4106 = vperm.xlu1 %6525, %v4060_v32   ;;  %v4047_v41 = vld [vmem:[%s13507_s5 + $0xd0] sm:$0xff]  ;;  %v4050_v2 = vld [vmem:[%s13507_s5 + $0xe8] sm:$0xff]  ;;  %v4049_v14 = vld [vmem:[%s13507_s5 + $0xe0] sm:$0xff] }
 0x3bc   :  { %v4052_v48 = vld [vmem:[%s13507_s5 + $0xf8] sm:$0xff]  ;;  %v4051_v38 = vld [vmem:[%s13507_s5 + $0xf0] sm:$0xff]  ;;  %v4359_v40 = vld [vmem:[%s13509_s7] sm:$0xff] }
 0x3bd   :  { %v4020_v10 = vld [vmem:[#allocation4 + $0xc0] sm:$0xff]  ;;  %5367 = vmatprep.mubr.f32.mxu1 %v4359_v40 }
 0x3be   :  { %4111 = vperm.xlu0 %6524, %v4061_v28   ;;  %4247 = vmatpush1.msra.mxu0 %v4020_v10 }
 0x3bf   :  { %4116 = vperm.xlu1 %6525, %v4062_v44   ;;  %4263 = vmatmul.mubr.f32.vlgmr.msra.gmra.mrb[0].mxu0 %v4021_v53 }
 0x3c0   :  { %5288 = vmatprep.mubr.msk.f32.mxu0 %vm4149_vm4, %v4024_v18 }
 0x3c2   :  { %4121 = vperm.xlu0 %6524, %v4063_v35  }
 0x3c3   :  { %4126 = vperm.xlu1 %6525, %v4064_v9   ;;  %4268 = vmatmul.mubr.f32.gmra.mrb[2].mxu0 %v4023_v1 }
 0x3c4   :  { %5289 = vmatprep.mubr.msk.f32.mxu0 %vm4149_vm4, %v4026_v56 }
 0x3c6   :  { %4131 = vperm.xlu0 %6524, %v4065_v21  }
 0x3c7   :  { %4136 = vperm.xlu1 %6525, %v4066_v50   ;;  %4273 = vmatmul.mubr.f32.gmra.mrb[4].mxu0 %v4025_v61 }
 0x3c8   :  { %5290 = vmatprep.mubr.msk.f32.mxu0 %vm4149_vm4, %v4028_v45 }
 0x3ca   :  { %4141 = vperm.xlu0 %6524, %v4067_v33  }
 0x3cb   :  { %4146 = vperm.xlu1 %6525, %v4068_v55   ;;  %4278 = vmatmul.mubr.f32.gmra.mrb[6].mxu0 %v4027_v20 }
 0x3cc   :  { %5291 = vmatprep.mubr.msk.f32.mxu0 %vm4149_vm4, %v4030_v24 }
 0x3ce   :  { %4393 = vperm.xlu0 %6524, %v4375_v13  }
 0x3cf   :  { %4398 = vperm.xlu1 %6525, %v4376_v62   ;;  %4283 = vmatmul.mubr.f32.gmra.mrb[8].mxu0 %v4029_v37 }
 0x3d0   :  { %5292 = vmatprep.mubr.msk.f32.mxu0 %vm4149_vm4, %v4032_v47 }
 0x3d2   :  { %4403 = vperm.xlu0 %6524, %v4377_v34  }
 0x3d3   :  { %4408 = vperm.xlu1 %6525, %v4378_v6   ;;  %4288 = vmatmul.mubr.f32.gmra.mrb[10].mxu0 %v4031_v36 }
 0x3d4   :  { %5293 = vmatprep.mubr.msk.f32.mxu0 %vm4149_vm4, %v4034_v29 }
 0x3d6   :  { %4413 = vperm.xlu0 %6524, %v4379_v31  }
 0x3d7   :  { %4418 = vperm.xlu1 %6525, %v4380_v43   ;;  %4293 = vmatmul.mubr.f32.gmra.mrb[12].mxu0 %v4033_v42 }
 0x3d8   :  { %5294 = vmatprep.mubr.msk.f32.mxu0 %vm4149_vm4, %v4036_v58 }
 0x3da   :  { %4423 = vperm.xlu0 %6524, %v4381_v3  }
 0x3db   :  { %4428 = vperm.xlu1 %6525, %v4382_v52   ;;  %4298 = vmatmul.mubr.f32.gmra.mrb[14].mxu0 %v4035_v0 }
 0x3dc   :  { %5295 = vmatprep.mubr.msk.f32.mxu0 %vm4149_vm4, %v4038_v57 }
 0x3de   :  { %4433 = vperm.xlu0 %6524, %v4383_v7  }
 0x3df   :  { %4438 = vperm.xlu1 %6525, %v4384_v51   ;;  %4303 = vmatmul.mubr.f32.gmra.mrb[16].mxu0 %v4037_v19 }
 0x3e0   :  { %5296 = vmatprep.mubr.msk.f32.mxu0 %vm4149_vm4, %v4040_v27 }
 0x3e2   :  { %4443 = vperm.xlu0 %6524, %v4385_v59  }
 0x3e3   :  { %4448 = vperm.xlu1 %6525, %v4386_v22   ;;  %4308 = vmatmul.mubr.f32.gmra.mrb[18].mxu0 %v4039_v63 }
 0x3e4   :  { %5297 = vmatprep.mubr.msk.f32.mxu0 %vm4149_vm4, %v4042_v23 }
 0x3e6   :  { %4453 = vperm.xlu0 %6524, %v4387_v17  }
 0x3e7   :  { %4458 = vperm.xlu1 %6525, %v4388_v8   ;;  %4313 = vmatmul.mubr.f32.gmra.mrb[20].mxu0 %v4041_v30 }
 0x3e8   :  { %5298 = vmatprep.mubr.msk.f32.mxu0 %vm4149_vm4, %v4044_v15 }
 0x3ea   :  { %4463 = vperm.xlu0 %6524, %v4389_v49  }
 0x3eb   :  { %4468 = vperm.xlu1 %6525, %v4390_v11   ;;  %4318 = vmatmul.mubr.f32.gmra.mrb[22].mxu0 %v4043_v46 }
 0x3ec   :  { %5299 = vmatprep.mubr.msk.f32.mxu0 %vm4149_vm4, %v4046_v5 }
 0x3ef   :  { %4323 = vmatmul.mubr.f32.gmra.mrb[24].mxu0 %v4045_v39 }
 0x3f0   :  { %5300 = vmatprep.mubr.msk.f32.mxu0 %vm4149_vm4, %v4048_v4 }
 0x3f3   :  { %4328 = vmatmul.mubr.f32.gmra.mrb[26].mxu0 %v4047_v41 }
 0x3f4   :  { %5301 = vmatprep.mubr.msk.f32.mxu0 %vm4149_vm4, %v4050_v2 }
 0x3f7   :  { %4333 = vmatmul.mubr.f32.gmra.mrb[28].mxu0 %v4049_v14 }
 0x3f8   :  { %5302 = vmatprep.mubr.msk.f32.mxu0 %vm4149_vm4, %v4052_v48 }
 0x3fb   :  { %4338 = vmatmul.mubr.f32.gmra.mrb[30].mxu0 %v4051_v38 }
 0x42d   :  { %v4072_v25 = vpop.permute.xlu0 %4071  ;;  %v4082_v44 = vpop.permute.xlu1 %4081 }
 0x431   :  { %v4077_v12 = vpop.permute.xlu0 %4076  ;;  %v4087_v56 = vpop.permute.xlu1 %4086 }
 0x435   :  { %v4092_v13 = vpop.permute.xlu0 %4091 }
 0x436   :  { %v4097_v37 = vpop.permute.xlu1 %4096 }
 0x439   :  { %v4102_v58 = vpop.permute.xlu0 %4101 }
 0x43a   :  { %v4107_v52 = vpop.permute.xlu1 %4106 }
 0x43d   :  { %v4112_v63 = vpop.permute.xlu0 %4111 }
 0x43e   :  { %v4117_v17 = vpop.permute.xlu1 %4116 }
 0x441   :  { %v4122_v4 = vpop.permute.xlu0 %4121 }
 0x442   :  { %v4127_v2 = vpop.permute.xlu1 %4126 }
 0x492   :  { %v4264_v54 = vpop.f32.mrb[0].mxu0 }
 0x493   :  { %v4266_v26 = vpop.f32.mrb[1].mxu0  ;;  %v4265_v60 = vadd.f32 %v4264_v54, %v4072_v25 }
 0x495   :  { %v4343_v53 = vmax.f32 %v4265_v60, 0.0 }
 0x496   :  { %v4269_v32 = vpop.f32.mrb[2].mxu0 }
 0x497   :  { %v4270_v16 = vadd.f32 %v4269_v32, %v4077_v12  ;;  %v4271_v28 = vpop.f32.mrb[3].mxu0  ;;  %v4132_v12 = vpop.permute.xlu0 %4131 }
 0x499   :  { %v4344_v10 = vmax.f32 %v4270_v16, 0.0  ;;  %v4137_v16 = vpop.permute.xlu1 %4136 }
 0x49a   :  { %v4274_v18 = vpop.f32.mrb[4].mxu0 }
 0x49b   :  { %v4276_v35 = vpop.f32.mrb[5].mxu0  ;;  %v5427_v9 = vpack.c.bf16 %v4344_v10, %v4343_v53  ;;  %v4275_v1 = vadd.f32 %v4274_v18, %v4082_v44 }
 0x49d   :  { %5428 = vmatprep.subr.bf16.mxu1 %v5427_v9  ;;  %v4345_v45 = vmax.f32 %v4275_v1, 0.0 }
 0x49e   :  { %v4279_v21 = vpop.f32.mrb[6].mxu0  ;;  %5430 = vmatpush3.bf16.msra.mxu1 %v5427_v9 }
 0x49f   :  { %v4280_v50 = vadd.f32 %v4279_v21, %v4087_v56  ;;  %v4281_v61 = vpop.f32.mrb[7].mxu0  ;;  %v4142_v56 = vpop.permute.xlu0 %4141 }
 0x4a1   :  { %v4346_v33 = vmax.f32 %v4280_v50, 0.0  ;;  %v4147_v50 = vpop.permute.xlu1 %4146 }
 0x4a2   :  { %v4284_v55 = vpop.f32.mrb[8].mxu0 }
 0x4a3   :  { %v5431_v20 = vpack.c.bf16 %v4346_v33, %v4345_v45  ;;  %v4286_v24 = vpop.f32.mrb[9].mxu0  ;;  %v4285_v62 = vadd.f32 %v4284_v55, %v4092_v13  ;;  %v4360_v13 = vld [vmem:[%s13509_s7 + $0x8] sm:$0xff] }
 0x4a5   :  { %5432 = vmatprep.subr.bf16.mxu1 %v5431_v20  ;;  %v4347_v36 = vmax.f32 %v4285_v62, 0.0  ;;  %v4361_v62 = vld [vmem:[%s13509_s7 + $0x10] sm:$0xff] }
 0x4a6   :  { %v4289_v47 = vpop.f32.mrb[10].mxu0  ;;  %5434 = vmatpush3.bf16.msra.mxu1 %v5431_v20 }
 0x4a7   :  { %v4290_v34 = vadd.f32 %v4289_v47, %v4097_v37  ;;  %v4291_v6 = vpop.f32.mrb[11].mxu0  ;;  %v4362_v37 = vld [vmem:[%s13509_s7 + $0x18] sm:$0xff]  ;;  %v4363_v47 = vld [vmem:[%s13509_s7 + $0x20] sm:$0xff] }
 0x4a8   :  { %v4365_v6 = vld [vmem:[%s13509_s7 + $0x30] sm:$0xff] }
 0x4a9   :  { %v4348_v29 = vmax.f32 %v4290_v34, 0.0  ;;  %v4364_v34 = vld [vmem:[%s13509_s7 + $0x28] sm:$0xff] }
 0x4aa   :  { %v4294_v31 = vpop.f32.mrb[12].mxu0 }
 0x4ab   :  { %v5435_v43 = vpack.c.bf16 %v4348_v29, %v4347_v36  ;;  %v4296_v42 = vpop.f32.mrb[13].mxu0  ;;  %v4295_v3 = vadd.f32 %v4294_v31, %v4102_v58  ;;  %v4366_v36 = vld [vmem:[%s13509_s7 + $0x38] sm:$0xff]  ;;  %v4367_v29 = vld [vmem:[%s13509_s7 + $0x40] sm:$0xff]  ;;  %v4368_v31 = vld [vmem:[%s13509_s7 + $0x48] sm:$0xff] }
 0x4ac   :  { %v4370_v42 = vld [vmem:[%s13509_s7 + $0x58] sm:$0xff]  ;;  %v4371_v58 = vld [vmem:[%s13509_s7 + $0x60] sm:$0xff] }
 0x4ad   :  { %5436 = vmatprep.subr.bf16.mxu1 %v5435_v43  ;;  %v4349_v51 = vmax.f32 %v4295_v3, 0.0  ;;  %v4372_v3 = vld [vmem:[%s13509_s7 + $0x68] sm:$0xff] }
 0x4ae   :  { %v4299_v0 = vpop.f32.mrb[14].mxu0  ;;  %5438 = vmatpush3.bf16.msra.mxu1 %v5435_v43  ;;  %v4369_v43 = vld [vmem:[%s13509_s7 + $0x50] sm:$0xff] }
 0x4af   :  { %v4300_v57 = vadd.f32 %v4299_v0, %v4107_v52  ;;  %v4301_v7 = vpop.f32.mrb[15].mxu0  ;;  %v4373_v52 = vld [vmem:[%s13509_s7 + $0x70] sm:$0xff]  ;;  %v4374_v0 = vld [vmem:[%s13509_s7 + $0x78] sm:$0xff] }
 0x4b0   :  { %v4394_v7 = vpop.permute.xlu0 %4393 }
 0x4b1   :  { %v4350_v19 = vmax.f32 %v4300_v57, 0.0  ;;  %v4399_v57 = vpop.permute.xlu1 %4398 }
 0x4b2   :  { %v4304_v27 = vpop.f32.mrb[16].mxu0 }
 0x4b3   :  { %v5439_v59 = vpack.c.bf16 %v4350_v19, %v4349_v51  ;;  %v4306_v22 = vpop.f32.mrb[17].mxu0  ;;  %v4305_v23 = vadd.f32 %v4304_v27, %v4112_v63 }
 0x4b4   :  { %v4404_v19 = vpop.permute.xlu0 %4403 }
 0x4b5   :  { %5440 = vmatprep.subr.bf16.mxu1 %v5439_v59  ;;  %v4351_v49 = vmax.f32 %v4305_v23, 0.0  ;;  %v4409_v51 = vpop.permute.xlu1 %4408 }
 0x4b6   :  { %v4309_v8 = vpop.f32.mrb[18].mxu0  ;;  %5442 = vmatpush3.bf16.msra.mxu1 %v5439_v59 }
 0x4b7   :  { %v4310_v30 = vadd.f32 %v4309_v8, %v4117_v17  ;;  %v4311_v15 = vpop.f32.mrb[19].mxu0 }
 0x4b8   :  { %v4414_v59 = vpop.permute.xlu0 %4413 }
 0x4b9   :  { %v4352_v11 = vmax.f32 %v4310_v30, 0.0  ;;  %v4419_v27 = vpop.permute.xlu1 %4418 }
 0x4ba   :  { %v4314_v46 = vpop.f32.mrb[20].mxu0 }
 0x4bb   :  { %v5443_v5 = vpack.c.bf16 %v4352_v11, %v4351_v49  ;;  %v4316_v39 = vpop.f32.mrb[21].mxu0  ;;  %v4315_v41 = vadd.f32 %v4314_v46, %v4122_v4 }
 0x4bc   :  { %v4424_v8 = vpop.permute.xlu0 %4423 }
 0x4bd   :  { %5444 = vmatprep.subr.bf16.mxu1 %v5443_v5  ;;  %v4353_v40 = vmax.f32 %v4315_v41, 0.0  ;;  %v4429_v23 = vpop.permute.xlu1 %4428 }
 0x4be   :  { %v4319_v14 = vpop.f32.mrb[22].mxu0  ;;  %5446 = vmatpush3.bf16.msra.mxu1 %v5443_v5 }
 0x4bf   :  { %v4320_v48 = vadd.f32 %v4319_v14, %v4127_v2  ;;  %v4321_v38 = vpop.f32.mrb[23].mxu0 }
 0x4c0   :  { %v4434_v41 = vpop.permute.xlu0 %4433 }
 0x4c1   :  { %v4354_v25 = vmax.f32 %v4320_v48, 0.0  ;;  %v4439_v39 = vpop.permute.xlu1 %4438 }
 0x4c2   :  { %v4324_v54 = vpop.f32.mrb[24].mxu0 }
 0x4c3   :  { %v5447_v26 = vpack.c.bf16 %v4354_v25, %v4353_v40  ;;  %v4326_v60 = vpop.f32.mrb[25].mxu0  ;;  %v4325_v32 = vadd.f32 %v4324_v54, %v4132_v12 }
 0x4c5   :  { %5448 = vmatprep.subr.bf16.mxu1 %v5447_v26  ;;  %v4355_v10 = vmax.f32 %v4325_v32, 0.0 }
 0x4c6   :  { %v4329_v28 = vpop.f32.mrb[26].mxu0  ;;  %5450 = vmatpush3.bf16.msra.mxu1 %v5447_v26 }
 0x4c7   :  { %v4330_v44 = vadd.f32 %v4329_v28, %v4137_v16  ;;  %v4331_v53 = vpop.f32.mrb[27].mxu0 }
 0x4c8   :  { %v4449_v53 = vpop.permute.xlu1 %4448 }
 0x4c9   :  { %v4356_v18 = vmax.f32 %v4330_v44, 0.0 }
 0x4ca   :  { %v4334_v35 = vpop.f32.mrb[28].mxu0 }
 0x4cb   :  { %v5451_v9 = vpack.c.bf16 %v4356_v18, %v4355_v10  ;;  %v4336_v1 = vpop.f32.mrb[29].mxu0  ;;  %v4335_v21 = vadd.f32 %v4334_v35, %v4142_v56 }
 0x4cc   :  { %v4444_v1 = vpop.permute.xlu0 %4443 }
 0x4cd   :  { %5452 = vmatprep.subr.bf16.mxu1 %v5451_v9  ;;  %v4357_v55 = vmax.f32 %v4335_v21, 0.0 }
 0x4ce   :  { %v4339_v61 = vpop.f32.mrb[30].mxu0  ;;  %5454 = vmatpush3.bf16.msra.mxu1 %v5451_v9 }
 0x4cf   :  { %v4340_v45 = vadd.f32 %v4339_v61, %v4147_v50  ;;  %v4341_v33 = vpop.f32.mrb[31].mxu0 }
 0x4d1   :  { %v4358_v20 = vmax.f32 %v4340_v45, 0.0 }
 0x4d3   :  { %v5455_v24 = vpack.c.bf16 %v4358_v20, %v4357_v55 }
 0x4d5   :  { %5456 = vmatprep.subr.bf16.mxu1 %v5455_v24 }
 0x4d6   :  { %5458 = vmatpush3.bf16.msra.mxu1 %v5455_v24 }
 0x4d9   :  { %5368 = vmatmul.mubr.f32.vlgmr.msra.gmra.mrb[0].mxu1 %v4360_v13 }
 0x4da   :  { %5370 = vmatprep.mubr.f32.mxu1 %v4361_v62 }
 0x4dd   :  { %5371 = vmatmul.mubr.f32.gmra.mrb[2].mxu1 %v4362_v37  ;;  %v4459_v37 = vpop.permute.xlu1 %4458 }
 0x4de   :  { %5373 = vmatprep.mubr.f32.mxu1 %v4363_v47 }
 0x4e1   :  { %5374 = vmatmul.mubr.f32.gmra.mrb[4].mxu1 %v4364_v34  ;;  %v4454_v34 = vpop.permute.xlu0 %4453 }
 0x4e2   :  { %5376 = vmatprep.mubr.f32.mxu1 %v4365_v6 }
 0x4e5   :  { %5377 = vmatmul.mubr.f32.gmra.mrb[6].mxu1 %v4366_v36 }
 0x4e6   :  { %5379 = vmatprep.mubr.f32.mxu1 %v4367_v29 }
 0x4e9   :  { %5380 = vmatmul.mubr.f32.gmra.mrb[8].mxu1 %v4368_v31 }
 0x4ea   :  { %5382 = vmatprep.mubr.f32.mxu1 %v4369_v43 }
 0x4ed   :  { %5383 = vmatmul.mubr.f32.gmra.mrb[10].mxu1 %v4370_v42 }
 0x4ee   :  { %5385 = vmatprep.mubr.f32.mxu1 %v4371_v58 }
 0x4f1   :  { %5386 = vmatmul.mubr.f32.gmra.mrb[12].mxu1 %v4372_v3 }
 0x4f2   :  { %5388 = vmatprep.mubr.f32.mxu1 %v4373_v52 }
 0x4f5   :  { %5389 = vmatmul.mubr.f32.gmra.mrb[14].mxu1 %v4374_v0  ;;  %v4469_v0 = vpop.permute.xlu1 %4468 }
 0x5ac   :  { %v5369_v22 = vpop.f32.mrb[0].mxu1 }
 0x5ad   :  { %v4537_v63 = vpop.f32.mrb[1].mxu1  ;;  %v13314_v15 = vadd.f32 %v5369_v22, %v4399_v57 }
 0x5ae   :  { %v13316_v49 = vadd.f32 %v4537_v63, %v4394_v7 }
 0x5af   :  { %v4618_v2 = vsel %vm1324_vm7, %v13314_v15, -inf }
 0x5b0   :  { %v5372_v17 = vpop.f32.mrb[2].mxu1  ;;  %v4617_v38 = vsel %vm1324_vm7, %v13316_v49, -inf }
 0x5b1   :  { %v4547_v30 = vpop.f32.mrb[3].mxu1  ;;  %v13324_v14 = vadd.f32 %v5372_v17, %v4409_v51 }
 0x5b2   :  { %v13330_v40 = vadd.f32 %v4547_v30, %v4404_v19  ;;  %v4464_v19 = vpop.permute.xlu0 %4463 }
 0x5b3   :  { %v4620_v28 = vsel %vm1324_vm7, %v13324_v14, -inf }
 0x5b4   :  { %v5375_v11 = vpop.f32.mrb[4].mxu1  ;;  %v4619_v10 = vsel %vm1324_vm7, %v13330_v40, -inf }
 0x5b5   :  { %v13318_v46 = vadd.f32 %v5375_v11, %v4419_v27  ;;  %v4557_v5 = vpop.f32.mrb[5].mxu1 }
 0x5b6   :  { %v13320_v4 = vadd.f32 %v4557_v5, %v4414_v59 }
 0x5b7   :  { %v4623_v48 = vsel %vm1324_vm7, %v13318_v46, -inf }
 0x5b8   :  { %v4624_v25 = vmax.f32 %v4618_v2, %v4623_v48  ;;  %v4621_v54 = vsel %vm1324_vm7, %v13320_v4, -inf  ;;  %v5378_v26 = vpop.f32.mrb[6].mxu1 }
 0x5b9   :  { %v4622_v60 = vmax.f32 %v4617_v38, %v4621_v54  ;;  %v13334_v12 = vadd.f32 %v5378_v26, %v4429_v23  ;;  %v4567_v32 = vpop.f32.mrb[7].mxu1 }
 0x5ba   :  { %v4568_v16 = vadd.f32 %v4567_v32, %v4424_v8 }
 0x5bb   :  { %v4627_v44 = vsel %vm1324_vm7, %v13334_v12, -inf }
 0x5bc   :  { %v4628_v18 = vmax.f32 %v4620_v28, %v4627_v44  ;;  %v4625_v35 = vsel %vm1324_vm7, %v4568_v16, -inf  ;;  %v5381_v9 = vpop.f32.mrb[8].mxu1 }
 0x5bd   :  { %v4626_v56 = vmax.f32 %v4619_v10, %v4625_v35  ;;  %v4583_v21 = vadd.f32 %v5381_v9, %v4439_v39  ;;  %v4577_v50 = vpop.f32.mrb[9].mxu1 }
 0x5be   :  { %v4578_v61 = vadd.f32 %v4577_v50, %v4434_v41 }
 0x5bf   :  { %v4631_v45 = vsel %vm1324_vm7, %v4583_v21, -inf }
 0x5c0   :  { %v4632_v33 = vmax.f32 %v4624_v25, %v4631_v45  ;;  %v4629_v55 = vsel %vm1324_vm7, %v4578_v61, -inf  ;;  %v5384_v20 = vpop.f32.mrb[10].mxu1 }
 0x5c1   :  { %v4630_v24 = vmax.f32 %v4622_v60, %v4629_v55  ;;  %v4593_v13 = vadd.f32 %v5384_v20, %v4449_v53  ;;  %v4587_v62 = vpop.f32.mrb[11].mxu1 }
 0x5c2   :  { %v4588_v47 = vadd.f32 %v4587_v62, %v4444_v1 }
 0x5c3   :  { %v4635_v6 = vsel %vm1324_vm7, %v4593_v13, -inf }
 0x5c4   :  { %v4636_v36 = vmax.f32 %v4628_v18, %v4635_v6  ;;  %v4633_v29 = vsel %vm1324_vm7, %v4588_v47, -inf  ;;  %v5387_v31 = vpop.f32.mrb[12].mxu1 }
 0x5c5   :  { %v4634_v43 = vmax.f32 %v4626_v56, %v4633_v29  ;;  %v4603_v42 = vadd.f32 %v5387_v31, %v4459_v37  ;;  %v4597_v58 = vpop.f32.mrb[13].mxu1 }
 0x5c6   :  { %v4598_v3 = vadd.f32 %v4597_v58, %v4454_v34 }
 0x5c7   :  { %v4639_v52 = vsel %vm1324_vm7, %v4603_v42, -inf }
 0x5c8   :  { %v4640_v57 = vmax.f32 %v4632_v33, %v4639_v52  ;;  %v4637_v7 = vsel %vm1324_vm7, %v4598_v3, -inf  ;;  %v5390_v51 = vpop.f32.mrb[14].mxu1 }
 0x5c9   :  { %v4638_v27 = vmax.f32 %v4630_v24, %v4637_v7  ;;  %v4613_v59 = vadd.f32 %v5390_v51, %v4469_v0  ;;  %v4607_v22 = vpop.f32.mrb[15].mxu1 }
 0x5ca   :  { %v4608_v63 = vadd.f32 %v4607_v22, %v4464_v19 }
 0x5cb   :  { %v4645_v23 = vmax.f32 %v4638_v27, %v4640_v57  ;;  %v4643_v17 = vsel %vm1324_vm7, %v4613_v59, -inf }
 0x5cc   :  { %v4644_v8 = vmax.f32 %v4636_v36, %v4643_v17  ;;  %v4641_v30 = vsel %vm1324_vm7, %v4608_v63, -inf }
 0x5cd   :  { %v4642_v11 = vmax.f32 %v4634_v43, %v4641_v30 }
 0x5cf   :  { %v4646_v5 = vmax.f32 %v4642_v11, %v4644_v8 }
 0x5d1   :  { %v4647_v39 = vmax.f32 %v4645_v23, %v4646_v5 }
 0x5d3   :  { %v4648_v41 = vrot.slane %v4647_v39, 4 }
 0x5d5   :  { %v4649_v2 = vmax.f32 %v4647_v39, %v4648_v41 }
 0x5d7   :  { %v4650_v48 = vrot.slane %v4649_v2, 2 }
 0x5d9   :  { %v4651_v38 = vmax.f32 %v4649_v2, %v4650_v48 }
 0x5db   :  { %v4652_v25 = vrot.slane %v4651_v38, 1 }
 0x5dd   :  { %v4653_v54 = vmax.f32 %v4651_v38, %v4652_v25 }
 0x5df   :  { %v13352_v26 = vsub.f32 %v13316_v49, %v4653_v54  ;;  %v13355_v60 = vsub.f32 %v13314_v15, %v4653_v54  ;;  %v13358_v32 = vsub.f32 %v13330_v40, %v4653_v54  ;;  %v13361_v28 = vsub.f32 %v13324_v14, %v4653_v54 }
 0x5e0   :  { %v13364_v44 = vsub.f32 %v13320_v4, %v4653_v54  ;;  %v13367_v53 = vsub.f32 %v13318_v46, %v4653_v54  ;;  %v13369_v10 = vsub.f32 %v4568_v16, %v4653_v54  ;;  %v13372_v49 = vsub.f32 %v13334_v12, %v4653_v54 }
 0x5e1   :  { %v13374_v18 = vsub.f32 %v4578_v61, %v4653_v54  ;;  %v13376_v15 = vsub.f32 %v4583_v21, %v4653_v54  ;;  %v13378_v40 = vsub.f32 %v4588_v47, %v4653_v54  ;;  %v13380_v35 = vsub.f32 %v4593_v13, %v4653_v54 }
 0x5e2   :  { %v13382_v14 = vsub.f32 %v4598_v3, %v4653_v54  ;;  %v13384_v4 = vsub.f32 %v4603_v42, %v4653_v54  ;;  %v13386_v9 = vsub.f32 %v4608_v63, %v4653_v54  ;;  %v13388_v46 = vsub.f32 %v4613_v59, %v4653_v54 }
 0x5e3   :  { %v4670_v16 = vmul.f32 1.442695, %v13352_v26  ;;  %v4672_v12 = vmul.f32 1.442695, %v13355_v60  ;;  %v4674_v1 = vmul.f32 1.442695, %v13358_v32 }
 0x5e4   :  { %v4676_v56 = vmul.f32 1.442695, %v13361_v28  ;;  %v4678_v21 = vmul.f32 1.442695, %v13364_v44  ;;  %v4680_v50 = vmul.f32 1.442695, %v13367_v53 }
 0x5e5   :  { %6526 = vpow2.f32 %v4670_v16  ;;  %v4682_v61 = vmul.f32 1.442695, %v13369_v10  ;;  %v4684_v45 = vmul.f32 1.442695, %v13372_v49  ;;  %v4686_v33 = vmul.f32 1.442695, %v13374_v18 }
 0x5e6   :  { %6528 = vpow2.f32 %v4672_v12  ;;  %v4688_v24 = vmul.f32 1.442695, %v13376_v15  ;;  %v4690_v34 = vmul.f32 1.442695, %v13378_v40  ;;  %v4692_v31 = vmul.f32 1.442695, %v13380_v35 }
 0x5e7   :  { %6530 = vpow2.f32 %v4674_v1  ;;  %v4694_v3 = vmul.f32 1.442695, %v13382_v14  ;;  %v4696_v7 = vmul.f32 1.442695, %v13384_v4  ;;  %v4698_v59 = vmul.f32 1.442695, %v13386_v9 }
 0x5e8   :  { %6532 = vpow2.f32 %v4676_v56  ;;  %v4700_v17 = vmul.f32 1.442695, %v13388_v46 }
 0x5e9   :  { %6534 = vpow2.f32 %v4678_v21 }
 0x5ea   :  { %6536 = vpow2.f32 %v4680_v50 }
 0x5eb   :  { %6538 = vpow2.f32 %v4682_v61 }
 0x5ec   :  { %6540 = vpow2.f32 %v4684_v45 }
 0x5ed   :  { %6542 = vpow2.f32 %v4686_v33 }
 0x5ee   :  { %6544 = vpow2.f32 %v4688_v24 }
 0x5ef   :  { %v6527_v55 = vpop.eup %6526  ;;  %6546 = vpow2.f32 %v4690_v34 }
 0x5f0   :  { %v6529_v20 = vpop.eup %6528  ;;  %v4702_v13 = vsel %vm1324_vm7, %v6527_v55, 0.0  ;;  %6548 = vpow2.f32 %v4692_v31 }
 0x5f1   :  { %v6531_v62 = vpop.eup %6530  ;;  %v4703_v37 = vsel %vm1324_vm7, %v6529_v20, 0.0  ;;  %6550 = vpow2.f32 %v4694_v3 }
 0x5f2   :  { %v6533_v47 = vpop.eup %6532  ;;  %v4704_v6 = vadd.f32 %v4703_v37, %v4702_v13  ;;  %v4705_v36 = vsel %vm1324_vm7, %v6531_v62, 0.0  ;;  %6552 = vpow2.f32 %v4696_v7 }
 0x5f3   :  { %v6535_v29 = vpop.eup %6534  ;;  %v4707_v42 = vsel %vm1324_vm7, %v6533_v47, 0.0  ;;  %6554 = vpow2.f32 %v4698_v59 }
 0x5f4   :  { %v4706_v43 = vadd.f32 %v4705_v36, %v4704_v6  ;;  %v6537_v58 = vpop.eup %6536  ;;  %v4709_v0 = vsel %vm1324_vm7, %v6535_v29, 0.0  ;;  %6556 = vpow2.f32 %v4700_v17 }
 0x5f5   :  { %v6539_v57 = vpop.eup %6538  ;;  %v4711_v19 = vsel %vm1324_vm7, %v6537_v58, 0.0 }
 0x5f6   :  { %v4708_v52 = vadd.f32 %v4707_v42, %v4706_v43  ;;  %v6541_v27 = vpop.eup %6540  ;;  %v4713_v63 = vsel %vm1324_vm7, %v6539_v57, 0.0 }
 0x5f7   :  { %v6543_v23 = vpop.eup %6542  ;;  %v4715_v30 = vsel %vm1324_vm7, %v6541_v27, 0.0 }
 0x5f8   :  { %v4710_v51 = vadd.f32 %v4709_v0, %v4708_v52  ;;  %v6545_v11 = vpop.eup %6544  ;;  %v4717_v39 = vsel %vm1324_vm7, %v6543_v23, 0.0 }
 0x5f9   :  { %v6547_v41 = vpop.eup %6546  ;;  %v4719_v48 = vsel %vm1324_vm7, %v6545_v11, 0.0 }
 0x5fa   :  { %v4712_v22 = vadd.f32 %v4711_v19, %v4710_v51  ;;  %v6549_v38 = vpop.eup %6548  ;;  %v4721_v54 = vsel %vm1324_vm7, %v6547_v41, 0.0 }
 0x5fb   :  { %v6551_v16 = vpop.eup %6550  ;;  %v4723_v1 = vsel %vm1324_vm7, %v6549_v38, 0.0 }
 0x5fc   :  { %v4714_v8 = vadd.f32 %v4713_v63, %v4712_v22  ;;  %v6553_v56 = vpop.eup %6552  ;;  %v4725_v50 = vsel %vm1324_vm7, %v6551_v16, 0.0 }
 0x5fd   :  { %v6555_v61 = vpop.eup %6554  ;;  %v4727_v33 = vsel %vm1324_vm7, %v6553_v56, 0.0 }
 0x5fe   :  { %v4716_v5 = vadd.f32 %v4715_v30, %v4714_v8  ;;  %v6557_v55 = vpop.eup %6556  ;;  %v4729_v24 = vsel %vm1324_vm7, %v6555_v61, 0.0 }
 0x5ff   :  { %v4731_v62 = vsel %vm1324_vm7, %v6557_v55, 0.0 }
 0x600   :  { %v4718_v2 = vadd.f32 %v4717_v39, %v4716_v5 }
 0x602   :  { %v4720_v25 = vadd.f32 %v4719_v48, %v4718_v2 }
 0x604   :  { %v4722_v12 = vadd.f32 %v4721_v54, %v4720_v25 }
 0x606   :  { %v4724_v21 = vadd.f32 %v4723_v1, %v4722_v12 }
 0x608   :  { %v4726_v45 = vadd.f32 %v4725_v50, %v4724_v21 }
 0x60a   :  { %v4728_v20 = vadd.f32 %v4727_v33, %v4726_v45 }
 0x60c   :  { %v4730_v13 = vadd.f32 %v4729_v24, %v4728_v20 }
 0x60e   :  { %v4732_v37 = vadd.f32 %v4731_v62, %v4730_v13 }
 0x610   :  { %v4733_v47 = vrot.slane %v4732_v37, 4 }
 0x612   :  { %v4734_v34 = vadd.f32 %v4733_v47, %v4732_v37 }
 0x614   :  { %v4735_v6 = vrot.slane %v4734_v34, 2 }
 0x616   :  { %v4736_v36 = vadd.f32 %v4735_v6, %v4734_v34 }
 0x618   :  { %v4737_v29 = vrot.slane %v4736_v36, 1 }
 0x61a   :  { %v4738_v31 = vadd.f32 %v4737_v29, %v4736_v36 }
 0x61c   :  { %6558 = vlog2.f32 %v4738_v31 }
 0x626   :  { %v6559_v43 = vpop.eup %6558 }
 0x627   :  { %v4740_v42 = vmul.f32 0.6931472, %v6559_v43 }
 0x629   :  { %v4741_v58 = vsub.f32 %v13352_v26, %v4740_v42  ;;  %v4742_v3 = vsub.f32 %v13355_v60, %v4740_v42  ;;  %v4743_v52 = vsub.f32 %v13358_v32, %v4740_v42  ;;  %v4744_v0 = vsub.f32 %v13361_v28, %v4740_v42 }
 0x62a   :  { %v4745_v57 = vsub.f32 %v13364_v44, %v4740_v42  ;;  %v4746_v7 = vsub.f32 %v13367_v53, %v4740_v42  ;;  %v4747_v51 = vsub.f32 %v13369_v10, %v4740_v42  ;;  %v4748_v19 = vsub.f32 %v13372_v49, %v4740_v42 }
 0x62b   :  { %v4749_v27 = vsub.f32 %v13374_v18, %v4740_v42  ;;  %v4750_v59 = vsub.f32 %v13376_v15, %v4740_v42  ;;  %v4751_v26 = vsub.f32 %v13378_v40, %v4740_v42  ;;  %v4752_v60 = vsub.f32 %v13380_v35, %v4740_v42  ;;  %4757 = vst.msk [vmem:[%s13511_s9] sm:$0xff] %vm1324_vm7, %v4741_v58 }
 0x62c   :  { %4758 = vst.msk [vmem:[%s13511_s9 + $0x8] sm:$0xff] %vm1324_vm7, %v4742_v3  ;;  %4759 = vst.msk [vmem:[%s13511_s9 + $0x10] sm:$0xff] %vm1324_vm7, %v4743_v52  ;;  %v4753_v32 = vsub.f32 %v13382_v14, %v4740_v42  ;;  %v4754_v28 = vsub.f32 %v13384_v4, %v4740_v42  ;;  %v4755_v44 = vsub.f32 %v13386_v9, %v4740_v42 }
 0x62d   :  { %4760 = vst.msk [vmem:[%s13511_s9 + $0x18] sm:$0xff] %vm1324_vm7, %v4744_v0  ;;  %v4756_v53 = vsub.f32 %v13388_v46, %v4740_v42  ;;  %4761 = vst.msk [vmem:[%s13511_s9 + $0x20] sm:$0xff] %vm1324_vm7, %v4745_v57 }
 0x62e   :  { %4762 = vst.msk [vmem:[%s13511_s9 + $0x28] sm:$0xff] %vm1324_vm7, %v4746_v7  ;;  %4763 = vst.msk [vmem:[%s13511_s9 + $0x30] sm:$0xff] %vm1324_vm7, %v4747_v51 }
 0x62f   :  { %4764 = vst.msk [vmem:[%s13511_s9 + $0x38] sm:$0xff] %vm1324_vm7, %v4748_v19  ;;  %4765 = vst.msk [vmem:[%s13511_s9 + $0x40] sm:$0xff] %vm1324_vm7, %v4749_v27 }
 0x630   :  { %4766 = vst.msk [vmem:[%s13511_s9 + $0x48] sm:$0xff] %vm1324_vm7, %v4750_v59  ;;  %4767 = vst.msk [vmem:[%s13511_s9 + $0x50] sm:$0xff] %vm1324_vm7, %v4751_v26 }
 0x631   :  { %4768 = vst.msk [vmem:[%s13511_s9 + $0x58] sm:$0xff] %vm1324_vm7, %v4752_v60  ;;  %4769 = vst.msk [vmem:[%s13511_s9 + $0x60] sm:$0xff] %vm1324_vm7, %v4753_v32 }
 0x632   :  { %4770 = vst.msk [vmem:[%s13511_s9 + $0x68] sm:$0xff] %vm1324_vm7, %v4754_v28  ;;  %4771 = vst.msk [vmem:[%s13511_s9 + $0x70] sm:$0xff] %vm1324_vm7, %v4755_v44 }
 0x633   :  { %4772 = vst.msk [vmem:[%s13511_s9 + $0x78] sm:$0xff] %vm1324_vm7, %v4756_v53 }
 0x634   :  { %4777 = vsyncpa [#allocation6], 1 }
 0x635   :  { %4778 = vsyncpa [#allocation8], 1 }
 0x636   :  { %4779 = vsyncpa [#allocation11], 1 }

</bundles_post_ra>
